<compile_context>
chip_gen: v7x
topology: tpu7x:2x2x1
jax: 0.10.0
libtpu: 0.0.40
codegen_flags: <defaults>
</compile_context>

<pallas_src>
import math

import jax
import jax.numpy as jnp
from jax.experimental import pallas as pl
from jax.experimental.pallas import tpu as pltpu


# ---------------------------------------------------------------------------
# Static per-layer configuration
# ---------------------------------------------------------------------------
class _LayerCfg:
    """Static shape info for one 3x3 / pad-1 conv stage."""

    def __init__(self, cin, cout, stride, hin, win):
        self.cin = cin
        self.cout = cout
        self.stride = stride
        self.hin = hin
        self.win = win
        self.hout = (hin - 1) // stride + 1     # (hin + 2*1 - 3)//s + 1
        self.wout = (win - 1) // stride + 1
        # width of the full stride-1 sliding-window product (== wout for stride 1)
        self.wfull = win


# ---------------------------------------------------------------------------
# Fused encoder kernel: all stages for one batch element, per grid step
# ---------------------------------------------------------------------------
def _make_fused_encoder_kernel(cfgs, neg_slope=0.2):
    n_layers = len(cfgs)

    def kernel(*refs):
        x_ref = refs[0]
        wt_refs = refs[1:1 + n_layers]
        b_refs = refs[1 + n_layers:1 + 2 * n_layers]
        o_ref = refs[1 + 2 * n_layers]
        scratch = refs[2 + 2 * n_layers:]
        pad_refs = scratch[:n_layers]    # zero-padded (H+2, C, W+2) input per stage
        xc_refs = scratch[n_layers:]     # per-stage im2col buffer (9*Cin, Ho*Wf)

        # ---- stage-0 input: zero-pad the network input into VMEM --------------
        c0 = cfgs[0]
        p0 = pad_refs[0]
        p0[...] = jnp.zeros(p0.shape, p0.dtype)
        p0[1:c0.hin + 1, :, 1:c0.win + 1] = x_ref[...]

        # ---- conv(3x3) + bias + LeakyReLU stages -------------------------------
        for l, cfg in enumerate(cfgs):
            pin = pad_refs[l]
            xc = xc_refs[l]
            s, cin, cout = cfg.stride, cfg.cin, cfg.cout
            ho, wo, wf = cfg.hout, cfg.wout, cfg.wfull

            # in-VMEM im2col (all offsets static Python ints):
            #   xc[(kh*3+kw)*cin + c, r*wf + w] = pin[s*r + kh, c, kw + w]
            for r in range(ho):
                for kh in range(3):
                    row = s * r + kh
                    for kw in range(3):
                        tap = kh * 3 + kw
                        xc[tap * cin:(tap + 1) * cin, r * wf:(r + 1) * wf] = \
                            pin[row, :, kw:kw + wf]

            # one fused MXU matmul per stage: (cout, 9*cin) @ (9*cin, ho*wf), f32 acc
            y = jnp.dot(wt_refs[l][...], xc[...],
                        preferred_element_type=jnp.float32)
            # bias + LeakyReLU(0.2) epilogue in f32 (commutes with the column
            # selection below, so it is applied once on the stacked-rows tensor)
            y = y + b_refs[l][...]
            y = jnp.maximum(y, neg_slope * y)

            if s == 2:
                # 0/1 selection matrix picking every other column of a row block;
                # keeps all tap loads above contiguous (no strided lane reads).
                fi = jax.lax.broadcasted_iota(jnp.int32, (wf, wo), 0)
                oi = jax.lax.broadcasted_iota(jnp.int32, (wf, wo), 1)
                sel = (fi == 2 * oi).astype(jnp.float32)

            pout = pad_refs[l + 1] if l + 1 < n_layers else None
            if pout is not None:
                pout[...] = jnp.zeros(pout.shape, pout.dtype)

            for r in range(ho):
                yr = y[:, r * wf:(r + 1) * wf]                       # (cout, wf)
                if s == 2:
                    yr = jnp.dot(yr, sel, preferred_element_type=jnp.float32)
                if pout is not None:
                    # write zero-padded into the next stage's VMEM input buffer
                    pout[r + 1, :, 1:wo + 1] = yr.astype(pout.dtype)
                else:
                    # last stage: write straight into the NCHW output block
                    o_ref[:, r, :] = yr.astype(o_ref.dtype)

    return kernel


# ---------------------------------------------------------------------------
# Wrapper: one pallas_call for the whole encoder, gridded over batch
# ---------------------------------------------------------------------------
def unet_encoder_forward(x_nchw, params):
    """x_nchw: (N, 2, H, W) f32; params: list of (w (Cout,Cin,3,3), b (Cout,), stride)."""
    N, c_in, H, W = x_nchw.shape

    cfgs = []
    h, w, cin = H, W, c_in
    for (wgt, _, stride) in params:
        cfg = _LayerCfg(cin, wgt.shape[0], stride, h, w)
        cfgs.append(cfg)
        h, w, cin = cfg.hout, cfg.wout, cfg.cout
    last = cfgs[-1]

    # ---- operand repacking (the only work outside the kernel) -----------------
    # feature-map layout inside the kernel is (H, C, W): W on the lane dim.
    x_hcw = jnp.transpose(x_nchw, (0, 2, 1, 3)).astype(jnp.bfloat16)
    wts, bs = [], []
    for (wgt, b, _), cfg in zip(params, cfgs):
        # tap-major weight slab: Wt[co, (kh*3+kw)*cin + ci] = w[co, ci, kh, kw]
        wts.append(jnp.transpose(wgt, (0, 2, 3, 1))
                   .reshape(cfg.cout, 9 * cfg.cin).astype(jnp.bfloat16))
        bs.append(b.reshape(cfg.cout, 1).astype(jnp.float32))

    in_specs = [pl.BlockSpec((None, H, c_in, W), lambda n: (n, 0, 0, 0))]
    in_specs += [pl.BlockSpec(t.shape, lambda n: (0, 0)) for t in wts]   # resident
    in_specs += [pl.BlockSpec(t.shape, lambda n: (0, 0)) for t in bs]    # resident
    out_specs = pl.BlockSpec((None, last.cout, last.hout, last.wout),
                             lambda n: (n, 0, 0, 0))
    out_shape = jax.ShapeDtypeStruct((N, last.cout, last.hout, last.wout),
                                     jnp.float32)

    scratch = [pltpu.VMEM((cfg.hin + 2, cfg.cin, cfg.win + 2), jnp.bfloat16)
               for cfg in cfgs]
    scratch += [pltpu.VMEM((9 * cfg.cin, cfg.hout * cfg.wfull), jnp.bfloat16)
                for cfg in cfgs]

    z = pl.pallas_call(
        _make_fused_encoder_kernel(cfgs),
        out_shape=out_shape,
        grid=(N,),
        in_specs=in_specs,
        out_specs=out_specs,
        scratch_shapes=scratch,
        compiler_params=pltpu.CompilerParams(
            dimension_semantics=("parallel",),      # batch across TensorCores
            vmem_limit_bytes=32 * 1024 * 1024),
    )(x_hcw, *wts, *bs)
    return z


# ---------------------------------------------------------------------------
# Parameter init (deterministic; matches the module's explicit
# kaiming_uniform_(a=0.2) on weights and the Conv2d-default bias bound)
# ---------------------------------------------------------------------------
def init_unet_encoder_params(key, in_channels=2, enc_channels=(16, 32, 32, 32, 32)):
    params = []
    a = 0.2
    gain = math.sqrt(2.0 / (1.0 + a * a))
    for i, out_ch in enumerate(enc_channels):
        in_ch = in_channels if i == 0 else enc_channels[i - 1]
        fan_in = in_ch * 3 * 3
        w_bound = gain * math.sqrt(3.0 / fan_in)
        b_bound = 1.0 / math.sqrt(fan_in)
        key, kw_, kb_ = jax.random.split(key, 3)
        w = jax.random.uniform(kw_, (out_ch, in_ch, 3, 3), jnp.float32,
                               minval=-w_bound, maxval=w_bound)
        b = jax.random.uniform(kb_, (out_ch,), jnp.float32,
                               minval=-b_bound, maxval=b_bound)
        stride = 1 if i == 0 else 2
        params.append((w, b, stride))
    return params


# ---------------------------------------------------------------------------
# Pure-JAX reference of the same forward pass (for a tolerance check)
# ---------------------------------------------------------------------------
def _reference_forward(x_nchw, params):
    fm = x_nchw
    for (wgt, b, stride) in params:
        fm = jax.lax.conv_general_dilated(
            fm, wgt, window_strides=(stride, stride),
            padding=((1, 1), (1, 1)),
            dimension_numbers=("NCHW", "OIHW", "NCHW"),
            precision=jax.lax.Precision.HIGHEST)
        fm = fm + b.reshape(1, -1, 1, 1)
        fm = jnp.maximum(fm, 0.2 * fm)
    return fm


if __name__ == "__main__":
    key = jax.random.PRNGKey(0)
    key, kx = jax.random.split(key)

    # ndim=2, in_channels=2 (first conv takes 2 channels), batch=2, spatial 16x16
    x = jax.random.normal(kx, (2, 2, 16, 16), jnp.float32)
    params = init_unet_encoder_params(key)

    forward = jax.jit(lambda inp: unet_encoder_forward(inp, params))
    z = forward(x)
    jax.block_until_ready(z)

    # Expected shape: (2, 32, 1, 1) -- 16x16 -> s1 -> 8 -> 4 -> 2 -> 1
    assert z.shape == (2, 32, 1, 1), z.shape
    assert z.dtype == jnp.float32

    # correctness vs. plain-JAX reference (bf16 MXU inputs => loose tolerance)
    z_ref = _reference_forward(x, params)
    assert bool(jnp.allclose(z, z_ref, atol=8e-2, rtol=5e-2)), \
        float(jnp.max(jnp.abs(z - z_ref)))

    print("KERNEL_OK")
</pallas_src>

<mosaic_0001>
module attributes {stable_mosaic.version = 11 : i64} {
  func.func @kernel(%arg0: i32, %arg1: memref<1x16x2x16xbf16, #tpu.memory_space<vmem>>, %arg2: memref<16x18xbf16, #tpu.memory_space<vmem>>, %arg3: memref<32x144xbf16, #tpu.memory_space<vmem>>, %arg4: memref<32x288xbf16, #tpu.memory_space<vmem>>, %arg5: memref<32x288xbf16, #tpu.memory_space<vmem>>, %arg6: memref<32x288xbf16, #tpu.memory_space<vmem>>, %arg7: memref<16x1xf32, #tpu.memory_space<vmem>>, %arg8: memref<32x1xf32, #tpu.memory_space<vmem>>, %arg9: memref<32x1xf32, #tpu.memory_space<vmem>>, %arg10: memref<32x1xf32, #tpu.memory_space<vmem>>, %arg11: memref<32x1xf32, #tpu.memory_space<vmem>>, %arg12: memref<1x32x1x1xf32, #tpu.memory_space<vmem>>, %arg13: memref<18x2x18xbf16, #tpu.memory_space<vmem>>, %arg14: memref<18x16x18xbf16, #tpu.memory_space<vmem>>, %arg15: memref<10x32x10xbf16, #tpu.memory_space<vmem>>, %arg16: memref<6x32x6xbf16, #tpu.memory_space<vmem>>, %arg17: memref<4x32x4xbf16, #tpu.memory_space<vmem>>, %arg18: memref<18x256xbf16, #tpu.memory_space<vmem>>, %arg19: memref<144x128xbf16, #tpu.memory_space<vmem>>, %arg20: memref<288x32xbf16, #tpu.memory_space<vmem>>, %arg21: memref<288x8xbf16, #tpu.memory_space<vmem>>, %arg22: memref<288x2xbf16, #tpu.memory_space<vmem>>) attributes {dimension_semantics = [#tpu.dimension_semantics<parallel>], iteration_bounds = array<i64: 2>, scalar_prefetch = 0 : i64, scratch_operands = 10 : i64, tpu.core_type = #tpu.core_type<tc>, window_params = [{transform_indices = @transform_0, window_bounds = array<i64: 1, 16, 2, 16>}, {pipeline_mode = #tpu.pipeline_mode<synchronous>, transform_indices = @transform_1, window_bounds = array<i64: 16, 18>}, {pipeline_mode = #tpu.pipeline_mode<synchronous>, transform_indices = @transform_2, window_bounds = array<i64: 32, 144>}, {pipeline_mode = #tpu.pipeline_mode<synchronous>, transform_indices = @transform_3, window_bounds = array<i64: 32, 288>}, {pipeline_mode = #tpu.pipeline_mode<synchronous>, transform_indices = @transform_4, window_bounds = array<i64: 32, 288>}, {pipeline_mode = #tpu.pipeline_mode<synchronous>, transform_indices = @transform_5, window_bounds = array<i64: 32, 288>}, {pipeline_mode = #tpu.pipeline_mode<synchronous>, transform_indices = @transform_6, window_bounds = array<i64: 16, 1>}, {pipeline_mode = #tpu.pipeline_mode<synchronous>, transform_indices = @transform_7, window_bounds = array<i64: 32, 1>}, {pipeline_mode = #tpu.pipeline_mode<synchronous>, transform_indices = @transform_8, window_bounds = array<i64: 32, 1>}, {pipeline_mode = #tpu.pipeline_mode<synchronous>, transform_indices = @transform_9, window_bounds = array<i64: 32, 1>}, {pipeline_mode = #tpu.pipeline_mode<synchronous>, transform_indices = @transform_10, window_bounds = array<i64: 32, 1>}, {transform_indices = @transform_11, window_bounds = array<i64: 1, 32, 1, 1>}]} {
    %cst = arith.constant 0.000000e+00 : bf16
    %0 = vector.broadcast %cst : bf16 to vector<18x2x18xbf16>
    %c0 = arith.constant 0 : index
    %c0_0 = arith.constant 0 : index
    %c0_1 = arith.constant 0 : index
    %1 = vector.load %arg13[%c0, %c0_0, %c0_1] : memref<18x2x18xbf16, #tpu.memory_space<vmem>>, vector<18x2x18xbf16>
    tpu.vector_store %arg13[%c0, %c0_0, %c0_1], %0 {strides = array<i32>} : memref<18x2x18xbf16, #tpu.memory_space<vmem>>, vector<18x2x18xbf16>,
    %c0_2 = arith.constant 0 : index
    %c0_3 = arith.constant 0 : index
    %c0_4 = arith.constant 0 : index
    %c0_5 = arith.constant 0 : index
    %2 = vector.load %arg1[%c0_2, %c0_3, %c0_4, %c0_5] : memref<1x16x2x16xbf16, #tpu.memory_space<vmem>>, vector<1x16x2x16xbf16>
    %3 = vector.shape_cast %2 : vector<1x16x2x16xbf16> to vector<16x2x16xbf16>
    %c1 = arith.constant 1 : index
    %c0_6 = arith.constant 0 : index
    %c1_7 = arith.constant 1 : index
    %4 = vector.load %arg13[%c1, %c0_6, %c1_7] : memref<18x2x18xbf16, #tpu.memory_space<vmem>>, vector<16x2x16xbf16>
    tpu.vector_store %arg13[%c1, %c0_6, %c1_7], %3 {strides = array<i32>} : memref<18x2x18xbf16, #tpu.memory_space<vmem>>, vector<16x2x16xbf16>,
    %c0_8 = arith.constant 0 : index
    %c0_9 = arith.constant 0 : index
    %c0_10 = arith.constant 0 : index
    %5 = vector.load %arg13[%c0_8, %c0_9, %c0_10] : memref<18x2x18xbf16, #tpu.memory_space<vmem>>, vector<1x2x16xbf16>
    %6 = vector.shape_cast %5 : vector<1x2x16xbf16> to vector<2x16xbf16>
    %c0_11 = arith.constant 0 : index
    %c0_12 = arith.constant 0 : index
    %7 = vector.load %arg18[%c0_11, %c0_12] : memref<18x256xbf16, #tpu.memory_space<vmem>>, vector<2x16xbf16>
    tpu.vector_store %arg18[%c0_11, %c0_12], %6 {strides = array<i32>} : memref<18x256xbf16, #tpu.memory_space<vmem>>, vector<2x16xbf16>,
    %c0_13 = arith.constant 0 : index
    %c0_14 = arith.constant 0 : index
    %c1_15 = arith.constant 1 : index
    %8 = vector.load %arg13[%c0_13, %c0_14, %c1_15] : memref<18x2x18xbf16, #tpu.memory_space<vmem>>, vector<1x2x16xbf16>
    %9 = vector.shape_cast %8 : vector<1x2x16xbf16> to vector<2x16xbf16>
    %c2 = arith.constant 2 : index
    %c0_16 = arith.constant 0 : index
    %10 = vector.load %arg18[%c2, %c0_16] : memref<18x256xbf16, #tpu.memory_space<vmem>>, vector<2x16xbf16>
    tpu.vector_store %arg18[%c2, %c0_16], %9 {strides = array<i32>} : memref<18x256xbf16, #tpu.memory_space<vmem>>, vector<2x16xbf16>,
    %c0_17 = arith.constant 0 : index
    %c0_18 = arith.constant 0 : index
    %c2_19 = arith.constant 2 : index
    %11 = vector.load %arg13[%c0_17, %c0_18, %c2_19] : memref<18x2x18xbf16, #tpu.memory_space<vmem>>, vector<1x2x16xbf16>
    %12 = vector.shape_cast %11 : vector<1x2x16xbf16> to vector<2x16xbf16>
    %c4 = arith.constant 4 : index
    %c0_20 = arith.constant 0 : index
    %13 = vector.load %arg18[%c4, %c0_20] : memref<18x256xbf16, #tpu.memory_space<vmem>>, vector<2x16xbf16>
    tpu.vector_store %arg18[%c4, %c0_20], %12 {strides = array<i32>} : memref<18x256xbf16, #tpu.memory_space<vmem>>, vector<2x16xbf16>,
    %c1_21 = arith.constant 1 : index
    %c0_22 = arith.constant 0 : index
    %c0_23 = arith.constant 0 : index
    %14 = vector.load %arg13[%c1_21, %c0_22, %c0_23] : memref<18x2x18xbf16, #tpu.memory_space<vmem>>, vector<1x2x16xbf16>
    %15 = vector.shape_cast %14 : vector<1x2x16xbf16> to vector<2x16xbf16>
    %c6 = arith.constant 6 : index
    %c0_24 = arith.constant 0 : index
    %16 = vector.load %arg18[%c6, %c0_24] : memref<18x256xbf16, #tpu.memory_space<vmem>>, vector<2x16xbf16>
    tpu.vector_store %arg18[%c6, %c0_24], %15 {strides = array<i32>} : memref<18x256xbf16, #tpu.memory_space<vmem>>, vector<2x16xbf16>,
    %c1_25 = arith.constant 1 : index
    %c0_26 = arith.constant 0 : index
    %c1_27 = arith.constant 1 : index
    %17 = vector.load %arg13[%c1_25, %c0_26, %c1_27] : memref<18x2x18xbf16, #tpu.memory_space<vmem>>, vector<1x2x16xbf16>
    %18 = vector.shape_cast %17 : vector<1x2x16xbf16> to vector<2x16xbf16>
    %c8 = arith.constant 8 : index
    %c0_28 = arith.constant 0 : index
    %19 = vector.load %arg18[%c8, %c0_28] : memref<18x256xbf16, #tpu.memory_space<vmem>>, vector<2x16xbf16>
    tpu.vector_store %arg18[%c8, %c0_28], %18 {strides = array<i32>} : memref<18x256xbf16, #tpu.memory_space<vmem>>, vector<2x16xbf16>,
    %c1_29 = arith.constant 1 : index
    %c0_30 = arith.constant 0 : index
    %c2_31 = arith.constant 2 : index
    %20 = vector.load %arg13[%c1_29, %c0_30, %c2_31] : memref<18x2x18xbf16, #tpu.memory_space<vmem>>, vector<1x2x16xbf16>
    %21 = vector.shape_cast %20 : vector<1x2x16xbf16> to vector<2x16xbf16>
    %c10 = arith.constant 10 : index
    %c0_32 = arith.constant 0 : index
    %22 = vector.load %arg18[%c10, %c0_32] : memref<18x256xbf16, #tpu.memory_space<vmem>>, vector<2x16xbf16>
    tpu.vector_store %arg18[%c10, %c0_32], %21 {strides = array<i32>} : memref<18x256xbf16, #tpu.memory_space<vmem>>, vector<2x16xbf16>,
    %c2_33 = arith.constant 2 : index
    %c0_34 = arith.constant 0 : index
    %c0_35 = arith.constant 0 : index
    %23 = vector.load %arg13[%c2_33, %c0_34, %c0_35] : memref<18x2x18xbf16, #tpu.memory_space<vmem>>, vector<1x2x16xbf16>
    %24 = vector.shape_cast %23 : vector<1x2x16xbf16> to vector<2x16xbf16>
    %c12 = arith.constant 12 : index
    %c0_36 = arith.constant 0 : index
    %25 = vector.load %arg18[%c12, %c0_36] : memref<18x256xbf16, #tpu.memory_space<vmem>>, vector<2x16xbf16>
    tpu.vector_store %arg18[%c12, %c0_36], %24 {strides = array<i32>} : memref<18x256xbf16, #tpu.memory_space<vmem>>, vector<2x16xbf16>,
    %c2_37 = arith.constant 2 : index
    %c0_38 = arith.constant 0 : index
    %c1_39 = arith.constant 1 : index
    %26 = vector.load %arg13[%c2_37, %c0_38, %c1_39] : memref<18x2x18xbf16, #tpu.memory_space<vmem>>, vector<1x2x16xbf16>
    %27 = vector.shape_cast %26 : vector<1x2x16xbf16> to vector<2x16xbf16>
    %c14 = arith.constant 14 : index
    %c0_40 = arith.constant 0 : index
    %28 = vector.load %arg18[%c14, %c0_40] : memref<18x256xbf16, #tpu.memory_space<vmem>>, vector<2x16xbf16>
    tpu.vector_store %arg18[%c14, %c0_40], %27 {strides = array<i32>} : memref<18x256xbf16, #tpu.memory_space<vmem>>, vector<2x16xbf16>,
    %c2_41 = arith.constant 2 : index
    %c0_42 = arith.constant 0 : index
    %c2_43 = arith.constant 2 : index
    %29 = vector.load %arg13[%c2_41, %c0_42, %c2_43] : memref<18x2x18xbf16, #tpu.memory_space<vmem>>, vector<1x2x16xbf16>
    %30 = vector.shape_cast %29 : vector<1x2x16xbf16> to vector<2x16xbf16>
    %c16 = arith.constant 16 : index
    %c0_44 = arith.constant 0 : index
    %31 = vector.load %arg18[%c16, %c0_44] : memref<18x256xbf16, #tpu.memory_space<vmem>>, vector<2x16xbf16>
    tpu.vector_store %arg18[%c16, %c0_44], %30 {strides = array<i32>} : memref<18x256xbf16, #tpu.memory_space<vmem>>, vector<2x16xbf16>,
    %c1_45 = arith.constant 1 : index
    %c0_46 = arith.constant 0 : index
    %c0_47 = arith.constant 0 : index
    %32 = vector.load %arg13[%c1_45, %c0_46, %c0_47] : memref<18x2x18xbf16, #tpu.memory_space<vmem>>, vector<1x2x16xbf16>
    %33 = vector.shape_cast %32 : vector<1x2x16xbf16> to vector<2x16xbf16>
    %c0_48 = arith.constant 0 : index
    %c16_49 = arith.constant 16 : index
    %34 = vector.load %arg18[%c0_48, %c16_49] : memref<18x256xbf16, #tpu.memory_space<vmem>>, vector<2x16xbf16>
    tpu.vector_store %arg18[%c0_48, %c16_49], %33 {strides = array<i32>} : memref<18x256xbf16, #tpu.memory_space<vmem>>, vector<2x16xbf16>,
    %c1_50 = arith.constant 1 : index
    %c0_51 = arith.constant 0 : index
    %c1_52 = arith.constant 1 : index
    %35 = vector.load %arg13[%c1_50, %c0_51, %c1_52] : memref<18x2x18xbf16, #tpu.memory_space<vmem>>, vector<1x2x16xbf16>
    %36 = vector.shape_cast %35 : vector<1x2x16xbf16> to vector<2x16xbf16>
    %c2_53 = arith.constant 2 : index
    %c16_54 = arith.constant 16 : index
    %37 = vector.load %arg18[%c2_53, %c16_54] : memref<18x256xbf16, #tpu.memory_space<vmem>>, vector<2x16xbf16>
    tpu.vector_store %arg18[%c2_53, %c16_54], %36 {strides = array<i32>} : memref<18x256xbf16, #tpu.memory_space<vmem>>, vector<2x16xbf16>,
    %c1_55 = arith.constant 1 : index
    %c0_56 = arith.constant 0 : index
    %c2_57 = arith.constant 2 : index
    %38 = vector.load %arg13[%c1_55, %c0_56, %c2_57] : memref<18x2x18xbf16, #tpu.memory_space<vmem>>, vector<1x2x16xbf16>
    %39 = vector.shape_cast %38 : vector<1x2x16xbf16> to vector<2x16xbf16>
    %c4_58 = arith.constant 4 : index
    %c16_59 = arith.constant 16 : index
    %40 = vector.load %arg18[%c4_58, %c16_59] : memref<18x256xbf16, #tpu.memory_space<vmem>>, vector<2x16xbf16>
    tpu.vector_store %arg18[%c4_58, %c16_59], %39 {strides = array<i32>} : memref<18x256xbf16, #tpu.memory_space<vmem>>, vector<2x16xbf16>,
    %c2_60 = arith.constant 2 : index
    %c0_61 = arith.constant 0 : index
    %c0_62 = arith.constant 0 : index
    %41 = vector.load %arg13[%c2_60, %c0_61, %c0_62] : memref<18x2x18xbf16, #tpu.memory_space<vmem>>, vector<1x2x16xbf16>
    %42 = vector.shape_cast %41 : vector<1x2x16xbf16> to vector<2x16xbf16>
    %c6_63 = arith.constant 6 : index
    %c16_64 = arith.constant 16 : index
    %43 = vector.load %arg18[%c6_63, %c16_64] : memref<18x256xbf16, #tpu.memory_space<vmem>>, vector<2x16xbf16>
    tpu.vector_store %arg18[%c6_63, %c16_64], %42 {strides = array<i32>} : memref<18x256xbf16, #tpu.memory_space<vmem>>, vector<2x16xbf16>,
    %c2_65 = arith.constant 2 : index
    %c0_66 = arith.constant 0 : index
    %c1_67 = arith.constant 1 : index
    %44 = vector.load %arg13[%c2_65, %c0_66, %c1_67] : memref<18x2x18xbf16, #tpu.memory_space<vmem>>, vector<1x2x16xbf16>
    %45 = vector.shape_cast %44 : vector<1x2x16xbf16> to vector<2x16xbf16>
    %c8_68 = arith.constant 8 : index
    %c16_69 = arith.constant 16 : index
    %46 = vector.load %arg18[%c8_68, %c16_69] : memref<18x256xbf16, #tpu.memory_space<vmem>>, vector<2x16xbf16>
    tpu.vector_store %arg18[%c8_68, %c16_69], %45 {strides = array<i32>} : memref<18x256xbf16, #tpu.memory_space<vmem>>, vector<2x16xbf16>,
    %c2_70 = arith.constant 2 : index
    %c0_71 = arith.constant 0 : index
    %c2_72 = arith.constant 2 : index
    %47 = vector.load %arg13[%c2_70, %c0_71, %c2_72] : memref<18x2x18xbf16, #tpu.memory_space<vmem>>, vector<1x2x16xbf16>
    %48 = vector.shape_cast %47 : vector<1x2x16xbf16> to vector<2x16xbf16>
    %c10_73 = arith.constant 10 : index
    %c16_74 = arith.constant 16 : index
    %49 = vector.load %arg18[%c10_73, %c16_74] : memref<18x256xbf16, #tpu.memory_space<vmem>>, vector<2x16xbf16>
    tpu.vector_store %arg18[%c10_73, %c16_74], %48 {strides = array<i32>} : memref<18x256xbf16, #tpu.memory_space<vmem>>, vector<2x16xbf16>,
    %c3 = arith.constant 3 : index
    %c0_75 = arith.constant 0 : index
    %c0_76 = arith.constant 0 : index
    %50 = vector.load %arg13[%c3, %c0_75, %c0_76] : memref<18x2x18xbf16, #tpu.memory_space<vmem>>, vector<1x2x16xbf16>
    %51 = vector.shape_cast %50 : vector<1x2x16xbf16> to vector<2x16xbf16>
    %c12_77 = arith.constant 12 : index
    %c16_78 = arith.constant 16 : index
    %52 = vector.load %arg18[%c12_77, %c16_78] : memref<18x256xbf16, #tpu.memory_space<vmem>>, vector<2x16xbf16>
    tpu.vector_store %arg18[%c12_77, %c16_78], %51 {strides = array<i32>} : memref<18x256xbf16, #tpu.memory_space<vmem>>, vector<2x16xbf16>,
    %c3_79 = arith.constant 3 : index
    %c0_80 = arith.constant 0 : index
    %c1_81 = arith.constant 1 : index
    %53 = vector.load %arg13[%c3_79, %c0_80, %c1_81] : memref<18x2x18xbf16, #tpu.memory_space<vmem>>, vector<1x2x16xbf16>
    %54 = vector.shape_cast %53 : vector<1x2x16xbf16> to vector<2x16xbf16>
    %c14_82 = arith.constant 14 : index
    %c16_83 = arith.constant 16 : index
    %55 = vector.load %arg18[%c14_82, %c16_83] : memref<18x256xbf16, #tpu.memory_space<vmem>>, vector<2x16xbf16>
    tpu.vector_store %arg18[%c14_82, %c16_83], %54 {strides = array<i32>} : memref<18x256xbf16, #tpu.memory_space<vmem>>, vector<2x16xbf16>,
    %c3_84 = arith.constant 3 : index
    %c0_85 = arith.constant 0 : index
    %c2_86 = arith.constant 2 : index
    %56 = vector.load %arg13[%c3_84, %c0_85, %c2_86] : memref<18x2x18xbf16, #tpu.memory_space<vmem>>, vector<1x2x16xbf16>
    %57 = vector.shape_cast %56 : vector<1x2x16xbf16> to vector<2x16xbf16>
    %c16_87 = arith.constant 16 : index
    %c16_88 = arith.constant 16 : index
    %58 = vector.load %arg18[%c16_87, %c16_88] : memref<18x256xbf16, #tpu.memory_space<vmem>>, vector<2x16xbf16>
    tpu.vector_store %arg18[%c16_87, %c16_88], %57 {strides = array<i32>} : memref<18x256xbf16, #tpu.memory_space<vmem>>, vector<2x16xbf16>,
    %c2_89 = arith.constant 2 : index
    %c0_90 = arith.constant 0 : index
    %c0_91 = arith.constant 0 : index
    %59 = vector.load %arg13[%c2_89, %c0_90, %c0_91] : memref<18x2x18xbf16, #tpu.memory_space<vmem>>, vector<1x2x16xbf16>
    %60 = vector.shape_cast %59 : vector<1x2x16xbf16> to vector<2x16xbf16>
    %c0_92 = arith.constant 0 : index
    %c32 = arith.constant 32 : index
    %61 = vector.load %arg18[%c0_92, %c32] : memref<18x256xbf16, #tpu.memory_space<vmem>>, vector<2x16xbf16>
    tpu.vector_store %arg18[%c0_92, %c32], %60 {strides = array<i32>} : memref<18x256xbf16, #tpu.memory_space<vmem>>, vector<2x16xbf16>,
    %c2_93 = arith.constant 2 : index
    %c0_94 = arith.constant 0 : index
    %c1_95 = arith.constant 1 : index
    %62 = vector.load %arg13[%c2_93, %c0_94, %c1_95] : memref<18x2x18xbf16, #tpu.memory_space<vmem>>, vector<1x2x16xbf16>
    %63 = vector.shape_cast %62 : vector<1x2x16xbf16> to vector<2x16xbf16>
    %c2_96 = arith.constant 2 : index
    %c32_97 = arith.constant 32 : index
    %64 = vector.load %arg18[%c2_96, %c32_97] : memref<18x256xbf16, #tpu.memory_space<vmem>>, vector<2x16xbf16>
    tpu.vector_store %arg18[%c2_96, %c32_97], %63 {strides = array<i32>} : memref<18x256xbf16, #tpu.memory_space<vmem>>, vector<2x16xbf16>,
    %c2_98 = arith.constant 2 : index
    %c0_99 = arith.constant 0 : index
    %c2_100 = arith.constant 2 : index
    %65 = vector.load %arg13[%c2_98, %c0_99, %c2_100] : memref<18x2x18xbf16, #tpu.memory_space<vmem>>, vector<1x2x16xbf16>
    %66 = vector.shape_cast %65 : vector<1x2x16xbf16> to vector<2x16xbf16>
    %c4_101 = arith.constant 4 : index
    %c32_102 = arith.constant 32 : index
    %67 = vector.load %arg18[%c4_101, %c32_102] : memref<18x256xbf16, #tpu.memory_space<vmem>>, vector<2x16xbf16>
    tpu.vector_store %arg18[%c4_101, %c32_102], %66 {strides = array<i32>} : memref<18x256xbf16, #tpu.memory_space<vmem>>, vector<2x16xbf16>,
    %c3_103 = arith.constant 3 : index
    %c0_104 = arith.constant 0 : index
    %c0_105 = arith.constant 0 : index
    %68 = vector.load %arg13[%c3_103, %c0_104, %c0_105] : memref<18x2x18xbf16, #tpu.memory_space<vmem>>, vector<1x2x16xbf16>
    %69 = vector.shape_cast %68 : vector<1x2x16xbf16> to vector<2x16xbf16>
    %c6_106 = arith.constant 6 : index
    %c32_107 = arith.constant 32 : index
    %70 = vector.load %arg18[%c6_106, %c32_107] : memref<18x256xbf16, #tpu.memory_space<vmem>>, vector<2x16xbf16>
    tpu.vector_store %arg18[%c6_106, %c32_107], %69 {strides = array<i32>} : memref<18x256xbf16, #tpu.memory_space<vmem>>, vector<2x16xbf16>,
    %c3_108 = arith.constant 3 : index
    %c0_109 = arith.constant 0 : index
    %c1_110 = arith.constant 1 : index
    %71 = vector.load %arg13[%c3_108, %c0_109, %c1_110] : memref<18x2x18xbf16, #tpu.memory_space<vmem>>, vector<1x2x16xbf16>
    %72 = vector.shape_cast %71 : vector<1x2x16xbf16> to vector<2x16xbf16>
    %c8_111 = arith.constant 8 : index
    %c32_112 = arith.constant 32 : index
    %73 = vector.load %arg18[%c8_111, %c32_112] : memref<18x256xbf16, #tpu.memory_space<vmem>>, vector<2x16xbf16>
    tpu.vector_store %arg18[%c8_111, %c32_112], %72 {strides = array<i32>} : memref<18x256xbf16, #tpu.memory_space<vmem>>, vector<2x16xbf16>,
    %c3_113 = arith.constant 3 : index
    %c0_114 = arith.constant 0 : index
    %c2_115 = arith.constant 2 : index
    %74 = vector.load %arg13[%c3_113, %c0_114, %c2_115] : memref<18x2x18xbf16, #tpu.memory_space<vmem>>, vector<1x2x16xbf16>
    %75 = vector.shape_cast %74 : vector<1x2x16xbf16> to vector<2x16xbf16>
    %c10_116 = arith.constant 10 : index
    %c32_117 = arith.constant 32 : index
    %76 = vector.load %arg18[%c10_116, %c32_117] : memref<18x256xbf16, #tpu.memory_space<vmem>>, vector<2x16xbf16>
    tpu.vector_store %arg18[%c10_116, %c32_117], %75 {strides = array<i32>} : memref<18x256xbf16, #tpu.memory_space<vmem>>, vector<2x16xbf16>,
    %c4_118 = arith.constant 4 : index
    %c0_119 = arith.constant 0 : index
    %c0_120 = arith.constant 0 : index
    %77 = vector.load %arg13[%c4_118, %c0_119, %c0_120] : memref<18x2x18xbf16, #tpu.memory_space<vmem>>, vector<1x2x16xbf16>
    %78 = vector.shape_cast %77 : vector<1x2x16xbf16> to vector<2x16xbf16>
    %c12_121 = arith.constant 12 : index
    %c32_122 = arith.constant 32 : index
    %79 = vector.load %arg18[%c12_121, %c32_122] : memref<18x256xbf16, #tpu.memory_space<vmem>>, vector<2x16xbf16>
    tpu.vector_store %arg18[%c12_121, %c32_122], %78 {strides = array<i32>} : memref<18x256xbf16, #tpu.memory_space<vmem>>, vector<2x16xbf16>,
    %c4_123 = arith.constant 4 : index
    %c0_124 = arith.constant 0 : index
    %c1_125 = arith.constant 1 : index
    %80 = vector.load %arg13[%c4_123, %c0_124, %c1_125] : memref<18x2x18xbf16, #tpu.memory_space<vmem>>, vector<1x2x16xbf16>
    %81 = vector.shape_cast %80 : vector<1x2x16xbf16> to vector<2x16xbf16>
    %c14_126 = arith.constant 14 : index
    %c32_127 = arith.constant 32 : index
    %82 = vector.load %arg18[%c14_126, %c32_127] : memref<18x256xbf16, #tpu.memory_space<vmem>>, vector<2x16xbf16>
    tpu.vector_store %arg18[%c14_126, %c32_127], %81 {strides = array<i32>} : memref<18x256xbf16, #tpu.memory_space<vmem>>, vector<2x16xbf16>,
    %c4_128 = arith.constant 4 : index
    %c0_129 = arith.constant 0 : index
    %c2_130 = arith.constant 2 : index
    %83 = vector.load %arg13[%c4_128, %c0_129, %c2_130] : memref<18x2x18xbf16, #tpu.memory_space<vmem>>, vector<1x2x16xbf16>
    %84 = vector.shape_cast %83 : vector<1x2x16xbf16> to vector<2x16xbf16>
    %c16_131 = arith.constant 16 : index
    %c32_132 = arith.constant 32 : index
    %85 = vector.load %arg18[%c16_131, %c32_132] : memref<18x256xbf16, #tpu.memory_space<vmem>>, vector<2x16xbf16>
    tpu.vector_store %arg18[%c16_131, %c32_132], %84 {strides = array<i32>} : memref<18x256xbf16, #tpu.memory_space<vmem>>, vector<2x16xbf16>,
    %c3_133 = arith.constant 3 : index
    %c0_134 = arith.constant 0 : index
    %c0_135 = arith.constant 0 : index
    %86 = vector.load %arg13[%c3_133, %c0_134, %c0_135] : memref<18x2x18xbf16, #tpu.memory_space<vmem>>, vector<1x2x16xbf16>
    %87 = vector.shape_cast %86 : vector<1x2x16xbf16> to vector<2x16xbf16>
    %c0_136 = arith.constant 0 : index
    %c48 = arith.constant 48 : index
    %88 = vector.load %arg18[%c0_136, %c48] : memref<18x256xbf16, #tpu.memory_space<vmem>>, vector<2x16xbf16>
    tpu.vector_store %arg18[%c0_136, %c48], %87 {strides = array<i32>} : memref<18x256xbf16, #tpu.memory_space<vmem>>, vector<2x16xbf16>,
    %c3_137 = arith.constant 3 : index
    %c0_138 = arith.constant 0 : index
    %c1_139 = arith.constant 1 : index
    %89 = vector.load %arg13[%c3_137, %c0_138, %c1_139] : memref<18x2x18xbf16, #tpu.memory_space<vmem>>, vector<1x2x16xbf16>
    %90 = vector.shape_cast %89 : vector<1x2x16xbf16> to vector<2x16xbf16>
    %c2_140 = arith.constant 2 : index
    %c48_141 = arith.constant 48 : index
    %91 = vector.load %arg18[%c2_140, %c48_141] : memref<18x256xbf16, #tpu.memory_space<vmem>>, vector<2x16xbf16>
    tpu.vector_store %arg18[%c2_140, %c48_141], %90 {strides = array<i32>} : memref<18x256xbf16, #tpu.memory_space<vmem>>, vector<2x16xbf16>,
    %c3_142 = arith.constant 3 : index
    %c0_143 = arith.constant 0 : index
    %c2_144 = arith.constant 2 : index
    %92 = vector.load %arg13[%c3_142, %c0_143, %c2_144] : memref<18x2x18xbf16, #tpu.memory_space<vmem>>, vector<1x2x16xbf16>
    %93 = vector.shape_cast %92 : vector<1x2x16xbf16> to vector<2x16xbf16>
    %c4_145 = arith.constant 4 : index
    %c48_146 = arith.constant 48 : index
    %94 = vector.load %arg18[%c4_145, %c48_146] : memref<18x256xbf16, #tpu.memory_space<vmem>>, vector<2x16xbf16>
    tpu.vector_store %arg18[%c4_145, %c48_146], %93 {strides = array<i32>} : memref<18x256xbf16, #tpu.memory_space<vmem>>, vector<2x16xbf16>,
    %c4_147 = arith.constant 4 : index
    %c0_148 = arith.constant 0 : index
    %c0_149 = arith.constant 0 : index
    %95 = vector.load %arg13[%c4_147, %c0_148, %c0_149] : memref<18x2x18xbf16, #tpu.memory_space<vmem>>, vector<1x2x16xbf16>
    %96 = vector.shape_cast %95 : vector<1x2x16xbf16> to vector<2x16xbf16>
    %c6_150 = arith.constant 6 : index
    %c48_151 = arith.constant 48 : index
    %97 = vector.load %arg18[%c6_150, %c48_151] : memref<18x256xbf16, #tpu.memory_space<vmem>>, vector<2x16xbf16>
    tpu.vector_store %arg18[%c6_150, %c48_151], %96 {strides = array<i32>} : memref<18x256xbf16, #tpu.memory_space<vmem>>, vector<2x16xbf16>,
    %c4_152 = arith.constant 4 : index
    %c0_153 = arith.constant 0 : index
    %c1_154 = arith.constant 1 : index
    %98 = vector.load %arg13[%c4_152, %c0_153, %c1_154] : memref<18x2x18xbf16, #tpu.memory_space<vmem>>, vector<1x2x16xbf16>
    %99 = vector.shape_cast %98 : vector<1x2x16xbf16> to vector<2x16xbf16>
    %c8_155 = arith.constant 8 : index
    %c48_156 = arith.constant 48 : index
    %100 = vector.load %arg18[%c8_155, %c48_156] : memref<18x256xbf16, #tpu.memory_space<vmem>>, vector<2x16xbf16>
    tpu.vector_store %arg18[%c8_155, %c48_156], %99 {strides = array<i32>} : memref<18x256xbf16, #tpu.memory_space<vmem>>, vector<2x16xbf16>,
    %c4_157 = arith.constant 4 : index
    %c0_158 = arith.constant 0 : index
    %c2_159 = arith.constant 2 : index
    %101 = vector.load %arg13[%c4_157, %c0_158, %c2_159] : memref<18x2x18xbf16, #tpu.memory_space<vmem>>, vector<1x2x16xbf16>
    %102 = vector.shape_cast %101 : vector<1x2x16xbf16> to vector<2x16xbf16>
    %c10_160 = arith.constant 10 : index
    %c48_161 = arith.constant 48 : index
    %103 = vector.load %arg18[%c10_160, %c48_161] : memref<18x256xbf16, #tpu.memory_space<vmem>>, vector<2x16xbf16>
    tpu.vector_store %arg18[%c10_160, %c48_161], %102 {strides = array<i32>} : memref<18x256xbf16, #tpu.memory_space<vmem>>, vector<2x16xbf16>,
    %c5 = arith.constant 5 : index
    %c0_162 = arith.constant 0 : index
    %c0_163 = arith.constant 0 : index
    %104 = vector.load %arg13[%c5, %c0_162, %c0_163] : memref<18x2x18xbf16, #tpu.memory_space<vmem>>, vector<1x2x16xbf16>
    %105 = vector.shape_cast %104 : vector<1x2x16xbf16> to vector<2x16xbf16>
    %c12_164 = arith.constant 12 : index
    %c48_165 = arith.constant 48 : index
    %106 = vector.load %arg18[%c12_164, %c48_165] : memref<18x256xbf16, #tpu.memory_space<vmem>>, vector<2x16xbf16>
    tpu.vector_store %arg18[%c12_164, %c48_165], %105 {strides = array<i32>} : memref<18x256xbf16, #tpu.memory_space<vmem>>, vector<2x16xbf16>,
    %c5_166 = arith.constant 5 : index
    %c0_167 = arith.constant 0 : index
    %c1_168 = arith.constant 1 : index
    %107 = vector.load %arg13[%c5_166, %c0_167, %c1_168] : memref<18x2x18xbf16, #tpu.memory_space<vmem>>, vector<1x2x16xbf16>
    %108 = vector.shape_cast %107 : vector<1x2x16xbf16> to vector<2x16xbf16>
    %c14_169 = arith.constant 14 : index
    %c48_170 = arith.constant 48 : index
    %109 = vector.load %arg18[%c14_169, %c48_170] : memref<18x256xbf16, #tpu.memory_space<vmem>>, vector<2x16xbf16>
    tpu.vector_store %arg18[%c14_169, %c48_170], %108 {strides = array<i32>} : memref<18x256xbf16, #tpu.memory_space<vmem>>, vector<2x16xbf16>,
    %c5_171 = arith.constant 5 : index
    %c0_172 = arith.constant 0 : index
    %c2_173 = arith.constant 2 : index
    %110 = vector.load %arg13[%c5_171, %c0_172, %c2_173] : memref<18x2x18xbf16, #tpu.memory_space<vmem>>, vector<1x2x16xbf16>
    %111 = vector.shape_cast %110 : vector<1x2x16xbf16> to vector<2x16xbf16>
    %c16_174 = arith.constant 16 : index
    %c48_175 = arith.constant 48 : index
    %112 = vector.load %arg18[%c16_174, %c48_175] : memref<18x256xbf16, #tpu.memory_space<vmem>>, vector<2x16xbf16>
    tpu.vector_store %arg18[%c16_174, %c48_175], %111 {strides = array<i32>} : memref<18x256xbf16, #tpu.memory_space<vmem>>, vector<2x16xbf16>,
    %c4_176 = arith.constant 4 : index
    %c0_177 = arith.constant 0 : index
    %c0_178 = arith.constant 0 : index
    %113 = vector.load %arg13[%c4_176, %c0_177, %c0_178] : memref<18x2x18xbf16, #tpu.memory_space<vmem>>, vector<1x2x16xbf16>
    %114 = vector.shape_cast %113 : vector<1x2x16xbf16> to vector<2x16xbf16>
    %c0_179 = arith.constant 0 : index
    %c64 = arith.constant 64 : index
    %115 = vector.load %arg18[%c0_179, %c64] : memref<18x256xbf16, #tpu.memory_space<vmem>>, vector<2x16xbf16>
    tpu.vector_store %arg18[%c0_179, %c64], %114 {strides = array<i32>} : memref<18x256xbf16, #tpu.memory_space<vmem>>, vector<2x16xbf16>,
    %c4_180 = arith.constant 4 : index
    %c0_181 = arith.constant 0 : index
    %c1_182 = arith.constant 1 : index
    %116 = vector.load %arg13[%c4_180, %c0_181, %c1_182] : memref<18x2x18xbf16, #tpu.memory_space<vmem>>, vector<1x2x16xbf16>
    %117 = vector.shape_cast %116 : vector<1x2x16xbf16> to vector<2x16xbf16>
    %c2_183 = arith.constant 2 : index
    %c64_184 = arith.constant 64 : index
    %118 = vector.load %arg18[%c2_183, %c64_184] : memref<18x256xbf16, #tpu.memory_space<vmem>>, vector<2x16xbf16>
    tpu.vector_store %arg18[%c2_183, %c64_184], %117 {strides = array<i32>} : memref<18x256xbf16, #tpu.memory_space<vmem>>, vector<2x16xbf16>,
    %c4_185 = arith.constant 4 : index
    %c0_186 = arith.constant 0 : index
    %c2_187 = arith.constant 2 : index
    %119 = vector.load %arg13[%c4_185, %c0_186, %c2_187] : memref<18x2x18xbf16, #tpu.memory_space<vmem>>, vector<1x2x16xbf16>
    %120 = vector.shape_cast %119 : vector<1x2x16xbf16> to vector<2x16xbf16>
    %c4_188 = arith.constant 4 : index
    %c64_189 = arith.constant 64 : index
    %121 = vector.load %arg18[%c4_188, %c64_189] : memref<18x256xbf16, #tpu.memory_space<vmem>>, vector<2x16xbf16>
    tpu.vector_store %arg18[%c4_188, %c64_189], %120 {strides = array<i32>} : memref<18x256xbf16, #tpu.memory_space<vmem>>, vector<2x16xbf16>,
    %c5_190 = arith.constant 5 : index
    %c0_191 = arith.constant 0 : index
    %c0_192 = arith.constant 0 : index
    %122 = vector.load %arg13[%c5_190, %c0_191, %c0_192] : memref<18x2x18xbf16, #tpu.memory_space<vmem>>, vector<1x2x16xbf16>
    %123 = vector.shape_cast %122 : vector<1x2x16xbf16> to vector<2x16xbf16>
    %c6_193 = arith.constant 6 : index
    %c64_194 = arith.constant 64 : index
    %124 = vector.load %arg18[%c6_193, %c64_194] : memref<18x256xbf16, #tpu.memory_space<vmem>>, vector<2x16xbf16>
    tpu.vector_store %arg18[%c6_193, %c64_194], %123 {strides = array<i32>} : memref<18x256xbf16, #tpu.memory_space<vmem>>, vector<2x16xbf16>,
    %c5_195 = arith.constant 5 : index
    %c0_196 = arith.constant 0 : index
    %c1_197 = arith.constant 1 : index
    %125 = vector.load %arg13[%c5_195, %c0_196, %c1_197] : memref<18x2x18xbf16, #tpu.memory_space<vmem>>, vector<1x2x16xbf16>
    %126 = vector.shape_cast %125 : vector<1x2x16xbf16> to vector<2x16xbf16>
    %c8_198 = arith.constant 8 : index
    %c64_199 = arith.constant 64 : index
    %127 = vector.load %arg18[%c8_198, %c64_199] : memref<18x256xbf16, #tpu.memory_space<vmem>>, vector<2x16xbf16>
    tpu.vector_store %arg18[%c8_198, %c64_199], %126 {strides = array<i32>} : memref<18x256xbf16, #tpu.memory_space<vmem>>, vector<2x16xbf16>,
    %c5_200 = arith.constant 5 : index
    %c0_201 = arith.constant 0 : index
    %c2_202 = arith.constant 2 : index
    %128 = vector.load %arg13[%c5_200, %c0_201, %c2_202] : memref<18x2x18xbf16, #tpu.memory_space<vmem>>, vector<1x2x16xbf16>
    %129 = vector.shape_cast %128 : vector<1x2x16xbf16> to vector<2x16xbf16>
    %c10_203 = arith.constant 10 : index
    %c64_204 = arith.constant 64 : index
    %130 = vector.load %arg18[%c10_203, %c64_204] : memref<18x256xbf16, #tpu.memory_space<vmem>>, vector<2x16xbf16>
    tpu.vector_store %arg18[%c10_203, %c64_204], %129 {strides = array<i32>} : memref<18x256xbf16, #tpu.memory_space<vmem>>, vector<2x16xbf16>,
    %c6_205 = arith.constant 6 : index
    %c0_206 = arith.constant 0 : index
    %c0_207 = arith.constant 0 : index
    %131 = vector.load %arg13[%c6_205, %c0_206, %c0_207] : memref<18x2x18xbf16, #tpu.memory_space<vmem>>, vector<1x2x16xbf16>
    %132 = vector.shape_cast %131 : vector<1x2x16xbf16> to vector<2x16xbf16>
    %c12_208 = arith.constant 12 : index
    %c64_209 = arith.constant 64 : index
    %133 = vector.load %arg18[%c12_208, %c64_209] : memref<18x256xbf16, #tpu.memory_space<vmem>>, vector<2x16xbf16>
    tpu.vector_store %arg18[%c12_208, %c64_209], %132 {strides = array<i32>} : memref<18x256xbf16, #tpu.memory_space<vmem>>, vector<2x16xbf16>,
    %c6_210 = arith.constant 6 : index
    %c0_211 = arith.constant 0 : index
    %c1_212 = arith.constant 1 : index
    %134 = vector.load %arg13[%c6_210, %c0_211, %c1_212] : memref<18x2x18xbf16, #tpu.memory_space<vmem>>, vector<1x2x16xbf16>
    %135 = vector.shape_cast %134 : vector<1x2x16xbf16> to vector<2x16xbf16>
    %c14_213 = arith.constant 14 : index
    %c64_214 = arith.constant 64 : index
    %136 = vector.load %arg18[%c14_213, %c64_214] : memref<18x256xbf16, #tpu.memory_space<vmem>>, vector<2x16xbf16>
    tpu.vector_store %arg18[%c14_213, %c64_214], %135 {strides = array<i32>} : memref<18x256xbf16, #tpu.memory_space<vmem>>, vector<2x16xbf16>,
    %c6_215 = arith.constant 6 : index
    %c0_216 = arith.constant 0 : index
    %c2_217 = arith.constant 2 : index
    %137 = vector.load %arg13[%c6_215, %c0_216, %c2_217] : memref<18x2x18xbf16, #tpu.memory_space<vmem>>, vector<1x2x16xbf16>
    %138 = vector.shape_cast %137 : vector<1x2x16xbf16> to vector<2x16xbf16>
    %c16_218 = arith.constant 16 : index
    %c64_219 = arith.constant 64 : index
    %139 = vector.load %arg18[%c16_218, %c64_219] : memref<18x256xbf16, #tpu.memory_space<vmem>>, vector<2x16xbf16>
    tpu.vector_store %arg18[%c16_218, %c64_219], %138 {strides = array<i32>} : memref<18x256xbf16, #tpu.memory_space<vmem>>, vector<2x16xbf16>,
    %c5_220 = arith.constant 5 : index
    %c0_221 = arith.constant 0 : index
    %c0_222 = arith.constant 0 : index
    %140 = vector.load %arg13[%c5_220, %c0_221, %c0_222] : memref<18x2x18xbf16, #tpu.memory_space<vmem>>, vector<1x2x16xbf16>
    %141 = vector.shape_cast %140 : vector<1x2x16xbf16> to vector<2x16xbf16>
    %c0_223 = arith.constant 0 : index
    %c80 = arith.constant 80 : index
    %142 = vector.load %arg18[%c0_223, %c80] : memref<18x256xbf16, #tpu.memory_space<vmem>>, vector<2x16xbf16>
    tpu.vector_store %arg18[%c0_223, %c80], %141 {strides = array<i32>} : memref<18x256xbf16, #tpu.memory_space<vmem>>, vector<2x16xbf16>,
    %c5_224 = arith.constant 5 : index
    %c0_225 = arith.constant 0 : index
    %c1_226 = arith.constant 1 : index
    %143 = vector.load %arg13[%c5_224, %c0_225, %c1_226] : memref<18x2x18xbf16, #tpu.memory_space<vmem>>, vector<1x2x16xbf16>
    %144 = vector.shape_cast %143 : vector<1x2x16xbf16> to vector<2x16xbf16>
    %c2_227 = arith.constant 2 : index
    %c80_228 = arith.constant 80 : index
    %145 = vector.load %arg18[%c2_227, %c80_228] : memref<18x256xbf16, #tpu.memory_space<vmem>>, vector<2x16xbf16>
    tpu.vector_store %arg18[%c2_227, %c80_228], %144 {strides = array<i32>} : memref<18x256xbf16, #tpu.memory_space<vmem>>, vector<2x16xbf16>,
    %c5_229 = arith.constant 5 : index
    %c0_230 = arith.constant 0 : index
    %c2_231 = arith.constant 2 : index
    %146 = vector.load %arg13[%c5_229, %c0_230, %c2_231] : memref<18x2x18xbf16, #tpu.memory_space<vmem>>, vector<1x2x16xbf16>
    %147 = vector.shape_cast %146 : vector<1x2x16xbf16> to vector<2x16xbf16>
    %c4_232 = arith.constant 4 : index
    %c80_233 = arith.constant 80 : index
    %148 = vector.load %arg18[%c4_232, %c80_233] : memref<18x256xbf16, #tpu.memory_space<vmem>>, vector<2x16xbf16>
    tpu.vector_store %arg18[%c4_232, %c80_233], %147 {strides = array<i32>} : memref<18x256xbf16, #tpu.memory_space<vmem>>, vector<2x16xbf16>,
    %c6_234 = arith.constant 6 : index
    %c0_235 = arith.constant 0 : index
    %c0_236 = arith.constant 0 : index
    %149 = vector.load %arg13[%c6_234, %c0_235, %c0_236] : memref<18x2x18xbf16, #tpu.memory_space<vmem>>, vector<1x2x16xbf16>
    %150 = vector.shape_cast %149 : vector<1x2x16xbf16> to vector<2x16xbf16>
    %c6_237 = arith.constant 6 : index
    %c80_238 = arith.constant 80 : index
    %151 = vector.load %arg18[%c6_237, %c80_238] : memref<18x256xbf16, #tpu.memory_space<vmem>>, vector<2x16xbf16>
    tpu.vector_store %arg18[%c6_237, %c80_238], %150 {strides = array<i32>} : memref<18x256xbf16, #tpu.memory_space<vmem>>, vector<2x16xbf16>,
    %c6_239 = arith.constant 6 : index
    %c0_240 = arith.constant 0 : index
    %c1_241 = arith.constant 1 : index
    %152 = vector.load %arg13[%c6_239, %c0_240, %c1_241] : memref<18x2x18xbf16, #tpu.memory_space<vmem>>, vector<1x2x16xbf16>
    %153 = vector.shape_cast %152 : vector<1x2x16xbf16> to vector<2x16xbf16>
    %c8_242 = arith.constant 8 : index
    %c80_243 = arith.constant 80 : index
    %154 = vector.load %arg18[%c8_242, %c80_243] : memref<18x256xbf16, #tpu.memory_space<vmem>>, vector<2x16xbf16>
    tpu.vector_store %arg18[%c8_242, %c80_243], %153 {strides = array<i32>} : memref<18x256xbf16, #tpu.memory_space<vmem>>, vector<2x16xbf16>,
    %c6_244 = arith.constant 6 : index
    %c0_245 = arith.constant 0 : index
    %c2_246 = arith.constant 2 : index
    %155 = vector.load %arg13[%c6_244, %c0_245, %c2_246] : memref<18x2x18xbf16, #tpu.memory_space<vmem>>, vector<1x2x16xbf16>
    %156 = vector.shape_cast %155 : vector<1x2x16xbf16> to vector<2x16xbf16>
    %c10_247 = arith.constant 10 : index
    %c80_248 = arith.constant 80 : index
    %157 = vector.load %arg18[%c10_247, %c80_248] : memref<18x256xbf16, #tpu.memory_space<vmem>>, vector<2x16xbf16>
    tpu.vector_store %arg18[%c10_247, %c80_248], %156 {strides = array<i32>} : memref<18x256xbf16, #tpu.memory_space<vmem>>, vector<2x16xbf16>,
    %c7 = arith.constant 7 : index
    %c0_249 = arith.constant 0 : index
    %c0_250 = arith.constant 0 : index
    %158 = vector.load %arg13[%c7, %c0_249, %c0_250] : memref<18x2x18xbf16, #tpu.memory_space<vmem>>, vector<1x2x16xbf16>
    %159 = vector.shape_cast %158 : vector<1x2x16xbf16> to vector<2x16xbf16>
    %c12_251 = arith.constant 12 : index
    %c80_252 = arith.constant 80 : index
    %160 = vector.load %arg18[%c12_251, %c80_252] : memref<18x256xbf16, #tpu.memory_space<vmem>>, vector<2x16xbf16>
    tpu.vector_store %arg18[%c12_251, %c80_252], %159 {strides = array<i32>} : memref<18x256xbf16, #tpu.memory_space<vmem>>, vector<2x16xbf16>,
    %c7_253 = arith.constant 7 : index
    %c0_254 = arith.constant 0 : index
    %c1_255 = arith.constant 1 : index
    %161 = vector.load %arg13[%c7_253, %c0_254, %c1_255] : memref<18x2x18xbf16, #tpu.memory_space<vmem>>, vector<1x2x16xbf16>
    %162 = vector.shape_cast %161 : vector<1x2x16xbf16> to vector<2x16xbf16>
    %c14_256 = arith.constant 14 : index
    %c80_257 = arith.constant 80 : index
    %163 = vector.load %arg18[%c14_256, %c80_257] : memref<18x256xbf16, #tpu.memory_space<vmem>>, vector<2x16xbf16>
    tpu.vector_store %arg18[%c14_256, %c80_257], %162 {strides = array<i32>} : memref<18x256xbf16, #tpu.memory_space<vmem>>, vector<2x16xbf16>,
    %c7_258 = arith.constant 7 : index
    %c0_259 = arith.constant 0 : index
    %c2_260 = arith.constant 2 : index
    %164 = vector.load %arg13[%c7_258, %c0_259, %c2_260] : memref<18x2x18xbf16, #tpu.memory_space<vmem>>, vector<1x2x16xbf16>
    %165 = vector.shape_cast %164 : vector<1x2x16xbf16> to vector<2x16xbf16>
    %c16_261 = arith.constant 16 : index
    %c80_262 = arith.constant 80 : index
    %166 = vector.load %arg18[%c16_261, %c80_262] : memref<18x256xbf16, #tpu.memory_space<vmem>>, vector<2x16xbf16>
    tpu.vector_store %arg18[%c16_261, %c80_262], %165 {strides = array<i32>} : memref<18x256xbf16, #tpu.memory_space<vmem>>, vector<2x16xbf16>,
    %c6_263 = arith.constant 6 : index
    %c0_264 = arith.constant 0 : index
    %c0_265 = arith.constant 0 : index
    %167 = vector.load %arg13[%c6_263, %c0_264, %c0_265] : memref<18x2x18xbf16, #tpu.memory_space<vmem>>, vector<1x2x16xbf16>
    %168 = vector.shape_cast %167 : vector<1x2x16xbf16> to vector<2x16xbf16>
    %c0_266 = arith.constant 0 : index
    %c96 = arith.constant 96 : index
    %169 = vector.load %arg18[%c0_266, %c96] : memref<18x256xbf16, #tpu.memory_space<vmem>>, vector<2x16xbf16>
    tpu.vector_store %arg18[%c0_266, %c96], %168 {strides = array<i32>} : memref<18x256xbf16, #tpu.memory_space<vmem>>, vector<2x16xbf16>,
    %c6_267 = arith.constant 6 : index
    %c0_268 = arith.constant 0 : index
    %c1_269 = arith.constant 1 : index
    %170 = vector.load %arg13[%c6_267, %c0_268, %c1_269] : memref<18x2x18xbf16, #tpu.memory_space<vmem>>, vector<1x2x16xbf16>
    %171 = vector.shape_cast %170 : vector<1x2x16xbf16> to vector<2x16xbf16>
    %c2_270 = arith.constant 2 : index
    %c96_271 = arith.constant 96 : index
    %172 = vector.load %arg18[%c2_270, %c96_271] : memref<18x256xbf16, #tpu.memory_space<vmem>>, vector<2x16xbf16>
    tpu.vector_store %arg18[%c2_270, %c96_271], %171 {strides = array<i32>} : memref<18x256xbf16, #tpu.memory_space<vmem>>, vector<2x16xbf16>,
    %c6_272 = arith.constant 6 : index
    %c0_273 = arith.constant 0 : index
    %c2_274 = arith.constant 2 : index
    %173 = vector.load %arg13[%c6_272, %c0_273, %c2_274] : memref<18x2x18xbf16, #tpu.memory_space<vmem>>, vector<1x2x16xbf16>
    %174 = vector.shape_cast %173 : vector<1x2x16xbf16> to vector<2x16xbf16>
    %c4_275 = arith.constant 4 : index
    %c96_276 = arith.constant 96 : index
    %175 = vector.load %arg18[%c4_275, %c96_276] : memref<18x256xbf16, #tpu.memory_space<vmem>>, vector<2x16xbf16>
    tpu.vector_store %arg18[%c4_275, %c96_276], %174 {strides = array<i32>} : memref<18x256xbf16, #tpu.memory_space<vmem>>, vector<2x16xbf16>,
    %c7_277 = arith.constant 7 : index
    %c0_278 = arith.constant 0 : index
    %c0_279 = arith.constant 0 : index
    %176 = vector.load %arg13[%c7_277, %c0_278, %c0_279] : memref<18x2x18xbf16, #tpu.memory_space<vmem>>, vector<1x2x16xbf16>
    %177 = vector.shape_cast %176 : vector<1x2x16xbf16> to vector<2x16xbf16>
    %c6_280 = arith.constant 6 : index
    %c96_281 = arith.constant 96 : index
    %178 = vector.load %arg18[%c6_280, %c96_281] : memref<18x256xbf16, #tpu.memory_space<vmem>>, vector<2x16xbf16>
    tpu.vector_store %arg18[%c6_280, %c96_281], %177 {strides = array<i32>} : memref<18x256xbf16, #tpu.memory_space<vmem>>, vector<2x16xbf16>,
    %c7_282 = arith.constant 7 : index
    %c0_283 = arith.constant 0 : index
    %c1_284 = arith.constant 1 : index
    %179 = vector.load %arg13[%c7_282, %c0_283, %c1_284] : memref<18x2x18xbf16, #tpu.memory_space<vmem>>, vector<1x2x16xbf16>
    %180 = vector.shape_cast %179 : vector<1x2x16xbf16> to vector<2x16xbf16>
    %c8_285 = arith.constant 8 : index
    %c96_286 = arith.constant 96 : index
    %181 = vector.load %arg18[%c8_285, %c96_286] : memref<18x256xbf16, #tpu.memory_space<vmem>>, vector<2x16xbf16>
    tpu.vector_store %arg18[%c8_285, %c96_286], %180 {strides = array<i32>} : memref<18x256xbf16, #tpu.memory_space<vmem>>, vector<2x16xbf16>,
    %c7_287 = arith.constant 7 : index
    %c0_288 = arith.constant 0 : index
    %c2_289 = arith.constant 2 : index
    %182 = vector.load %arg13[%c7_287, %c0_288, %c2_289] : memref<18x2x18xbf16, #tpu.memory_space<vmem>>, vector<1x2x16xbf16>
    %183 = vector.shape_cast %182 : vector<1x2x16xbf16> to vector<2x16xbf16>
    %c10_290 = arith.constant 10 : index
    %c96_291 = arith.constant 96 : index
    %184 = vector.load %arg18[%c10_290, %c96_291] : memref<18x256xbf16, #tpu.memory_space<vmem>>, vector<2x16xbf16>
    tpu.vector_store %arg18[%c10_290, %c96_291], %183 {strides = array<i32>} : memref<18x256xbf16, #tpu.memory_space<vmem>>, vector<2x16xbf16>,
    %c8_292 = arith.constant 8 : index
    %c0_293 = arith.constant 0 : index
    %c0_294 = arith.constant 0 : index
    %185 = vector.load %arg13[%c8_292, %c0_293, %c0_294] : memref<18x2x18xbf16, #tpu.memory_space<vmem>>, vector<1x2x16xbf16>
    %186 = vector.shape_cast %185 : vector<1x2x16xbf16> to vector<2x16xbf16>
    %c12_295 = arith.constant 12 : index
    %c96_296 = arith.constant 96 : index
    %187 = vector.load %arg18[%c12_295, %c96_296] : memref<18x256xbf16, #tpu.memory_space<vmem>>, vector<2x16xbf16>
    tpu.vector_store %arg18[%c12_295, %c96_296], %186 {strides = array<i32>} : memref<18x256xbf16, #tpu.memory_space<vmem>>, vector<2x16xbf16>,
    %c8_297 = arith.constant 8 : index
    %c0_298 = arith.constant 0 : index
    %c1_299 = arith.constant 1 : index
    %188 = vector.load %arg13[%c8_297, %c0_298, %c1_299] : memref<18x2x18xbf16, #tpu.memory_space<vmem>>, vector<1x2x16xbf16>
    %189 = vector.shape_cast %188 : vector<1x2x16xbf16> to vector<2x16xbf16>
    %c14_300 = arith.constant 14 : index
    %c96_301 = arith.constant 96 : index
    %190 = vector.load %arg18[%c14_300, %c96_301] : memref<18x256xbf16, #tpu.memory_space<vmem>>, vector<2x16xbf16>
    tpu.vector_store %arg18[%c14_300, %c96_301], %189 {strides = array<i32>} : memref<18x256xbf16, #tpu.memory_space<vmem>>, vector<2x16xbf16>,
    %c8_302 = arith.constant 8 : index
    %c0_303 = arith.constant 0 : index
    %c2_304 = arith.constant 2 : index
    %191 = vector.load %arg13[%c8_302, %c0_303, %c2_304] : memref<18x2x18xbf16, #tpu.memory_space<vmem>>, vector<1x2x16xbf16>
    %192 = vector.shape_cast %191 : vector<1x2x16xbf16> to vector<2x16xbf16>
    %c16_305 = arith.constant 16 : index
    %c96_306 = arith.constant 96 : index
    %193 = vector.load %arg18[%c16_305, %c96_306] : memref<18x256xbf16, #tpu.memory_space<vmem>>, vector<2x16xbf16>
    tpu.vector_store %arg18[%c16_305, %c96_306], %192 {strides = array<i32>} : memref<18x256xbf16, #tpu.memory_space<vmem>>, vector<2x16xbf16>,
    %c7_307 = arith.constant 7 : index
    %c0_308 = arith.constant 0 : index
    %c0_309 = arith.constant 0 : index
    %194 = vector.load %arg13[%c7_307, %c0_308, %c0_309] : memref<18x2x18xbf16, #tpu.memory_space<vmem>>, vector<1x2x16xbf16>
    %195 = vector.shape_cast %194 : vector<1x2x16xbf16> to vector<2x16xbf16>
    %c0_310 = arith.constant 0 : index
    %c112 = arith.constant 112 : index
    %196 = vector.load %arg18[%c0_310, %c112] : memref<18x256xbf16, #tpu.memory_space<vmem>>, vector<2x16xbf16>
    tpu.vector_store %arg18[%c0_310, %c112], %195 {strides = array<i32>} : memref<18x256xbf16, #tpu.memory_space<vmem>>, vector<2x16xbf16>,
    %c7_311 = arith.constant 7 : index
    %c0_312 = arith.constant 0 : index
    %c1_313 = arith.constant 1 : index
    %197 = vector.load %arg13[%c7_311, %c0_312, %c1_313] : memref<18x2x18xbf16, #tpu.memory_space<vmem>>, vector<1x2x16xbf16>
    %198 = vector.shape_cast %197 : vector<1x2x16xbf16> to vector<2x16xbf16>
    %c2_314 = arith.constant 2 : index
    %c112_315 = arith.constant 112 : index
    %199 = vector.load %arg18[%c2_314, %c112_315] : memref<18x256xbf16, #tpu.memory_space<vmem>>, vector<2x16xbf16>
    tpu.vector_store %arg18[%c2_314, %c112_315], %198 {strides = array<i32>} : memref<18x256xbf16, #tpu.memory_space<vmem>>, vector<2x16xbf16>,
    %c7_316 = arith.constant 7 : index
    %c0_317 = arith.constant 0 : index
    %c2_318 = arith.constant 2 : index
    %200 = vector.load %arg13[%c7_316, %c0_317, %c2_318] : memref<18x2x18xbf16, #tpu.memory_space<vmem>>, vector<1x2x16xbf16>
    %201 = vector.shape_cast %200 : vector<1x2x16xbf16> to vector<2x16xbf16>
    %c4_319 = arith.constant 4 : index
    %c112_320 = arith.constant 112 : index
    %202 = vector.load %arg18[%c4_319, %c112_320] : memref<18x256xbf16, #tpu.memory_space<vmem>>, vector<2x16xbf16>
    tpu.vector_store %arg18[%c4_319, %c112_320], %201 {strides = array<i32>} : memref<18x256xbf16, #tpu.memory_space<vmem>>, vector<2x16xbf16>,
    %c8_321 = arith.constant 8 : index
    %c0_322 = arith.constant 0 : index
    %c0_323 = arith.constant 0 : index
    %203 = vector.load %arg13[%c8_321, %c0_322, %c0_323] : memref<18x2x18xbf16, #tpu.memory_space<vmem>>, vector<1x2x16xbf16>
    %204 = vector.shape_cast %203 : vector<1x2x16xbf16> to vector<2x16xbf16>
    %c6_324 = arith.constant 6 : index
    %c112_325 = arith.constant 112 : index
    %205 = vector.load %arg18[%c6_324, %c112_325] : memref<18x256xbf16, #tpu.memory_space<vmem>>, vector<2x16xbf16>
    tpu.vector_store %arg18[%c6_324, %c112_325], %204 {strides = array<i32>} : memref<18x256xbf16, #tpu.memory_space<vmem>>, vector<2x16xbf16>,
    %c8_326 = arith.constant 8 : index
    %c0_327 = arith.constant 0 : index
    %c1_328 = arith.constant 1 : index
    %206 = vector.load %arg13[%c8_326, %c0_327, %c1_328] : memref<18x2x18xbf16, #tpu.memory_space<vmem>>, vector<1x2x16xbf16>
    %207 = vector.shape_cast %206 : vector<1x2x16xbf16> to vector<2x16xbf16>
    %c8_329 = arith.constant 8 : index
    %c112_330 = arith.constant 112 : index
    %208 = vector.load %arg18[%c8_329, %c112_330] : memref<18x256xbf16, #tpu.memory_space<vmem>>, vector<2x16xbf16>
    tpu.vector_store %arg18[%c8_329, %c112_330], %207 {strides = array<i32>} : memref<18x256xbf16, #tpu.memory_space<vmem>>, vector<2x16xbf16>,
    %c8_331 = arith.constant 8 : index
    %c0_332 = arith.constant 0 : index
    %c2_333 = arith.constant 2 : index
    %209 = vector.load %arg13[%c8_331, %c0_332, %c2_333] : memref<18x2x18xbf16, #tpu.memory_space<vmem>>, vector<1x2x16xbf16>
    %210 = vector.shape_cast %209 : vector<1x2x16xbf16> to vector<2x16xbf16>
    %c10_334 = arith.constant 10 : index
    %c112_335 = arith.constant 112 : index
    %211 = vector.load %arg18[%c10_334, %c112_335] : memref<18x256xbf16, #tpu.memory_space<vmem>>, vector<2x16xbf16>
    tpu.vector_store %arg18[%c10_334, %c112_335], %210 {strides = array<i32>} : memref<18x256xbf16, #tpu.memory_space<vmem>>, vector<2x16xbf16>,
    %c9 = arith.constant 9 : index
    %c0_336 = arith.constant 0 : index
    %c0_337 = arith.constant 0 : index
    %212 = vector.load %arg13[%c9, %c0_336, %c0_337] : memref<18x2x18xbf16, #tpu.memory_space<vmem>>, vector<1x2x16xbf16>
    %213 = vector.shape_cast %212 : vector<1x2x16xbf16> to vector<2x16xbf16>
    %c12_338 = arith.constant 12 : index
    %c112_339 = arith.constant 112 : index
    %214 = vector.load %arg18[%c12_338, %c112_339] : memref<18x256xbf16, #tpu.memory_space<vmem>>, vector<2x16xbf16>
    tpu.vector_store %arg18[%c12_338, %c112_339], %213 {strides = array<i32>} : memref<18x256xbf16, #tpu.memory_space<vmem>>, vector<2x16xbf16>,
    %c9_340 = arith.constant 9 : index
    %c0_341 = arith.constant 0 : index
    %c1_342 = arith.constant 1 : index
    %215 = vector.load %arg13[%c9_340, %c0_341, %c1_342] : memref<18x2x18xbf16, #tpu.memory_space<vmem>>, vector<1x2x16xbf16>
    %216 = vector.shape_cast %215 : vector<1x2x16xbf16> to vector<2x16xbf16>
    %c14_343 = arith.constant 14 : index
    %c112_344 = arith.constant 112 : index
    %217 = vector.load %arg18[%c14_343, %c112_344] : memref<18x256xbf16, #tpu.memory_space<vmem>>, vector<2x16xbf16>
    tpu.vector_store %arg18[%c14_343, %c112_344], %216 {strides = array<i32>} : memref<18x256xbf16, #tpu.memory_space<vmem>>, vector<2x16xbf16>,
    %c9_345 = arith.constant 9 : index
    %c0_346 = arith.constant 0 : index
    %c2_347 = arith.constant 2 : index
    %218 = vector.load %arg13[%c9_345, %c0_346, %c2_347] : memref<18x2x18xbf16, #tpu.memory_space<vmem>>, vector<1x2x16xbf16>
    %219 = vector.shape_cast %218 : vector<1x2x16xbf16> to vector<2x16xbf16>
    %c16_348 = arith.constant 16 : index
    %c112_349 = arith.constant 112 : index
    %220 = vector.load %arg18[%c16_348, %c112_349] : memref<18x256xbf16, #tpu.memory_space<vmem>>, vector<2x16xbf16>
    tpu.vector_store %arg18[%c16_348, %c112_349], %219 {strides = array<i32>} : memref<18x256xbf16, #tpu.memory_space<vmem>>, vector<2x16xbf16>,
    %c8_350 = arith.constant 8 : index
    %c0_351 = arith.constant 0 : index
    %c0_352 = arith.constant 0 : index
    %221 = vector.load %arg13[%c8_350, %c0_351, %c0_352] : memref<18x2x18xbf16, #tpu.memory_space<vmem>>, vector<1x2x16xbf16>
    %222 = vector.shape_cast %221 : vector<1x2x16xbf16> to vector<2x16xbf16>
    %c0_353 = arith.constant 0 : index
    %c128 = arith.constant 128 : index
    %223 = vector.load %arg18[%c0_353, %c128] : memref<18x256xbf16, #tpu.memory_space<vmem>>, vector<2x16xbf16>
    tpu.vector_store %arg18[%c0_353, %c128], %222 {strides = array<i32>} : memref<18x256xbf16, #tpu.memory_space<vmem>>, vector<2x16xbf16>,
    %c8_354 = arith.constant 8 : index
    %c0_355 = arith.constant 0 : index
    %c1_356 = arith.constant 1 : index
    %224 = vector.load %arg13[%c8_354, %c0_355, %c1_356] : memref<18x2x18xbf16, #tpu.memory_space<vmem>>, vector<1x2x16xbf16>
    %225 = vector.shape_cast %224 : vector<1x2x16xbf16> to vector<2x16xbf16>
    %c2_357 = arith.constant 2 : index
    %c128_358 = arith.constant 128 : index
    %226 = vector.load %arg18[%c2_357, %c128_358] : memref<18x256xbf16, #tpu.memory_space<vmem>>, vector<2x16xbf16>
    tpu.vector_store %arg18[%c2_357, %c128_358], %225 {strides = array<i32>} : memref<18x256xbf16, #tpu.memory_space<vmem>>, vector<2x16xbf16>,
    %c8_359 = arith.constant 8 : index
    %c0_360 = arith.constant 0 : index
    %c2_361 = arith.constant 2 : index
    %227 = vector.load %arg13[%c8_359, %c0_360, %c2_361] : memref<18x2x18xbf16, #tpu.memory_space<vmem>>, vector<1x2x16xbf16>
    %228 = vector.shape_cast %227 : vector<1x2x16xbf16> to vector<2x16xbf16>
    %c4_362 = arith.constant 4 : index
    %c128_363 = arith.constant 128 : index
    %229 = vector.load %arg18[%c4_362, %c128_363] : memref<18x256xbf16, #tpu.memory_space<vmem>>, vector<2x16xbf16>
    tpu.vector_store %arg18[%c4_362, %c128_363], %228 {strides = array<i32>} : memref<18x256xbf16, #tpu.memory_space<vmem>>, vector<2x16xbf16>,
    %c9_364 = arith.constant 9 : index
    %c0_365 = arith.constant 0 : index
    %c0_366 = arith.constant 0 : index
    %230 = vector.load %arg13[%c9_364, %c0_365, %c0_366] : memref<18x2x18xbf16, #tpu.memory_space<vmem>>, vector<1x2x16xbf16>
    %231 = vector.shape_cast %230 : vector<1x2x16xbf16> to vector<2x16xbf16>
    %c6_367 = arith.constant 6 : index
    %c128_368 = arith.constant 128 : index
    %232 = vector.load %arg18[%c6_367, %c128_368] : memref<18x256xbf16, #tpu.memory_space<vmem>>, vector<2x16xbf16>
    tpu.vector_store %arg18[%c6_367, %c128_368], %231 {strides = array<i32>} : memref<18x256xbf16, #tpu.memory_space<vmem>>, vector<2x16xbf16>,
    %c9_369 = arith.constant 9 : index
    %c0_370 = arith.constant 0 : index
    %c1_371 = arith.constant 1 : index
    %233 = vector.load %arg13[%c9_369, %c0_370, %c1_371] : memref<18x2x18xbf16, #tpu.memory_space<vmem>>, vector<1x2x16xbf16>
    %234 = vector.shape_cast %233 : vector<1x2x16xbf16> to vector<2x16xbf16>
    %c8_372 = arith.constant 8 : index
    %c128_373 = arith.constant 128 : index
    %235 = vector.load %arg18[%c8_372, %c128_373] : memref<18x256xbf16, #tpu.memory_space<vmem>>, vector<2x16xbf16>
    tpu.vector_store %arg18[%c8_372, %c128_373], %234 {strides = array<i32>} : memref<18x256xbf16, #tpu.memory_space<vmem>>, vector<2x16xbf16>,
    %c9_374 = arith.constant 9 : index
    %c0_375 = arith.constant 0 : index
    %c2_376 = arith.constant 2 : index
    %236 = vector.load %arg13[%c9_374, %c0_375, %c2_376] : memref<18x2x18xbf16, #tpu.memory_space<vmem>>, vector<1x2x16xbf16>
    %237 = vector.shape_cast %236 : vector<1x2x16xbf16> to vector<2x16xbf16>
    %c10_377 = arith.constant 10 : index
    %c128_378 = arith.constant 128 : index
    %238 = vector.load %arg18[%c10_377, %c128_378] : memref<18x256xbf16, #tpu.memory_space<vmem>>, vector<2x16xbf16>
    tpu.vector_store %arg18[%c10_377, %c128_378], %237 {strides = array<i32>} : memref<18x256xbf16, #tpu.memory_space<vmem>>, vector<2x16xbf16>,
    %c10_379 = arith.constant 10 : index
    %c0_380 = arith.constant 0 : index
    %c0_381 = arith.constant 0 : index
    %239 = vector.load %arg13[%c10_379, %c0_380, %c0_381] : memref<18x2x18xbf16, #tpu.memory_space<vmem>>, vector<1x2x16xbf16>
    %240 = vector.shape_cast %239 : vector<1x2x16xbf16> to vector<2x16xbf16>
    %c12_382 = arith.constant 12 : index
    %c128_383 = arith.constant 128 : index
    %241 = vector.load %arg18[%c12_382, %c128_383] : memref<18x256xbf16, #tpu.memory_space<vmem>>, vector<2x16xbf16>
    tpu.vector_store %arg18[%c12_382, %c128_383], %240 {strides = array<i32>} : memref<18x256xbf16, #tpu.memory_space<vmem>>, vector<2x16xbf16>,
    %c10_384 = arith.constant 10 : index
    %c0_385 = arith.constant 0 : index
    %c1_386 = arith.constant 1 : index
    %242 = vector.load %arg13[%c10_384, %c0_385, %c1_386] : memref<18x2x18xbf16, #tpu.memory_space<vmem>>, vector<1x2x16xbf16>
    %243 = vector.shape_cast %242 : vector<1x2x16xbf16> to vector<2x16xbf16>
    %c14_387 = arith.constant 14 : index
    %c128_388 = arith.constant 128 : index
    %244 = vector.load %arg18[%c14_387, %c128_388] : memref<18x256xbf16, #tpu.memory_space<vmem>>, vector<2x16xbf16>
    tpu.vector_store %arg18[%c14_387, %c128_388], %243 {strides = array<i32>} : memref<18x256xbf16, #tpu.memory_space<vmem>>, vector<2x16xbf16>,
    %c10_389 = arith.constant 10 : index
    %c0_390 = arith.constant 0 : index
    %c2_391 = arith.constant 2 : index
    %245 = vector.load %arg13[%c10_389, %c0_390, %c2_391] : memref<18x2x18xbf16, #tpu.memory_space<vmem>>, vector<1x2x16xbf16>
    %246 = vector.shape_cast %245 : vector<1x2x16xbf16> to vector<2x16xbf16>
    %c16_392 = arith.constant 16 : index
    %c128_393 = arith.constant 128 : index
    %247 = vector.load %arg18[%c16_392, %c128_393] : memref<18x256xbf16, #tpu.memory_space<vmem>>, vector<2x16xbf16>
    tpu.vector_store %arg18[%c16_392, %c128_393], %246 {strides = array<i32>} : memref<18x256xbf16, #tpu.memory_space<vmem>>, vector<2x16xbf16>,
    %c9_394 = arith.constant 9 : index
    %c0_395 = arith.constant 0 : index
    %c0_396 = arith.constant 0 : index
    %248 = vector.load %arg13[%c9_394, %c0_395, %c0_396] : memref<18x2x18xbf16, #tpu.memory_space<vmem>>, vector<1x2x16xbf16>
    %249 = vector.shape_cast %248 : vector<1x2x16xbf16> to vector<2x16xbf16>
    %c0_397 = arith.constant 0 : index
    %c144 = arith.constant 144 : index
    %250 = vector.load %arg18[%c0_397, %c144] : memref<18x256xbf16, #tpu.memory_space<vmem>>, vector<2x16xbf16>
    tpu.vector_store %arg18[%c0_397, %c144], %249 {strides = array<i32>} : memref<18x256xbf16, #tpu.memory_space<vmem>>, vector<2x16xbf16>,
    %c9_398 = arith.constant 9 : index
    %c0_399 = arith.constant 0 : index
    %c1_400 = arith.constant 1 : index
    %251 = vector.load %arg13[%c9_398, %c0_399, %c1_400] : memref<18x2x18xbf16, #tpu.memory_space<vmem>>, vector<1x2x16xbf16>
    %252 = vector.shape_cast %251 : vector<1x2x16xbf16> to vector<2x16xbf16>
    %c2_401 = arith.constant 2 : index
    %c144_402 = arith.constant 144 : index
    %253 = vector.load %arg18[%c2_401, %c144_402] : memref<18x256xbf16, #tpu.memory_space<vmem>>, vector<2x16xbf16>
    tpu.vector_store %arg18[%c2_401, %c144_402], %252 {strides = array<i32>} : memref<18x256xbf16, #tpu.memory_space<vmem>>, vector<2x16xbf16>,
    %c9_403 = arith.constant 9 : index
    %c0_404 = arith.constant 0 : index
    %c2_405 = arith.constant 2 : index
    %254 = vector.load %arg13[%c9_403, %c0_404, %c2_405] : memref<18x2x18xbf16, #tpu.memory_space<vmem>>, vector<1x2x16xbf16>
    %255 = vector.shape_cast %254 : vector<1x2x16xbf16> to vector<2x16xbf16>
    %c4_406 = arith.constant 4 : index
    %c144_407 = arith.constant 144 : index
    %256 = vector.load %arg18[%c4_406, %c144_407] : memref<18x256xbf16, #tpu.memory_space<vmem>>, vector<2x16xbf16>
    tpu.vector_store %arg18[%c4_406, %c144_407], %255 {strides = array<i32>} : memref<18x256xbf16, #tpu.memory_space<vmem>>, vector<2x16xbf16>,
    %c10_408 = arith.constant 10 : index
    %c0_409 = arith.constant 0 : index
    %c0_410 = arith.constant 0 : index
    %257 = vector.load %arg13[%c10_408, %c0_409, %c0_410] : memref<18x2x18xbf16, #tpu.memory_space<vmem>>, vector<1x2x16xbf16>
    %258 = vector.shape_cast %257 : vector<1x2x16xbf16> to vector<2x16xbf16>
    %c6_411 = arith.constant 6 : index
    %c144_412 = arith.constant 144 : index
    %259 = vector.load %arg18[%c6_411, %c144_412] : memref<18x256xbf16, #tpu.memory_space<vmem>>, vector<2x16xbf16>
    tpu.vector_store %arg18[%c6_411, %c144_412], %258 {strides = array<i32>} : memref<18x256xbf16, #tpu.memory_space<vmem>>, vector<2x16xbf16>,
    %c10_413 = arith.constant 10 : index
    %c0_414 = arith.constant 0 : index
    %c1_415 = arith.constant 1 : index
    %260 = vector.load %arg13[%c10_413, %c0_414, %c1_415] : memref<18x2x18xbf16, #tpu.memory_space<vmem>>, vector<1x2x16xbf16>
    %261 = vector.shape_cast %260 : vector<1x2x16xbf16> to vector<2x16xbf16>
    %c8_416 = arith.constant 8 : index
    %c144_417 = arith.constant 144 : index
    %262 = vector.load %arg18[%c8_416, %c144_417] : memref<18x256xbf16, #tpu.memory_space<vmem>>, vector<2x16xbf16>
    tpu.vector_store %arg18[%c8_416, %c144_417], %261 {strides = array<i32>} : memref<18x256xbf16, #tpu.memory_space<vmem>>, vector<2x16xbf16>,
    %c10_418 = arith.constant 10 : index
    %c0_419 = arith.constant 0 : index
    %c2_420 = arith.constant 2 : index
    %263 = vector.load %arg13[%c10_418, %c0_419, %c2_420] : memref<18x2x18xbf16, #tpu.memory_space<vmem>>, vector<1x2x16xbf16>
    %264 = vector.shape_cast %263 : vector<1x2x16xbf16> to vector<2x16xbf16>
    %c10_421 = arith.constant 10 : index
    %c144_422 = arith.constant 144 : index
    %265 = vector.load %arg18[%c10_421, %c144_422] : memref<18x256xbf16, #tpu.memory_space<vmem>>, vector<2x16xbf16>
    tpu.vector_store %arg18[%c10_421, %c144_422], %264 {strides = array<i32>} : memref<18x256xbf16, #tpu.memory_space<vmem>>, vector<2x16xbf16>,
    %c11 = arith.constant 11 : index
    %c0_423 = arith.constant 0 : index
    %c0_424 = arith.constant 0 : index
    %266 = vector.load %arg13[%c11, %c0_423, %c0_424] : memref<18x2x18xbf16, #tpu.memory_space<vmem>>, vector<1x2x16xbf16>
    %267 = vector.shape_cast %266 : vector<1x2x16xbf16> to vector<2x16xbf16>
    %c12_425 = arith.constant 12 : index
    %c144_426 = arith.constant 144 : index
    %268 = vector.load %arg18[%c12_425, %c144_426] : memref<18x256xbf16, #tpu.memory_space<vmem>>, vector<2x16xbf16>
    tpu.vector_store %arg18[%c12_425, %c144_426], %267 {strides = array<i32>} : memref<18x256xbf16, #tpu.memory_space<vmem>>, vector<2x16xbf16>,
    %c11_427 = arith.constant 11 : index
    %c0_428 = arith.constant 0 : index
    %c1_429 = arith.constant 1 : index
    %269 = vector.load %arg13[%c11_427, %c0_428, %c1_429] : memref<18x2x18xbf16, #tpu.memory_space<vmem>>, vector<1x2x16xbf16>
    %270 = vector.shape_cast %269 : vector<1x2x16xbf16> to vector<2x16xbf16>
    %c14_430 = arith.constant 14 : index
    %c144_431 = arith.constant 144 : index
    %271 = vector.load %arg18[%c14_430, %c144_431] : memref<18x256xbf16, #tpu.memory_space<vmem>>, vector<2x16xbf16>
    tpu.vector_store %arg18[%c14_430, %c144_431], %270 {strides = array<i32>} : memref<18x256xbf16, #tpu.memory_space<vmem>>, vector<2x16xbf16>,
    %c11_432 = arith.constant 11 : index
    %c0_433 = arith.constant 0 : index
    %c2_434 = arith.constant 2 : index
    %272 = vector.load %arg13[%c11_432, %c0_433, %c2_434] : memref<18x2x18xbf16, #tpu.memory_space<vmem>>, vector<1x2x16xbf16>
    %273 = vector.shape_cast %272 : vector<1x2x16xbf16> to vector<2x16xbf16>
    %c16_435 = arith.constant 16 : index
    %c144_436 = arith.constant 144 : index
    %274 = vector.load %arg18[%c16_435, %c144_436] : memref<18x256xbf16, #tpu.memory_space<vmem>>, vector<2x16xbf16>
    tpu.vector_store %arg18[%c16_435, %c144_436], %273 {strides = array<i32>} : memref<18x256xbf16, #tpu.memory_space<vmem>>, vector<2x16xbf16>,
    %c10_437 = arith.constant 10 : index
    %c0_438 = arith.constant 0 : index
    %c0_439 = arith.constant 0 : index
    %275 = vector.load %arg13[%c10_437, %c0_438, %c0_439] : memref<18x2x18xbf16, #tpu.memory_space<vmem>>, vector<1x2x16xbf16>
    %276 = vector.shape_cast %275 : vector<1x2x16xbf16> to vector<2x16xbf16>
    %c0_440 = arith.constant 0 : index
    %c160 = arith.constant 160 : index
    %277 = vector.load %arg18[%c0_440, %c160] : memref<18x256xbf16, #tpu.memory_space<vmem>>, vector<2x16xbf16>
    tpu.vector_store %arg18[%c0_440, %c160], %276 {strides = array<i32>} : memref<18x256xbf16, #tpu.memory_space<vmem>>, vector<2x16xbf16>,
    %c10_441 = arith.constant 10 : index
    %c0_442 = arith.constant 0 : index
    %c1_443 = arith.constant 1 : index
    %278 = vector.load %arg13[%c10_441, %c0_442, %c1_443] : memref<18x2x18xbf16, #tpu.memory_space<vmem>>, vector<1x2x16xbf16>
    %279 = vector.shape_cast %278 : vector<1x2x16xbf16> to vector<2x16xbf16>
    %c2_444 = arith.constant 2 : index
    %c160_445 = arith.constant 160 : index
    %280 = vector.load %arg18[%c2_444, %c160_445] : memref<18x256xbf16, #tpu.memory_space<vmem>>, vector<2x16xbf16>
    tpu.vector_store %arg18[%c2_444, %c160_445], %279 {strides = array<i32>} : memref<18x256xbf16, #tpu.memory_space<vmem>>, vector<2x16xbf16>,
    %c10_446 = arith.constant 10 : index
    %c0_447 = arith.constant 0 : index
    %c2_448 = arith.constant 2 : index
    %281 = vector.load %arg13[%c10_446, %c0_447, %c2_448] : memref<18x2x18xbf16, #tpu.memory_space<vmem>>, vector<1x2x16xbf16>
    %282 = vector.shape_cast %281 : vector<1x2x16xbf16> to vector<2x16xbf16>
    %c4_449 = arith.constant 4 : index
    %c160_450 = arith.constant 160 : index
    %283 = vector.load %arg18[%c4_449, %c160_450] : memref<18x256xbf16, #tpu.memory_space<vmem>>, vector<2x16xbf16>
    tpu.vector_store %arg18[%c4_449, %c160_450], %282 {strides = array<i32>} : memref<18x256xbf16, #tpu.memory_space<vmem>>, vector<2x16xbf16>,
    %c11_451 = arith.constant 11 : index
    %c0_452 = arith.constant 0 : index
    %c0_453 = arith.constant 0 : index
    %284 = vector.load %arg13[%c11_451, %c0_452, %c0_453] : memref<18x2x18xbf16, #tpu.memory_space<vmem>>, vector<1x2x16xbf16>
    %285 = vector.shape_cast %284 : vector<1x2x16xbf16> to vector<2x16xbf16>
    %c6_454 = arith.constant 6 : index
    %c160_455 = arith.constant 160 : index
    %286 = vector.load %arg18[%c6_454, %c160_455] : memref<18x256xbf16, #tpu.memory_space<vmem>>, vector<2x16xbf16>
    tpu.vector_store %arg18[%c6_454, %c160_455], %285 {strides = array<i32>} : memref<18x256xbf16, #tpu.memory_space<vmem>>, vector<2x16xbf16>,
    %c11_456 = arith.constant 11 : index
    %c0_457 = arith.constant 0 : index
    %c1_458 = arith.constant 1 : index
    %287 = vector.load %arg13[%c11_456, %c0_457, %c1_458] : memref<18x2x18xbf16, #tpu.memory_space<vmem>>, vector<1x2x16xbf16>
    %288 = vector.shape_cast %287 : vector<1x2x16xbf16> to vector<2x16xbf16>
    %c8_459 = arith.constant 8 : index
    %c160_460 = arith.constant 160 : index
    %289 = vector.load %arg18[%c8_459, %c160_460] : memref<18x256xbf16, #tpu.memory_space<vmem>>, vector<2x16xbf16>
    tpu.vector_store %arg18[%c8_459, %c160_460], %288 {strides = array<i32>} : memref<18x256xbf16, #tpu.memory_space<vmem>>, vector<2x16xbf16>,
    %c11_461 = arith.constant 11 : index
    %c0_462 = arith.constant 0 : index
    %c2_463 = arith.constant 2 : index
    %290 = vector.load %arg13[%c11_461, %c0_462, %c2_463] : memref<18x2x18xbf16, #tpu.memory_space<vmem>>, vector<1x2x16xbf16>
    %291 = vector.shape_cast %290 : vector<1x2x16xbf16> to vector<2x16xbf16>
    %c10_464 = arith.constant 10 : index
    %c160_465 = arith.constant 160 : index
    %292 = vector.load %arg18[%c10_464, %c160_465] : memref<18x256xbf16, #tpu.memory_space<vmem>>, vector<2x16xbf16>
    tpu.vector_store %arg18[%c10_464, %c160_465], %291 {strides = array<i32>} : memref<18x256xbf16, #tpu.memory_space<vmem>>, vector<2x16xbf16>,
    %c12_466 = arith.constant 12 : index
    %c0_467 = arith.constant 0 : index
    %c0_468 = arith.constant 0 : index
    %293 = vector.load %arg13[%c12_466, %c0_467, %c0_468] : memref<18x2x18xbf16, #tpu.memory_space<vmem>>, vector<1x2x16xbf16>
    %294 = vector.shape_cast %293 : vector<1x2x16xbf16> to vector<2x16xbf16>
    %c12_469 = arith.constant 12 : index
    %c160_470 = arith.constant 160 : index
    %295 = vector.load %arg18[%c12_469, %c160_470] : memref<18x256xbf16, #tpu.memory_space<vmem>>, vector<2x16xbf16>
    tpu.vector_store %arg18[%c12_469, %c160_470], %294 {strides = array<i32>} : memref<18x256xbf16, #tpu.memory_space<vmem>>, vector<2x16xbf16>,
    %c12_471 = arith.constant 12 : index
    %c0_472 = arith.constant 0 : index
    %c1_473 = arith.constant 1 : index
    %296 = vector.load %arg13[%c12_471, %c0_472, %c1_473] : memref<18x2x18xbf16, #tpu.memory_space<vmem>>, vector<1x2x16xbf16>
    %297 = vector.shape_cast %296 : vector<1x2x16xbf16> to vector<2x16xbf16>
    %c14_474 = arith.constant 14 : index
    %c160_475 = arith.constant 160 : index
    %298 = vector.load %arg18[%c14_474, %c160_475] : memref<18x256xbf16, #tpu.memory_space<vmem>>, vector<2x16xbf16>
    tpu.vector_store %arg18[%c14_474, %c160_475], %297 {strides = array<i32>} : memref<18x256xbf16, #tpu.memory_space<vmem>>, vector<2x16xbf16>,
    %c12_476 = arith.constant 12 : index
    %c0_477 = arith.constant 0 : index
    %c2_478 = arith.constant 2 : index
    %299 = vector.load %arg13[%c12_476, %c0_477, %c2_478] : memref<18x2x18xbf16, #tpu.memory_space<vmem>>, vector<1x2x16xbf16>
    %300 = vector.shape_cast %299 : vector<1x2x16xbf16> to vector<2x16xbf16>
    %c16_479 = arith.constant 16 : index
    %c160_480 = arith.constant 160 : index
    %301 = vector.load %arg18[%c16_479, %c160_480] : memref<18x256xbf16, #tpu.memory_space<vmem>>, vector<2x16xbf16>
    tpu.vector_store %arg18[%c16_479, %c160_480], %300 {strides = array<i32>} : memref<18x256xbf16, #tpu.memory_space<vmem>>, vector<2x16xbf16>,
    %c11_481 = arith.constant 11 : index
    %c0_482 = arith.constant 0 : index
    %c0_483 = arith.constant 0 : index
    %302 = vector.load %arg13[%c11_481, %c0_482, %c0_483] : memref<18x2x18xbf16, #tpu.memory_space<vmem>>, vector<1x2x16xbf16>
    %303 = vector.shape_cast %302 : vector<1x2x16xbf16> to vector<2x16xbf16>
    %c0_484 = arith.constant 0 : index
    %c176 = arith.constant 176 : index
    %304 = vector.load %arg18[%c0_484, %c176] : memref<18x256xbf16, #tpu.memory_space<vmem>>, vector<2x16xbf16>
    tpu.vector_store %arg18[%c0_484, %c176], %303 {strides = array<i32>} : memref<18x256xbf16, #tpu.memory_space<vmem>>, vector<2x16xbf16>,
    %c11_485 = arith.constant 11 : index
    %c0_486 = arith.constant 0 : index
    %c1_487 = arith.constant 1 : index
    %305 = vector.load %arg13[%c11_485, %c0_486, %c1_487] : memref<18x2x18xbf16, #tpu.memory_space<vmem>>, vector<1x2x16xbf16>
    %306 = vector.shape_cast %305 : vector<1x2x16xbf16> to vector<2x16xbf16>
    %c2_488 = arith.constant 2 : index
    %c176_489 = arith.constant 176 : index
    %307 = vector.load %arg18[%c2_488, %c176_489] : memref<18x256xbf16, #tpu.memory_space<vmem>>, vector<2x16xbf16>
    tpu.vector_store %arg18[%c2_488, %c176_489], %306 {strides = array<i32>} : memref<18x256xbf16, #tpu.memory_space<vmem>>, vector<2x16xbf16>,
    %c11_490 = arith.constant 11 : index
    %c0_491 = arith.constant 0 : index
    %c2_492 = arith.constant 2 : index
    %308 = vector.load %arg13[%c11_490, %c0_491, %c2_492] : memref<18x2x18xbf16, #tpu.memory_space<vmem>>, vector<1x2x16xbf16>
    %309 = vector.shape_cast %308 : vector<1x2x16xbf16> to vector<2x16xbf16>
    %c4_493 = arith.constant 4 : index
    %c176_494 = arith.constant 176 : index
    %310 = vector.load %arg18[%c4_493, %c176_494] : memref<18x256xbf16, #tpu.memory_space<vmem>>, vector<2x16xbf16>
    tpu.vector_store %arg18[%c4_493, %c176_494], %309 {strides = array<i32>} : memref<18x256xbf16, #tpu.memory_space<vmem>>, vector<2x16xbf16>,
    %c12_495 = arith.constant 12 : index
    %c0_496 = arith.constant 0 : index
    %c0_497 = arith.constant 0 : index
    %311 = vector.load %arg13[%c12_495, %c0_496, %c0_497] : memref<18x2x18xbf16, #tpu.memory_space<vmem>>, vector<1x2x16xbf16>
    %312 = vector.shape_cast %311 : vector<1x2x16xbf16> to vector<2x16xbf16>
    %c6_498 = arith.constant 6 : index
    %c176_499 = arith.constant 176 : index
    %313 = vector.load %arg18[%c6_498, %c176_499] : memref<18x256xbf16, #tpu.memory_space<vmem>>, vector<2x16xbf16>
    tpu.vector_store %arg18[%c6_498, %c176_499], %312 {strides = array<i32>} : memref<18x256xbf16, #tpu.memory_space<vmem>>, vector<2x16xbf16>,
    %c12_500 = arith.constant 12 : index
    %c0_501 = arith.constant 0 : index
    %c1_502 = arith.constant 1 : index
    %314 = vector.load %arg13[%c12_500, %c0_501, %c1_502] : memref<18x2x18xbf16, #tpu.memory_space<vmem>>, vector<1x2x16xbf16>
    %315 = vector.shape_cast %314 : vector<1x2x16xbf16> to vector<2x16xbf16>
    %c8_503 = arith.constant 8 : index
    %c176_504 = arith.constant 176 : index
    %316 = vector.load %arg18[%c8_503, %c176_504] : memref<18x256xbf16, #tpu.memory_space<vmem>>, vector<2x16xbf16>
    tpu.vector_store %arg18[%c8_503, %c176_504], %315 {strides = array<i32>} : memref<18x256xbf16, #tpu.memory_space<vmem>>, vector<2x16xbf16>,
    %c12_505 = arith.constant 12 : index
    %c0_506 = arith.constant 0 : index
    %c2_507 = arith.constant 2 : index
    %317 = vector.load %arg13[%c12_505, %c0_506, %c2_507] : memref<18x2x18xbf16, #tpu.memory_space<vmem>>, vector<1x2x16xbf16>
    %318 = vector.shape_cast %317 : vector<1x2x16xbf16> to vector<2x16xbf16>
    %c10_508 = arith.constant 10 : index
    %c176_509 = arith.constant 176 : index
    %319 = vector.load %arg18[%c10_508, %c176_509] : memref<18x256xbf16, #tpu.memory_space<vmem>>, vector<2x16xbf16>
    tpu.vector_store %arg18[%c10_508, %c176_509], %318 {strides = array<i32>} : memref<18x256xbf16, #tpu.memory_space<vmem>>, vector<2x16xbf16>,
    %c13 = arith.constant 13 : index
    %c0_510 = arith.constant 0 : index
    %c0_511 = arith.constant 0 : index
    %320 = vector.load %arg13[%c13, %c0_510, %c0_511] : memref<18x2x18xbf16, #tpu.memory_space<vmem>>, vector<1x2x16xbf16>
    %321 = vector.shape_cast %320 : vector<1x2x16xbf16> to vector<2x16xbf16>
    %c12_512 = arith.constant 12 : index
    %c176_513 = arith.constant 176 : index
    %322 = vector.load %arg18[%c12_512, %c176_513] : memref<18x256xbf16, #tpu.memory_space<vmem>>, vector<2x16xbf16>
    tpu.vector_store %arg18[%c12_512, %c176_513], %321 {strides = array<i32>} : memref<18x256xbf16, #tpu.memory_space<vmem>>, vector<2x16xbf16>,
    %c13_514 = arith.constant 13 : index
    %c0_515 = arith.constant 0 : index
    %c1_516 = arith.constant 1 : index
    %323 = vector.load %arg13[%c13_514, %c0_515, %c1_516] : memref<18x2x18xbf16, #tpu.memory_space<vmem>>, vector<1x2x16xbf16>
    %324 = vector.shape_cast %323 : vector<1x2x16xbf16> to vector<2x16xbf16>
    %c14_517 = arith.constant 14 : index
    %c176_518 = arith.constant 176 : index
    %325 = vector.load %arg18[%c14_517, %c176_518] : memref<18x256xbf16, #tpu.memory_space<vmem>>, vector<2x16xbf16>
    tpu.vector_store %arg18[%c14_517, %c176_518], %324 {strides = array<i32>} : memref<18x256xbf16, #tpu.memory_space<vmem>>, vector<2x16xbf16>,
    %c13_519 = arith.constant 13 : index
    %c0_520 = arith.constant 0 : index
    %c2_521 = arith.constant 2 : index
    %326 = vector.load %arg13[%c13_519, %c0_520, %c2_521] : memref<18x2x18xbf16, #tpu.memory_space<vmem>>, vector<1x2x16xbf16>
    %327 = vector.shape_cast %326 : vector<1x2x16xbf16> to vector<2x16xbf16>
    %c16_522 = arith.constant 16 : index
    %c176_523 = arith.constant 176 : index
    %328 = vector.load %arg18[%c16_522, %c176_523] : memref<18x256xbf16, #tpu.memory_space<vmem>>, vector<2x16xbf16>
    tpu.vector_store %arg18[%c16_522, %c176_523], %327 {strides = array<i32>} : memref<18x256xbf16, #tpu.memory_space<vmem>>, vector<2x16xbf16>,
    %c12_524 = arith.constant 12 : index
    %c0_525 = arith.constant 0 : index
    %c0_526 = arith.constant 0 : index
    %329 = vector.load %arg13[%c12_524, %c0_525, %c0_526] : memref<18x2x18xbf16, #tpu.memory_space<vmem>>, vector<1x2x16xbf16>
    %330 = vector.shape_cast %329 : vector<1x2x16xbf16> to vector<2x16xbf16>
    %c0_527 = arith.constant 0 : index
    %c192 = arith.constant 192 : index
    %331 = vector.load %arg18[%c0_527, %c192] : memref<18x256xbf16, #tpu.memory_space<vmem>>, vector<2x16xbf16>
    tpu.vector_store %arg18[%c0_527, %c192], %330 {strides = array<i32>} : memref<18x256xbf16, #tpu.memory_space<vmem>>, vector<2x16xbf16>,
    %c12_528 = arith.constant 12 : index
    %c0_529 = arith.constant 0 : index
    %c1_530 = arith.constant 1 : index
    %332 = vector.load %arg13[%c12_528, %c0_529, %c1_530] : memref<18x2x18xbf16, #tpu.memory_space<vmem>>, vector<1x2x16xbf16>
    %333 = vector.shape_cast %332 : vector<1x2x16xbf16> to vector<2x16xbf16>
    %c2_531 = arith.constant 2 : index
    %c192_532 = arith.constant 192 : index
    %334 = vector.load %arg18[%c2_531, %c192_532] : memref<18x256xbf16, #tpu.memory_space<vmem>>, vector<2x16xbf16>
    tpu.vector_store %arg18[%c2_531, %c192_532], %333 {strides = array<i32>} : memref<18x256xbf16, #tpu.memory_space<vmem>>, vector<2x16xbf16>,
    %c12_533 = arith.constant 12 : index
    %c0_534 = arith.constant 0 : index
    %c2_535 = arith.constant 2 : index
    %335 = vector.load %arg13[%c12_533, %c0_534, %c2_535] : memref<18x2x18xbf16, #tpu.memory_space<vmem>>, vector<1x2x16xbf16>
    %336 = vector.shape_cast %335 : vector<1x2x16xbf16> to vector<2x16xbf16>
    %c4_536 = arith.constant 4 : index
    %c192_537 = arith.constant 192 : index
    %337 = vector.load %arg18[%c4_536, %c192_537] : memref<18x256xbf16, #tpu.memory_space<vmem>>, vector<2x16xbf16>
    tpu.vector_store %arg18[%c4_536, %c192_537], %336 {strides = array<i32>} : memref<18x256xbf16, #tpu.memory_space<vmem>>, vector<2x16xbf16>,
    %c13_538 = arith.constant 13 : index
    %c0_539 = arith.constant 0 : index
    %c0_540 = arith.constant 0 : index
    %338 = vector.load %arg13[%c13_538, %c0_539, %c0_540] : memref<18x2x18xbf16, #tpu.memory_space<vmem>>, vector<1x2x16xbf16>
    %339 = vector.shape_cast %338 : vector<1x2x16xbf16> to vector<2x16xbf16>
    %c6_541 = arith.constant 6 : index
    %c192_542 = arith.constant 192 : index
    %340 = vector.load %arg18[%c6_541, %c192_542] : memref<18x256xbf16, #tpu.memory_space<vmem>>, vector<2x16xbf16>
    tpu.vector_store %arg18[%c6_541, %c192_542], %339 {strides = array<i32>} : memref<18x256xbf16, #tpu.memory_space<vmem>>, vector<2x16xbf16>,
    %c13_543 = arith.constant 13 : index
    %c0_544 = arith.constant 0 : index
    %c1_545 = arith.constant 1 : index
    %341 = vector.load %arg13[%c13_543, %c0_544, %c1_545] : memref<18x2x18xbf16, #tpu.memory_space<vmem>>, vector<1x2x16xbf16>
    %342 = vector.shape_cast %341 : vector<1x2x16xbf16> to vector<2x16xbf16>
    %c8_546 = arith.constant 8 : index
    %c192_547 = arith.constant 192 : index
    %343 = vector.load %arg18[%c8_546, %c192_547] : memref<18x256xbf16, #tpu.memory_space<vmem>>, vector<2x16xbf16>
    tpu.vector_store %arg18[%c8_546, %c192_547], %342 {strides = array<i32>} : memref<18x256xbf16, #tpu.memory_space<vmem>>, vector<2x16xbf16>,
    %c13_548 = arith.constant 13 : index
    %c0_549 = arith.constant 0 : index
    %c2_550 = arith.constant 2 : index
    %344 = vector.load %arg13[%c13_548, %c0_549, %c2_550] : memref<18x2x18xbf16, #tpu.memory_space<vmem>>, vector<1x2x16xbf16>
    %345 = vector.shape_cast %344 : vector<1x2x16xbf16> to vector<2x16xbf16>
    %c10_551 = arith.constant 10 : index
    %c192_552 = arith.constant 192 : index
    %346 = vector.load %arg18[%c10_551, %c192_552] : memref<18x256xbf16, #tpu.memory_space<vmem>>, vector<2x16xbf16>
    tpu.vector_store %arg18[%c10_551, %c192_552], %345 {strides = array<i32>} : memref<18x256xbf16, #tpu.memory_space<vmem>>, vector<2x16xbf16>,
    %c14_553 = arith.constant 14 : index
    %c0_554 = arith.constant 0 : index
    %c0_555 = arith.constant 0 : index
    %347 = vector.load %arg13[%c14_553, %c0_554, %c0_555] : memref<18x2x18xbf16, #tpu.memory_space<vmem>>, vector<1x2x16xbf16>
    %348 = vector.shape_cast %347 : vector<1x2x16xbf16> to vector<2x16xbf16>
    %c12_556 = arith.constant 12 : index
    %c192_557 = arith.constant 192 : index
    %349 = vector.load %arg18[%c12_556, %c192_557] : memref<18x256xbf16, #tpu.memory_space<vmem>>, vector<2x16xbf16>
    tpu.vector_store %arg18[%c12_556, %c192_557], %348 {strides = array<i32>} : memref<18x256xbf16, #tpu.memory_space<vmem>>, vector<2x16xbf16>,
    %c14_558 = arith.constant 14 : index
    %c0_559 = arith.constant 0 : index
    %c1_560 = arith.constant 1 : index
    %350 = vector.load %arg13[%c14_558, %c0_559, %c1_560] : memref<18x2x18xbf16, #tpu.memory_space<vmem>>, vector<1x2x16xbf16>
    %351 = vector.shape_cast %350 : vector<1x2x16xbf16> to vector<2x16xbf16>
    %c14_561 = arith.constant 14 : index
    %c192_562 = arith.constant 192 : index
    %352 = vector.load %arg18[%c14_561, %c192_562] : memref<18x256xbf16, #tpu.memory_space<vmem>>, vector<2x16xbf16>
    tpu.vector_store %arg18[%c14_561, %c192_562], %351 {strides = array<i32>} : memref<18x256xbf16, #tpu.memory_space<vmem>>, vector<2x16xbf16>,
    %c14_563 = arith.constant 14 : index
    %c0_564 = arith.constant 0 : index
    %c2_565 = arith.constant 2 : index
    %353 = vector.load %arg13[%c14_563, %c0_564, %c2_565] : memref<18x2x18xbf16, #tpu.memory_space<vmem>>, vector<1x2x16xbf16>
    %354 = vector.shape_cast %353 : vector<1x2x16xbf16> to vector<2x16xbf16>
    %c16_566 = arith.constant 16 : index
    %c192_567 = arith.constant 192 : index
    %355 = vector.load %arg18[%c16_566, %c192_567] : memref<18x256xbf16, #tpu.memory_space<vmem>>, vector<2x16xbf16>
    tpu.vector_store %arg18[%c16_566, %c192_567], %354 {strides = array<i32>} : memref<18x256xbf16, #tpu.memory_space<vmem>>, vector<2x16xbf16>,
    %c13_568 = arith.constant 13 : index
    %c0_569 = arith.constant 0 : index
    %c0_570 = arith.constant 0 : index
    %356 = vector.load %arg13[%c13_568, %c0_569, %c0_570] : memref<18x2x18xbf16, #tpu.memory_space<vmem>>, vector<1x2x16xbf16>
    %357 = vector.shape_cast %356 : vector<1x2x16xbf16> to vector<2x16xbf16>
    %c0_571 = arith.constant 0 : index
    %c208 = arith.constant 208 : index
    %358 = vector.load %arg18[%c0_571, %c208] : memref<18x256xbf16, #tpu.memory_space<vmem>>, vector<2x16xbf16>
    tpu.vector_store %arg18[%c0_571, %c208], %357 {strides = array<i32>} : memref<18x256xbf16, #tpu.memory_space<vmem>>, vector<2x16xbf16>,
    %c13_572 = arith.constant 13 : index
    %c0_573 = arith.constant 0 : index
    %c1_574 = arith.constant 1 : index
    %359 = vector.load %arg13[%c13_572, %c0_573, %c1_574] : memref<18x2x18xbf16, #tpu.memory_space<vmem>>, vector<1x2x16xbf16>
    %360 = vector.shape_cast %359 : vector<1x2x16xbf16> to vector<2x16xbf16>
    %c2_575 = arith.constant 2 : index
    %c208_576 = arith.constant 208 : index
    %361 = vector.load %arg18[%c2_575, %c208_576] : memref<18x256xbf16, #tpu.memory_space<vmem>>, vector<2x16xbf16>
    tpu.vector_store %arg18[%c2_575, %c208_576], %360 {strides = array<i32>} : memref<18x256xbf16, #tpu.memory_space<vmem>>, vector<2x16xbf16>,
    %c13_577 = arith.constant 13 : index
    %c0_578 = arith.constant 0 : index
    %c2_579 = arith.constant 2 : index
    %362 = vector.load %arg13[%c13_577, %c0_578, %c2_579] : memref<18x2x18xbf16, #tpu.memory_space<vmem>>, vector<1x2x16xbf16>
    %363 = vector.shape_cast %362 : vector<1x2x16xbf16> to vector<2x16xbf16>
    %c4_580 = arith.constant 4 : index
    %c208_581 = arith.constant 208 : index
    %364 = vector.load %arg18[%c4_580, %c208_581] : memref<18x256xbf16, #tpu.memory_space<vmem>>, vector<2x16xbf16>
    tpu.vector_store %arg18[%c4_580, %c208_581], %363 {strides = array<i32>} : memref<18x256xbf16, #tpu.memory_space<vmem>>, vector<2x16xbf16>,
    %c14_582 = arith.constant 14 : index
    %c0_583 = arith.constant 0 : index
    %c0_584 = arith.constant 0 : index
    %365 = vector.load %arg13[%c14_582, %c0_583, %c0_584] : memref<18x2x18xbf16, #tpu.memory_space<vmem>>, vector<1x2x16xbf16>
    %366 = vector.shape_cast %365 : vector<1x2x16xbf16> to vector<2x16xbf16>
    %c6_585 = arith.constant 6 : index
    %c208_586 = arith.constant 208 : index
    %367 = vector.load %arg18[%c6_585, %c208_586] : memref<18x256xbf16, #tpu.memory_space<vmem>>, vector<2x16xbf16>
    tpu.vector_store %arg18[%c6_585, %c208_586], %366 {strides = array<i32>} : memref<18x256xbf16, #tpu.memory_space<vmem>>, vector<2x16xbf16>,
    %c14_587 = arith.constant 14 : index
    %c0_588 = arith.constant 0 : index
    %c1_589 = arith.constant 1 : index
    %368 = vector.load %arg13[%c14_587, %c0_588, %c1_589] : memref<18x2x18xbf16, #tpu.memory_space<vmem>>, vector<1x2x16xbf16>
    %369 = vector.shape_cast %368 : vector<1x2x16xbf16> to vector<2x16xbf16>
    %c8_590 = arith.constant 8 : index
    %c208_591 = arith.constant 208 : index
    %370 = vector.load %arg18[%c8_590, %c208_591] : memref<18x256xbf16, #tpu.memory_space<vmem>>, vector<2x16xbf16>
    tpu.vector_store %arg18[%c8_590, %c208_591], %369 {strides = array<i32>} : memref<18x256xbf16, #tpu.memory_space<vmem>>, vector<2x16xbf16>,
    %c14_592 = arith.constant 14 : index
    %c0_593 = arith.constant 0 : index
    %c2_594 = arith.constant 2 : index
    %371 = vector.load %arg13[%c14_592, %c0_593, %c2_594] : memref<18x2x18xbf16, #tpu.memory_space<vmem>>, vector<1x2x16xbf16>
    %372 = vector.shape_cast %371 : vector<1x2x16xbf16> to vector<2x16xbf16>
    %c10_595 = arith.constant 10 : index
    %c208_596 = arith.constant 208 : index
    %373 = vector.load %arg18[%c10_595, %c208_596] : memref<18x256xbf16, #tpu.memory_space<vmem>>, vector<2x16xbf16>
    tpu.vector_store %arg18[%c10_595, %c208_596], %372 {strides = array<i32>} : memref<18x256xbf16, #tpu.memory_space<vmem>>, vector<2x16xbf16>,
    %c15 = arith.constant 15 : index
    %c0_597 = arith.constant 0 : index
    %c0_598 = arith.constant 0 : index
    %374 = vector.load %arg13[%c15, %c0_597, %c0_598] : memref<18x2x18xbf16, #tpu.memory_space<vmem>>, vector<1x2x16xbf16>
    %375 = vector.shape_cast %374 : vector<1x2x16xbf16> to vector<2x16xbf16>
    %c12_599 = arith.constant 12 : index
    %c208_600 = arith.constant 208 : index
    %376 = vector.load %arg18[%c12_599, %c208_600] : memref<18x256xbf16, #tpu.memory_space<vmem>>, vector<2x16xbf16>
    tpu.vector_store %arg18[%c12_599, %c208_600], %375 {strides = array<i32>} : memref<18x256xbf16, #tpu.memory_space<vmem>>, vector<2x16xbf16>,
    %c15_601 = arith.constant 15 : index
    %c0_602 = arith.constant 0 : index
    %c1_603 = arith.constant 1 : index
    %377 = vector.load %arg13[%c15_601, %c0_602, %c1_603] : memref<18x2x18xbf16, #tpu.memory_space<vmem>>, vector<1x2x16xbf16>
    %378 = vector.shape_cast %377 : vector<1x2x16xbf16> to vector<2x16xbf16>
    %c14_604 = arith.constant 14 : index
    %c208_605 = arith.constant 208 : index
    %379 = vector.load %arg18[%c14_604, %c208_605] : memref<18x256xbf16, #tpu.memory_space<vmem>>, vector<2x16xbf16>
    tpu.vector_store %arg18[%c14_604, %c208_605], %378 {strides = array<i32>} : memref<18x256xbf16, #tpu.memory_space<vmem>>, vector<2x16xbf16>,
    %c15_606 = arith.constant 15 : index
    %c0_607 = arith.constant 0 : index
    %c2_608 = arith.constant 2 : index
    %380 = vector.load %arg13[%c15_606, %c0_607, %c2_608] : memref<18x2x18xbf16, #tpu.memory_space<vmem>>, vector<1x2x16xbf16>
    %381 = vector.shape_cast %380 : vector<1x2x16xbf16> to vector<2x16xbf16>
    %c16_609 = arith.constant 16 : index
    %c208_610 = arith.constant 208 : index
    %382 = vector.load %arg18[%c16_609, %c208_610] : memref<18x256xbf16, #tpu.memory_space<vmem>>, vector<2x16xbf16>
    tpu.vector_store %arg18[%c16_609, %c208_610], %381 {strides = array<i32>} : memref<18x256xbf16, #tpu.memory_space<vmem>>, vector<2x16xbf16>,
    %c14_611 = arith.constant 14 : index
    %c0_612 = arith.constant 0 : index
    %c0_613 = arith.constant 0 : index
    %383 = vector.load %arg13[%c14_611, %c0_612, %c0_613] : memref<18x2x18xbf16, #tpu.memory_space<vmem>>, vector<1x2x16xbf16>
    %384 = vector.shape_cast %383 : vector<1x2x16xbf16> to vector<2x16xbf16>
    %c0_614 = arith.constant 0 : index
    %c224 = arith.constant 224 : index
    %385 = vector.load %arg18[%c0_614, %c224] : memref<18x256xbf16, #tpu.memory_space<vmem>>, vector<2x16xbf16>
    tpu.vector_store %arg18[%c0_614, %c224], %384 {strides = array<i32>} : memref<18x256xbf16, #tpu.memory_space<vmem>>, vector<2x16xbf16>,
    %c14_615 = arith.constant 14 : index
    %c0_616 = arith.constant 0 : index
    %c1_617 = arith.constant 1 : index
    %386 = vector.load %arg13[%c14_615, %c0_616, %c1_617] : memref<18x2x18xbf16, #tpu.memory_space<vmem>>, vector<1x2x16xbf16>
    %387 = vector.shape_cast %386 : vector<1x2x16xbf16> to vector<2x16xbf16>
    %c2_618 = arith.constant 2 : index
    %c224_619 = arith.constant 224 : index
    %388 = vector.load %arg18[%c2_618, %c224_619] : memref<18x256xbf16, #tpu.memory_space<vmem>>, vector<2x16xbf16>
    tpu.vector_store %arg18[%c2_618, %c224_619], %387 {strides = array<i32>} : memref<18x256xbf16, #tpu.memory_space<vmem>>, vector<2x16xbf16>,
    %c14_620 = arith.constant 14 : index
    %c0_621 = arith.constant 0 : index
    %c2_622 = arith.constant 2 : index
    %389 = vector.load %arg13[%c14_620, %c0_621, %c2_622] : memref<18x2x18xbf16, #tpu.memory_space<vmem>>, vector<1x2x16xbf16>
    %390 = vector.shape_cast %389 : vector<1x2x16xbf16> to vector<2x16xbf16>
    %c4_623 = arith.constant 4 : index
    %c224_624 = arith.constant 224 : index
    %391 = vector.load %arg18[%c4_623, %c224_624] : memref<18x256xbf16, #tpu.memory_space<vmem>>, vector<2x16xbf16>
    tpu.vector_store %arg18[%c4_623, %c224_624], %390 {strides = array<i32>} : memref<18x256xbf16, #tpu.memory_space<vmem>>, vector<2x16xbf16>,
    %c15_625 = arith.constant 15 : index
    %c0_626 = arith.constant 0 : index
    %c0_627 = arith.constant 0 : index
    %392 = vector.load %arg13[%c15_625, %c0_626, %c0_627] : memref<18x2x18xbf16, #tpu.memory_space<vmem>>, vector<1x2x16xbf16>
    %393 = vector.shape_cast %392 : vector<1x2x16xbf16> to vector<2x16xbf16>
    %c6_628 = arith.constant 6 : index
    %c224_629 = arith.constant 224 : index
    %394 = vector.load %arg18[%c6_628, %c224_629] : memref<18x256xbf16, #tpu.memory_space<vmem>>, vector<2x16xbf16>
    tpu.vector_store %arg18[%c6_628, %c224_629], %393 {strides = array<i32>} : memref<18x256xbf16, #tpu.memory_space<vmem>>, vector<2x16xbf16>,
    %c15_630 = arith.constant 15 : index
    %c0_631 = arith.constant 0 : index
    %c1_632 = arith.constant 1 : index
    %395 = vector.load %arg13[%c15_630, %c0_631, %c1_632] : memref<18x2x18xbf16, #tpu.memory_space<vmem>>, vector<1x2x16xbf16>
    %396 = vector.shape_cast %395 : vector<1x2x16xbf16> to vector<2x16xbf16>
    %c8_633 = arith.constant 8 : index
    %c224_634 = arith.constant 224 : index
    %397 = vector.load %arg18[%c8_633, %c224_634] : memref<18x256xbf16, #tpu.memory_space<vmem>>, vector<2x16xbf16>
    tpu.vector_store %arg18[%c8_633, %c224_634], %396 {strides = array<i32>} : memref<18x256xbf16, #tpu.memory_space<vmem>>, vector<2x16xbf16>,
    %c15_635 = arith.constant 15 : index
    %c0_636 = arith.constant 0 : index
    %c2_637 = arith.constant 2 : index
    %398 = vector.load %arg13[%c15_635, %c0_636, %c2_637] : memref<18x2x18xbf16, #tpu.memory_space<vmem>>, vector<1x2x16xbf16>
    %399 = vector.shape_cast %398 : vector<1x2x16xbf16> to vector<2x16xbf16>
    %c10_638 = arith.constant 10 : index
    %c224_639 = arith.constant 224 : index
    %400 = vector.load %arg18[%c10_638, %c224_639] : memref<18x256xbf16, #tpu.memory_space<vmem>>, vector<2x16xbf16>
    tpu.vector_store %arg18[%c10_638, %c224_639], %399 {strides = array<i32>} : memref<18x256xbf16, #tpu.memory_space<vmem>>, vector<2x16xbf16>,
    %c16_640 = arith.constant 16 : index
    %c0_641 = arith.constant 0 : index
    %c0_642 = arith.constant 0 : index
    %401 = vector.load %arg13[%c16_640, %c0_641, %c0_642] : memref<18x2x18xbf16, #tpu.memory_space<vmem>>, vector<1x2x16xbf16>
    %402 = vector.shape_cast %401 : vector<1x2x16xbf16> to vector<2x16xbf16>
    %c12_643 = arith.constant 12 : index
    %c224_644 = arith.constant 224 : index
    %403 = vector.load %arg18[%c12_643, %c224_644] : memref<18x256xbf16, #tpu.memory_space<vmem>>, vector<2x16xbf16>
    tpu.vector_store %arg18[%c12_643, %c224_644], %402 {strides = array<i32>} : memref<18x256xbf16, #tpu.memory_space<vmem>>, vector<2x16xbf16>,
    %c16_645 = arith.constant 16 : index
    %c0_646 = arith.constant 0 : index
    %c1_647 = arith.constant 1 : index
    %404 = vector.load %arg13[%c16_645, %c0_646, %c1_647] : memref<18x2x18xbf16, #tpu.memory_space<vmem>>, vector<1x2x16xbf16>
    %405 = vector.shape_cast %404 : vector<1x2x16xbf16> to vector<2x16xbf16>
    %c14_648 = arith.constant 14 : index
    %c224_649 = arith.constant 224 : index
    %406 = vector.load %arg18[%c14_648, %c224_649] : memref<18x256xbf16, #tpu.memory_space<vmem>>, vector<2x16xbf16>
    tpu.vector_store %arg18[%c14_648, %c224_649], %405 {strides = array<i32>} : memref<18x256xbf16, #tpu.memory_space<vmem>>, vector<2x16xbf16>,
    %c16_650 = arith.constant 16 : index
    %c0_651 = arith.constant 0 : index
    %c2_652 = arith.constant 2 : index
    %407 = vector.load %arg13[%c16_650, %c0_651, %c2_652] : memref<18x2x18xbf16, #tpu.memory_space<vmem>>, vector<1x2x16xbf16>
    %408 = vector.shape_cast %407 : vector<1x2x16xbf16> to vector<2x16xbf16>
    %c16_653 = arith.constant 16 : index
    %c224_654 = arith.constant 224 : index
    %409 = vector.load %arg18[%c16_653, %c224_654] : memref<18x256xbf16, #tpu.memory_space<vmem>>, vector<2x16xbf16>
    tpu.vector_store %arg18[%c16_653, %c224_654], %408 {strides = array<i32>} : memref<18x256xbf16, #tpu.memory_space<vmem>>, vector<2x16xbf16>,
    %c15_655 = arith.constant 15 : index
    %c0_656 = arith.constant 0 : index
    %c0_657 = arith.constant 0 : index
    %410 = vector.load %arg13[%c15_655, %c0_656, %c0_657] : memref<18x2x18xbf16, #tpu.memory_space<vmem>>, vector<1x2x16xbf16>
    %411 = vector.shape_cast %410 : vector<1x2x16xbf16> to vector<2x16xbf16>
    %c0_658 = arith.constant 0 : index
    %c240 = arith.constant 240 : index
    %412 = vector.load %arg18[%c0_658, %c240] : memref<18x256xbf16, #tpu.memory_space<vmem>>, vector<2x16xbf16>
    tpu.vector_store %arg18[%c0_658, %c240], %411 {strides = array<i32>} : memref<18x256xbf16, #tpu.memory_space<vmem>>, vector<2x16xbf16>,
    %c15_659 = arith.constant 15 : index
    %c0_660 = arith.constant 0 : index
    %c1_661 = arith.constant 1 : index
    %413 = vector.load %arg13[%c15_659, %c0_660, %c1_661] : memref<18x2x18xbf16, #tpu.memory_space<vmem>>, vector<1x2x16xbf16>
    %414 = vector.shape_cast %413 : vector<1x2x16xbf16> to vector<2x16xbf16>
    %c2_662 = arith.constant 2 : index
    %c240_663 = arith.constant 240 : index
    %415 = vector.load %arg18[%c2_662, %c240_663] : memref<18x256xbf16, #tpu.memory_space<vmem>>, vector<2x16xbf16>
    tpu.vector_store %arg18[%c2_662, %c240_663], %414 {strides = array<i32>} : memref<18x256xbf16, #tpu.memory_space<vmem>>, vector<2x16xbf16>,
    %c15_664 = arith.constant 15 : index
    %c0_665 = arith.constant 0 : index
    %c2_666 = arith.constant 2 : index
    %416 = vector.load %arg13[%c15_664, %c0_665, %c2_666] : memref<18x2x18xbf16, #tpu.memory_space<vmem>>, vector<1x2x16xbf16>
    %417 = vector.shape_cast %416 : vector<1x2x16xbf16> to vector<2x16xbf16>
    %c4_667 = arith.constant 4 : index
    %c240_668 = arith.constant 240 : index
    %418 = vector.load %arg18[%c4_667, %c240_668] : memref<18x256xbf16, #tpu.memory_space<vmem>>, vector<2x16xbf16>
    tpu.vector_store %arg18[%c4_667, %c240_668], %417 {strides = array<i32>} : memref<18x256xbf16, #tpu.memory_space<vmem>>, vector<2x16xbf16>,
    %c16_669 = arith.constant 16 : index
    %c0_670 = arith.constant 0 : index
    %c0_671 = arith.constant 0 : index
    %419 = vector.load %arg13[%c16_669, %c0_670, %c0_671] : memref<18x2x18xbf16, #tpu.memory_space<vmem>>, vector<1x2x16xbf16>
    %420 = vector.shape_cast %419 : vector<1x2x16xbf16> to vector<2x16xbf16>
    %c6_672 = arith.constant 6 : index
    %c240_673 = arith.constant 240 : index
    %421 = vector.load %arg18[%c6_672, %c240_673] : memref<18x256xbf16, #tpu.memory_space<vmem>>, vector<2x16xbf16>
    tpu.vector_store %arg18[%c6_672, %c240_673], %420 {strides = array<i32>} : memref<18x256xbf16, #tpu.memory_space<vmem>>, vector<2x16xbf16>,
    %c16_674 = arith.constant 16 : index
    %c0_675 = arith.constant 0 : index
    %c1_676 = arith.constant 1 : index
    %422 = vector.load %arg13[%c16_674, %c0_675, %c1_676] : memref<18x2x18xbf16, #tpu.memory_space<vmem>>, vector<1x2x16xbf16>
    %423 = vector.shape_cast %422 : vector<1x2x16xbf16> to vector<2x16xbf16>
    %c8_677 = arith.constant 8 : index
    %c240_678 = arith.constant 240 : index
    %424 = vector.load %arg18[%c8_677, %c240_678] : memref<18x256xbf16, #tpu.memory_space<vmem>>, vector<2x16xbf16>
    tpu.vector_store %arg18[%c8_677, %c240_678], %423 {strides = array<i32>} : memref<18x256xbf16, #tpu.memory_space<vmem>>, vector<2x16xbf16>,
    %c16_679 = arith.constant 16 : index
    %c0_680 = arith.constant 0 : index
    %c2_681 = arith.constant 2 : index
    %425 = vector.load %arg13[%c16_679, %c0_680, %c2_681] : memref<18x2x18xbf16, #tpu.memory_space<vmem>>, vector<1x2x16xbf16>
    %426 = vector.shape_cast %425 : vector<1x2x16xbf16> to vector<2x16xbf16>
    %c10_682 = arith.constant 10 : index
    %c240_683 = arith.constant 240 : index
    %427 = vector.load %arg18[%c10_682, %c240_683] : memref<18x256xbf16, #tpu.memory_space<vmem>>, vector<2x16xbf16>
    tpu.vector_store %arg18[%c10_682, %c240_683], %426 {strides = array<i32>} : memref<18x256xbf16, #tpu.memory_space<vmem>>, vector<2x16xbf16>,
    %c17 = arith.constant 17 : index
    %c0_684 = arith.constant 0 : index
    %c0_685 = arith.constant 0 : index
    %428 = vector.load %arg13[%c17, %c0_684, %c0_685] : memref<18x2x18xbf16, #tpu.memory_space<vmem>>, vector<1x2x16xbf16>
    %429 = vector.shape_cast %428 : vector<1x2x16xbf16> to vector<2x16xbf16>
    %c12_686 = arith.constant 12 : index
    %c240_687 = arith.constant 240 : index
    %430 = vector.load %arg18[%c12_686, %c240_687] : memref<18x256xbf16, #tpu.memory_space<vmem>>, vector<2x16xbf16>
    tpu.vector_store %arg18[%c12_686, %c240_687], %429 {strides = array<i32>} : memref<18x256xbf16, #tpu.memory_space<vmem>>, vector<2x16xbf16>,
    %c17_688 = arith.constant 17 : index
    %c0_689 = arith.constant 0 : index
    %c1_690 = arith.constant 1 : index
    %431 = vector.load %arg13[%c17_688, %c0_689, %c1_690] : memref<18x2x18xbf16, #tpu.memory_space<vmem>>, vector<1x2x16xbf16>
    %432 = vector.shape_cast %431 : vector<1x2x16xbf16> to vector<2x16xbf16>
    %c14_691 = arith.constant 14 : index
    %c240_692 = arith.constant 240 : index
    %433 = vector.load %arg18[%c14_691, %c240_692] : memref<18x256xbf16, #tpu.memory_space<vmem>>, vector<2x16xbf16>
    tpu.vector_store %arg18[%c14_691, %c240_692], %432 {strides = array<i32>} : memref<18x256xbf16, #tpu.memory_space<vmem>>, vector<2x16xbf16>,
    %c17_693 = arith.constant 17 : index
    %c0_694 = arith.constant 0 : index
    %c2_695 = arith.constant 2 : index
    %434 = vector.load %arg13[%c17_693, %c0_694, %c2_695] : memref<18x2x18xbf16, #tpu.memory_space<vmem>>, vector<1x2x16xbf16>
    %435 = vector.shape_cast %434 : vector<1x2x16xbf16> to vector<2x16xbf16>
    %c16_696 = arith.constant 16 : index
    %c240_697 = arith.constant 240 : index
    %436 = vector.load %arg18[%c16_696, %c240_697] : memref<18x256xbf16, #tpu.memory_space<vmem>>, vector<2x16xbf16>
    tpu.vector_store %arg18[%c16_696, %c240_697], %435 {strides = array<i32>} : memref<18x256xbf16, #tpu.memory_space<vmem>>, vector<2x16xbf16>,
    %c0_698 = arith.constant 0 : index
    %c0_699 = arith.constant 0 : index
    %437 = vector.load %arg2[%c0_698, %c0_699] : memref<16x18xbf16, #tpu.memory_space<vmem>>, vector<16x18xbf16>
    %c0_700 = arith.constant 0 : index
    %c0_701 = arith.constant 0 : index
    %438 = vector.load %arg18[%c0_700, %c0_701] : memref<18x256xbf16, #tpu.memory_space<vmem>>, vector<18x256xbf16>
    %cst_702 = arith.constant dense<0.000000e+00> : vector<16x256xf32>
    %439 = tpu.matmul %437, %438, %cst_702 {dimension_numbers = #tpu.dot_dimension_numbers<[1], [0], [0], [1], [0, 0, 1, 1], [], []>} : vector<16x18xbf16>, vector<18x256xbf16>, vector<16x256xf32> -> vector<16x256xf32>
    %c0_703 = arith.constant 0 : index
    %c0_704 = arith.constant 0 : index
    %440 = vector.load %arg7[%c0_703, %c0_704] : memref<16x1xf32, #tpu.memory_space<vmem>>, vector<16x1xf32>
    %441 = vector.broadcast %440 : vector<16x1xf32> to vector<16x256xf32>
    %442 = arith.addf %439, %441 : vector<16x256xf32>
    %cst_705 = arith.constant 2.000000e-01 : f32
    %443 = vector.broadcast %cst_705 : f32 to vector<16x256xf32>
    %444 = arith.mulf %443, %442 : vector<16x256xf32>
    %445 = arith.maximumf %442, %444 : vector<16x256xf32>
    %cst_706 = arith.constant 0.000000e+00 : bf16
    %446 = vector.broadcast %cst_706 : bf16 to vector<18x16x18xbf16>
    %c0_707 = arith.constant 0 : index
    %c0_708 = arith.constant 0 : index
    %c0_709 = arith.constant 0 : index
    %447 = vector.load %arg14[%c0_707, %c0_708, %c0_709] : memref<18x16x18xbf16, #tpu.memory_space<vmem>>, vector<18x16x18xbf16>
    tpu.vector_store %arg14[%c0_707, %c0_708, %c0_709], %446 {strides = array<i32>} : memref<18x16x18xbf16, #tpu.memory_space<vmem>>, vector<18x16x18xbf16>,
    %448 = vector.extract_strided_slice %445 {offsets = [0, 0], sizes = [16, 16], strides = [1, 1]} : vector<16x256xf32> to vector<16x16xf32>
    %449 = arith.truncf %448 : vector<16x16xf32> to vector<16x16xbf16>
    %c1_710 = arith.constant 1 : index
    %c0_711 = arith.constant 0 : index
    %c1_712 = arith.constant 1 : index
    %450 = vector.load %arg14[%c1_710, %c0_711, %c1_712] : memref<18x16x18xbf16, #tpu.memory_space<vmem>>, vector<1x16x16xbf16>
    %451 = vector.shape_cast %450 : vector<1x16x16xbf16> to vector<16x16xbf16>
    %452 = vector.shape_cast %449 : vector<16x16xbf16> to vector<1x16x16xbf16>
    tpu.vector_store %arg14[%c1_710, %c0_711, %c1_712], %452 {strides = array<i32>} : memref<18x16x18xbf16, #tpu.memory_space<vmem>>, vector<1x16x16xbf16>,
    %453 = vector.extract_strided_slice %445 {offsets = [0, 16], sizes = [16, 16], strides = [1, 1]} : vector<16x256xf32> to vector<16x16xf32>
    %454 = arith.truncf %453 : vector<16x16xf32> to vector<16x16xbf16>
    %c2_713 = arith.constant 2 : index
    %c0_714 = arith.constant 0 : index
    %c1_715 = arith.constant 1 : index
    %455 = vector.load %arg14[%c2_713, %c0_714, %c1_715] : memref<18x16x18xbf16, #tpu.memory_space<vmem>>, vector<1x16x16xbf16>
    %456 = vector.shape_cast %455 : vector<1x16x16xbf16> to vector<16x16xbf16>
    %457 = vector.shape_cast %454 : vector<16x16xbf16> to vector<1x16x16xbf16>
    tpu.vector_store %arg14[%c2_713, %c0_714, %c1_715], %457 {strides = array<i32>} : memref<18x16x18xbf16, #tpu.memory_space<vmem>>, vector<1x16x16xbf16>,
    %458 = vector.extract_strided_slice %445 {offsets = [0, 32], sizes = [16, 16], strides = [1, 1]} : vector<16x256xf32> to vector<16x16xf32>
    %459 = arith.truncf %458 : vector<16x16xf32> to vector<16x16xbf16>
    %c3_716 = arith.constant 3 : index
    %c0_717 = arith.constant 0 : index
    %c1_718 = arith.constant 1 : index
    %460 = vector.load %arg14[%c3_716, %c0_717, %c1_718] : memref<18x16x18xbf16, #tpu.memory_space<vmem>>, vector<1x16x16xbf16>
    %461 = vector.shape_cast %460 : vector<1x16x16xbf16> to vector<16x16xbf16>
    %462 = vector.shape_cast %459 : vector<16x16xbf16> to vector<1x16x16xbf16>
    tpu.vector_store %arg14[%c3_716, %c0_717, %c1_718], %462 {strides = array<i32>} : memref<18x16x18xbf16, #tpu.memory_space<vmem>>, vector<1x16x16xbf16>,
    %463 = vector.extract_strided_slice %445 {offsets = [0, 48], sizes = [16, 16], strides = [1, 1]} : vector<16x256xf32> to vector<16x16xf32>
    %464 = arith.truncf %463 : vector<16x16xf32> to vector<16x16xbf16>
    %c4_719 = arith.constant 4 : index
    %c0_720 = arith.constant 0 : index
    %c1_721 = arith.constant 1 : index
    %465 = vector.load %arg14[%c4_719, %c0_720, %c1_721] : memref<18x16x18xbf16, #tpu.memory_space<vmem>>, vector<1x16x16xbf16>
    %466 = vector.shape_cast %465 : vector<1x16x16xbf16> to vector<16x16xbf16>
    %467 = vector.shape_cast %464 : vector<16x16xbf16> to vector<1x16x16xbf16>
    tpu.vector_store %arg14[%c4_719, %c0_720, %c1_721], %467 {strides = array<i32>} : memref<18x16x18xbf16, #tpu.memory_space<vmem>>, vector<1x16x16xbf16>,
    %468 = vector.extract_strided_slice %445 {offsets = [0, 64], sizes = [16, 16], strides = [1, 1]} : vector<16x256xf32> to vector<16x16xf32>
    %469 = arith.truncf %468 : vector<16x16xf32> to vector<16x16xbf16>
    %c5_722 = arith.constant 5 : index
    %c0_723 = arith.constant 0 : index
    %c1_724 = arith.constant 1 : index
    %470 = vector.load %arg14[%c5_722, %c0_723, %c1_724] : memref<18x16x18xbf16, #tpu.memory_space<vmem>>, vector<1x16x16xbf16>
    %471 = vector.shape_cast %470 : vector<1x16x16xbf16> to vector<16x16xbf16>
    %472 = vector.shape_cast %469 : vector<16x16xbf16> to vector<1x16x16xbf16>
    tpu.vector_store %arg14[%c5_722, %c0_723, %c1_724], %472 {strides = array<i32>} : memref<18x16x18xbf16, #tpu.memory_space<vmem>>, vector<1x16x16xbf16>,
    %473 = vector.extract_strided_slice %445 {offsets = [0, 80], sizes = [16, 16], strides = [1, 1]} : vector<16x256xf32> to vector<16x16xf32>
    %474 = arith.truncf %473 : vector<16x16xf32> to vector<16x16xbf16>
    %c6_725 = arith.constant 6 : index
    %c0_726 = arith.constant 0 : index
    %c1_727 = arith.constant 1 : index
    %475 = vector.load %arg14[%c6_725, %c0_726, %c1_727] : memref<18x16x18xbf16, #tpu.memory_space<vmem>>, vector<1x16x16xbf16>
    %476 = vector.shape_cast %475 : vector<1x16x16xbf16> to vector<16x16xbf16>
    %477 = vector.shape_cast %474 : vector<16x16xbf16> to vector<1x16x16xbf16>
    tpu.vector_store %arg14[%c6_725, %c0_726, %c1_727], %477 {strides = array<i32>} : memref<18x16x18xbf16, #tpu.memory_space<vmem>>, vector<1x16x16xbf16>,
    %478 = vector.extract_strided_slice %445 {offsets = [0, 96], sizes = [16, 16], strides = [1, 1]} : vector<16x256xf32> to vector<16x16xf32>
    %479 = arith.truncf %478 : vector<16x16xf32> to vector<16x16xbf16>
    %c7_728 = arith.constant 7 : index
    %c0_729 = arith.constant 0 : index
    %c1_730 = arith.constant 1 : index
    %480 = vector.load %arg14[%c7_728, %c0_729, %c1_730] : memref<18x16x18xbf16, #tpu.memory_space<vmem>>, vector<1x16x16xbf16>
    %481 = vector.shape_cast %480 : vector<1x16x16xbf16> to vector<16x16xbf16>
    %482 = vector.shape_cast %479 : vector<16x16xbf16> to vector<1x16x16xbf16>
    tpu.vector_store %arg14[%c7_728, %c0_729, %c1_730], %482 {strides = array<i32>} : memref<18x16x18xbf16, #tpu.memory_space<vmem>>, vector<1x16x16xbf16>,
    %483 = vector.extract_strided_slice %445 {offsets = [0, 112], sizes = [16, 16], strides = [1, 1]} : vector<16x256xf32> to vector<16x16xf32>
    %484 = arith.truncf %483 : vector<16x16xf32> to vector<16x16xbf16>
    %c8_731 = arith.constant 8 : index
    %c0_732 = arith.constant 0 : index
    %c1_733 = arith.constant 1 : index
    %485 = vector.load %arg14[%c8_731, %c0_732, %c1_733] : memref<18x16x18xbf16, #tpu.memory_space<vmem>>, vector<1x16x16xbf16>
    %486 = vector.shape_cast %485 : vector<1x16x16xbf16> to vector<16x16xbf16>
    %487 = vector.shape_cast %484 : vector<16x16xbf16> to vector<1x16x16xbf16>
    tpu.vector_store %arg14[%c8_731, %c0_732, %c1_733], %487 {strides = array<i32>} : memref<18x16x18xbf16, #tpu.memory_space<vmem>>, vector<1x16x16xbf16>,
    %488 = vector.extract_strided_slice %445 {offsets = [0, 128], sizes = [16, 16], strides = [1, 1]} : vector<16x256xf32> to vector<16x16xf32>
    %489 = arith.truncf %488 : vector<16x16xf32> to vector<16x16xbf16>
    %c9_734 = arith.constant 9 : index
    %c0_735 = arith.constant 0 : index
    %c1_736 = arith.constant 1 : index
    %490 = vector.load %arg14[%c9_734, %c0_735, %c1_736] : memref<18x16x18xbf16, #tpu.memory_space<vmem>>, vector<1x16x16xbf16>
    %491 = vector.shape_cast %490 : vector<1x16x16xbf16> to vector<16x16xbf16>
    %492 = vector.shape_cast %489 : vector<16x16xbf16> to vector<1x16x16xbf16>
    tpu.vector_store %arg14[%c9_734, %c0_735, %c1_736], %492 {strides = array<i32>} : memref<18x16x18xbf16, #tpu.memory_space<vmem>>, vector<1x16x16xbf16>,
    %493 = vector.extract_strided_slice %445 {offsets = [0, 144], sizes = [16, 16], strides = [1, 1]} : vector<16x256xf32> to vector<16x16xf32>
    %494 = arith.truncf %493 : vector<16x16xf32> to vector<16x16xbf16>
    %c10_737 = arith.constant 10 : index
    %c0_738 = arith.constant 0 : index
    %c1_739 = arith.constant 1 : index
    %495 = vector.load %arg14[%c10_737, %c0_738, %c1_739] : memref<18x16x18xbf16, #tpu.memory_space<vmem>>, vector<1x16x16xbf16>
    %496 = vector.shape_cast %495 : vector<1x16x16xbf16> to vector<16x16xbf16>
    %497 = vector.shape_cast %494 : vector<16x16xbf16> to vector<1x16x16xbf16>
    tpu.vector_store %arg14[%c10_737, %c0_738, %c1_739], %497 {strides = array<i32>} : memref<18x16x18xbf16, #tpu.memory_space<vmem>>, vector<1x16x16xbf16>,
    %498 = vector.extract_strided_slice %445 {offsets = [0, 160], sizes = [16, 16], strides = [1, 1]} : vector<16x256xf32> to vector<16x16xf32>
    %499 = arith.truncf %498 : vector<16x16xf32> to vector<16x16xbf16>
    %c11_740 = arith.constant 11 : index
    %c0_741 = arith.constant 0 : index
    %c1_742 = arith.constant 1 : index
    %500 = vector.load %arg14[%c11_740, %c0_741, %c1_742] : memref<18x16x18xbf16, #tpu.memory_space<vmem>>, vector<1x16x16xbf16>
    %501 = vector.shape_cast %500 : vector<1x16x16xbf16> to vector<16x16xbf16>
    %502 = vector.shape_cast %499 : vector<16x16xbf16> to vector<1x16x16xbf16>
    tpu.vector_store %arg14[%c11_740, %c0_741, %c1_742], %502 {strides = array<i32>} : memref<18x16x18xbf16, #tpu.memory_space<vmem>>, vector<1x16x16xbf16>,
    %503 = vector.extract_strided_slice %445 {offsets = [0, 176], sizes = [16, 16], strides = [1, 1]} : vector<16x256xf32> to vector<16x16xf32>
    %504 = arith.truncf %503 : vector<16x16xf32> to vector<16x16xbf16>
    %c12_743 = arith.constant 12 : index
    %c0_744 = arith.constant 0 : index
    %c1_745 = arith.constant 1 : index
    %505 = vector.load %arg14[%c12_743, %c0_744, %c1_745] : memref<18x16x18xbf16, #tpu.memory_space<vmem>>, vector<1x16x16xbf16>
    %506 = vector.shape_cast %505 : vector<1x16x16xbf16> to vector<16x16xbf16>
    %507 = vector.shape_cast %504 : vector<16x16xbf16> to vector<1x16x16xbf16>
    tpu.vector_store %arg14[%c12_743, %c0_744, %c1_745], %507 {strides = array<i32>} : memref<18x16x18xbf16, #tpu.memory_space<vmem>>, vector<1x16x16xbf16>,
    %508 = vector.extract_strided_slice %445 {offsets = [0, 192], sizes = [16, 16], strides = [1, 1]} : vector<16x256xf32> to vector<16x16xf32>
    %509 = arith.truncf %508 : vector<16x16xf32> to vector<16x16xbf16>
    %c13_746 = arith.constant 13 : index
    %c0_747 = arith.constant 0 : index
    %c1_748 = arith.constant 1 : index
    %510 = vector.load %arg14[%c13_746, %c0_747, %c1_748] : memref<18x16x18xbf16, #tpu.memory_space<vmem>>, vector<1x16x16xbf16>
    %511 = vector.shape_cast %510 : vector<1x16x16xbf16> to vector<16x16xbf16>
    %512 = vector.shape_cast %509 : vector<16x16xbf16> to vector<1x16x16xbf16>
    tpu.vector_store %arg14[%c13_746, %c0_747, %c1_748], %512 {strides = array<i32>} : memref<18x16x18xbf16, #tpu.memory_space<vmem>>, vector<1x16x16xbf16>,
    %513 = vector.extract_strided_slice %445 {offsets = [0, 208], sizes = [16, 16], strides = [1, 1]} : vector<16x256xf32> to vector<16x16xf32>
    %514 = arith.truncf %513 : vector<16x16xf32> to vector<16x16xbf16>
    %c14_749 = arith.constant 14 : index
    %c0_750 = arith.constant 0 : index
    %c1_751 = arith.constant 1 : index
    %515 = vector.load %arg14[%c14_749, %c0_750, %c1_751] : memref<18x16x18xbf16, #tpu.memory_space<vmem>>, vector<1x16x16xbf16>
    %516 = vector.shape_cast %515 : vector<1x16x16xbf16> to vector<16x16xbf16>
    %517 = vector.shape_cast %514 : vector<16x16xbf16> to vector<1x16x16xbf16>
    tpu.vector_store %arg14[%c14_749, %c0_750, %c1_751], %517 {strides = array<i32>} : memref<18x16x18xbf16, #tpu.memory_space<vmem>>, vector<1x16x16xbf16>,
    %518 = vector.extract_strided_slice %445 {offsets = [0, 224], sizes = [16, 16], strides = [1, 1]} : vector<16x256xf32> to vector<16x16xf32>
    %519 = arith.truncf %518 : vector<16x16xf32> to vector<16x16xbf16>
    %c15_752 = arith.constant 15 : index
    %c0_753 = arith.constant 0 : index
    %c1_754 = arith.constant 1 : index
    %520 = vector.load %arg14[%c15_752, %c0_753, %c1_754] : memref<18x16x18xbf16, #tpu.memory_space<vmem>>, vector<1x16x16xbf16>
    %521 = vector.shape_cast %520 : vector<1x16x16xbf16> to vector<16x16xbf16>
    %522 = vector.shape_cast %519 : vector<16x16xbf16> to vector<1x16x16xbf16>
    tpu.vector_store %arg14[%c15_752, %c0_753, %c1_754], %522 {strides = array<i32>} : memref<18x16x18xbf16, #tpu.memory_space<vmem>>, vector<1x16x16xbf16>,
    %523 = vector.extract_strided_slice %445 {offsets = [0, 240], sizes = [16, 16], strides = [1, 1]} : vector<16x256xf32> to vector<16x16xf32>
    %524 = arith.truncf %523 : vector<16x16xf32> to vector<16x16xbf16>
    %c16_755 = arith.constant 16 : index
    %c0_756 = arith.constant 0 : index
    %c1_757 = arith.constant 1 : index
    %525 = vector.load %arg14[%c16_755, %c0_756, %c1_757] : memref<18x16x18xbf16, #tpu.memory_space<vmem>>, vector<1x16x16xbf16>
    %526 = vector.shape_cast %525 : vector<1x16x16xbf16> to vector<16x16xbf16>
    %527 = vector.shape_cast %524 : vector<16x16xbf16> to vector<1x16x16xbf16>
    tpu.vector_store %arg14[%c16_755, %c0_756, %c1_757], %527 {strides = array<i32>} : memref<18x16x18xbf16, #tpu.memory_space<vmem>>, vector<1x16x16xbf16>,
    %c0_758 = arith.constant 0 : index
    %c0_759 = arith.constant 0 : index
    %c0_760 = arith.constant 0 : index
    %528 = vector.load %arg14[%c0_758, %c0_759, %c0_760] : memref<18x16x18xbf16, #tpu.memory_space<vmem>>, vector<1x16x16xbf16>
    %529 = vector.shape_cast %528 : vector<1x16x16xbf16> to vector<16x16xbf16>
    %c0_761 = arith.constant 0 : index
    %c0_762 = arith.constant 0 : index
    %530 = vector.load %arg19[%c0_761, %c0_762] : memref<144x128xbf16, #tpu.memory_space<vmem>>, vector<16x16xbf16>
    tpu.vector_store %arg19[%c0_761, %c0_762], %529 {strides = array<i32>} : memref<144x128xbf16, #tpu.memory_space<vmem>>, vector<16x16xbf16>,
    %c0_763 = arith.constant 0 : index
    %c0_764 = arith.constant 0 : index
    %c1_765 = arith.constant 1 : index
    %531 = vector.load %arg14[%c0_763, %c0_764, %c1_765] : memref<18x16x18xbf16, #tpu.memory_space<vmem>>, vector<1x16x16xbf16>
    %532 = vector.shape_cast %531 : vector<1x16x16xbf16> to vector<16x16xbf16>
    %c16_766 = arith.constant 16 : index
    %c0_767 = arith.constant 0 : index
    %533 = vector.load %arg19[%c16_766, %c0_767] : memref<144x128xbf16, #tpu.memory_space<vmem>>, vector<16x16xbf16>
    tpu.vector_store %arg19[%c16_766, %c0_767], %532 {strides = array<i32>} : memref<144x128xbf16, #tpu.memory_space<vmem>>, vector<16x16xbf16>,
    %c0_768 = arith.constant 0 : index
    %c0_769 = arith.constant 0 : index
    %c2_770 = arith.constant 2 : index
    %534 = vector.load %arg14[%c0_768, %c0_769, %c2_770] : memref<18x16x18xbf16, #tpu.memory_space<vmem>>, vector<1x16x16xbf16>
    %535 = vector.shape_cast %534 : vector<1x16x16xbf16> to vector<16x16xbf16>
    %c32_771 = arith.constant 32 : index
    %c0_772 = arith.constant 0 : index
    %536 = vector.load %arg19[%c32_771, %c0_772] : memref<144x128xbf16, #tpu.memory_space<vmem>>, vector<16x16xbf16>
    tpu.vector_store %arg19[%c32_771, %c0_772], %535 {strides = array<i32>} : memref<144x128xbf16, #tpu.memory_space<vmem>>, vector<16x16xbf16>,
    %c1_773 = arith.constant 1 : index
    %c0_774 = arith.constant 0 : index
    %c0_775 = arith.constant 0 : index
    %537 = vector.load %arg14[%c1_773, %c0_774, %c0_775] : memref<18x16x18xbf16, #tpu.memory_space<vmem>>, vector<1x16x16xbf16>
    %538 = vector.shape_cast %537 : vector<1x16x16xbf16> to vector<16x16xbf16>
    %c48_776 = arith.constant 48 : index
    %c0_777 = arith.constant 0 : index
    %539 = vector.load %arg19[%c48_776, %c0_777] : memref<144x128xbf16, #tpu.memory_space<vmem>>, vector<16x16xbf16>
    tpu.vector_store %arg19[%c48_776, %c0_777], %538 {strides = array<i32>} : memref<144x128xbf16, #tpu.memory_space<vmem>>, vector<16x16xbf16>,
    %c1_778 = arith.constant 1 : index
    %c0_779 = arith.constant 0 : index
    %c1_780 = arith.constant 1 : index
    %540 = vector.load %arg14[%c1_778, %c0_779, %c1_780] : memref<18x16x18xbf16, #tpu.memory_space<vmem>>, vector<1x16x16xbf16>
    %541 = vector.shape_cast %540 : vector<1x16x16xbf16> to vector<16x16xbf16>
    %c64_781 = arith.constant 64 : index
    %c0_782 = arith.constant 0 : index
    %542 = vector.load %arg19[%c64_781, %c0_782] : memref<144x128xbf16, #tpu.memory_space<vmem>>, vector<16x16xbf16>
    tpu.vector_store %arg19[%c64_781, %c0_782], %541 {strides = array<i32>} : memref<144x128xbf16, #tpu.memory_space<vmem>>, vector<16x16xbf16>,
    %c1_783 = arith.constant 1 : index
    %c0_784 = arith.constant 0 : index
    %c2_785 = arith.constant 2 : index
    %543 = vector.load %arg14[%c1_783, %c0_784, %c2_785] : memref<18x16x18xbf16, #tpu.memory_space<vmem>>, vector<1x16x16xbf16>
    %544 = vector.shape_cast %543 : vector<1x16x16xbf16> to vector<16x16xbf16>
    %c80_786 = arith.constant 80 : index
    %c0_787 = arith.constant 0 : index
    %545 = vector.load %arg19[%c80_786, %c0_787] : memref<144x128xbf16, #tpu.memory_space<vmem>>, vector<16x16xbf16>
    tpu.vector_store %arg19[%c80_786, %c0_787], %544 {strides = array<i32>} : memref<144x128xbf16, #tpu.memory_space<vmem>>, vector<16x16xbf16>,
    %c2_788 = arith.constant 2 : index
    %c0_789 = arith.constant 0 : index
    %c0_790 = arith.constant 0 : index
    %546 = vector.load %arg14[%c2_788, %c0_789, %c0_790] : memref<18x16x18xbf16, #tpu.memory_space<vmem>>, vector<1x16x16xbf16>
    %547 = vector.shape_cast %546 : vector<1x16x16xbf16> to vector<16x16xbf16>
    %c96_791 = arith.constant 96 : index
    %c0_792 = arith.constant 0 : index
    %548 = vector.load %arg19[%c96_791, %c0_792] : memref<144x128xbf16, #tpu.memory_space<vmem>>, vector<16x16xbf16>
    tpu.vector_store %arg19[%c96_791, %c0_792], %547 {strides = array<i32>} : memref<144x128xbf16, #tpu.memory_space<vmem>>, vector<16x16xbf16>,
    %c2_793 = arith.constant 2 : index
    %c0_794 = arith.constant 0 : index
    %c1_795 = arith.constant 1 : index
    %549 = vector.load %arg14[%c2_793, %c0_794, %c1_795] : memref<18x16x18xbf16, #tpu.memory_space<vmem>>, vector<1x16x16xbf16>
    %550 = vector.shape_cast %549 : vector<1x16x16xbf16> to vector<16x16xbf16>
    %c112_796 = arith.constant 112 : index
    %c0_797 = arith.constant 0 : index
    %551 = vector.load %arg19[%c112_796, %c0_797] : memref<144x128xbf16, #tpu.memory_space<vmem>>, vector<16x16xbf16>
    tpu.vector_store %arg19[%c112_796, %c0_797], %550 {strides = array<i32>} : memref<144x128xbf16, #tpu.memory_space<vmem>>, vector<16x16xbf16>,
    %c2_798 = arith.constant 2 : index
    %c0_799 = arith.constant 0 : index
    %c2_800 = arith.constant 2 : index
    %552 = vector.load %arg14[%c2_798, %c0_799, %c2_800] : memref<18x16x18xbf16, #tpu.memory_space<vmem>>, vector<1x16x16xbf16>
    %553 = vector.shape_cast %552 : vector<1x16x16xbf16> to vector<16x16xbf16>
    %c128_801 = arith.constant 128 : index
    %c0_802 = arith.constant 0 : index
    %554 = vector.load %arg19[%c128_801, %c0_802] : memref<144x128xbf16, #tpu.memory_space<vmem>>, vector<16x16xbf16>
    tpu.vector_store %arg19[%c128_801, %c0_802], %553 {strides = array<i32>} : memref<144x128xbf16, #tpu.memory_space<vmem>>, vector<16x16xbf16>,
    %c2_803 = arith.constant 2 : index
    %c0_804 = arith.constant 0 : index
    %c0_805 = arith.constant 0 : index
    %555 = vector.load %arg14[%c2_803, %c0_804, %c0_805] : memref<18x16x18xbf16, #tpu.memory_space<vmem>>, vector<1x16x16xbf16>
    %556 = vector.shape_cast %555 : vector<1x16x16xbf16> to vector<16x16xbf16>
    %c0_806 = arith.constant 0 : index
    %c16_807 = arith.constant 16 : index
    %557 = vector.load %arg19[%c0_806, %c16_807] : memref<144x128xbf16, #tpu.memory_space<vmem>>, vector<16x16xbf16>
    tpu.vector_store %arg19[%c0_806, %c16_807], %556 {strides = array<i32>} : memref<144x128xbf16, #tpu.memory_space<vmem>>, vector<16x16xbf16>,
    %c2_808 = arith.constant 2 : index
    %c0_809 = arith.constant 0 : index
    %c1_810 = arith.constant 1 : index
    %558 = vector.load %arg14[%c2_808, %c0_809, %c1_810] : memref<18x16x18xbf16, #tpu.memory_space<vmem>>, vector<1x16x16xbf16>
    %559 = vector.shape_cast %558 : vector<1x16x16xbf16> to vector<16x16xbf16>
    %c16_811 = arith.constant 16 : index
    %c16_812 = arith.constant 16 : index
    %560 = vector.load %arg19[%c16_811, %c16_812] : memref<144x128xbf16, #tpu.memory_space<vmem>>, vector<16x16xbf16>
    tpu.vector_store %arg19[%c16_811, %c16_812], %559 {strides = array<i32>} : memref<144x128xbf16, #tpu.memory_space<vmem>>, vector<16x16xbf16>,
    %c2_813 = arith.constant 2 : index
    %c0_814 = arith.constant 0 : index
    %c2_815 = arith.constant 2 : index
    %561 = vector.load %arg14[%c2_813, %c0_814, %c2_815] : memref<18x16x18xbf16, #tpu.memory_space<vmem>>, vector<1x16x16xbf16>
    %562 = vector.shape_cast %561 : vector<1x16x16xbf16> to vector<16x16xbf16>
    %c32_816 = arith.constant 32 : index
    %c16_817 = arith.constant 16 : index
    %563 = vector.load %arg19[%c32_816, %c16_817] : memref<144x128xbf16, #tpu.memory_space<vmem>>, vector<16x16xbf16>
    tpu.vector_store %arg19[%c32_816, %c16_817], %562 {strides = array<i32>} : memref<144x128xbf16, #tpu.memory_space<vmem>>, vector<16x16xbf16>,
    %c3_818 = arith.constant 3 : index
    %c0_819 = arith.constant 0 : index
    %c0_820 = arith.constant 0 : index
    %564 = vector.load %arg14[%c3_818, %c0_819, %c0_820] : memref<18x16x18xbf16, #tpu.memory_space<vmem>>, vector<1x16x16xbf16>
    %565 = vector.shape_cast %564 : vector<1x16x16xbf16> to vector<16x16xbf16>
    %c48_821 = arith.constant 48 : index
    %c16_822 = arith.constant 16 : index
    %566 = vector.load %arg19[%c48_821, %c16_822] : memref<144x128xbf16, #tpu.memory_space<vmem>>, vector<16x16xbf16>
    tpu.vector_store %arg19[%c48_821, %c16_822], %565 {strides = array<i32>} : memref<144x128xbf16, #tpu.memory_space<vmem>>, vector<16x16xbf16>,
    %c3_823 = arith.constant 3 : index
    %c0_824 = arith.constant 0 : index
    %c1_825 = arith.constant 1 : index
    %567 = vector.load %arg14[%c3_823, %c0_824, %c1_825] : memref<18x16x18xbf16, #tpu.memory_space<vmem>>, vector<1x16x16xbf16>
    %568 = vector.shape_cast %567 : vector<1x16x16xbf16> to vector<16x16xbf16>
    %c64_826 = arith.constant 64 : index
    %c16_827 = arith.constant 16 : index
    %569 = vector.load %arg19[%c64_826, %c16_827] : memref<144x128xbf16, #tpu.memory_space<vmem>>, vector<16x16xbf16>
    tpu.vector_store %arg19[%c64_826, %c16_827], %568 {strides = array<i32>} : memref<144x128xbf16, #tpu.memory_space<vmem>>, vector<16x16xbf16>,
    %c3_828 = arith.constant 3 : index
    %c0_829 = arith.constant 0 : index
    %c2_830 = arith.constant 2 : index
    %570 = vector.load %arg14[%c3_828, %c0_829, %c2_830] : memref<18x16x18xbf16, #tpu.memory_space<vmem>>, vector<1x16x16xbf16>
    %571 = vector.shape_cast %570 : vector<1x16x16xbf16> to vector<16x16xbf16>
    %c80_831 = arith.constant 80 : index
    %c16_832 = arith.constant 16 : index
    %572 = vector.load %arg19[%c80_831, %c16_832] : memref<144x128xbf16, #tpu.memory_space<vmem>>, vector<16x16xbf16>
    tpu.vector_store %arg19[%c80_831, %c16_832], %571 {strides = array<i32>} : memref<144x128xbf16, #tpu.memory_space<vmem>>, vector<16x16xbf16>,
    %c4_833 = arith.constant 4 : index
    %c0_834 = arith.constant 0 : index
    %c0_835 = arith.constant 0 : index
    %573 = vector.load %arg14[%c4_833, %c0_834, %c0_835] : memref<18x16x18xbf16, #tpu.memory_space<vmem>>, vector<1x16x16xbf16>
    %574 = vector.shape_cast %573 : vector<1x16x16xbf16> to vector<16x16xbf16>
    %c96_836 = arith.constant 96 : index
    %c16_837 = arith.constant 16 : index
    %575 = vector.load %arg19[%c96_836, %c16_837] : memref<144x128xbf16, #tpu.memory_space<vmem>>, vector<16x16xbf16>
    tpu.vector_store %arg19[%c96_836, %c16_837], %574 {strides = array<i32>} : memref<144x128xbf16, #tpu.memory_space<vmem>>, vector<16x16xbf16>,
    %c4_838 = arith.constant 4 : index
    %c0_839 = arith.constant 0 : index
    %c1_840 = arith.constant 1 : index
    %576 = vector.load %arg14[%c4_838, %c0_839, %c1_840] : memref<18x16x18xbf16, #tpu.memory_space<vmem>>, vector<1x16x16xbf16>
    %577 = vector.shape_cast %576 : vector<1x16x16xbf16> to vector<16x16xbf16>
    %c112_841 = arith.constant 112 : index
    %c16_842 = arith.constant 16 : index
    %578 = vector.load %arg19[%c112_841, %c16_842] : memref<144x128xbf16, #tpu.memory_space<vmem>>, vector<16x16xbf16>
    tpu.vector_store %arg19[%c112_841, %c16_842], %577 {strides = array<i32>} : memref<144x128xbf16, #tpu.memory_space<vmem>>, vector<16x16xbf16>,
    %c4_843 = arith.constant 4 : index
    %c0_844 = arith.constant 0 : index
    %c2_845 = arith.constant 2 : index
    %579 = vector.load %arg14[%c4_843, %c0_844, %c2_845] : memref<18x16x18xbf16, #tpu.memory_space<vmem>>, vector<1x16x16xbf16>
    %580 = vector.shape_cast %579 : vector<1x16x16xbf16> to vector<16x16xbf16>
    %c128_846 = arith.constant 128 : index
    %c16_847 = arith.constant 16 : index
    %581 = vector.load %arg19[%c128_846, %c16_847] : memref<144x128xbf16, #tpu.memory_space<vmem>>, vector<16x16xbf16>
    tpu.vector_store %arg19[%c128_846, %c16_847], %580 {strides = array<i32>} : memref<144x128xbf16, #tpu.memory_space<vmem>>, vector<16x16xbf16>,
    %c4_848 = arith.constant 4 : index
    %c0_849 = arith.constant 0 : index
    %c0_850 = arith.constant 0 : index
    %582 = vector.load %arg14[%c4_848, %c0_849, %c0_850] : memref<18x16x18xbf16, #tpu.memory_space<vmem>>, vector<1x16x16xbf16>
    %583 = vector.shape_cast %582 : vector<1x16x16xbf16> to vector<16x16xbf16>
    %c0_851 = arith.constant 0 : index
    %c32_852 = arith.constant 32 : index
    %584 = vector.load %arg19[%c0_851, %c32_852] : memref<144x128xbf16, #tpu.memory_space<vmem>>, vector<16x16xbf16>
    tpu.vector_store %arg19[%c0_851, %c32_852], %583 {strides = array<i32>} : memref<144x128xbf16, #tpu.memory_space<vmem>>, vector<16x16xbf16>,
    %c4_853 = arith.constant 4 : index
    %c0_854 = arith.constant 0 : index
    %c1_855 = arith.constant 1 : index
    %585 = vector.load %arg14[%c4_853, %c0_854, %c1_855] : memref<18x16x18xbf16, #tpu.memory_space<vmem>>, vector<1x16x16xbf16>
    %586 = vector.shape_cast %585 : vector<1x16x16xbf16> to vector<16x16xbf16>
    %c16_856 = arith.constant 16 : index
    %c32_857 = arith.constant 32 : index
    %587 = vector.load %arg19[%c16_856, %c32_857] : memref<144x128xbf16, #tpu.memory_space<vmem>>, vector<16x16xbf16>
    tpu.vector_store %arg19[%c16_856, %c32_857], %586 {strides = array<i32>} : memref<144x128xbf16, #tpu.memory_space<vmem>>, vector<16x16xbf16>,
    %c4_858 = arith.constant 4 : index
    %c0_859 = arith.constant 0 : index
    %c2_860 = arith.constant 2 : index
    %588 = vector.load %arg14[%c4_858, %c0_859, %c2_860] : memref<18x16x18xbf16, #tpu.memory_space<vmem>>, vector<1x16x16xbf16>
    %589 = vector.shape_cast %588 : vector<1x16x16xbf16> to vector<16x16xbf16>
    %c32_861 = arith.constant 32 : index
    %c32_862 = arith.constant 32 : index
    %590 = vector.load %arg19[%c32_861, %c32_862] : memref<144x128xbf16, #tpu.memory_space<vmem>>, vector<16x16xbf16>
    tpu.vector_store %arg19[%c32_861, %c32_862], %589 {strides = array<i32>} : memref<144x128xbf16, #tpu.memory_space<vmem>>, vector<16x16xbf16>,
    %c5_863 = arith.constant 5 : index
    %c0_864 = arith.constant 0 : index
    %c0_865 = arith.constant 0 : index
    %591 = vector.load %arg14[%c5_863, %c0_864, %c0_865] : memref<18x16x18xbf16, #tpu.memory_space<vmem>>, vector<1x16x16xbf16>
    %592 = vector.shape_cast %591 : vector<1x16x16xbf16> to vector<16x16xbf16>
    %c48_866 = arith.constant 48 : index
    %c32_867 = arith.constant 32 : index
    %593 = vector.load %arg19[%c48_866, %c32_867] : memref<144x128xbf16, #tpu.memory_space<vmem>>, vector<16x16xbf16>
    tpu.vector_store %arg19[%c48_866, %c32_867], %592 {strides = array<i32>} : memref<144x128xbf16, #tpu.memory_space<vmem>>, vector<16x16xbf16>,
    %c5_868 = arith.constant 5 : index
    %c0_869 = arith.constant 0 : index
    %c1_870 = arith.constant 1 : index
    %594 = vector.load %arg14[%c5_868, %c0_869, %c1_870] : memref<18x16x18xbf16, #tpu.memory_space<vmem>>, vector<1x16x16xbf16>
    %595 = vector.shape_cast %594 : vector<1x16x16xbf16> to vector<16x16xbf16>
    %c64_871 = arith.constant 64 : index
    %c32_872 = arith.constant 32 : index
    %596 = vector.load %arg19[%c64_871, %c32_872] : memref<144x128xbf16, #tpu.memory_space<vmem>>, vector<16x16xbf16>
    tpu.vector_store %arg19[%c64_871, %c32_872], %595 {strides = array<i32>} : memref<144x128xbf16, #tpu.memory_space<vmem>>, vector<16x16xbf16>,
    %c5_873 = arith.constant 5 : index
    %c0_874 = arith.constant 0 : index
    %c2_875 = arith.constant 2 : index
    %597 = vector.load %arg14[%c5_873, %c0_874, %c2_875] : memref<18x16x18xbf16, #tpu.memory_space<vmem>>, vector<1x16x16xbf16>
    %598 = vector.shape_cast %597 : vector<1x16x16xbf16> to vector<16x16xbf16>
    %c80_876 = arith.constant 80 : index
    %c32_877 = arith.constant 32 : index
    %599 = vector.load %arg19[%c80_876, %c32_877] : memref<144x128xbf16, #tpu.memory_space<vmem>>, vector<16x16xbf16>
    tpu.vector_store %arg19[%c80_876, %c32_877], %598 {strides = array<i32>} : memref<144x128xbf16, #tpu.memory_space<vmem>>, vector<16x16xbf16>,
    %c6_878 = arith.constant 6 : index
    %c0_879 = arith.constant 0 : index
    %c0_880 = arith.constant 0 : index
    %600 = vector.load %arg14[%c6_878, %c0_879, %c0_880] : memref<18x16x18xbf16, #tpu.memory_space<vmem>>, vector<1x16x16xbf16>
    %601 = vector.shape_cast %600 : vector<1x16x16xbf16> to vector<16x16xbf16>
    %c96_881 = arith.constant 96 : index
    %c32_882 = arith.constant 32 : index
    %602 = vector.load %arg19[%c96_881, %c32_882] : memref<144x128xbf16, #tpu.memory_space<vmem>>, vector<16x16xbf16>
    tpu.vector_store %arg19[%c96_881, %c32_882], %601 {strides = array<i32>} : memref<144x128xbf16, #tpu.memory_space<vmem>>, vector<16x16xbf16>,
    %c6_883 = arith.constant 6 : index
    %c0_884 = arith.constant 0 : index
    %c1_885 = arith.constant 1 : index
    %603 = vector.load %arg14[%c6_883, %c0_884, %c1_885] : memref<18x16x18xbf16, #tpu.memory_space<vmem>>, vector<1x16x16xbf16>
    %604 = vector.shape_cast %603 : vector<1x16x16xbf16> to vector<16x16xbf16>
    %c112_886 = arith.constant 112 : index
    %c32_887 = arith.constant 32 : index
    %605 = vector.load %arg19[%c112_886, %c32_887] : memref<144x128xbf16, #tpu.memory_space<vmem>>, vector<16x16xbf16>
    tpu.vector_store %arg19[%c112_886, %c32_887], %604 {strides = array<i32>} : memref<144x128xbf16, #tpu.memory_space<vmem>>, vector<16x16xbf16>,
    %c6_888 = arith.constant 6 : index
    %c0_889 = arith.constant 0 : index
    %c2_890 = arith.constant 2 : index
    %606 = vector.load %arg14[%c6_888, %c0_889, %c2_890] : memref<18x16x18xbf16, #tpu.memory_space<vmem>>, vector<1x16x16xbf16>
    %607 = vector.shape_cast %606 : vector<1x16x16xbf16> to vector<16x16xbf16>
    %c128_891 = arith.constant 128 : index
    %c32_892 = arith.constant 32 : index
    %608 = vector.load %arg19[%c128_891, %c32_892] : memref<144x128xbf16, #tpu.memory_space<vmem>>, vector<16x16xbf16>
    tpu.vector_store %arg19[%c128_891, %c32_892], %607 {strides = array<i32>} : memref<144x128xbf16, #tpu.memory_space<vmem>>, vector<16x16xbf16>,
    %c6_893 = arith.constant 6 : index
    %c0_894 = arith.constant 0 : index
    %c0_895 = arith.constant 0 : index
    %609 = vector.load %arg14[%c6_893, %c0_894, %c0_895] : memref<18x16x18xbf16, #tpu.memory_space<vmem>>, vector<1x16x16xbf16>
    %610 = vector.shape_cast %609 : vector<1x16x16xbf16> to vector<16x16xbf16>
    %c0_896 = arith.constant 0 : index
    %c48_897 = arith.constant 48 : index
    %611 = vector.load %arg19[%c0_896, %c48_897] : memref<144x128xbf16, #tpu.memory_space<vmem>>, vector<16x16xbf16>
    tpu.vector_store %arg19[%c0_896, %c48_897], %610 {strides = array<i32>} : memref<144x128xbf16, #tpu.memory_space<vmem>>, vector<16x16xbf16>,
    %c6_898 = arith.constant 6 : index
    %c0_899 = arith.constant 0 : index
    %c1_900 = arith.constant 1 : index
    %612 = vector.load %arg14[%c6_898, %c0_899, %c1_900] : memref<18x16x18xbf16, #tpu.memory_space<vmem>>, vector<1x16x16xbf16>
    %613 = vector.shape_cast %612 : vector<1x16x16xbf16> to vector<16x16xbf16>
    %c16_901 = arith.constant 16 : index
    %c48_902 = arith.constant 48 : index
    %614 = vector.load %arg19[%c16_901, %c48_902] : memref<144x128xbf16, #tpu.memory_space<vmem>>, vector<16x16xbf16>
    tpu.vector_store %arg19[%c16_901, %c48_902], %613 {strides = array<i32>} : memref<144x128xbf16, #tpu.memory_space<vmem>>, vector<16x16xbf16>,
    %c6_903 = arith.constant 6 : index
    %c0_904 = arith.constant 0 : index
    %c2_905 = arith.constant 2 : index
    %615 = vector.load %arg14[%c6_903, %c0_904, %c2_905] : memref<18x16x18xbf16, #tpu.memory_space<vmem>>, vector<1x16x16xbf16>
    %616 = vector.shape_cast %615 : vector<1x16x16xbf16> to vector<16x16xbf16>
    %c32_906 = arith.constant 32 : index
    %c48_907 = arith.constant 48 : index
    %617 = vector.load %arg19[%c32_906, %c48_907] : memref<144x128xbf16, #tpu.memory_space<vmem>>, vector<16x16xbf16>
    tpu.vector_store %arg19[%c32_906, %c48_907], %616 {strides = array<i32>} : memref<144x128xbf16, #tpu.memory_space<vmem>>, vector<16x16xbf16>,
    %c7_908 = arith.constant 7 : index
    %c0_909 = arith.constant 0 : index
    %c0_910 = arith.constant 0 : index
    %618 = vector.load %arg14[%c7_908, %c0_909, %c0_910] : memref<18x16x18xbf16, #tpu.memory_space<vmem>>, vector<1x16x16xbf16>
    %619 = vector.shape_cast %618 : vector<1x16x16xbf16> to vector<16x16xbf16>
    %c48_911 = arith.constant 48 : index
    %c48_912 = arith.constant 48 : index
    %620 = vector.load %arg19[%c48_911, %c48_912] : memref<144x128xbf16, #tpu.memory_space<vmem>>, vector<16x16xbf16>
    tpu.vector_store %arg19[%c48_911, %c48_912], %619 {strides = array<i32>} : memref<144x128xbf16, #tpu.memory_space<vmem>>, vector<16x16xbf16>,
    %c7_913 = arith.constant 7 : index
    %c0_914 = arith.constant 0 : index
    %c1_915 = arith.constant 1 : index
    %621 = vector.load %arg14[%c7_913, %c0_914, %c1_915] : memref<18x16x18xbf16, #tpu.memory_space<vmem>>, vector<1x16x16xbf16>
    %622 = vector.shape_cast %621 : vector<1x16x16xbf16> to vector<16x16xbf16>
    %c64_916 = arith.constant 64 : index
    %c48_917 = arith.constant 48 : index
    %623 = vector.load %arg19[%c64_916, %c48_917] : memref<144x128xbf16, #tpu.memory_space<vmem>>, vector<16x16xbf16>
    tpu.vector_store %arg19[%c64_916, %c48_917], %622 {strides = array<i32>} : memref<144x128xbf16, #tpu.memory_space<vmem>>, vector<16x16xbf16>,
    %c7_918 = arith.constant 7 : index
    %c0_919 = arith.constant 0 : index
    %c2_920 = arith.constant 2 : index
    %624 = vector.load %arg14[%c7_918, %c0_919, %c2_920] : memref<18x16x18xbf16, #tpu.memory_space<vmem>>, vector<1x16x16xbf16>
    %625 = vector.shape_cast %624 : vector<1x16x16xbf16> to vector<16x16xbf16>
    %c80_921 = arith.constant 80 : index
    %c48_922 = arith.constant 48 : index
    %626 = vector.load %arg19[%c80_921, %c48_922] : memref<144x128xbf16, #tpu.memory_space<vmem>>, vector<16x16xbf16>
    tpu.vector_store %arg19[%c80_921, %c48_922], %625 {strides = array<i32>} : memref<144x128xbf16, #tpu.memory_space<vmem>>, vector<16x16xbf16>,
    %c8_923 = arith.constant 8 : index
    %c0_924 = arith.constant 0 : index
    %c0_925 = arith.constant 0 : index
    %627 = vector.load %arg14[%c8_923, %c0_924, %c0_925] : memref<18x16x18xbf16, #tpu.memory_space<vmem>>, vector<1x16x16xbf16>
    %628 = vector.shape_cast %627 : vector<1x16x16xbf16> to vector<16x16xbf16>
    %c96_926 = arith.constant 96 : index
    %c48_927 = arith.constant 48 : index
    %629 = vector.load %arg19[%c96_926, %c48_927] : memref<144x128xbf16, #tpu.memory_space<vmem>>, vector<16x16xbf16>
    tpu.vector_store %arg19[%c96_926, %c48_927], %628 {strides = array<i32>} : memref<144x128xbf16, #tpu.memory_space<vmem>>, vector<16x16xbf16>,
    %c8_928 = arith.constant 8 : index
    %c0_929 = arith.constant 0 : index
    %c1_930 = arith.constant 1 : index
    %630 = vector.load %arg14[%c8_928, %c0_929, %c1_930] : memref<18x16x18xbf16, #tpu.memory_space<vmem>>, vector<1x16x16xbf16>
    %631 = vector.shape_cast %630 : vector<1x16x16xbf16> to vector<16x16xbf16>
    %c112_931 = arith.constant 112 : index
    %c48_932 = arith.constant 48 : index
    %632 = vector.load %arg19[%c112_931, %c48_932] : memref<144x128xbf16, #tpu.memory_space<vmem>>, vector<16x16xbf16>
    tpu.vector_store %arg19[%c112_931, %c48_932], %631 {strides = array<i32>} : memref<144x128xbf16, #tpu.memory_space<vmem>>, vector<16x16xbf16>,
    %c8_933 = arith.constant 8 : index
    %c0_934 = arith.constant 0 : index
    %c2_935 = arith.constant 2 : index
    %633 = vector.load %arg14[%c8_933, %c0_934, %c2_935] : memref<18x16x18xbf16, #tpu.memory_space<vmem>>, vector<1x16x16xbf16>
    %634 = vector.shape_cast %633 : vector<1x16x16xbf16> to vector<16x16xbf16>
    %c128_936 = arith.constant 128 : index
    %c48_937 = arith.constant 48 : index
    %635 = vector.load %arg19[%c128_936, %c48_937] : memref<144x128xbf16, #tpu.memory_space<vmem>>, vector<16x16xbf16>
    tpu.vector_store %arg19[%c128_936, %c48_937], %634 {strides = array<i32>} : memref<144x128xbf16, #tpu.memory_space<vmem>>, vector<16x16xbf16>,
    %c8_938 = arith.constant 8 : index
    %c0_939 = arith.constant 0 : index
    %c0_940 = arith.constant 0 : index
    %636 = vector.load %arg14[%c8_938, %c0_939, %c0_940] : memref<18x16x18xbf16, #tpu.memory_space<vmem>>, vector<1x16x16xbf16>
    %637 = vector.shape_cast %636 : vector<1x16x16xbf16> to vector<16x16xbf16>
    %c0_941 = arith.constant 0 : index
    %c64_942 = arith.constant 64 : index
    %638 = vector.load %arg19[%c0_941, %c64_942] : memref<144x128xbf16, #tpu.memory_space<vmem>>, vector<16x16xbf16>
    tpu.vector_store %arg19[%c0_941, %c64_942], %637 {strides = array<i32>} : memref<144x128xbf16, #tpu.memory_space<vmem>>, vector<16x16xbf16>,
    %c8_943 = arith.constant 8 : index
    %c0_944 = arith.constant 0 : index
    %c1_945 = arith.constant 1 : index
    %639 = vector.load %arg14[%c8_943, %c0_944, %c1_945] : memref<18x16x18xbf16, #tpu.memory_space<vmem>>, vector<1x16x16xbf16>
    %640 = vector.shape_cast %639 : vector<1x16x16xbf16> to vector<16x16xbf16>
    %c16_946 = arith.constant 16 : index
    %c64_947 = arith.constant 64 : index
    %641 = vector.load %arg19[%c16_946, %c64_947] : memref<144x128xbf16, #tpu.memory_space<vmem>>, vector<16x16xbf16>
    tpu.vector_store %arg19[%c16_946, %c64_947], %640 {strides = array<i32>} : memref<144x128xbf16, #tpu.memory_space<vmem>>, vector<16x16xbf16>,
    %c8_948 = arith.constant 8 : index
    %c0_949 = arith.constant 0 : index
    %c2_950 = arith.constant 2 : index
    %642 = vector.load %arg14[%c8_948, %c0_949, %c2_950] : memref<18x16x18xbf16, #tpu.memory_space<vmem>>, vector<1x16x16xbf16>
    %643 = vector.shape_cast %642 : vector<1x16x16xbf16> to vector<16x16xbf16>
    %c32_951 = arith.constant 32 : index
    %c64_952 = arith.constant 64 : index
    %644 = vector.load %arg19[%c32_951, %c64_952] : memref<144x128xbf16, #tpu.memory_space<vmem>>, vector<16x16xbf16>
    tpu.vector_store %arg19[%c32_951, %c64_952], %643 {strides = array<i32>} : memref<144x128xbf16, #tpu.memory_space<vmem>>, vector<16x16xbf16>,
    %c9_953 = arith.constant 9 : index
    %c0_954 = arith.constant 0 : index
    %c0_955 = arith.constant 0 : index
    %645 = vector.load %arg14[%c9_953, %c0_954, %c0_955] : memref<18x16x18xbf16, #tpu.memory_space<vmem>>, vector<1x16x16xbf16>
    %646 = vector.shape_cast %645 : vector<1x16x16xbf16> to vector<16x16xbf16>
    %c48_956 = arith.constant 48 : index
    %c64_957 = arith.constant 64 : index
    %647 = vector.load %arg19[%c48_956, %c64_957] : memref<144x128xbf16, #tpu.memory_space<vmem>>, vector<16x16xbf16>
    tpu.vector_store %arg19[%c48_956, %c64_957], %646 {strides = array<i32>} : memref<144x128xbf16, #tpu.memory_space<vmem>>, vector<16x16xbf16>,
    %c9_958 = arith.constant 9 : index
    %c0_959 = arith.constant 0 : index
    %c1_960 = arith.constant 1 : index
    %648 = vector.load %arg14[%c9_958, %c0_959, %c1_960] : memref<18x16x18xbf16, #tpu.memory_space<vmem>>, vector<1x16x16xbf16>
    %649 = vector.shape_cast %648 : vector<1x16x16xbf16> to vector<16x16xbf16>
    %c64_961 = arith.constant 64 : index
    %c64_962 = arith.constant 64 : index
    %650 = vector.load %arg19[%c64_961, %c64_962] : memref<144x128xbf16, #tpu.memory_space<vmem>>, vector<16x16xbf16>
    tpu.vector_store %arg19[%c64_961, %c64_962], %649 {strides = array<i32>} : memref<144x128xbf16, #tpu.memory_space<vmem>>, vector<16x16xbf16>,
    %c9_963 = arith.constant 9 : index
    %c0_964 = arith.constant 0 : index
    %c2_965 = arith.constant 2 : index
    %651 = vector.load %arg14[%c9_963, %c0_964, %c2_965] : memref<18x16x18xbf16, #tpu.memory_space<vmem>>, vector<1x16x16xbf16>
    %652 = vector.shape_cast %651 : vector<1x16x16xbf16> to vector<16x16xbf16>
    %c80_966 = arith.constant 80 : index
    %c64_967 = arith.constant 64 : index
    %653 = vector.load %arg19[%c80_966, %c64_967] : memref<144x128xbf16, #tpu.memory_space<vmem>>, vector<16x16xbf16>
    tpu.vector_store %arg19[%c80_966, %c64_967], %652 {strides = array<i32>} : memref<144x128xbf16, #tpu.memory_space<vmem>>, vector<16x16xbf16>,
    %c10_968 = arith.constant 10 : index
    %c0_969 = arith.constant 0 : index
    %c0_970 = arith.constant 0 : index
    %654 = vector.load %arg14[%c10_968, %c0_969, %c0_970] : memref<18x16x18xbf16, #tpu.memory_space<vmem>>, vector<1x16x16xbf16>
    %655 = vector.shape_cast %654 : vector<1x16x16xbf16> to vector<16x16xbf16>
    %c96_971 = arith.constant 96 : index
    %c64_972 = arith.constant 64 : index
    %656 = vector.load %arg19[%c96_971, %c64_972] : memref<144x128xbf16, #tpu.memory_space<vmem>>, vector<16x16xbf16>
    tpu.vector_store %arg19[%c96_971, %c64_972], %655 {strides = array<i32>} : memref<144x128xbf16, #tpu.memory_space<vmem>>, vector<16x16xbf16>,
    %c10_973 = arith.constant 10 : index
    %c0_974 = arith.constant 0 : index
    %c1_975 = arith.constant 1 : index
    %657 = vector.load %arg14[%c10_973, %c0_974, %c1_975] : memref<18x16x18xbf16, #tpu.memory_space<vmem>>, vector<1x16x16xbf16>
    %658 = vector.shape_cast %657 : vector<1x16x16xbf16> to vector<16x16xbf16>
    %c112_976 = arith.constant 112 : index
    %c64_977 = arith.constant 64 : index
    %659 = vector.load %arg19[%c112_976, %c64_977] : memref<144x128xbf16, #tpu.memory_space<vmem>>, vector<16x16xbf16>
    tpu.vector_store %arg19[%c112_976, %c64_977], %658 {strides = array<i32>} : memref<144x128xbf16, #tpu.memory_space<vmem>>, vector<16x16xbf16>,
    %c10_978 = arith.constant 10 : index
    %c0_979 = arith.constant 0 : index
    %c2_980 = arith.constant 2 : index
    %660 = vector.load %arg14[%c10_978, %c0_979, %c2_980] : memref<18x16x18xbf16, #tpu.memory_space<vmem>>, vector<1x16x16xbf16>
    %661 = vector.shape_cast %660 : vector<1x16x16xbf16> to vector<16x16xbf16>
    %c128_981 = arith.constant 128 : index
    %c64_982 = arith.constant 64 : index
    %662 = vector.load %arg19[%c128_981, %c64_982] : memref<144x128xbf16, #tpu.memory_space<vmem>>, vector<16x16xbf16>
    tpu.vector_store %arg19[%c128_981, %c64_982], %661 {strides = array<i32>} : memref<144x128xbf16, #tpu.memory_space<vmem>>, vector<16x16xbf16>,
    %c10_983 = arith.constant 10 : index
    %c0_984 = arith.constant 0 : index
    %c0_985 = arith.constant 0 : index
    %663 = vector.load %arg14[%c10_983, %c0_984, %c0_985] : memref<18x16x18xbf16, #tpu.memory_space<vmem>>, vector<1x16x16xbf16>
    %664 = vector.shape_cast %663 : vector<1x16x16xbf16> to vector<16x16xbf16>
    %c0_986 = arith.constant 0 : index
    %c80_987 = arith.constant 80 : index
    %665 = vector.load %arg19[%c0_986, %c80_987] : memref<144x128xbf16, #tpu.memory_space<vmem>>, vector<16x16xbf16>
    tpu.vector_store %arg19[%c0_986, %c80_987], %664 {strides = array<i32>} : memref<144x128xbf16, #tpu.memory_space<vmem>>, vector<16x16xbf16>,
    %c10_988 = arith.constant 10 : index
    %c0_989 = arith.constant 0 : index
    %c1_990 = arith.constant 1 : index
    %666 = vector.load %arg14[%c10_988, %c0_989, %c1_990] : memref<18x16x18xbf16, #tpu.memory_space<vmem>>, vector<1x16x16xbf16>
    %667 = vector.shape_cast %666 : vector<1x16x16xbf16> to vector<16x16xbf16>
    %c16_991 = arith.constant 16 : index
    %c80_992 = arith.constant 80 : index
    %668 = vector.load %arg19[%c16_991, %c80_992] : memref<144x128xbf16, #tpu.memory_space<vmem>>, vector<16x16xbf16>
    tpu.vector_store %arg19[%c16_991, %c80_992], %667 {strides = array<i32>} : memref<144x128xbf16, #tpu.memory_space<vmem>>, vector<16x16xbf16>,
    %c10_993 = arith.constant 10 : index
    %c0_994 = arith.constant 0 : index
    %c2_995 = arith.constant 2 : index
    %669 = vector.load %arg14[%c10_993, %c0_994, %c2_995] : memref<18x16x18xbf16, #tpu.memory_space<vmem>>, vector<1x16x16xbf16>
    %670 = vector.shape_cast %669 : vector<1x16x16xbf16> to vector<16x16xbf16>
    %c32_996 = arith.constant 32 : index
    %c80_997 = arith.constant 80 : index
    %671 = vector.load %arg19[%c32_996, %c80_997] : memref<144x128xbf16, #tpu.memory_space<vmem>>, vector<16x16xbf16>
    tpu.vector_store %arg19[%c32_996, %c80_997], %670 {strides = array<i32>} : memref<144x128xbf16, #tpu.memory_space<vmem>>, vector<16x16xbf16>,
    %c11_998 = arith.constant 11 : index
    %c0_999 = arith.constant 0 : index
    %c0_1000 = arith.constant 0 : index
    %672 = vector.load %arg14[%c11_998, %c0_999, %c0_1000] : memref<18x16x18xbf16, #tpu.memory_space<vmem>>, vector<1x16x16xbf16>
    %673 = vector.shape_cast %672 : vector<1x16x16xbf16> to vector<16x16xbf16>
    %c48_1001 = arith.constant 48 : index
    %c80_1002 = arith.constant 80 : index
    %674 = vector.load %arg19[%c48_1001, %c80_1002] : memref<144x128xbf16, #tpu.memory_space<vmem>>, vector<16x16xbf16>
    tpu.vector_store %arg19[%c48_1001, %c80_1002], %673 {strides = array<i32>} : memref<144x128xbf16, #tpu.memory_space<vmem>>, vector<16x16xbf16>,
    %c11_1003 = arith.constant 11 : index
    %c0_1004 = arith.constant 0 : index
    %c1_1005 = arith.constant 1 : index
    %675 = vector.load %arg14[%c11_1003, %c0_1004, %c1_1005] : memref<18x16x18xbf16, #tpu.memory_space<vmem>>, vector<1x16x16xbf16>
    %676 = vector.shape_cast %675 : vector<1x16x16xbf16> to vector<16x16xbf16>
    %c64_1006 = arith.constant 64 : index
    %c80_1007 = arith.constant 80 : index
    %677 = vector.load %arg19[%c64_1006, %c80_1007] : memref<144x128xbf16, #tpu.memory_space<vmem>>, vector<16x16xbf16>
    tpu.vector_store %arg19[%c64_1006, %c80_1007], %676 {strides = array<i32>} : memref<144x128xbf16, #tpu.memory_space<vmem>>, vector<16x16xbf16>,
    %c11_1008 = arith.constant 11 : index
    %c0_1009 = arith.constant 0 : index
    %c2_1010 = arith.constant 2 : index
    %678 = vector.load %arg14[%c11_1008, %c0_1009, %c2_1010] : memref<18x16x18xbf16, #tpu.memory_space<vmem>>, vector<1x16x16xbf16>
    %679 = vector.shape_cast %678 : vector<1x16x16xbf16> to vector<16x16xbf16>
    %c80_1011 = arith.constant 80 : index
    %c80_1012 = arith.constant 80 : index
    %680 = vector.load %arg19[%c80_1011, %c80_1012] : memref<144x128xbf16, #tpu.memory_space<vmem>>, vector<16x16xbf16>
    tpu.vector_store %arg19[%c80_1011, %c80_1012], %679 {strides = array<i32>} : memref<144x128xbf16, #tpu.memory_space<vmem>>, vector<16x16xbf16>,
    %c12_1013 = arith.constant 12 : index
    %c0_1014 = arith.constant 0 : index
    %c0_1015 = arith.constant 0 : index
    %681 = vector.load %arg14[%c12_1013, %c0_1014, %c0_1015] : memref<18x16x18xbf16, #tpu.memory_space<vmem>>, vector<1x16x16xbf16>
    %682 = vector.shape_cast %681 : vector<1x16x16xbf16> to vector<16x16xbf16>
    %c96_1016 = arith.constant 96 : index
    %c80_1017 = arith.constant 80 : index
    %683 = vector.load %arg19[%c96_1016, %c80_1017] : memref<144x128xbf16, #tpu.memory_space<vmem>>, vector<16x16xbf16>
    tpu.vector_store %arg19[%c96_1016, %c80_1017], %682 {strides = array<i32>} : memref<144x128xbf16, #tpu.memory_space<vmem>>, vector<16x16xbf16>,
    %c12_1018 = arith.constant 12 : index
    %c0_1019 = arith.constant 0 : index
    %c1_1020 = arith.constant 1 : index
    %684 = vector.load %arg14[%c12_1018, %c0_1019, %c1_1020] : memref<18x16x18xbf16, #tpu.memory_space<vmem>>, vector<1x16x16xbf16>
    %685 = vector.shape_cast %684 : vector<1x16x16xbf16> to vector<16x16xbf16>
    %c112_1021 = arith.constant 112 : index
    %c80_1022 = arith.constant 80 : index
    %686 = vector.load %arg19[%c112_1021, %c80_1022] : memref<144x128xbf16, #tpu.memory_space<vmem>>, vector<16x16xbf16>
    tpu.vector_store %arg19[%c112_1021, %c80_1022], %685 {strides = array<i32>} : memref<144x128xbf16, #tpu.memory_space<vmem>>, vector<16x16xbf16>,
    %c12_1023 = arith.constant 12 : index
    %c0_1024 = arith.constant 0 : index
    %c2_1025 = arith.constant 2 : index
    %687 = vector.load %arg14[%c12_1023, %c0_1024, %c2_1025] : memref<18x16x18xbf16, #tpu.memory_space<vmem>>, vector<1x16x16xbf16>
    %688 = vector.shape_cast %687 : vector<1x16x16xbf16> to vector<16x16xbf16>
    %c128_1026 = arith.constant 128 : index
    %c80_1027 = arith.constant 80 : index
    %689 = vector.load %arg19[%c128_1026, %c80_1027] : memref<144x128xbf16, #tpu.memory_space<vmem>>, vector<16x16xbf16>
    tpu.vector_store %arg19[%c128_1026, %c80_1027], %688 {strides = array<i32>} : memref<144x128xbf16, #tpu.memory_space<vmem>>, vector<16x16xbf16>,
    %c12_1028 = arith.constant 12 : index
    %c0_1029 = arith.constant 0 : index
    %c0_1030 = arith.constant 0 : index
    %690 = vector.load %arg14[%c12_1028, %c0_1029, %c0_1030] : memref<18x16x18xbf16, #tpu.memory_space<vmem>>, vector<1x16x16xbf16>
    %691 = vector.shape_cast %690 : vector<1x16x16xbf16> to vector<16x16xbf16>
    %c0_1031 = arith.constant 0 : index
    %c96_1032 = arith.constant 96 : index
    %692 = vector.load %arg19[%c0_1031, %c96_1032] : memref<144x128xbf16, #tpu.memory_space<vmem>>, vector<16x16xbf16>
    tpu.vector_store %arg19[%c0_1031, %c96_1032], %691 {strides = array<i32>} : memref<144x128xbf16, #tpu.memory_space<vmem>>, vector<16x16xbf16>,
    %c12_1033 = arith.constant 12 : index
    %c0_1034 = arith.constant 0 : index
    %c1_1035 = arith.constant 1 : index
    %693 = vector.load %arg14[%c12_1033, %c0_1034, %c1_1035] : memref<18x16x18xbf16, #tpu.memory_space<vmem>>, vector<1x16x16xbf16>
    %694 = vector.shape_cast %693 : vector<1x16x16xbf16> to vector<16x16xbf16>
    %c16_1036 = arith.constant 16 : index
    %c96_1037 = arith.constant 96 : index
    %695 = vector.load %arg19[%c16_1036, %c96_1037] : memref<144x128xbf16, #tpu.memory_space<vmem>>, vector<16x16xbf16>
    tpu.vector_store %arg19[%c16_1036, %c96_1037], %694 {strides = array<i32>} : memref<144x128xbf16, #tpu.memory_space<vmem>>, vector<16x16xbf16>,
    %c12_1038 = arith.constant 12 : index
    %c0_1039 = arith.constant 0 : index
    %c2_1040 = arith.constant 2 : index
    %696 = vector.load %arg14[%c12_1038, %c0_1039, %c2_1040] : memref<18x16x18xbf16, #tpu.memory_space<vmem>>, vector<1x16x16xbf16>
    %697 = vector.shape_cast %696 : vector<1x16x16xbf16> to vector<16x16xbf16>
    %c32_1041 = arith.constant 32 : index
    %c96_1042 = arith.constant 96 : index
    %698 = vector.load %arg19[%c32_1041, %c96_1042] : memref<144x128xbf16, #tpu.memory_space<vmem>>, vector<16x16xbf16>
    tpu.vector_store %arg19[%c32_1041, %c96_1042], %697 {strides = array<i32>} : memref<144x128xbf16, #tpu.memory_space<vmem>>, vector<16x16xbf16>,
    %c13_1043 = arith.constant 13 : index
    %c0_1044 = arith.constant 0 : index
    %c0_1045 = arith.constant 0 : index
    %699 = vector.load %arg14[%c13_1043, %c0_1044, %c0_1045] : memref<18x16x18xbf16, #tpu.memory_space<vmem>>, vector<1x16x16xbf16>
    %700 = vector.shape_cast %699 : vector<1x16x16xbf16> to vector<16x16xbf16>
    %c48_1046 = arith.constant 48 : index
    %c96_1047 = arith.constant 96 : index
    %701 = vector.load %arg19[%c48_1046, %c96_1047] : memref<144x128xbf16, #tpu.memory_space<vmem>>, vector<16x16xbf16>
    tpu.vector_store %arg19[%c48_1046, %c96_1047], %700 {strides = array<i32>} : memref<144x128xbf16, #tpu.memory_space<vmem>>, vector<16x16xbf16>,
    %c13_1048 = arith.constant 13 : index
    %c0_1049 = arith.constant 0 : index
    %c1_1050 = arith.constant 1 : index
    %702 = vector.load %arg14[%c13_1048, %c0_1049, %c1_1050] : memref<18x16x18xbf16, #tpu.memory_space<vmem>>, vector<1x16x16xbf16>
    %703 = vector.shape_cast %702 : vector<1x16x16xbf16> to vector<16x16xbf16>
    %c64_1051 = arith.constant 64 : index
    %c96_1052 = arith.constant 96 : index
    %704 = vector.load %arg19[%c64_1051, %c96_1052] : memref<144x128xbf16, #tpu.memory_space<vmem>>, vector<16x16xbf16>
    tpu.vector_store %arg19[%c64_1051, %c96_1052], %703 {strides = array<i32>} : memref<144x128xbf16, #tpu.memory_space<vmem>>, vector<16x16xbf16>,
    %c13_1053 = arith.constant 13 : index
    %c0_1054 = arith.constant 0 : index
    %c2_1055 = arith.constant 2 : index
    %705 = vector.load %arg14[%c13_1053, %c0_1054, %c2_1055] : memref<18x16x18xbf16, #tpu.memory_space<vmem>>, vector<1x16x16xbf16>
    %706 = vector.shape_cast %705 : vector<1x16x16xbf16> to vector<16x16xbf16>
    %c80_1056 = arith.constant 80 : index
    %c96_1057 = arith.constant 96 : index
    %707 = vector.load %arg19[%c80_1056, %c96_1057] : memref<144x128xbf16, #tpu.memory_space<vmem>>, vector<16x16xbf16>
    tpu.vector_store %arg19[%c80_1056, %c96_1057], %706 {strides = array<i32>} : memref<144x128xbf16, #tpu.memory_space<vmem>>, vector<16x16xbf16>,
    %c14_1058 = arith.constant 14 : index
    %c0_1059 = arith.constant 0 : index
    %c0_1060 = arith.constant 0 : index
    %708 = vector.load %arg14[%c14_1058, %c0_1059, %c0_1060] : memref<18x16x18xbf16, #tpu.memory_space<vmem>>, vector<1x16x16xbf16>
    %709 = vector.shape_cast %708 : vector<1x16x16xbf16> to vector<16x16xbf16>
    %c96_1061 = arith.constant 96 : index
    %c96_1062 = arith.constant 96 : index
    %710 = vector.load %arg19[%c96_1061, %c96_1062] : memref<144x128xbf16, #tpu.memory_space<vmem>>, vector<16x16xbf16>
    tpu.vector_store %arg19[%c96_1061, %c96_1062], %709 {strides = array<i32>} : memref<144x128xbf16, #tpu.memory_space<vmem>>, vector<16x16xbf16>,
    %c14_1063 = arith.constant 14 : index
    %c0_1064 = arith.constant 0 : index
    %c1_1065 = arith.constant 1 : index
    %711 = vector.load %arg14[%c14_1063, %c0_1064, %c1_1065] : memref<18x16x18xbf16, #tpu.memory_space<vmem>>, vector<1x16x16xbf16>
    %712 = vector.shape_cast %711 : vector<1x16x16xbf16> to vector<16x16xbf16>
    %c112_1066 = arith.constant 112 : index
    %c96_1067 = arith.constant 96 : index
    %713 = vector.load %arg19[%c112_1066, %c96_1067] : memref<144x128xbf16, #tpu.memory_space<vmem>>, vector<16x16xbf16>
    tpu.vector_store %arg19[%c112_1066, %c96_1067], %712 {strides = array<i32>} : memref<144x128xbf16, #tpu.memory_space<vmem>>, vector<16x16xbf16>,
    %c14_1068 = arith.constant 14 : index
    %c0_1069 = arith.constant 0 : index
    %c2_1070 = arith.constant 2 : index
    %714 = vector.load %arg14[%c14_1068, %c0_1069, %c2_1070] : memref<18x16x18xbf16, #tpu.memory_space<vmem>>, vector<1x16x16xbf16>
    %715 = vector.shape_cast %714 : vector<1x16x16xbf16> to vector<16x16xbf16>
    %c128_1071 = arith.constant 128 : index
    %c96_1072 = arith.constant 96 : index
    %716 = vector.load %arg19[%c128_1071, %c96_1072] : memref<144x128xbf16, #tpu.memory_space<vmem>>, vector<16x16xbf16>
    tpu.vector_store %arg19[%c128_1071, %c96_1072], %715 {strides = array<i32>} : memref<144x128xbf16, #tpu.memory_space<vmem>>, vector<16x16xbf16>,
    %c14_1073 = arith.constant 14 : index
    %c0_1074 = arith.constant 0 : index
    %c0_1075 = arith.constant 0 : index
    %717 = vector.load %arg14[%c14_1073, %c0_1074, %c0_1075] : memref<18x16x18xbf16, #tpu.memory_space<vmem>>, vector<1x16x16xbf16>
    %718 = vector.shape_cast %717 : vector<1x16x16xbf16> to vector<16x16xbf16>
    %c0_1076 = arith.constant 0 : index
    %c112_1077 = arith.constant 112 : index
    %719 = vector.load %arg19[%c0_1076, %c112_1077] : memref<144x128xbf16, #tpu.memory_space<vmem>>, vector<16x16xbf16>
    tpu.vector_store %arg19[%c0_1076, %c112_1077], %718 {strides = array<i32>} : memref<144x128xbf16, #tpu.memory_space<vmem>>, vector<16x16xbf16>,
    %c14_1078 = arith.constant 14 : index
    %c0_1079 = arith.constant 0 : index
    %c1_1080 = arith.constant 1 : index
    %720 = vector.load %arg14[%c14_1078, %c0_1079, %c1_1080] : memref<18x16x18xbf16, #tpu.memory_space<vmem>>, vector<1x16x16xbf16>
    %721 = vector.shape_cast %720 : vector<1x16x16xbf16> to vector<16x16xbf16>
    %c16_1081 = arith.constant 16 : index
    %c112_1082 = arith.constant 112 : index
    %722 = vector.load %arg19[%c16_1081, %c112_1082] : memref<144x128xbf16, #tpu.memory_space<vmem>>, vector<16x16xbf16>
    tpu.vector_store %arg19[%c16_1081, %c112_1082], %721 {strides = array<i32>} : memref<144x128xbf16, #tpu.memory_space<vmem>>, vector<16x16xbf16>,
    %c14_1083 = arith.constant 14 : index
    %c0_1084 = arith.constant 0 : index
    %c2_1085 = arith.constant 2 : index
    %723 = vector.load %arg14[%c14_1083, %c0_1084, %c2_1085] : memref<18x16x18xbf16, #tpu.memory_space<vmem>>, vector<1x16x16xbf16>
    %724 = vector.shape_cast %723 : vector<1x16x16xbf16> to vector<16x16xbf16>
    %c32_1086 = arith.constant 32 : index
    %c112_1087 = arith.constant 112 : index
    %725 = vector.load %arg19[%c32_1086, %c112_1087] : memref<144x128xbf16, #tpu.memory_space<vmem>>, vector<16x16xbf16>
    tpu.vector_store %arg19[%c32_1086, %c112_1087], %724 {strides = array<i32>} : memref<144x128xbf16, #tpu.memory_space<vmem>>, vector<16x16xbf16>,
    %c15_1088 = arith.constant 15 : index
    %c0_1089 = arith.constant 0 : index
    %c0_1090 = arith.constant 0 : index
    %726 = vector.load %arg14[%c15_1088, %c0_1089, %c0_1090] : memref<18x16x18xbf16, #tpu.memory_space<vmem>>, vector<1x16x16xbf16>
    %727 = vector.shape_cast %726 : vector<1x16x16xbf16> to vector<16x16xbf16>
    %c48_1091 = arith.constant 48 : index
    %c112_1092 = arith.constant 112 : index
    %728 = vector.load %arg19[%c48_1091, %c112_1092] : memref<144x128xbf16, #tpu.memory_space<vmem>>, vector<16x16xbf16>
    tpu.vector_store %arg19[%c48_1091, %c112_1092], %727 {strides = array<i32>} : memref<144x128xbf16, #tpu.memory_space<vmem>>, vector<16x16xbf16>,
    %c15_1093 = arith.constant 15 : index
    %c0_1094 = arith.constant 0 : index
    %c1_1095 = arith.constant 1 : index
    %729 = vector.load %arg14[%c15_1093, %c0_1094, %c1_1095] : memref<18x16x18xbf16, #tpu.memory_space<vmem>>, vector<1x16x16xbf16>
    %730 = vector.shape_cast %729 : vector<1x16x16xbf16> to vector<16x16xbf16>
    %c64_1096 = arith.constant 64 : index
    %c112_1097 = arith.constant 112 : index
    %731 = vector.load %arg19[%c64_1096, %c112_1097] : memref<144x128xbf16, #tpu.memory_space<vmem>>, vector<16x16xbf16>
    tpu.vector_store %arg19[%c64_1096, %c112_1097], %730 {strides = array<i32>} : memref<144x128xbf16, #tpu.memory_space<vmem>>, vector<16x16xbf16>,
    %c15_1098 = arith.constant 15 : index
    %c0_1099 = arith.constant 0 : index
    %c2_1100 = arith.constant 2 : index
    %732 = vector.load %arg14[%c15_1098, %c0_1099, %c2_1100] : memref<18x16x18xbf16, #tpu.memory_space<vmem>>, vector<1x16x16xbf16>
    %733 = vector.shape_cast %732 : vector<1x16x16xbf16> to vector<16x16xbf16>
    %c80_1101 = arith.constant 80 : index
    %c112_1102 = arith.constant 112 : index
    %734 = vector.load %arg19[%c80_1101, %c112_1102] : memref<144x128xbf16, #tpu.memory_space<vmem>>, vector<16x16xbf16>
    tpu.vector_store %arg19[%c80_1101, %c112_1102], %733 {strides = array<i32>} : memref<144x128xbf16, #tpu.memory_space<vmem>>, vector<16x16xbf16>,
    %c16_1103 = arith.constant 16 : index
    %c0_1104 = arith.constant 0 : index
    %c0_1105 = arith.constant 0 : index
    %735 = vector.load %arg14[%c16_1103, %c0_1104, %c0_1105] : memref<18x16x18xbf16, #tpu.memory_space<vmem>>, vector<1x16x16xbf16>
    %736 = vector.shape_cast %735 : vector<1x16x16xbf16> to vector<16x16xbf16>
    %c96_1106 = arith.constant 96 : index
    %c112_1107 = arith.constant 112 : index
    %737 = vector.load %arg19[%c96_1106, %c112_1107] : memref<144x128xbf16, #tpu.memory_space<vmem>>, vector<16x16xbf16>
    tpu.vector_store %arg19[%c96_1106, %c112_1107], %736 {strides = array<i32>} : memref<144x128xbf16, #tpu.memory_space<vmem>>, vector<16x16xbf16>,
    %c16_1108 = arith.constant 16 : index
    %c0_1109 = arith.constant 0 : index
    %c1_1110 = arith.constant 1 : index
    %738 = vector.load %arg14[%c16_1108, %c0_1109, %c1_1110] : memref<18x16x18xbf16, #tpu.memory_space<vmem>>, vector<1x16x16xbf16>
    %739 = vector.shape_cast %738 : vector<1x16x16xbf16> to vector<16x16xbf16>
    %c112_1111 = arith.constant 112 : index
    %c112_1112 = arith.constant 112 : index
    %740 = vector.load %arg19[%c112_1111, %c112_1112] : memref<144x128xbf16, #tpu.memory_space<vmem>>, vector<16x16xbf16>
    tpu.vector_store %arg19[%c112_1111, %c112_1112], %739 {strides = array<i32>} : memref<144x128xbf16, #tpu.memory_space<vmem>>, vector<16x16xbf16>,
    %c16_1113 = arith.constant 16 : index
    %c0_1114 = arith.constant 0 : index
    %c2_1115 = arith.constant 2 : index
    %741 = vector.load %arg14[%c16_1113, %c0_1114, %c2_1115] : memref<18x16x18xbf16, #tpu.memory_space<vmem>>, vector<1x16x16xbf16>
    %742 = vector.shape_cast %741 : vector<1x16x16xbf16> to vector<16x16xbf16>
    %c128_1116 = arith.constant 128 : index
    %c112_1117 = arith.constant 112 : index
    %743 = vector.load %arg19[%c128_1116, %c112_1117] : memref<144x128xbf16, #tpu.memory_space<vmem>>, vector<16x16xbf16>
    tpu.vector_store %arg19[%c128_1116, %c112_1117], %742 {strides = array<i32>} : memref<144x128xbf16, #tpu.memory_space<vmem>>, vector<16x16xbf16>,
    %c0_1118 = arith.constant 0 : index
    %c0_1119 = arith.constant 0 : index
    %744 = vector.load %arg3[%c0_1118, %c0_1119] : memref<32x144xbf16, #tpu.memory_space<vmem>>, vector<32x144xbf16>
    %c0_1120 = arith.constant 0 : index
    %c0_1121 = arith.constant 0 : index
    %745 = vector.load %arg19[%c0_1120, %c0_1121] : memref<144x128xbf16, #tpu.memory_space<vmem>>, vector<144x128xbf16>
    %cst_1122 = arith.constant dense<0.000000e+00> : vector<32x128xf32>
    %746 = tpu.matmul %744, %745, %cst_1122 {dimension_numbers = #tpu.dot_dimension_numbers<[1], [0], [0], [1], [0, 0, 1, 1], [], []>} : vector<32x144xbf16>, vector<144x128xbf16>, vector<32x128xf32> -> vector<32x128xf32>
    %c0_1123 = arith.constant 0 : index
    %c0_1124 = arith.constant 0 : index
    %747 = vector.load %arg8[%c0_1123, %c0_1124] : memref<32x1xf32, #tpu.memory_space<vmem>>, vector<32x1xf32>
    %748 = vector.broadcast %747 : vector<32x1xf32> to vector<32x128xf32>
    %749 = arith.addf %746, %748 : vector<32x128xf32>
    %cst_1125 = arith.constant 2.000000e-01 : f32
    %750 = vector.broadcast %cst_1125 : f32 to vector<32x128xf32>
    %751 = arith.mulf %750, %749 : vector<32x128xf32>
    %752 = arith.maximumf %749, %751 : vector<32x128xf32>
    %753 = tpu.iota {dimensions = array<i32: 0>} : vector<16x8xi32>
    %754 = tpu.iota {dimensions = array<i32: 1>} : vector<16x8xi32>
    %c2_i32 = arith.constant 2 : i32
    %755 = vector.broadcast %c2_i32 : i32 to vector<16x8xi32>
    %756 = arith.muli %755, %754 : vector<16x8xi32>
    %757 = arith.cmpi eq, %753, %756 : vector<16x8xi32>
    %758 = arith.extui %757 : vector<16x8xi1> to vector<16x8xi32>
    %759 = arith.sitofp %758 : vector<16x8xi32> to vector<16x8xf32>
    %cst_1126 = arith.constant 0.000000e+00 : bf16
    %760 = vector.broadcast %cst_1126 : bf16 to vector<10x32x10xbf16>
    %c0_1127 = arith.constant 0 : index
    %c0_1128 = arith.constant 0 : index
    %c0_1129 = arith.constant 0 : index
    %761 = vector.load %arg15[%c0_1127, %c0_1128, %c0_1129] : memref<10x32x10xbf16, #tpu.memory_space<vmem>>, vector<10x32x10xbf16>
    tpu.vector_store %arg15[%c0_1127, %c0_1128, %c0_1129], %760 {strides = array<i32>} : memref<10x32x10xbf16, #tpu.memory_space<vmem>>, vector<10x32x10xbf16>,
    %762 = vector.extract_strided_slice %752 {offsets = [0, 0], sizes = [32, 16], strides = [1, 1]} : vector<32x128xf32> to vector<32x16xf32>
    %cst_1130 = arith.constant dense<0.000000e+00> : vector<32x8xf32>
    %763 = tpu.matmul %762, %759, %cst_1130 {dimension_numbers = #tpu.dot_dimension_numbers<[1], [0], [0], [1], [0, 0, 1, 1], [], []>} : vector<32x16xf32>, vector<16x8xf32>, vector<32x8xf32> -> vector<32x8xf32>
    %764 = arith.truncf %763 : vector<32x8xf32> to vector<32x8xbf16>
    %c1_1131 = arith.constant 1 : index
    %c0_1132 = arith.constant 0 : index
    %c1_1133 = arith.constant 1 : index
    %765 = vector.load %arg15[%c1_1131, %c0_1132, %c1_1133] : memref<10x32x10xbf16, #tpu.memory_space<vmem>>, vector<1x32x8xbf16>
    %766 = vector.shape_cast %765 : vector<1x32x8xbf16> to vector<32x8xbf16>
    %767 = vector.shape_cast %764 : vector<32x8xbf16> to vector<1x32x8xbf16>
    tpu.vector_store %arg15[%c1_1131, %c0_1132, %c1_1133], %767 {strides = array<i32>} : memref<10x32x10xbf16, #tpu.memory_space<vmem>>, vector<1x32x8xbf16>,
    %768 = vector.extract_strided_slice %752 {offsets = [0, 16], sizes = [32, 16], strides = [1, 1]} : vector<32x128xf32> to vector<32x16xf32>
    %cst_1134 = arith.constant dense<0.000000e+00> : vector<32x8xf32>
    %769 = tpu.matmul %768, %759, %cst_1134 {dimension_numbers = #tpu.dot_dimension_numbers<[1], [0], [0], [1], [0, 0, 1, 1], [], []>} : vector<32x16xf32>, vector<16x8xf32>, vector<32x8xf32> -> vector<32x8xf32>
    %770 = arith.truncf %769 : vector<32x8xf32> to vector<32x8xbf16>
    %c2_1135 = arith.constant 2 : index
    %c0_1136 = arith.constant 0 : index
    %c1_1137 = arith.constant 1 : index
    %771 = vector.load %arg15[%c2_1135, %c0_1136, %c1_1137] : memref<10x32x10xbf16, #tpu.memory_space<vmem>>, vector<1x32x8xbf16>
    %772 = vector.shape_cast %771 : vector<1x32x8xbf16> to vector<32x8xbf16>
    %773 = vector.shape_cast %770 : vector<32x8xbf16> to vector<1x32x8xbf16>
    tpu.vector_store %arg15[%c2_1135, %c0_1136, %c1_1137], %773 {strides = array<i32>} : memref<10x32x10xbf16, #tpu.memory_space<vmem>>, vector<1x32x8xbf16>,
    %774 = vector.extract_strided_slice %752 {offsets = [0, 32], sizes = [32, 16], strides = [1, 1]} : vector<32x128xf32> to vector<32x16xf32>
    %cst_1138 = arith.constant dense<0.000000e+00> : vector<32x8xf32>
    %775 = tpu.matmul %774, %759, %cst_1138 {dimension_numbers = #tpu.dot_dimension_numbers<[1], [0], [0], [1], [0, 0, 1, 1], [], []>} : vector<32x16xf32>, vector<16x8xf32>, vector<32x8xf32> -> vector<32x8xf32>
    %776 = arith.truncf %775 : vector<32x8xf32> to vector<32x8xbf16>
    %c3_1139 = arith.constant 3 : index
    %c0_1140 = arith.constant 0 : index
    %c1_1141 = arith.constant 1 : index
    %777 = vector.load %arg15[%c3_1139, %c0_1140, %c1_1141] : memref<10x32x10xbf16, #tpu.memory_space<vmem>>, vector<1x32x8xbf16>
    %778 = vector.shape_cast %777 : vector<1x32x8xbf16> to vector<32x8xbf16>
    %779 = vector.shape_cast %776 : vector<32x8xbf16> to vector<1x32x8xbf16>
    tpu.vector_store %arg15[%c3_1139, %c0_1140, %c1_1141], %779 {strides = array<i32>} : memref<10x32x10xbf16, #tpu.memory_space<vmem>>, vector<1x32x8xbf16>,
    %780 = vector.extract_strided_slice %752 {offsets = [0, 48], sizes = [32, 16], strides = [1, 1]} : vector<32x128xf32> to vector<32x16xf32>
    %cst_1142 = arith.constant dense<0.000000e+00> : vector<32x8xf32>
    %781 = tpu.matmul %780, %759, %cst_1142 {dimension_numbers = #tpu.dot_dimension_numbers<[1], [0], [0], [1], [0, 0, 1, 1], [], []>} : vector<32x16xf32>, vector<16x8xf32>, vector<32x8xf32> -> vector<32x8xf32>
    %782 = arith.truncf %781 : vector<32x8xf32> to vector<32x8xbf16>
    %c4_1143 = arith.constant 4 : index
    %c0_1144 = arith.constant 0 : index
    %c1_1145 = arith.constant 1 : index
    %783 = vector.load %arg15[%c4_1143, %c0_1144, %c1_1145] : memref<10x32x10xbf16, #tpu.memory_space<vmem>>, vector<1x32x8xbf16>
    %784 = vector.shape_cast %783 : vector<1x32x8xbf16> to vector<32x8xbf16>
    %785 = vector.shape_cast %782 : vector<32x8xbf16> to vector<1x32x8xbf16>
    tpu.vector_store %arg15[%c4_1143, %c0_1144, %c1_1145], %785 {strides = array<i32>} : memref<10x32x10xbf16, #tpu.memory_space<vmem>>, vector<1x32x8xbf16>,
    %786 = vector.extract_strided_slice %752 {offsets = [0, 64], sizes = [32, 16], strides = [1, 1]} : vector<32x128xf32> to vector<32x16xf32>
    %cst_1146 = arith.constant dense<0.000000e+00> : vector<32x8xf32>
    %787 = tpu.matmul %786, %759, %cst_1146 {dimension_numbers = #tpu.dot_dimension_numbers<[1], [0], [0], [1], [0, 0, 1, 1], [], []>} : vector<32x16xf32>, vector<16x8xf32>, vector<32x8xf32> -> vector<32x8xf32>
    %788 = arith.truncf %787 : vector<32x8xf32> to vector<32x8xbf16>
    %c5_1147 = arith.constant 5 : index
    %c0_1148 = arith.constant 0 : index
    %c1_1149 = arith.constant 1 : index
    %789 = vector.load %arg15[%c5_1147, %c0_1148, %c1_1149] : memref<10x32x10xbf16, #tpu.memory_space<vmem>>, vector<1x32x8xbf16>
    %790 = vector.shape_cast %789 : vector<1x32x8xbf16> to vector<32x8xbf16>
    %791 = vector.shape_cast %788 : vector<32x8xbf16> to vector<1x32x8xbf16>
    tpu.vector_store %arg15[%c5_1147, %c0_1148, %c1_1149], %791 {strides = array<i32>} : memref<10x32x10xbf16, #tpu.memory_space<vmem>>, vector<1x32x8xbf16>,
    %792 = vector.extract_strided_slice %752 {offsets = [0, 80], sizes = [32, 16], strides = [1, 1]} : vector<32x128xf32> to vector<32x16xf32>
    %cst_1150 = arith.constant dense<0.000000e+00> : vector<32x8xf32>
    %793 = tpu.matmul %792, %759, %cst_1150 {dimension_numbers = #tpu.dot_dimension_numbers<[1], [0], [0], [1], [0, 0, 1, 1], [], []>} : vector<32x16xf32>, vector<16x8xf32>, vector<32x8xf32> -> vector<32x8xf32>
    %794 = arith.truncf %793 : vector<32x8xf32> to vector<32x8xbf16>
    %c6_1151 = arith.constant 6 : index
    %c0_1152 = arith.constant 0 : index
    %c1_1153 = arith.constant 1 : index
    %795 = vector.load %arg15[%c6_1151, %c0_1152, %c1_1153] : memref<10x32x10xbf16, #tpu.memory_space<vmem>>, vector<1x32x8xbf16>
    %796 = vector.shape_cast %795 : vector<1x32x8xbf16> to vector<32x8xbf16>
    %797 = vector.shape_cast %794 : vector<32x8xbf16> to vector<1x32x8xbf16>
    tpu.vector_store %arg15[%c6_1151, %c0_1152, %c1_1153], %797 {strides = array<i32>} : memref<10x32x10xbf16, #tpu.memory_space<vmem>>, vector<1x32x8xbf16>,
    %798 = vector.extract_strided_slice %752 {offsets = [0, 96], sizes = [32, 16], strides = [1, 1]} : vector<32x128xf32> to vector<32x16xf32>
    %cst_1154 = arith.constant dense<0.000000e+00> : vector<32x8xf32>
    %799 = tpu.matmul %798, %759, %cst_1154 {dimension_numbers = #tpu.dot_dimension_numbers<[1], [0], [0], [1], [0, 0, 1, 1], [], []>} : vector<32x16xf32>, vector<16x8xf32>, vector<32x8xf32> -> vector<32x8xf32>
    %800 = arith.truncf %799 : vector<32x8xf32> to vector<32x8xbf16>
    %c7_1155 = arith.constant 7 : index
    %c0_1156 = arith.constant 0 : index
    %c1_1157 = arith.constant 1 : index
    %801 = vector.load %arg15[%c7_1155, %c0_1156, %c1_1157] : memref<10x32x10xbf16, #tpu.memory_space<vmem>>, vector<1x32x8xbf16>
    %802 = vector.shape_cast %801 : vector<1x32x8xbf16> to vector<32x8xbf16>
    %803 = vector.shape_cast %800 : vector<32x8xbf16> to vector<1x32x8xbf16>
    tpu.vector_store %arg15[%c7_1155, %c0_1156, %c1_1157], %803 {strides = array<i32>} : memref<10x32x10xbf16, #tpu.memory_space<vmem>>, vector<1x32x8xbf16>,
    %804 = vector.extract_strided_slice %752 {offsets = [0, 112], sizes = [32, 16], strides = [1, 1]} : vector<32x128xf32> to vector<32x16xf32>
    %cst_1158 = arith.constant dense<0.000000e+00> : vector<32x8xf32>
    %805 = tpu.matmul %804, %759, %cst_1158 {dimension_numbers = #tpu.dot_dimension_numbers<[1], [0], [0], [1], [0, 0, 1, 1], [], []>} : vector<32x16xf32>, vector<16x8xf32>, vector<32x8xf32> -> vector<32x8xf32>
    %806 = arith.truncf %805 : vector<32x8xf32> to vector<32x8xbf16>
    %c8_1159 = arith.constant 8 : index
    %c0_1160 = arith.constant 0 : index
    %c1_1161 = arith.constant 1 : index
    %807 = vector.load %arg15[%c8_1159, %c0_1160, %c1_1161] : memref<10x32x10xbf16, #tpu.memory_space<vmem>>, vector<1x32x8xbf16>
    %808 = vector.shape_cast %807 : vector<1x32x8xbf16> to vector<32x8xbf16>
    %809 = vector.shape_cast %806 : vector<32x8xbf16> to vector<1x32x8xbf16>
    tpu.vector_store %arg15[%c8_1159, %c0_1160, %c1_1161], %809 {strides = array<i32>} : memref<10x32x10xbf16, #tpu.memory_space<vmem>>, vector<1x32x8xbf16>,
    %c0_1162 = arith.constant 0 : index
    %c0_1163 = arith.constant 0 : index
    %c0_1164 = arith.constant 0 : index
    %810 = vector.load %arg15[%c0_1162, %c0_1163, %c0_1164] : memref<10x32x10xbf16, #tpu.memory_space<vmem>>, vector<1x32x8xbf16>
    %811 = vector.shape_cast %810 : vector<1x32x8xbf16> to vector<32x8xbf16>
    %c0_1165 = arith.constant 0 : index
    %c0_1166 = arith.constant 0 : index
    %812 = vector.load %arg20[%c0_1165, %c0_1166] : memref<288x32xbf16, #tpu.memory_space<vmem>>, vector<32x8xbf16>
    tpu.vector_store %arg20[%c0_1165, %c0_1166], %811 {strides = array<i32>} : memref<288x32xbf16, #tpu.memory_space<vmem>>, vector<32x8xbf16>,
    %c0_1167 = arith.constant 0 : index
    %c0_1168 = arith.constant 0 : index
    %c1_1169 = arith.constant 1 : index
    %813 = vector.load %arg15[%c0_1167, %c0_1168, %c1_1169] : memref<10x32x10xbf16, #tpu.memory_space<vmem>>, vector<1x32x8xbf16>
    %814 = vector.shape_cast %813 : vector<1x32x8xbf16> to vector<32x8xbf16>
    %c32_1170 = arith.constant 32 : index
    %c0_1171 = arith.constant 0 : index
    %815 = vector.load %arg20[%c32_1170, %c0_1171] : memref<288x32xbf16, #tpu.memory_space<vmem>>, vector<32x8xbf16>
    tpu.vector_store %arg20[%c32_1170, %c0_1171], %814 {strides = array<i32>} : memref<288x32xbf16, #tpu.memory_space<vmem>>, vector<32x8xbf16>,
    %c0_1172 = arith.constant 0 : index
    %c0_1173 = arith.constant 0 : index
    %c2_1174 = arith.constant 2 : index
    %816 = vector.load %arg15[%c0_1172, %c0_1173, %c2_1174] : memref<10x32x10xbf16, #tpu.memory_space<vmem>>, vector<1x32x8xbf16>
    %817 = vector.shape_cast %816 : vector<1x32x8xbf16> to vector<32x8xbf16>
    %c64_1175 = arith.constant 64 : index
    %c0_1176 = arith.constant 0 : index
    %818 = vector.load %arg20[%c64_1175, %c0_1176] : memref<288x32xbf16, #tpu.memory_space<vmem>>, vector<32x8xbf16>
    tpu.vector_store %arg20[%c64_1175, %c0_1176], %817 {strides = array<i32>} : memref<288x32xbf16, #tpu.memory_space<vmem>>, vector<32x8xbf16>,
    %c1_1177 = arith.constant 1 : index
    %c0_1178 = arith.constant 0 : index
    %c0_1179 = arith.constant 0 : index
    %819 = vector.load %arg15[%c1_1177, %c0_1178, %c0_1179] : memref<10x32x10xbf16, #tpu.memory_space<vmem>>, vector<1x32x8xbf16>
    %820 = vector.shape_cast %819 : vector<1x32x8xbf16> to vector<32x8xbf16>
    %c96_1180 = arith.constant 96 : index
    %c0_1181 = arith.constant 0 : index
    %821 = vector.load %arg20[%c96_1180, %c0_1181] : memref<288x32xbf16, #tpu.memory_space<vmem>>, vector<32x8xbf16>
    tpu.vector_store %arg20[%c96_1180, %c0_1181], %820 {strides = array<i32>} : memref<288x32xbf16, #tpu.memory_space<vmem>>, vector<32x8xbf16>,
    %c1_1182 = arith.constant 1 : index
    %c0_1183 = arith.constant 0 : index
    %c1_1184 = arith.constant 1 : index
    %822 = vector.load %arg15[%c1_1182, %c0_1183, %c1_1184] : memref<10x32x10xbf16, #tpu.memory_space<vmem>>, vector<1x32x8xbf16>
    %823 = vector.shape_cast %822 : vector<1x32x8xbf16> to vector<32x8xbf16>
    %c128_1185 = arith.constant 128 : index
    %c0_1186 = arith.constant 0 : index
    %824 = vector.load %arg20[%c128_1185, %c0_1186] : memref<288x32xbf16, #tpu.memory_space<vmem>>, vector<32x8xbf16>
    tpu.vector_store %arg20[%c128_1185, %c0_1186], %823 {strides = array<i32>} : memref<288x32xbf16, #tpu.memory_space<vmem>>, vector<32x8xbf16>,
    %c1_1187 = arith.constant 1 : index
    %c0_1188 = arith.constant 0 : index
    %c2_1189 = arith.constant 2 : index
    %825 = vector.load %arg15[%c1_1187, %c0_1188, %c2_1189] : memref<10x32x10xbf16, #tpu.memory_space<vmem>>, vector<1x32x8xbf16>
    %826 = vector.shape_cast %825 : vector<1x32x8xbf16> to vector<32x8xbf16>
    %c160_1190 = arith.constant 160 : index
    %c0_1191 = arith.constant 0 : index
    %827 = vector.load %arg20[%c160_1190, %c0_1191] : memref<288x32xbf16, #tpu.memory_space<vmem>>, vector<32x8xbf16>
    tpu.vector_store %arg20[%c160_1190, %c0_1191], %826 {strides = array<i32>} : memref<288x32xbf16, #tpu.memory_space<vmem>>, vector<32x8xbf16>,
    %c2_1192 = arith.constant 2 : index
    %c0_1193 = arith.constant 0 : index
    %c0_1194 = arith.constant 0 : index
    %828 = vector.load %arg15[%c2_1192, %c0_1193, %c0_1194] : memref<10x32x10xbf16, #tpu.memory_space<vmem>>, vector<1x32x8xbf16>
    %829 = vector.shape_cast %828 : vector<1x32x8xbf16> to vector<32x8xbf16>
    %c192_1195 = arith.constant 192 : index
    %c0_1196 = arith.constant 0 : index
    %830 = vector.load %arg20[%c192_1195, %c0_1196] : memref<288x32xbf16, #tpu.memory_space<vmem>>, vector<32x8xbf16>
    tpu.vector_store %arg20[%c192_1195, %c0_1196], %829 {strides = array<i32>} : memref<288x32xbf16, #tpu.memory_space<vmem>>, vector<32x8xbf16>,
    %c2_1197 = arith.constant 2 : index
    %c0_1198 = arith.constant 0 : index
    %c1_1199 = arith.constant 1 : index
    %831 = vector.load %arg15[%c2_1197, %c0_1198, %c1_1199] : memref<10x32x10xbf16, #tpu.memory_space<vmem>>, vector<1x32x8xbf16>
    %832 = vector.shape_cast %831 : vector<1x32x8xbf16> to vector<32x8xbf16>
    %c224_1200 = arith.constant 224 : index
    %c0_1201 = arith.constant 0 : index
    %833 = vector.load %arg20[%c224_1200, %c0_1201] : memref<288x32xbf16, #tpu.memory_space<vmem>>, vector<32x8xbf16>
    tpu.vector_store %arg20[%c224_1200, %c0_1201], %832 {strides = array<i32>} : memref<288x32xbf16, #tpu.memory_space<vmem>>, vector<32x8xbf16>,
    %c2_1202 = arith.constant 2 : index
    %c0_1203 = arith.constant 0 : index
    %c2_1204 = arith.constant 2 : index
    %834 = vector.load %arg15[%c2_1202, %c0_1203, %c2_1204] : memref<10x32x10xbf16, #tpu.memory_space<vmem>>, vector<1x32x8xbf16>
    %835 = vector.shape_cast %834 : vector<1x32x8xbf16> to vector<32x8xbf16>
    %c256 = arith.constant 256 : index
    %c0_1205 = arith.constant 0 : index
    %836 = vector.load %arg20[%c256, %c0_1205] : memref<288x32xbf16, #tpu.memory_space<vmem>>, vector<32x8xbf16>
    tpu.vector_store %arg20[%c256, %c0_1205], %835 {strides = array<i32>} : memref<288x32xbf16, #tpu.memory_space<vmem>>, vector<32x8xbf16>,
    %c2_1206 = arith.constant 2 : index
    %c0_1207 = arith.constant 0 : index
    %c0_1208 = arith.constant 0 : index
    %837 = vector.load %arg15[%c2_1206, %c0_1207, %c0_1208] : memref<10x32x10xbf16, #tpu.memory_space<vmem>>, vector<1x32x8xbf16>
    %838 = vector.shape_cast %837 : vector<1x32x8xbf16> to vector<32x8xbf16>
    %c0_1209 = arith.constant 0 : index
    %c8_1210 = arith.constant 8 : index
    %839 = vector.load %arg20[%c0_1209, %c8_1210] : memref<288x32xbf16, #tpu.memory_space<vmem>>, vector<32x8xbf16>
    tpu.vector_store %arg20[%c0_1209, %c8_1210], %838 {strides = array<i32>} : memref<288x32xbf16, #tpu.memory_space<vmem>>, vector<32x8xbf16>,
    %c2_1211 = arith.constant 2 : index
    %c0_1212 = arith.constant 0 : index
    %c1_1213 = arith.constant 1 : index
    %840 = vector.load %arg15[%c2_1211, %c0_1212, %c1_1213] : memref<10x32x10xbf16, #tpu.memory_space<vmem>>, vector<1x32x8xbf16>
    %841 = vector.shape_cast %840 : vector<1x32x8xbf16> to vector<32x8xbf16>
    %c32_1214 = arith.constant 32 : index
    %c8_1215 = arith.constant 8 : index
    %842 = vector.load %arg20[%c32_1214, %c8_1215] : memref<288x32xbf16, #tpu.memory_space<vmem>>, vector<32x8xbf16>
    tpu.vector_store %arg20[%c32_1214, %c8_1215], %841 {strides = array<i32>} : memref<288x32xbf16, #tpu.memory_space<vmem>>, vector<32x8xbf16>,
    %c2_1216 = arith.constant 2 : index
    %c0_1217 = arith.constant 0 : index
    %c2_1218 = arith.constant 2 : index
    %843 = vector.load %arg15[%c2_1216, %c0_1217, %c2_1218] : memref<10x32x10xbf16, #tpu.memory_space<vmem>>, vector<1x32x8xbf16>
    %844 = vector.shape_cast %843 : vector<1x32x8xbf16> to vector<32x8xbf16>
    %c64_1219 = arith.constant 64 : index
    %c8_1220 = arith.constant 8 : index
    %845 = vector.load %arg20[%c64_1219, %c8_1220] : memref<288x32xbf16, #tpu.memory_space<vmem>>, vector<32x8xbf16>
    tpu.vector_store %arg20[%c64_1219, %c8_1220], %844 {strides = array<i32>} : memref<288x32xbf16, #tpu.memory_space<vmem>>, vector<32x8xbf16>,
    %c3_1221 = arith.constant 3 : index
    %c0_1222 = arith.constant 0 : index
    %c0_1223 = arith.constant 0 : index
    %846 = vector.load %arg15[%c3_1221, %c0_1222, %c0_1223] : memref<10x32x10xbf16, #tpu.memory_space<vmem>>, vector<1x32x8xbf16>
    %847 = vector.shape_cast %846 : vector<1x32x8xbf16> to vector<32x8xbf16>
    %c96_1224 = arith.constant 96 : index
    %c8_1225 = arith.constant 8 : index
    %848 = vector.load %arg20[%c96_1224, %c8_1225] : memref<288x32xbf16, #tpu.memory_space<vmem>>, vector<32x8xbf16>
    tpu.vector_store %arg20[%c96_1224, %c8_1225], %847 {strides = array<i32>} : memref<288x32xbf16, #tpu.memory_space<vmem>>, vector<32x8xbf16>,
    %c3_1226 = arith.constant 3 : index
    %c0_1227 = arith.constant 0 : index
    %c1_1228 = arith.constant 1 : index
    %849 = vector.load %arg15[%c3_1226, %c0_1227, %c1_1228] : memref<10x32x10xbf16, #tpu.memory_space<vmem>>, vector<1x32x8xbf16>
    %850 = vector.shape_cast %849 : vector<1x32x8xbf16> to vector<32x8xbf16>
    %c128_1229 = arith.constant 128 : index
    %c8_1230 = arith.constant 8 : index
    %851 = vector.load %arg20[%c128_1229, %c8_1230] : memref<288x32xbf16, #tpu.memory_space<vmem>>, vector<32x8xbf16>
    tpu.vector_store %arg20[%c128_1229, %c8_1230], %850 {strides = array<i32>} : memref<288x32xbf16, #tpu.memory_space<vmem>>, vector<32x8xbf16>,
    %c3_1231 = arith.constant 3 : index
    %c0_1232 = arith.constant 0 : index
    %c2_1233 = arith.constant 2 : index
    %852 = vector.load %arg15[%c3_1231, %c0_1232, %c2_1233] : memref<10x32x10xbf16, #tpu.memory_space<vmem>>, vector<1x32x8xbf16>
    %853 = vector.shape_cast %852 : vector<1x32x8xbf16> to vector<32x8xbf16>
    %c160_1234 = arith.constant 160 : index
    %c8_1235 = arith.constant 8 : index
    %854 = vector.load %arg20[%c160_1234, %c8_1235] : memref<288x32xbf16, #tpu.memory_space<vmem>>, vector<32x8xbf16>
    tpu.vector_store %arg20[%c160_1234, %c8_1235], %853 {strides = array<i32>} : memref<288x32xbf16, #tpu.memory_space<vmem>>, vector<32x8xbf16>,
    %c4_1236 = arith.constant 4 : index
    %c0_1237 = arith.constant 0 : index
    %c0_1238 = arith.constant 0 : index
    %855 = vector.load %arg15[%c4_1236, %c0_1237, %c0_1238] : memref<10x32x10xbf16, #tpu.memory_space<vmem>>, vector<1x32x8xbf16>
    %856 = vector.shape_cast %855 : vector<1x32x8xbf16> to vector<32x8xbf16>
    %c192_1239 = arith.constant 192 : index
    %c8_1240 = arith.constant 8 : index
    %857 = vector.load %arg20[%c192_1239, %c8_1240] : memref<288x32xbf16, #tpu.memory_space<vmem>>, vector<32x8xbf16>
    tpu.vector_store %arg20[%c192_1239, %c8_1240], %856 {strides = array<i32>} : memref<288x32xbf16, #tpu.memory_space<vmem>>, vector<32x8xbf16>,
    %c4_1241 = arith.constant 4 : index
    %c0_1242 = arith.constant 0 : index
    %c1_1243 = arith.constant 1 : index
    %858 = vector.load %arg15[%c4_1241, %c0_1242, %c1_1243] : memref<10x32x10xbf16, #tpu.memory_space<vmem>>, vector<1x32x8xbf16>
    %859 = vector.shape_cast %858 : vector<1x32x8xbf16> to vector<32x8xbf16>
    %c224_1244 = arith.constant 224 : index
    %c8_1245 = arith.constant 8 : index
    %860 = vector.load %arg20[%c224_1244, %c8_1245] : memref<288x32xbf16, #tpu.memory_space<vmem>>, vector<32x8xbf16>
    tpu.vector_store %arg20[%c224_1244, %c8_1245], %859 {strides = array<i32>} : memref<288x32xbf16, #tpu.memory_space<vmem>>, vector<32x8xbf16>,
    %c4_1246 = arith.constant 4 : index
    %c0_1247 = arith.constant 0 : index
    %c2_1248 = arith.constant 2 : index
    %861 = vector.load %arg15[%c4_1246, %c0_1247, %c2_1248] : memref<10x32x10xbf16, #tpu.memory_space<vmem>>, vector<1x32x8xbf16>
    %862 = vector.shape_cast %861 : vector<1x32x8xbf16> to vector<32x8xbf16>
    %c256_1249 = arith.constant 256 : index
    %c8_1250 = arith.constant 8 : index
    %863 = vector.load %arg20[%c256_1249, %c8_1250] : memref<288x32xbf16, #tpu.memory_space<vmem>>, vector<32x8xbf16>
    tpu.vector_store %arg20[%c256_1249, %c8_1250], %862 {strides = array<i32>} : memref<288x32xbf16, #tpu.memory_space<vmem>>, vector<32x8xbf16>,
    %c4_1251 = arith.constant 4 : index
    %c0_1252 = arith.constant 0 : index
    %c0_1253 = arith.constant 0 : index
    %864 = vector.load %arg15[%c4_1251, %c0_1252, %c0_1253] : memref<10x32x10xbf16, #tpu.memory_space<vmem>>, vector<1x32x8xbf16>
    %865 = vector.shape_cast %864 : vector<1x32x8xbf16> to vector<32x8xbf16>
    %c0_1254 = arith.constant 0 : index
    %c16_1255 = arith.constant 16 : index
    %866 = vector.load %arg20[%c0_1254, %c16_1255] : memref<288x32xbf16, #tpu.memory_space<vmem>>, vector<32x8xbf16>
    tpu.vector_store %arg20[%c0_1254, %c16_1255], %865 {strides = array<i32>} : memref<288x32xbf16, #tpu.memory_space<vmem>>, vector<32x8xbf16>,
    %c4_1256 = arith.constant 4 : index
    %c0_1257 = arith.constant 0 : index
    %c1_1258 = arith.constant 1 : index
    %867 = vector.load %arg15[%c4_1256, %c0_1257, %c1_1258] : memref<10x32x10xbf16, #tpu.memory_space<vmem>>, vector<1x32x8xbf16>
    %868 = vector.shape_cast %867 : vector<1x32x8xbf16> to vector<32x8xbf16>
    %c32_1259 = arith.constant 32 : index
    %c16_1260 = arith.constant 16 : index
    %869 = vector.load %arg20[%c32_1259, %c16_1260] : memref<288x32xbf16, #tpu.memory_space<vmem>>, vector<32x8xbf16>
    tpu.vector_store %arg20[%c32_1259, %c16_1260], %868 {strides = array<i32>} : memref<288x32xbf16, #tpu.memory_space<vmem>>, vector<32x8xbf16>,
    %c4_1261 = arith.constant 4 : index
    %c0_1262 = arith.constant 0 : index
    %c2_1263 = arith.constant 2 : index
    %870 = vector.load %arg15[%c4_1261, %c0_1262, %c2_1263] : memref<10x32x10xbf16, #tpu.memory_space<vmem>>, vector<1x32x8xbf16>
    %871 = vector.shape_cast %870 : vector<1x32x8xbf16> to vector<32x8xbf16>
    %c64_1264 = arith.constant 64 : index
    %c16_1265 = arith.constant 16 : index
    %872 = vector.load %arg20[%c64_1264, %c16_1265] : memref<288x32xbf16, #tpu.memory_space<vmem>>, vector<32x8xbf16>
    tpu.vector_store %arg20[%c64_1264, %c16_1265], %871 {strides = array<i32>} : memref<288x32xbf16, #tpu.memory_space<vmem>>, vector<32x8xbf16>,
    %c5_1266 = arith.constant 5 : index
    %c0_1267 = arith.constant 0 : index
    %c0_1268 = arith.constant 0 : index
    %873 = vector.load %arg15[%c5_1266, %c0_1267, %c0_1268] : memref<10x32x10xbf16, #tpu.memory_space<vmem>>, vector<1x32x8xbf16>
    %874 = vector.shape_cast %873 : vector<1x32x8xbf16> to vector<32x8xbf16>
    %c96_1269 = arith.constant 96 : index
    %c16_1270 = arith.constant 16 : index
    %875 = vector.load %arg20[%c96_1269, %c16_1270] : memref<288x32xbf16, #tpu.memory_space<vmem>>, vector<32x8xbf16>
    tpu.vector_store %arg20[%c96_1269, %c16_1270], %874 {strides = array<i32>} : memref<288x32xbf16, #tpu.memory_space<vmem>>, vector<32x8xbf16>,
    %c5_1271 = arith.constant 5 : index
    %c0_1272 = arith.constant 0 : index
    %c1_1273 = arith.constant 1 : index
    %876 = vector.load %arg15[%c5_1271, %c0_1272, %c1_1273] : memref<10x32x10xbf16, #tpu.memory_space<vmem>>, vector<1x32x8xbf16>
    %877 = vector.shape_cast %876 : vector<1x32x8xbf16> to vector<32x8xbf16>
    %c128_1274 = arith.constant 128 : index
    %c16_1275 = arith.constant 16 : index
    %878 = vector.load %arg20[%c128_1274, %c16_1275] : memref<288x32xbf16, #tpu.memory_space<vmem>>, vector<32x8xbf16>
    tpu.vector_store %arg20[%c128_1274, %c16_1275], %877 {strides = array<i32>} : memref<288x32xbf16, #tpu.memory_space<vmem>>, vector<32x8xbf16>,
    %c5_1276 = arith.constant 5 : index
    %c0_1277 = arith.constant 0 : index
    %c2_1278 = arith.constant 2 : index
    %879 = vector.load %arg15[%c5_1276, %c0_1277, %c2_1278] : memref<10x32x10xbf16, #tpu.memory_space<vmem>>, vector<1x32x8xbf16>
    %880 = vector.shape_cast %879 : vector<1x32x8xbf16> to vector<32x8xbf16>
    %c160_1279 = arith.constant 160 : index
    %c16_1280 = arith.constant 16 : index
    %881 = vector.load %arg20[%c160_1279, %c16_1280] : memref<288x32xbf16, #tpu.memory_space<vmem>>, vector<32x8xbf16>
    tpu.vector_store %arg20[%c160_1279, %c16_1280], %880 {strides = array<i32>} : memref<288x32xbf16, #tpu.memory_space<vmem>>, vector<32x8xbf16>,
    %c6_1281 = arith.constant 6 : index
    %c0_1282 = arith.constant 0 : index
    %c0_1283 = arith.constant 0 : index
    %882 = vector.load %arg15[%c6_1281, %c0_1282, %c0_1283] : memref<10x32x10xbf16, #tpu.memory_space<vmem>>, vector<1x32x8xbf16>
    %883 = vector.shape_cast %882 : vector<1x32x8xbf16> to vector<32x8xbf16>
    %c192_1284 = arith.constant 192 : index
    %c16_1285 = arith.constant 16 : index
    %884 = vector.load %arg20[%c192_1284, %c16_1285] : memref<288x32xbf16, #tpu.memory_space<vmem>>, vector<32x8xbf16>
    tpu.vector_store %arg20[%c192_1284, %c16_1285], %883 {strides = array<i32>} : memref<288x32xbf16, #tpu.memory_space<vmem>>, vector<32x8xbf16>,
    %c6_1286 = arith.constant 6 : index
    %c0_1287 = arith.constant 0 : index
    %c1_1288 = arith.constant 1 : index
    %885 = vector.load %arg15[%c6_1286, %c0_1287, %c1_1288] : memref<10x32x10xbf16, #tpu.memory_space<vmem>>, vector<1x32x8xbf16>
    %886 = vector.shape_cast %885 : vector<1x32x8xbf16> to vector<32x8xbf16>
    %c224_1289 = arith.constant 224 : index
    %c16_1290 = arith.constant 16 : index
    %887 = vector.load %arg20[%c224_1289, %c16_1290] : memref<288x32xbf16, #tpu.memory_space<vmem>>, vector<32x8xbf16>
    tpu.vector_store %arg20[%c224_1289, %c16_1290], %886 {strides = array<i32>} : memref<288x32xbf16, #tpu.memory_space<vmem>>, vector<32x8xbf16>,
    %c6_1291 = arith.constant 6 : index
    %c0_1292 = arith.constant 0 : index
    %c2_1293 = arith.constant 2 : index
    %888 = vector.load %arg15[%c6_1291, %c0_1292, %c2_1293] : memref<10x32x10xbf16, #tpu.memory_space<vmem>>, vector<1x32x8xbf16>
    %889 = vector.shape_cast %888 : vector<1x32x8xbf16> to vector<32x8xbf16>
    %c256_1294 = arith.constant 256 : index
    %c16_1295 = arith.constant 16 : index
    %890 = vector.load %arg20[%c256_1294, %c16_1295] : memref<288x32xbf16, #tpu.memory_space<vmem>>, vector<32x8xbf16>
    tpu.vector_store %arg20[%c256_1294, %c16_1295], %889 {strides = array<i32>} : memref<288x32xbf16, #tpu.memory_space<vmem>>, vector<32x8xbf16>,
    %c6_1296 = arith.constant 6 : index
    %c0_1297 = arith.constant 0 : index
    %c0_1298 = arith.constant 0 : index
    %891 = vector.load %arg15[%c6_1296, %c0_1297, %c0_1298] : memref<10x32x10xbf16, #tpu.memory_space<vmem>>, vector<1x32x8xbf16>
    %892 = vector.shape_cast %891 : vector<1x32x8xbf16> to vector<32x8xbf16>
    %c0_1299 = arith.constant 0 : index
    %c24 = arith.constant 24 : index
    %893 = vector.load %arg20[%c0_1299, %c24] : memref<288x32xbf16, #tpu.memory_space<vmem>>, vector<32x8xbf16>
    tpu.vector_store %arg20[%c0_1299, %c24], %892 {strides = array<i32>} : memref<288x32xbf16, #tpu.memory_space<vmem>>, vector<32x8xbf16>,
    %c6_1300 = arith.constant 6 : index
    %c0_1301 = arith.constant 0 : index
    %c1_1302 = arith.constant 1 : index
    %894 = vector.load %arg15[%c6_1300, %c0_1301, %c1_1302] : memref<10x32x10xbf16, #tpu.memory_space<vmem>>, vector<1x32x8xbf16>
    %895 = vector.shape_cast %894 : vector<1x32x8xbf16> to vector<32x8xbf16>
    %c32_1303 = arith.constant 32 : index
    %c24_1304 = arith.constant 24 : index
    %896 = vector.load %arg20[%c32_1303, %c24_1304] : memref<288x32xbf16, #tpu.memory_space<vmem>>, vector<32x8xbf16>
    tpu.vector_store %arg20[%c32_1303, %c24_1304], %895 {strides = array<i32>} : memref<288x32xbf16, #tpu.memory_space<vmem>>, vector<32x8xbf16>,
    %c6_1305 = arith.constant 6 : index
    %c0_1306 = arith.constant 0 : index
    %c2_1307 = arith.constant 2 : index
    %897 = vector.load %arg15[%c6_1305, %c0_1306, %c2_1307] : memref<10x32x10xbf16, #tpu.memory_space<vmem>>, vector<1x32x8xbf16>
    %898 = vector.shape_cast %897 : vector<1x32x8xbf16> to vector<32x8xbf16>
    %c64_1308 = arith.constant 64 : index
    %c24_1309 = arith.constant 24 : index
    %899 = vector.load %arg20[%c64_1308, %c24_1309] : memref<288x32xbf16, #tpu.memory_space<vmem>>, vector<32x8xbf16>
    tpu.vector_store %arg20[%c64_1308, %c24_1309], %898 {strides = array<i32>} : memref<288x32xbf16, #tpu.memory_space<vmem>>, vector<32x8xbf16>,
    %c7_1310 = arith.constant 7 : index
    %c0_1311 = arith.constant 0 : index
    %c0_1312 = arith.constant 0 : index
    %900 = vector.load %arg15[%c7_1310, %c0_1311, %c0_1312] : memref<10x32x10xbf16, #tpu.memory_space<vmem>>, vector<1x32x8xbf16>
    %901 = vector.shape_cast %900 : vector<1x32x8xbf16> to vector<32x8xbf16>
    %c96_1313 = arith.constant 96 : index
    %c24_1314 = arith.constant 24 : index
    %902 = vector.load %arg20[%c96_1313, %c24_1314] : memref<288x32xbf16, #tpu.memory_space<vmem>>, vector<32x8xbf16>
    tpu.vector_store %arg20[%c96_1313, %c24_1314], %901 {strides = array<i32>} : memref<288x32xbf16, #tpu.memory_space<vmem>>, vector<32x8xbf16>,
    %c7_1315 = arith.constant 7 : index
    %c0_1316 = arith.constant 0 : index
    %c1_1317 = arith.constant 1 : index
    %903 = vector.load %arg15[%c7_1315, %c0_1316, %c1_1317] : memref<10x32x10xbf16, #tpu.memory_space<vmem>>, vector<1x32x8xbf16>
    %904 = vector.shape_cast %903 : vector<1x32x8xbf16> to vector<32x8xbf16>
    %c128_1318 = arith.constant 128 : index
    %c24_1319 = arith.constant 24 : index
    %905 = vector.load %arg20[%c128_1318, %c24_1319] : memref<288x32xbf16, #tpu.memory_space<vmem>>, vector<32x8xbf16>
    tpu.vector_store %arg20[%c128_1318, %c24_1319], %904 {strides = array<i32>} : memref<288x32xbf16, #tpu.memory_space<vmem>>, vector<32x8xbf16>,
    %c7_1320 = arith.constant 7 : index
    %c0_1321 = arith.constant 0 : index
    %c2_1322 = arith.constant 2 : index
    %906 = vector.load %arg15[%c7_1320, %c0_1321, %c2_1322] : memref<10x32x10xbf16, #tpu.memory_space<vmem>>, vector<1x32x8xbf16>
    %907 = vector.shape_cast %906 : vector<1x32x8xbf16> to vector<32x8xbf16>
    %c160_1323 = arith.constant 160 : index
    %c24_1324 = arith.constant 24 : index
    %908 = vector.load %arg20[%c160_1323, %c24_1324] : memref<288x32xbf16, #tpu.memory_space<vmem>>, vector<32x8xbf16>
    tpu.vector_store %arg20[%c160_1323, %c24_1324], %907 {strides = array<i32>} : memref<288x32xbf16, #tpu.memory_space<vmem>>, vector<32x8xbf16>,
    %c8_1325 = arith.constant 8 : index
    %c0_1326 = arith.constant 0 : index
    %c0_1327 = arith.constant 0 : index
    %909 = vector.load %arg15[%c8_1325, %c0_1326, %c0_1327] : memref<10x32x10xbf16, #tpu.memory_space<vmem>>, vector<1x32x8xbf16>
    %910 = vector.shape_cast %909 : vector<1x32x8xbf16> to vector<32x8xbf16>
    %c192_1328 = arith.constant 192 : index
    %c24_1329 = arith.constant 24 : index
    %911 = vector.load %arg20[%c192_1328, %c24_1329] : memref<288x32xbf16, #tpu.memory_space<vmem>>, vector<32x8xbf16>
    tpu.vector_store %arg20[%c192_1328, %c24_1329], %910 {strides = array<i32>} : memref<288x32xbf16, #tpu.memory_space<vmem>>, vector<32x8xbf16>,
    %c8_1330 = arith.constant 8 : index
    %c0_1331 = arith.constant 0 : index
    %c1_1332 = arith.constant 1 : index
    %912 = vector.load %arg15[%c8_1330, %c0_1331, %c1_1332] : memref<10x32x10xbf16, #tpu.memory_space<vmem>>, vector<1x32x8xbf16>
    %913 = vector.shape_cast %912 : vector<1x32x8xbf16> to vector<32x8xbf16>
    %c224_1333 = arith.constant 224 : index
    %c24_1334 = arith.constant 24 : index
    %914 = vector.load %arg20[%c224_1333, %c24_1334] : memref<288x32xbf16, #tpu.memory_space<vmem>>, vector<32x8xbf16>
    tpu.vector_store %arg20[%c224_1333, %c24_1334], %913 {strides = array<i32>} : memref<288x32xbf16, #tpu.memory_space<vmem>>, vector<32x8xbf16>,
    %c8_1335 = arith.constant 8 : index
    %c0_1336 = arith.constant 0 : index
    %c2_1337 = arith.constant 2 : index
    %915 = vector.load %arg15[%c8_1335, %c0_1336, %c2_1337] : memref<10x32x10xbf16, #tpu.memory_space<vmem>>, vector<1x32x8xbf16>
    %916 = vector.shape_cast %915 : vector<1x32x8xbf16> to vector<32x8xbf16>
    %c256_1338 = arith.constant 256 : index
    %c24_1339 = arith.constant 24 : index
    %917 = vector.load %arg20[%c256_1338, %c24_1339] : memref<288x32xbf16, #tpu.memory_space<vmem>>, vector<32x8xbf16>
    tpu.vector_store %arg20[%c256_1338, %c24_1339], %916 {strides = array<i32>} : memref<288x32xbf16, #tpu.memory_space<vmem>>, vector<32x8xbf16>,
    %c0_1340 = arith.constant 0 : index
    %c0_1341 = arith.constant 0 : index
    %918 = vector.load %arg4[%c0_1340, %c0_1341] : memref<32x288xbf16, #tpu.memory_space<vmem>>, vector<32x288xbf16>
    %c0_1342 = arith.constant 0 : index
    %c0_1343 = arith.constant 0 : index
    %919 = vector.load %arg20[%c0_1342, %c0_1343] : memref<288x32xbf16, #tpu.memory_space<vmem>>, vector<288x32xbf16>
    %cst_1344 = arith.constant dense<0.000000e+00> : vector<32x32xf32>
    %920 = tpu.matmul %918, %919, %cst_1344 {dimension_numbers = #tpu.dot_dimension_numbers<[1], [0], [0], [1], [0, 0, 1, 1], [], []>} : vector<32x288xbf16>, vector<288x32xbf16>, vector<32x32xf32> -> vector<32x32xf32>
    %c0_1345 = arith.constant 0 : index
    %c0_1346 = arith.constant 0 : index
    %921 = vector.load %arg9[%c0_1345, %c0_1346] : memref<32x1xf32, #tpu.memory_space<vmem>>, vector<32x1xf32>
    %922 = vector.broadcast %921 : vector<32x1xf32> to vector<32x32xf32>
    %923 = arith.addf %920, %922 : vector<32x32xf32>
    %cst_1347 = arith.constant 2.000000e-01 : f32
    %924 = vector.broadcast %cst_1347 : f32 to vector<32x32xf32>
    %925 = arith.mulf %924, %923 : vector<32x32xf32>
    %926 = arith.maximumf %923, %925 : vector<32x32xf32>
    %927 = tpu.iota {dimensions = array<i32: 0>} : vector<8x4xi32>
    %928 = tpu.iota {dimensions = array<i32: 1>} : vector<8x4xi32>
    %c2_i32_1348 = arith.constant 2 : i32
    %929 = vector.broadcast %c2_i32_1348 : i32 to vector<8x4xi32>
    %930 = arith.muli %929, %928 : vector<8x4xi32>
    %931 = arith.cmpi eq, %927, %930 : vector<8x4xi32>
    %932 = arith.extui %931 : vector<8x4xi1> to vector<8x4xi32>
    %933 = arith.sitofp %932 : vector<8x4xi32> to vector<8x4xf32>
    %cst_1349 = arith.constant 0.000000e+00 : bf16
    %934 = vector.broadcast %cst_1349 : bf16 to vector<6x32x6xbf16>
    %c0_1350 = arith.constant 0 : index
    %c0_1351 = arith.constant 0 : index
    %c0_1352 = arith.constant 0 : index
    %935 = vector.load %arg16[%c0_1350, %c0_1351, %c0_1352] : memref<6x32x6xbf16, #tpu.memory_space<vmem>>, vector<6x32x6xbf16>
    tpu.vector_store %arg16[%c0_1350, %c0_1351, %c0_1352], %934 {strides = array<i32>} : memref<6x32x6xbf16, #tpu.memory_space<vmem>>, vector<6x32x6xbf16>,
    %936 = vector.extract_strided_slice %926 {offsets = [0, 0], sizes = [32, 8], strides = [1, 1]} : vector<32x32xf32> to vector<32x8xf32>
    %cst_1353 = arith.constant dense<0.000000e+00> : vector<32x4xf32>
    %937 = tpu.matmul %936, %933, %cst_1353 {dimension_numbers = #tpu.dot_dimension_numbers<[1], [0], [0], [1], [0, 0, 1, 1], [], []>} : vector<32x8xf32>, vector<8x4xf32>, vector<32x4xf32> -> vector<32x4xf32>
    %938 = arith.truncf %937 : vector<32x4xf32> to vector<32x4xbf16>
    %c1_1354 = arith.constant 1 : index
    %c0_1355 = arith.constant 0 : index
    %c1_1356 = arith.constant 1 : index
    %939 = vector.load %arg16[%c1_1354, %c0_1355, %c1_1356] : memref<6x32x6xbf16, #tpu.memory_space<vmem>>, vector<1x32x4xbf16>
    %940 = vector.shape_cast %939 : vector<1x32x4xbf16> to vector<32x4xbf16>
    %941 = vector.shape_cast %938 : vector<32x4xbf16> to vector<1x32x4xbf16>
    tpu.vector_store %arg16[%c1_1354, %c0_1355, %c1_1356], %941 {strides = array<i32>} : memref<6x32x6xbf16, #tpu.memory_space<vmem>>, vector<1x32x4xbf16>,
    %942 = vector.extract_strided_slice %926 {offsets = [0, 8], sizes = [32, 8], strides = [1, 1]} : vector<32x32xf32> to vector<32x8xf32>
    %cst_1357 = arith.constant dense<0.000000e+00> : vector<32x4xf32>
    %943 = tpu.matmul %942, %933, %cst_1357 {dimension_numbers = #tpu.dot_dimension_numbers<[1], [0], [0], [1], [0, 0, 1, 1], [], []>} : vector<32x8xf32>, vector<8x4xf32>, vector<32x4xf32> -> vector<32x4xf32>
    %944 = arith.truncf %943 : vector<32x4xf32> to vector<32x4xbf16>
    %c2_1358 = arith.constant 2 : index
    %c0_1359 = arith.constant 0 : index
    %c1_1360 = arith.constant 1 : index
    %945 = vector.load %arg16[%c2_1358, %c0_1359, %c1_1360] : memref<6x32x6xbf16, #tpu.memory_space<vmem>>, vector<1x32x4xbf16>
    %946 = vector.shape_cast %945 : vector<1x32x4xbf16> to vector<32x4xbf16>
    %947 = vector.shape_cast %944 : vector<32x4xbf16> to vector<1x32x4xbf16>
    tpu.vector_store %arg16[%c2_1358, %c0_1359, %c1_1360], %947 {strides = array<i32>} : memref<6x32x6xbf16, #tpu.memory_space<vmem>>, vector<1x32x4xbf16>,
    %948 = vector.extract_strided_slice %926 {offsets = [0, 16], sizes = [32, 8], strides = [1, 1]} : vector<32x32xf32> to vector<32x8xf32>
    %cst_1361 = arith.constant dense<0.000000e+00> : vector<32x4xf32>
    %949 = tpu.matmul %948, %933, %cst_1361 {dimension_numbers = #tpu.dot_dimension_numbers<[1], [0], [0], [1], [0, 0, 1, 1], [], []>} : vector<32x8xf32>, vector<8x4xf32>, vector<32x4xf32> -> vector<32x4xf32>
    %950 = arith.truncf %949 : vector<32x4xf32> to vector<32x4xbf16>
    %c3_1362 = arith.constant 3 : index
    %c0_1363 = arith.constant 0 : index
    %c1_1364 = arith.constant 1 : index
    %951 = vector.load %arg16[%c3_1362, %c0_1363, %c1_1364] : memref<6x32x6xbf16, #tpu.memory_space<vmem>>, vector<1x32x4xbf16>
    %952 = vector.shape_cast %951 : vector<1x32x4xbf16> to vector<32x4xbf16>
    %953 = vector.shape_cast %950 : vector<32x4xbf16> to vector<1x32x4xbf16>
    tpu.vector_store %arg16[%c3_1362, %c0_1363, %c1_1364], %953 {strides = array<i32>} : memref<6x32x6xbf16, #tpu.memory_space<vmem>>, vector<1x32x4xbf16>,
    %954 = vector.extract_strided_slice %926 {offsets = [0, 24], sizes = [32, 8], strides = [1, 1]} : vector<32x32xf32> to vector<32x8xf32>
    %cst_1365 = arith.constant dense<0.000000e+00> : vector<32x4xf32>
    %955 = tpu.matmul %954, %933, %cst_1365 {dimension_numbers = #tpu.dot_dimension_numbers<[1], [0], [0], [1], [0, 0, 1, 1], [], []>} : vector<32x8xf32>, vector<8x4xf32>, vector<32x4xf32> -> vector<32x4xf32>
    %956 = arith.truncf %955 : vector<32x4xf32> to vector<32x4xbf16>
    %c4_1366 = arith.constant 4 : index
    %c0_1367 = arith.constant 0 : index
    %c1_1368 = arith.constant 1 : index
    %957 = vector.load %arg16[%c4_1366, %c0_1367, %c1_1368] : memref<6x32x6xbf16, #tpu.memory_space<vmem>>, vector<1x32x4xbf16>
    %958 = vector.shape_cast %957 : vector<1x32x4xbf16> to vector<32x4xbf16>
    %959 = vector.shape_cast %956 : vector<32x4xbf16> to vector<1x32x4xbf16>
    tpu.vector_store %arg16[%c4_1366, %c0_1367, %c1_1368], %959 {strides = array<i32>} : memref<6x32x6xbf16, #tpu.memory_space<vmem>>, vector<1x32x4xbf16>,
    %c0_1369 = arith.constant 0 : index
    %c0_1370 = arith.constant 0 : index
    %c0_1371 = arith.constant 0 : index
    %960 = vector.load %arg16[%c0_1369, %c0_1370, %c0_1371] : memref<6x32x6xbf16, #tpu.memory_space<vmem>>, vector<1x32x4xbf16>
    %961 = vector.shape_cast %960 : vector<1x32x4xbf16> to vector<32x4xbf16>
    %c0_1372 = arith.constant 0 : index
    %c0_1373 = arith.constant 0 : index
    %962 = vector.load %arg21[%c0_1372, %c0_1373] : memref<288x8xbf16, #tpu.memory_space<vmem>>, vector<32x4xbf16>
    tpu.vector_store %arg21[%c0_1372, %c0_1373], %961 {strides = array<i32>} : memref<288x8xbf16, #tpu.memory_space<vmem>>, vector<32x4xbf16>,
    %c0_1374 = arith.constant 0 : index
    %c0_1375 = arith.constant 0 : index
    %c1_1376 = arith.constant 1 : index
    %963 = vector.load %arg16[%c0_1374, %c0_1375, %c1_1376] : memref<6x32x6xbf16, #tpu.memory_space<vmem>>, vector<1x32x4xbf16>
    %964 = vector.shape_cast %963 : vector<1x32x4xbf16> to vector<32x4xbf16>
    %c32_1377 = arith.constant 32 : index
    %c0_1378 = arith.constant 0 : index
    %965 = vector.load %arg21[%c32_1377, %c0_1378] : memref<288x8xbf16, #tpu.memory_space<vmem>>, vector<32x4xbf16>
    tpu.vector_store %arg21[%c32_1377, %c0_1378], %964 {strides = array<i32>} : memref<288x8xbf16, #tpu.memory_space<vmem>>, vector<32x4xbf16>,
    %c0_1379 = arith.constant 0 : index
    %c0_1380 = arith.constant 0 : index
    %c2_1381 = arith.constant 2 : index
    %966 = vector.load %arg16[%c0_1379, %c0_1380, %c2_1381] : memref<6x32x6xbf16, #tpu.memory_space<vmem>>, vector<1x32x4xbf16>
    %967 = vector.shape_cast %966 : vector<1x32x4xbf16> to vector<32x4xbf16>
    %c64_1382 = arith.constant 64 : index
    %c0_1383 = arith.constant 0 : index
    %968 = vector.load %arg21[%c64_1382, %c0_1383] : memref<288x8xbf16, #tpu.memory_space<vmem>>, vector<32x4xbf16>
    tpu.vector_store %arg21[%c64_1382, %c0_1383], %967 {strides = array<i32>} : memref<288x8xbf16, #tpu.memory_space<vmem>>, vector<32x4xbf16>,
    %c1_1384 = arith.constant 1 : index
    %c0_1385 = arith.constant 0 : index
    %c0_1386 = arith.constant 0 : index
    %969 = vector.load %arg16[%c1_1384, %c0_1385, %c0_1386] : memref<6x32x6xbf16, #tpu.memory_space<vmem>>, vector<1x32x4xbf16>
    %970 = vector.shape_cast %969 : vector<1x32x4xbf16> to vector<32x4xbf16>
    %c96_1387 = arith.constant 96 : index
    %c0_1388 = arith.constant 0 : index
    %971 = vector.load %arg21[%c96_1387, %c0_1388] : memref<288x8xbf16, #tpu.memory_space<vmem>>, vector<32x4xbf16>
    tpu.vector_store %arg21[%c96_1387, %c0_1388], %970 {strides = array<i32>} : memref<288x8xbf16, #tpu.memory_space<vmem>>, vector<32x4xbf16>,
    %c1_1389 = arith.constant 1 : index
    %c0_1390 = arith.constant 0 : index
    %c1_1391 = arith.constant 1 : index
    %972 = vector.load %arg16[%c1_1389, %c0_1390, %c1_1391] : memref<6x32x6xbf16, #tpu.memory_space<vmem>>, vector<1x32x4xbf16>
    %973 = vector.shape_cast %972 : vector<1x32x4xbf16> to vector<32x4xbf16>
    %c128_1392 = arith.constant 128 : index
    %c0_1393 = arith.constant 0 : index
    %974 = vector.load %arg21[%c128_1392, %c0_1393] : memref<288x8xbf16, #tpu.memory_space<vmem>>, vector<32x4xbf16>
    tpu.vector_store %arg21[%c128_1392, %c0_1393], %973 {strides = array<i32>} : memref<288x8xbf16, #tpu.memory_space<vmem>>, vector<32x4xbf16>,
    %c1_1394 = arith.constant 1 : index
    %c0_1395 = arith.constant 0 : index
    %c2_1396 = arith.constant 2 : index
    %975 = vector.load %arg16[%c1_1394, %c0_1395, %c2_1396] : memref<6x32x6xbf16, #tpu.memory_space<vmem>>, vector<1x32x4xbf16>
    %976 = vector.shape_cast %975 : vector<1x32x4xbf16> to vector<32x4xbf16>
    %c160_1397 = arith.constant 160 : index
    %c0_1398 = arith.constant 0 : index
    %977 = vector.load %arg21[%c160_1397, %c0_1398] : memref<288x8xbf16, #tpu.memory_space<vmem>>, vector<32x4xbf16>
    tpu.vector_store %arg21[%c160_1397, %c0_1398], %976 {strides = array<i32>} : memref<288x8xbf16, #tpu.memory_space<vmem>>, vector<32x4xbf16>,
    %c2_1399 = arith.constant 2 : index
    %c0_1400 = arith.constant 0 : index
    %c0_1401 = arith.constant 0 : index
    %978 = vector.load %arg16[%c2_1399, %c0_1400, %c0_1401] : memref<6x32x6xbf16, #tpu.memory_space<vmem>>, vector<1x32x4xbf16>
    %979 = vector.shape_cast %978 : vector<1x32x4xbf16> to vector<32x4xbf16>
    %c192_1402 = arith.constant 192 : index
    %c0_1403 = arith.constant 0 : index
    %980 = vector.load %arg21[%c192_1402, %c0_1403] : memref<288x8xbf16, #tpu.memory_space<vmem>>, vector<32x4xbf16>
    tpu.vector_store %arg21[%c192_1402, %c0_1403], %979 {strides = array<i32>} : memref<288x8xbf16, #tpu.memory_space<vmem>>, vector<32x4xbf16>,
    %c2_1404 = arith.constant 2 : index
    %c0_1405 = arith.constant 0 : index
    %c1_1406 = arith.constant 1 : index
    %981 = vector.load %arg16[%c2_1404, %c0_1405, %c1_1406] : memref<6x32x6xbf16, #tpu.memory_space<vmem>>, vector<1x32x4xbf16>
    %982 = vector.shape_cast %981 : vector<1x32x4xbf16> to vector<32x4xbf16>
    %c224_1407 = arith.constant 224 : index
    %c0_1408 = arith.constant 0 : index
    %983 = vector.load %arg21[%c224_1407, %c0_1408] : memref<288x8xbf16, #tpu.memory_space<vmem>>, vector<32x4xbf16>
    tpu.vector_store %arg21[%c224_1407, %c0_1408], %982 {strides = array<i32>} : memref<288x8xbf16, #tpu.memory_space<vmem>>, vector<32x4xbf16>,
    %c2_1409 = arith.constant 2 : index
    %c0_1410 = arith.constant 0 : index
    %c2_1411 = arith.constant 2 : index
    %984 = vector.load %arg16[%c2_1409, %c0_1410, %c2_1411] : memref<6x32x6xbf16, #tpu.memory_space<vmem>>, vector<1x32x4xbf16>
    %985 = vector.shape_cast %984 : vector<1x32x4xbf16> to vector<32x4xbf16>
    %c256_1412 = arith.constant 256 : index
    %c0_1413 = arith.constant 0 : index
    %986 = vector.load %arg21[%c256_1412, %c0_1413] : memref<288x8xbf16, #tpu.memory_space<vmem>>, vector<32x4xbf16>
    tpu.vector_store %arg21[%c256_1412, %c0_1413], %985 {strides = array<i32>} : memref<288x8xbf16, #tpu.memory_space<vmem>>, vector<32x4xbf16>,
    %c2_1414 = arith.constant 2 : index
    %c0_1415 = arith.constant 0 : index
    %c0_1416 = arith.constant 0 : index
    %987 = vector.load %arg16[%c2_1414, %c0_1415, %c0_1416] : memref<6x32x6xbf16, #tpu.memory_space<vmem>>, vector<1x32x4xbf16>
    %988 = vector.shape_cast %987 : vector<1x32x4xbf16> to vector<32x4xbf16>
    %c0_1417 = arith.constant 0 : index
    %c4_1418 = arith.constant 4 : index
    %989 = vector.load %arg21[%c0_1417, %c4_1418] : memref<288x8xbf16, #tpu.memory_space<vmem>>, vector<32x4xbf16>
    tpu.vector_store %arg21[%c0_1417, %c4_1418], %988 {strides = array<i32>} : memref<288x8xbf16, #tpu.memory_space<vmem>>, vector<32x4xbf16>,
    %c2_1419 = arith.constant 2 : index
    %c0_1420 = arith.constant 0 : index
    %c1_1421 = arith.constant 1 : index
    %990 = vector.load %arg16[%c2_1419, %c0_1420, %c1_1421] : memref<6x32x6xbf16, #tpu.memory_space<vmem>>, vector<1x32x4xbf16>
    %991 = vector.shape_cast %990 : vector<1x32x4xbf16> to vector<32x4xbf16>
    %c32_1422 = arith.constant 32 : index
    %c4_1423 = arith.constant 4 : index
    %992 = vector.load %arg21[%c32_1422, %c4_1423] : memref<288x8xbf16, #tpu.memory_space<vmem>>, vector<32x4xbf16>
    tpu.vector_store %arg21[%c32_1422, %c4_1423], %991 {strides = array<i32>} : memref<288x8xbf16, #tpu.memory_space<vmem>>, vector<32x4xbf16>,
    %c2_1424 = arith.constant 2 : index
    %c0_1425 = arith.constant 0 : index
    %c2_1426 = arith.constant 2 : index
    %993 = vector.load %arg16[%c2_1424, %c0_1425, %c2_1426] : memref<6x32x6xbf16, #tpu.memory_space<vmem>>, vector<1x32x4xbf16>
    %994 = vector.shape_cast %993 : vector<1x32x4xbf16> to vector<32x4xbf16>
    %c64_1427 = arith.constant 64 : index
    %c4_1428 = arith.constant 4 : index
    %995 = vector.load %arg21[%c64_1427, %c4_1428] : memref<288x8xbf16, #tpu.memory_space<vmem>>, vector<32x4xbf16>
    tpu.vector_store %arg21[%c64_1427, %c4_1428], %994 {strides = array<i32>} : memref<288x8xbf16, #tpu.memory_space<vmem>>, vector<32x4xbf16>,
    %c3_1429 = arith.constant 3 : index
    %c0_1430 = arith.constant 0 : index
    %c0_1431 = arith.constant 0 : index
    %996 = vector.load %arg16[%c3_1429, %c0_1430, %c0_1431] : memref<6x32x6xbf16, #tpu.memory_space<vmem>>, vector<1x32x4xbf16>
    %997 = vector.shape_cast %996 : vector<1x32x4xbf16> to vector<32x4xbf16>
    %c96_1432 = arith.constant 96 : index
    %c4_1433 = arith.constant 4 : index
    %998 = vector.load %arg21[%c96_1432, %c4_1433] : memref<288x8xbf16, #tpu.memory_space<vmem>>, vector<32x4xbf16>
    tpu.vector_store %arg21[%c96_1432, %c4_1433], %997 {strides = array<i32>} : memref<288x8xbf16, #tpu.memory_space<vmem>>, vector<32x4xbf16>,
    %c3_1434 = arith.constant 3 : index
    %c0_1435 = arith.constant 0 : index
    %c1_1436 = arith.constant 1 : index
    %999 = vector.load %arg16[%c3_1434, %c0_1435, %c1_1436] : memref<6x32x6xbf16, #tpu.memory_space<vmem>>, vector<1x32x4xbf16>
    %1000 = vector.shape_cast %999 : vector<1x32x4xbf16> to vector<32x4xbf16>
    %c128_1437 = arith.constant 128 : index
    %c4_1438 = arith.constant 4 : index
    %1001 = vector.load %arg21[%c128_1437, %c4_1438] : memref<288x8xbf16, #tpu.memory_space<vmem>>, vector<32x4xbf16>
    tpu.vector_store %arg21[%c128_1437, %c4_1438], %1000 {strides = array<i32>} : memref<288x8xbf16, #tpu.memory_space<vmem>>, vector<32x4xbf16>,
    %c3_1439 = arith.constant 3 : index
    %c0_1440 = arith.constant 0 : index
    %c2_1441 = arith.constant 2 : index
    %1002 = vector.load %arg16[%c3_1439, %c0_1440, %c2_1441] : memref<6x32x6xbf16, #tpu.memory_space<vmem>>, vector<1x32x4xbf16>
    %1003 = vector.shape_cast %1002 : vector<1x32x4xbf16> to vector<32x4xbf16>
    %c160_1442 = arith.constant 160 : index
    %c4_1443 = arith.constant 4 : index
    %1004 = vector.load %arg21[%c160_1442, %c4_1443] : memref<288x8xbf16, #tpu.memory_space<vmem>>, vector<32x4xbf16>
    tpu.vector_store %arg21[%c160_1442, %c4_1443], %1003 {strides = array<i32>} : memref<288x8xbf16, #tpu.memory_space<vmem>>, vector<32x4xbf16>,
    %c4_1444 = arith.constant 4 : index
    %c0_1445 = arith.constant 0 : index
    %c0_1446 = arith.constant 0 : index
    %1005 = vector.load %arg16[%c4_1444, %c0_1445, %c0_1446] : memref<6x32x6xbf16, #tpu.memory_space<vmem>>, vector<1x32x4xbf16>
    %1006 = vector.shape_cast %1005 : vector<1x32x4xbf16> to vector<32x4xbf16>
    %c192_1447 = arith.constant 192 : index
    %c4_1448 = arith.constant 4 : index
    %1007 = vector.load %arg21[%c192_1447, %c4_1448] : memref<288x8xbf16, #tpu.memory_space<vmem>>, vector<32x4xbf16>
    tpu.vector_store %arg21[%c192_1447, %c4_1448], %1006 {strides = array<i32>} : memref<288x8xbf16, #tpu.memory_space<vmem>>, vector<32x4xbf16>,
    %c4_1449 = arith.constant 4 : index
    %c0_1450 = arith.constant 0 : index
    %c1_1451 = arith.constant 1 : index
    %1008 = vector.load %arg16[%c4_1449, %c0_1450, %c1_1451] : memref<6x32x6xbf16, #tpu.memory_space<vmem>>, vector<1x32x4xbf16>
    %1009 = vector.shape_cast %1008 : vector<1x32x4xbf16> to vector<32x4xbf16>
    %c224_1452 = arith.constant 224 : index
    %c4_1453 = arith.constant 4 : index
    %1010 = vector.load %arg21[%c224_1452, %c4_1453] : memref<288x8xbf16, #tpu.memory_space<vmem>>, vector<32x4xbf16>
    tpu.vector_store %arg21[%c224_1452, %c4_1453], %1009 {strides = array<i32>} : memref<288x8xbf16, #tpu.memory_space<vmem>>, vector<32x4xbf16>,
    %c4_1454 = arith.constant 4 : index
    %c0_1455 = arith.constant 0 : index
    %c2_1456 = arith.constant 2 : index
    %1011 = vector.load %arg16[%c4_1454, %c0_1455, %c2_1456] : memref<6x32x6xbf16, #tpu.memory_space<vmem>>, vector<1x32x4xbf16>
    %1012 = vector.shape_cast %1011 : vector<1x32x4xbf16> to vector<32x4xbf16>
    %c256_1457 = arith.constant 256 : index
    %c4_1458 = arith.constant 4 : index
    %1013 = vector.load %arg21[%c256_1457, %c4_1458] : memref<288x8xbf16, #tpu.memory_space<vmem>>, vector<32x4xbf16>
    tpu.vector_store %arg21[%c256_1457, %c4_1458], %1012 {strides = array<i32>} : memref<288x8xbf16, #tpu.memory_space<vmem>>, vector<32x4xbf16>,
    %c0_1459 = arith.constant 0 : index
    %c0_1460 = arith.constant 0 : index
    %1014 = vector.load %arg5[%c0_1459, %c0_1460] : memref<32x288xbf16, #tpu.memory_space<vmem>>, vector<32x288xbf16>
    %c0_1461 = arith.constant 0 : index
    %c0_1462 = arith.constant 0 : index
    %1015 = vector.load %arg21[%c0_1461, %c0_1462] : memref<288x8xbf16, #tpu.memory_space<vmem>>, vector<288x8xbf16>
    %cst_1463 = arith.constant dense<0.000000e+00> : vector<32x8xf32>
    %1016 = tpu.matmul %1014, %1015, %cst_1463 {dimension_numbers = #tpu.dot_dimension_numbers<[1], [0], [0], [1], [0, 0, 1, 1], [], []>} : vector<32x288xbf16>, vector<288x8xbf16>, vector<32x8xf32> -> vector<32x8xf32>
    %c0_1464 = arith.constant 0 : index
    %c0_1465 = arith.constant 0 : index
    %1017 = vector.load %arg10[%c0_1464, %c0_1465] : memref<32x1xf32, #tpu.memory_space<vmem>>, vector<32x1xf32>
    %1018 = vector.broadcast %1017 : vector<32x1xf32> to vector<32x8xf32>
    %1019 = arith.addf %1016, %1018 : vector<32x8xf32>
    %cst_1466 = arith.constant 2.000000e-01 : f32
    %1020 = vector.broadcast %cst_1466 : f32 to vector<32x8xf32>
    %1021 = arith.mulf %1020, %1019 : vector<32x8xf32>
    %1022 = arith.maximumf %1019, %1021 : vector<32x8xf32>
    %1023 = tpu.iota {dimensions = array<i32: 0>} : vector<4x2xi32>
    %1024 = tpu.iota {dimensions = array<i32: 1>} : vector<4x2xi32>
    %c2_i32_1467 = arith.constant 2 : i32
    %1025 = vector.broadcast %c2_i32_1467 : i32 to vector<4x2xi32>
    %1026 = arith.muli %1025, %1024 : vector<4x2xi32>
    %1027 = arith.cmpi eq, %1023, %1026 : vector<4x2xi32>
    %1028 = arith.extui %1027 : vector<4x2xi1> to vector<4x2xi32>
    %1029 = arith.sitofp %1028 : vector<4x2xi32> to vector<4x2xf32>
    %cst_1468 = arith.constant 0.000000e+00 : bf16
    %1030 = vector.broadcast %cst_1468 : bf16 to vector<4x32x4xbf16>
    %c0_1469 = arith.constant 0 : index
    %c0_1470 = arith.constant 0 : index
    %c0_1471 = arith.constant 0 : index
    %1031 = vector.load %arg17[%c0_1469, %c0_1470, %c0_1471] : memref<4x32x4xbf16, #tpu.memory_space<vmem>>, vector<4x32x4xbf16>
    tpu.vector_store %arg17[%c0_1469, %c0_1470, %c0_1471], %1030 {strides = array<i32>} : memref<4x32x4xbf16, #tpu.memory_space<vmem>>, vector<4x32x4xbf16>,
    %1032 = vector.extract_strided_slice %1022 {offsets = [0, 0], sizes = [32, 4], strides = [1, 1]} : vector<32x8xf32> to vector<32x4xf32>
    %cst_1472 = arith.constant dense<0.000000e+00> : vector<32x2xf32>
    %1033 = tpu.matmul %1032, %1029, %cst_1472 {dimension_numbers = #tpu.dot_dimension_numbers<[1], [0], [0], [1], [0, 0, 1, 1], [], []>} : vector<32x4xf32>, vector<4x2xf32>, vector<32x2xf32> -> vector<32x2xf32>
    %1034 = arith.truncf %1033 : vector<32x2xf32> to vector<32x2xbf16>
    %c1_1473 = arith.constant 1 : index
    %c0_1474 = arith.constant 0 : index
    %c1_1475 = arith.constant 1 : index
    %1035 = vector.load %arg17[%c1_1473, %c0_1474, %c1_1475] : memref<4x32x4xbf16, #tpu.memory_space<vmem>>, vector<1x32x2xbf16>
    %1036 = vector.shape_cast %1035 : vector<1x32x2xbf16> to vector<32x2xbf16>
    %1037 = vector.shape_cast %1034 : vector<32x2xbf16> to vector<1x32x2xbf16>
    tpu.vector_store %arg17[%c1_1473, %c0_1474, %c1_1475], %1037 {strides = array<i32>} : memref<4x32x4xbf16, #tpu.memory_space<vmem>>, vector<1x32x2xbf16>,
    %1038 = vector.extract_strided_slice %1022 {offsets = [0, 4], sizes = [32, 4], strides = [1, 1]} : vector<32x8xf32> to vector<32x4xf32>
    %cst_1476 = arith.constant dense<0.000000e+00> : vector<32x2xf32>
    %1039 = tpu.matmul %1038, %1029, %cst_1476 {dimension_numbers = #tpu.dot_dimension_numbers<[1], [0], [0], [1], [0, 0, 1, 1], [], []>} : vector<32x4xf32>, vector<4x2xf32>, vector<32x2xf32> -> vector<32x2xf32>
    %1040 = arith.truncf %1039 : vector<32x2xf32> to vector<32x2xbf16>
    %c2_1477 = arith.constant 2 : index
    %c0_1478 = arith.constant 0 : index
    %c1_1479 = arith.constant 1 : index
    %1041 = vector.load %arg17[%c2_1477, %c0_1478, %c1_1479] : memref<4x32x4xbf16, #tpu.memory_space<vmem>>, vector<1x32x2xbf16>
    %1042 = vector.shape_cast %1041 : vector<1x32x2xbf16> to vector<32x2xbf16>
    %1043 = vector.shape_cast %1040 : vector<32x2xbf16> to vector<1x32x2xbf16>
    tpu.vector_store %arg17[%c2_1477, %c0_1478, %c1_1479], %1043 {strides = array<i32>} : memref<4x32x4xbf16, #tpu.memory_space<vmem>>, vector<1x32x2xbf16>,
    %c0_1480 = arith.constant 0 : index
    %c0_1481 = arith.constant 0 : index
    %c0_1482 = arith.constant 0 : index
    %1044 = vector.load %arg17[%c0_1480, %c0_1481, %c0_1482] : memref<4x32x4xbf16, #tpu.memory_space<vmem>>, vector<1x32x2xbf16>
    %1045 = vector.shape_cast %1044 : vector<1x32x2xbf16> to vector<32x2xbf16>
    %c0_1483 = arith.constant 0 : index
    %c0_1484 = arith.constant 0 : index
    %1046 = vector.load %arg22[%c0_1483, %c0_1484] : memref<288x2xbf16, #tpu.memory_space<vmem>>, vector<32x2xbf16>
    tpu.vector_store %arg22[%c0_1483, %c0_1484], %1045 {strides = array<i32>} : memref<288x2xbf16, #tpu.memory_space<vmem>>, vector<32x2xbf16>,
    %c0_1485 = arith.constant 0 : index
    %c0_1486 = arith.constant 0 : index
    %c1_1487 = arith.constant 1 : index
    %1047 = vector.load %arg17[%c0_1485, %c0_1486, %c1_1487] : memref<4x32x4xbf16, #tpu.memory_space<vmem>>, vector<1x32x2xbf16>
    %1048 = vector.shape_cast %1047 : vector<1x32x2xbf16> to vector<32x2xbf16>
    %c32_1488 = arith.constant 32 : index
    %c0_1489 = arith.constant 0 : index
    %1049 = vector.load %arg22[%c32_1488, %c0_1489] : memref<288x2xbf16, #tpu.memory_space<vmem>>, vector<32x2xbf16>
    tpu.vector_store %arg22[%c32_1488, %c0_1489], %1048 {strides = array<i32>} : memref<288x2xbf16, #tpu.memory_space<vmem>>, vector<32x2xbf16>,
    %c0_1490 = arith.constant 0 : index
    %c0_1491 = arith.constant 0 : index
    %c2_1492 = arith.constant 2 : index
    %1050 = vector.load %arg17[%c0_1490, %c0_1491, %c2_1492] : memref<4x32x4xbf16, #tpu.memory_space<vmem>>, vector<1x32x2xbf16>
    %1051 = vector.shape_cast %1050 : vector<1x32x2xbf16> to vector<32x2xbf16>
    %c64_1493 = arith.constant 64 : index
    %c0_1494 = arith.constant 0 : index
    %1052 = vector.load %arg22[%c64_1493, %c0_1494] : memref<288x2xbf16, #tpu.memory_space<vmem>>, vector<32x2xbf16>
    tpu.vector_store %arg22[%c64_1493, %c0_1494], %1051 {strides = array<i32>} : memref<288x2xbf16, #tpu.memory_space<vmem>>, vector<32x2xbf16>,
    %c1_1495 = arith.constant 1 : index
    %c0_1496 = arith.constant 0 : index
    %c0_1497 = arith.constant 0 : index
    %1053 = vector.load %arg17[%c1_1495, %c0_1496, %c0_1497] : memref<4x32x4xbf16, #tpu.memory_space<vmem>>, vector<1x32x2xbf16>
    %1054 = vector.shape_cast %1053 : vector<1x32x2xbf16> to vector<32x2xbf16>
    %c96_1498 = arith.constant 96 : index
    %c0_1499 = arith.constant 0 : index
    %1055 = vector.load %arg22[%c96_1498, %c0_1499] : memref<288x2xbf16, #tpu.memory_space<vmem>>, vector<32x2xbf16>
    tpu.vector_store %arg22[%c96_1498, %c0_1499], %1054 {strides = array<i32>} : memref<288x2xbf16, #tpu.memory_space<vmem>>, vector<32x2xbf16>,
    %c1_1500 = arith.constant 1 : index
    %c0_1501 = arith.constant 0 : index
    %c1_1502 = arith.constant 1 : index
    %1056 = vector.load %arg17[%c1_1500, %c0_1501, %c1_1502] : memref<4x32x4xbf16, #tpu.memory_space<vmem>>, vector<1x32x2xbf16>
    %1057 = vector.shape_cast %1056 : vector<1x32x2xbf16> to vector<32x2xbf16>
    %c128_1503 = arith.constant 128 : index
    %c0_1504 = arith.constant 0 : index
    %1058 = vector.load %arg22[%c128_1503, %c0_1504] : memref<288x2xbf16, #tpu.memory_space<vmem>>, vector<32x2xbf16>
    tpu.vector_store %arg22[%c128_1503, %c0_1504], %1057 {strides = array<i32>} : memref<288x2xbf16, #tpu.memory_space<vmem>>, vector<32x2xbf16>,
    %c1_1505 = arith.constant 1 : index
    %c0_1506 = arith.constant 0 : index
    %c2_1507 = arith.constant 2 : index
    %1059 = vector.load %arg17[%c1_1505, %c0_1506, %c2_1507] : memref<4x32x4xbf16, #tpu.memory_space<vmem>>, vector<1x32x2xbf16>
    %1060 = vector.shape_cast %1059 : vector<1x32x2xbf16> to vector<32x2xbf16>
    %c160_1508 = arith.constant 160 : index
    %c0_1509 = arith.constant 0 : index
    %1061 = vector.load %arg22[%c160_1508, %c0_1509] : memref<288x2xbf16, #tpu.memory_space<vmem>>, vector<32x2xbf16>
    tpu.vector_store %arg22[%c160_1508, %c0_1509], %1060 {strides = array<i32>} : memref<288x2xbf16, #tpu.memory_space<vmem>>, vector<32x2xbf16>,
    %c2_1510 = arith.constant 2 : index
    %c0_1511 = arith.constant 0 : index
    %c0_1512 = arith.constant 0 : index
    %1062 = vector.load %arg17[%c2_1510, %c0_1511, %c0_1512] : memref<4x32x4xbf16, #tpu.memory_space<vmem>>, vector<1x32x2xbf16>
    %1063 = vector.shape_cast %1062 : vector<1x32x2xbf16> to vector<32x2xbf16>
    %c192_1513 = arith.constant 192 : index
    %c0_1514 = arith.constant 0 : index
    %1064 = vector.load %arg22[%c192_1513, %c0_1514] : memref<288x2xbf16, #tpu.memory_space<vmem>>, vector<32x2xbf16>
    tpu.vector_store %arg22[%c192_1513, %c0_1514], %1063 {strides = array<i32>} : memref<288x2xbf16, #tpu.memory_space<vmem>>, vector<32x2xbf16>,
    %c2_1515 = arith.constant 2 : index
    %c0_1516 = arith.constant 0 : index
    %c1_1517 = arith.constant 1 : index
    %1065 = vector.load %arg17[%c2_1515, %c0_1516, %c1_1517] : memref<4x32x4xbf16, #tpu.memory_space<vmem>>, vector<1x32x2xbf16>
    %1066 = vector.shape_cast %1065 : vector<1x32x2xbf16> to vector<32x2xbf16>
    %c224_1518 = arith.constant 224 : index
    %c0_1519 = arith.constant 0 : index
    %1067 = vector.load %arg22[%c224_1518, %c0_1519] : memref<288x2xbf16, #tpu.memory_space<vmem>>, vector<32x2xbf16>
    tpu.vector_store %arg22[%c224_1518, %c0_1519], %1066 {strides = array<i32>} : memref<288x2xbf16, #tpu.memory_space<vmem>>, vector<32x2xbf16>,
    %c2_1520 = arith.constant 2 : index
    %c0_1521 = arith.constant 0 : index
    %c2_1522 = arith.constant 2 : index
    %1068 = vector.load %arg17[%c2_1520, %c0_1521, %c2_1522] : memref<4x32x4xbf16, #tpu.memory_space<vmem>>, vector<1x32x2xbf16>
    %1069 = vector.shape_cast %1068 : vector<1x32x2xbf16> to vector<32x2xbf16>
    %c256_1523 = arith.constant 256 : index
    %c0_1524 = arith.constant 0 : index
    %1070 = vector.load %arg22[%c256_1523, %c0_1524] : memref<288x2xbf16, #tpu.memory_space<vmem>>, vector<32x2xbf16>
    tpu.vector_store %arg22[%c256_1523, %c0_1524], %1069 {strides = array<i32>} : memref<288x2xbf16, #tpu.memory_space<vmem>>, vector<32x2xbf16>,
    %c0_1525 = arith.constant 0 : index
    %c0_1526 = arith.constant 0 : index
    %1071 = vector.load %arg6[%c0_1525, %c0_1526] : memref<32x288xbf16, #tpu.memory_space<vmem>>, vector<32x288xbf16>
    %c0_1527 = arith.constant 0 : index
    %c0_1528 = arith.constant 0 : index
    %1072 = vector.load %arg22[%c0_1527, %c0_1528] : memref<288x2xbf16, #tpu.memory_space<vmem>>, vector<288x2xbf16>
    %cst_1529 = arith.constant dense<0.000000e+00> : vector<32x2xf32>
    %1073 = tpu.matmul %1071, %1072, %cst_1529 {dimension_numbers = #tpu.dot_dimension_numbers<[1], [0], [0], [1], [0, 0, 1, 1], [], []>} : vector<32x288xbf16>, vector<288x2xbf16>, vector<32x2xf32> -> vector<32x2xf32>
    %c0_1530 = arith.constant 0 : index
    %c0_1531 = arith.constant 0 : index
    %1074 = vector.load %arg11[%c0_1530, %c0_1531] : memref<32x1xf32, #tpu.memory_space<vmem>>, vector<32x1xf32>
    %1075 = vector.broadcast %1074 : vector<32x1xf32> to vector<32x2xf32>
    %1076 = arith.addf %1073, %1075 : vector<32x2xf32>
    %cst_1532 = arith.constant 2.000000e-01 : f32
    %1077 = vector.broadcast %cst_1532 : f32 to vector<32x2xf32>
    %1078 = arith.mulf %1077, %1076 : vector<32x2xf32>
    %1079 = arith.maximumf %1076, %1078 : vector<32x2xf32>
    %1080 = tpu.iota {dimensions = array<i32: 0>} : vector<2x1xi32>
    %1081 = tpu.iota {dimensions = array<i32: 1>} : vector<2x1xi32>
    %c2_i32_1533 = arith.constant 2 : i32
    %1082 = vector.broadcast %c2_i32_1533 : i32 to vector<2x1xi32>
    %1083 = arith.muli %1082, %1081 : vector<2x1xi32>
    %1084 = arith.cmpi eq, %1080, %1083 : vector<2x1xi32>
    %1085 = arith.extui %1084 : vector<2x1xi1> to vector<2x1xi32>
    %1086 = arith.sitofp %1085 : vector<2x1xi32> to vector<2x1xf32>
    %cst_1534 = arith.constant dense<0.000000e+00> : vector<32x1xf32>
    %1087 = tpu.matmul %1079, %1086, %cst_1534 {dimension_numbers = #tpu.dot_dimension_numbers<[1], [0], [0], [1], [0, 0, 1, 1], [], []>} : vector<32x2xf32>, vector<2x1xf32>, vector<32x1xf32> -> vector<32x1xf32>
    %c0_1535 = arith.constant 0 : index
    %c0_1536 = arith.constant 0 : index
    %c0_1537 = arith.constant 0 : index
    %c0_1538 = arith.constant 0 : index
    %1088 = vector.load %arg12[%c0_1535, %c0_1536, %c0_1537, %c0_1538] : memref<1x32x1x1xf32, #tpu.memory_space<vmem>>, vector<1x32x1x1xf32>
    %1089 = vector.shape_cast %1088 : vector<1x32x1x1xf32> to vector<32x1xf32>
    %1090 = vector.shape_cast %1087 : vector<32x1xf32> to vector<1x32x1x1xf32>
    tpu.vector_store %arg12[%c0_1535, %c0_1536, %c0_1537, %c0_1538], %1090 {strides = array<i32>} : memref<1x32x1x1xf32, #tpu.memory_space<vmem>>, vector<1x32x1x1xf32>,
    return
  }
  func.func @transform_0(%arg0: i32) -> (i32, i32, i32, i32) {
    %c0_i32 = arith.constant 0 : i32
    %c0_i32_0 = arith.constant 0 : i32
    %c0_i32_1 = arith.constant 0 : i32
    %c0_i32_2 = arith.constant 0 : i32
    return %arg0, %c0_i32, %c0_i32_0, %c0_i32_1 : i32, i32, i32, i32
  }
  func.func @transform_1(%arg0: i32) -> (i32, i32) {
    %c0_i32 = arith.constant 0 : i32
    %c0_i32_0 = arith.constant 0 : i32
    %c0_i32_1 = arith.constant 0 : i32
    return %c0_i32, %c0_i32_0 : i32, i32
  }
  func.func @transform_2(%arg0: i32) -> (i32, i32) {
    %c0_i32 = arith.constant 0 : i32
    %c0_i32_0 = arith.constant 0 : i32
    %c0_i32_1 = arith.constant 0 : i32
    return %c0_i32, %c0_i32_0 : i32, i32
  }
  func.func @transform_3(%arg0: i32) -> (i32, i32) {
    %c0_i32 = arith.constant 0 : i32
    %c0_i32_0 = arith.constant 0 : i32
    %c0_i32_1 = arith.constant 0 : i32
    return %c0_i32, %c0_i32_0 : i32, i32
  }
  func.func @transform_4(%arg0: i32) -> (i32, i32) {
    %c0_i32 = arith.constant 0 : i32
    %c0_i32_0 = arith.constant 0 : i32
    %c0_i32_1 = arith.constant 0 : i32
    return %c0_i32, %c0_i32_0 : i32, i32
  }
  func.func @transform_5(%arg0: i32) -> (i32, i32) {
    %c0_i32 = arith.constant 0 : i32
    %c0_i32_0 = arith.constant 0 : i32
    %c0_i32_1 = arith.constant 0 : i32
    return %c0_i32, %c0_i32_0 : i32, i32
  }
  func.func @transform_6(%arg0: i32) -> (i32, i32) {
    %c0_i32 = arith.constant 0 : i32
    %c0_i32_0 = arith.constant 0 : i32
    %c0_i32_1 = arith.constant 0 : i32
    return %c0_i32, %c0_i32_0 : i32, i32
  }
  func.func @transform_7(%arg0: i32) -> (i32, i32) {
    %c0_i32 = arith.constant 0 : i32
    %c0_i32_0 = arith.constant 0 : i32
    %c0_i32_1 = arith.constant 0 : i32
    return %c0_i32, %c0_i32_0 : i32, i32
  }
  func.func @transform_8(%arg0: i32) -> (i32, i32) {
    %c0_i32 = arith.constant 0 : i32
    %c0_i32_0 = arith.constant 0 : i32
    %c0_i32_1 = arith.constant 0 : i32
    return %c0_i32, %c0_i32_0 : i32, i32
  }
  func.func @transform_9(%arg0: i32) -> (i32, i32) {
    %c0_i32 = arith.constant 0 : i32
    %c0_i32_0 = arith.constant 0 : i32
    %c0_i32_1 = arith.constant 0 : i32
    return %c0_i32, %c0_i32_0 : i32, i32
  }
  func.func @transform_10(%arg0: i32) -> (i32, i32) {
    %c0_i32 = arith.constant 0 : i32
    %c0_i32_0 = arith.constant 0 : i32
    %c0_i32_1 = arith.constant 0 : i32
    return %c0_i32, %c0_i32_0 : i32, i32
  }
  func.func @transform_11(%arg0: i32) -> (i32, i32, i32, i32) {
    %c0_i32 = arith.constant 0 : i32
    %c0_i32_0 = arith.constant 0 : i32
    %c0_i32_1 = arith.constant 0 : i32
    %c0_i32_2 = arith.constant 0 : i32
    return %arg0, %c0_i32, %c0_i32_0, %c0_i32_1 : i32, i32, i32, i32
  }
}

</mosaic_0001>

<bundles_post_ra>
// kernel: _lambda_.1
= control target key start
LH: loop header
LB: loop body
LE: loop exit
PB: predicated region body
PF: predicated region fallthrough
CT: control target
= control target key end

     0   :  { %s8446_s17 = smov 0   ;;  %s10137_s0 = inlined_call_operand.vmem [shape: bf16[2,16,2,16], index: 0, kind: input, shape index: {}]   ;;  %s10138_s1 = inlined_call_operand.vmem [shape: bf16[16,18], index: 1, kind: input, shape index: {}]   ;;  %s10139_s2 = inlined_call_operand.vmem [shape: bf16[32,144], index: 2, kind: input, shape index: {}]   ;;  %s10140_s3 = inlined_call_operand.vmem [shape: bf16[32,288], index: 3, kind: input, shape index: {}]   ;;  %s10141_s4 = inlined_call_operand.vmem [shape: bf16[32,288], index: 4, kind: input, shape index: {}]   ;;  %s10142_s5 = inlined_call_operand.vmem [shape: bf16[32,288], index: 5, kind: input, shape index: {}]   ;;  %s10143_s6 = inlined_call_operand.vmem [shape: f32[16,1], index: 6, kind: input, shape index: {}]   ;;  %s10144_s7 = inlined_call_operand.vmem [shape: f32[32,1], index: 7, kind: input, shape index: {}]   ;;  %s10145_s8 = inlined_call_operand.vmem [shape: f32[32,1], index: 8, kind: input, shape index: {}]   ;;  %s10146_s9 = inlined_call_operand.vmem [shape: f32[32,1], index: 9, kind: input, shape index: {}]   ;;  %s10147_s10 = inlined_call_operand.vmem [shape: f32[32,1], index: 10, kind: input, shape index: {}]   ;;  %s10148_s11 = inlined_call_operand.vmem [shape: f32[2,32,1,1], index: 11, kind: output, shape index: {}]  }
   0x1 LB: > { %s7591_s18 = sadd.s32 4294967295, %s8335_s17   ;;  %p7595_p0 = scmp.ge.s32.totalorder %s8335_s17, 1  ;;  %s8335_s17 = sphi %s8446_s17, %s21_s17  }
   0x2   : > { %p336_p1 = scmp.lt.s32.totalorder %s8335_s17, 3 }
   0x4   : > { %p337_p2 = pnand %p7595_p0, %p336_p1 }
   0x5   : > { %p8454_p3 = scmp.lt.s32.totalorder (!%p337_p2), %s7591_s18, 1  ;;  %vm383_vm0 = vcmask (!%p337_p2), 139264   ;;  %v8337_v0 = vmov (!%p337_p2), 0   ;;  %s10179_s24 = smov (!%p337_p2), 1   ;;  %v8339_v11 = vmov (!%p337_p2), 1935823168   ;;  %v516_v13 = vlaneseq (!%p337_p2) }
   0x6   : > { %340 = sbr.rel (%p337_p2) target bundleno = 4245 (0x1095), region = 64  ;;  %387 = vst.msk [vmem:[#allocation2 + $0x3] sm:$0x1] (!%p337_p2), %vm383_vm0, %v8337_v0  ;;  %384 = vst.msk [vmem:[#allocation2] sm:$0x1] (!%p337_p2), %vm383_vm0, %v8337_v0  ;;  %3592 = vmatprep.mubr.bf16.mxu1 (!%p337_p2), %v8337_v0  ;;  %8228 = vset.pattern.permute.xlu0 (!%p337_p2), %v8337_v0  ;;  %v514_v12 = vunpack.c.l.s4 (!%p337_p2), %v8339_v11  ;;  %s10173_s25 = smov (!%p337_p2), 126  }
   0x7   : > { %385 = vst.msk [vmem:[#allocation2 + $0x1] sm:$0x1] (!%p337_p2), %vm383_vm0, %v8337_v0  ;;  %386 = vst.msk [vmem:[#allocation2 + $0x2] sm:$0x1] (!%p337_p2), %vm383_vm0, %v8337_v0  ;;  %8229 = vset.pattern.permute.xlu1 (!%p337_p2), %v8337_v0  ;;  %v8530_v17 = vshrl.u32 (!%p337_p2), %v516_v13, 7  ;;  %s10175_s26 = smov (!%p337_p2), 127  }
   0x8   : > { %388 = vst.msk [vmem:[#allocation2 + $0x4] sm:$0x1] (!%p337_p2), %vm383_vm0, %v8337_v0  ;;  %389 = vst.msk [vmem:[#allocation2 + $0x5] sm:$0x1] (!%p337_p2), %vm383_vm0, %v8337_v0  ;;  %v515_v16 = vunpack.c.0.s8 (!%p337_p2), %v514_v12  ;;  %vm483_vm1 = vcmask (!%p337_p2), 131080   ;;  %s10181_s27 = smov (!%p337_p2), 16  }
   0x9   : > { %390 = vst.msk [vmem:[#allocation2 + $0x6] sm:$0x1] (!%p337_p2), %vm383_vm0, %v8337_v0  ;;  %391 = vst.msk [vmem:[#allocation2 + $0x7] sm:$0x1] (!%p337_p2), %vm383_vm0, %v8337_v0  ;;  %s10177_s28 = smov (!%p337_p2), 15   ;;  %vm523_vm2 = vcmask (!%p337_p2), 123905  }
   0xa   : > { %392 = vst.msk [vmem:[#allocation2 + $0x8] sm:$0x1] (!%p337_p2), %vm383_vm0, %v8337_v0  ;;  %393 = vst.msk [vmem:[#allocation2 + $0x9] sm:$0x1] (!%p337_p2), %vm383_vm0, %v8337_v0  ;;  %v8537_v22 = vsub.s32 (!%p337_p2), %v515_v16, %v8530_v17  ;;  %vm545_vm3 = vcmask (!%p337_p2), 124930   ;;  %vm501_vm4 = vcmask (!%p337_p2), 122880  }
   0xb   : > { %394 = vst.msk [vmem:[#allocation2 + $0xa] sm:$0x1] (!%p337_p2), %vm383_vm0, %v8337_v0  ;;  %395 = vst.msk [vmem:[#allocation2 + $0xb] sm:$0x1] (!%p337_p2), %vm383_vm0, %v8337_v0  ;;  %s10183_s29 = smov (!%p337_p2), 32   ;;  %s10153_s30 = smov (!%p337_p2), 14  }
   0xc   : > { %396 = vst.msk [vmem:[#allocation2 + $0xc] sm:$0x1] (!%p337_p2), %vm383_vm0, %v8337_v0  ;;  %397 = vst.msk [vmem:[#allocation2 + $0xd] sm:$0x1] (!%p337_p2), %vm383_vm0, %v8337_v0  ;;  %s8346_s12 = smov (!%p337_p2), 31   ;;  %s10185_s13 = smov (!%p337_p2), 48  }
   0xd   : > { %398 = vst.msk [vmem:[#allocation2 + $0xe] sm:$0x1] %vm383_vm0, %v8337_v0  ;;  %399 = vst.msk [vmem:[#allocation2 + $0xf] sm:$0x1] %vm383_vm0, %v8337_v0  ;;  %s10212_s18 = smov (!%p8454_p3, %s7591_s18), 1  ;;  %s10159_s14 = smov 30  }
   0xe   : > { %400 = vst.msk [vmem:[#allocation2 + $0x10] sm:$0x1] %vm383_vm0, %v8337_v0  ;;  %401 = vst.msk [vmem:[#allocation2 + $0x11] sm:$0x1] %vm383_vm0, %v8337_v0  ;;  %s7596_s20 = sshll.u32 %s10212_s18, 4  ;;  %s8349_s15 = smov 47  }
   0xf   : > { %s8505_s23 = scalar_lea.vmem %s10137_s0, %s7596_s20  ;;  %v8230_v18 = vld [vmem:[#allocation2] ss:$0 sps:$4 sm:$0x11]   ;;  %vm566_vm5 = vcmask 125955   ;;  %s8350_s16 = smov 46   ;;  %vm690_vm6 = vcmask 254080  }
  0x10   : > { %v404_v1 = vld [vmem:[%s8505_s23 + $0x2] sm:$0x1]  ;;  %v403_v2 = vld [vmem:[%s8505_s23 + $0x1] sm:$0x1]  ;;  %v412_v3 = vld [vmem:[%s8505_s23 + $0xa] sm:$0x1]  ;;  %v534_v23 = vrot.slane %v8230_v18, %v8537_v22 }
  0x11   : > { %438 = vrot.lane.b32.xlu1 %v404_v1, %s10179_s24  ;;  %436 = vrot.lane.b32.xlu0 %v403_v2, %s10179_s24  ;;  %v411_v4 = vld [vmem:[%s8505_s23 + $0x9] sm:$0x1]  ;;  %v409_v5 = vld [vmem:[%s8505_s23 + $0x7] sm:$0x1]  ;;  %v500_v61 = vld [vmem:[#allocation2] sm:$0x1] }
  0x12   : > { %v405_v6 = vld [vmem:[%s8505_s23 + $0x3] sm:$0x1]  ;;  %v402_v7 = vld [vmem:[%s8505_s23] sm:$0x1]  ;;  %v413_v8 = vld [vmem:[%s8505_s23 + $0xb] sm:$0x1]  ;;  %v541_v27 = vrot.slane %v534_v23, %v8537_v22 }
  0x13   : > { %v410_v9 = vld [vmem:[%s8505_s23 + $0x8] sm:$0x1]  ;;  %v406_v10 = vld [vmem:[%s8505_s23 + $0x4] sm:$0x1]  ;;  %v407_v14 = vld [vmem:[%s8505_s23 + $0x5] sm:$0x1] }
  0x14   : > { %v414_v15 = vld [vmem:[%s8505_s23 + $0xc] sm:$0x1]  ;;  %v408_v19 = vld [vmem:[%s8505_s23 + $0x6] sm:$0x1]  ;;  %v415_v20 = vld [vmem:[%s8505_s23 + $0xd] sm:$0x1] }
  0x15   : > { %454 = vrot.lane.b32.xlu1 %v412_v3, %s10179_s24  ;;  %452 = vrot.lane.b32.xlu0 %v411_v4, %s10179_s24  ;;  %v7598_v21 = vld.sshfl [vmem:[#allocation2] sm:$0x1 pattern:$0x73625140]  ;;  %v417_v25 = vld [vmem:[%s8505_s23 + $0xf] sm:$0x1] }
  0x16   : > { %v512_v24 = vcombine.low %v7598_v21, %v7598_v21  ;;  %v416_v26 = vld [vmem:[%s8505_s23 + $0xe] sm:$0x1]  ;;  %502 = vst.msk [vmem:[#allocation7] sm:$0x1] %vm501_vm4, %v500_v61  ;;  %s10149_s19 = smov 63   ;;  %s8352_s20 = smov 64  }
  0x17   : > { %s8353_s21 = smov 62   ;;  %vm712_vm7 = vcmask 255105   ;;  %vm883_vm8 = vcmask 385280   ;;  %vm905_vm9 = vcmask 386305   ;;  %vm1076_vm10 = vcmask 516480   ;;  %s10155_s22 = smov 79  }
  0x18   : > { %v519_v28 = vrot.slane %v512_v24, %v8537_v22  ;;  %s10151_s23 = smov 80   ;;  %vm1098_vm11 = vcmask 517505   ;;  %vm734_vm12 = vcmask 256130   ;;  %vm757_vm13 = vcmask 257155  }
  0x19   : > { %448 = vrot.lane.b32.xlu1 %v409_v5, %s10179_s24  ;;  %440 = vrot.lane.b32.xlu0 %v405_v6, %s10179_s24  ;;  %vm927_vm14 = vcmask 387330   ;;  %vm950_vm15 = vcmask 388355   ;;  %vm1120_vm0 = vcmask 518530  }
  0x1d   : > { %434 = vrot.lane.b32.xlu1 %v402_v7, %s10179_s24  ;;  %456 = vrot.lane.b32.xlu0 %v413_v8, %s10179_s24 }
  0x21   : > { %450 = vrot.lane.b32.xlu1 %v410_v9, %s10179_s24  ;;  %442 = vrot.lane.b32.xlu0 %v406_v10, %s10179_s24 }
  0x25   : > { %444 = vrot.lane.b32.xlu1 %v407_v14, %s10179_s24  ;;  %458 = vrot.lane.b32.xlu0 %v414_v15, %s10179_s24 }
  0x29   : > { %446 = vrot.lane.b32.xlu1 %v408_v19, %s10179_s24  ;;  %460 = vrot.lane.b32.xlu0 %v415_v20, %s10179_s24 }
  0x2d   : > { %464 = vrot.lane.b32.xlu1 %v417_v25, %s10179_s24  ;;  %462 = vrot.lane.b32.xlu0 %v416_v26, %s10179_s24 }
  0x31   : > { %542 = vrot.lane.b32.xlu1 %v541_v27, %s10173_s25  ;;  %520 = vrot.lane.b32.xlu0 %v519_v28, %s10175_s26 }
  0x83   : > { %v439_v29 = vpop.permute.xlu1 %438  ;;  %v437_v30 = vpop.permute.xlu0 %436 }
  0x84   : > { %486 = vst.msk [vmem:[#allocation2 + $0x3] sm:$0x1] %vm483_vm1, %v439_v29  ;;  %485 = vst.msk [vmem:[#allocation2 + $0x2] sm:$0x1] %vm483_vm1, %v437_v30 }
  0x87   : > { %v455_v31 = vpop.permute.xlu1 %454  ;;  %v453_v32 = vpop.permute.xlu0 %452 }
  0x88   : > { %494 = vst.msk [vmem:[#allocation2 + $0xb] sm:$0x1] %vm483_vm1, %v455_v31  ;;  %493 = vst.msk [vmem:[#allocation2 + $0xa] sm:$0x1] %vm483_vm1, %v453_v32 }
  0x8b   : > { %v449_v33 = vpop.permute.xlu1 %448  ;;  %v441_v34 = vpop.permute.xlu0 %440  ;;  %v7604_v43 = vld.sshfl [vmem:[#allocation2 + $0x2] sm:$0x1 pattern:$0x73625140] }
  0x8c   : > { %491 = vst.msk [vmem:[#allocation2 + $0x8] sm:$0x1] %vm483_vm1, %v449_v33  ;;  %487 = vst.msk [vmem:[#allocation2 + $0x4] sm:$0x1] %vm483_vm1, %v441_v34  ;;  %v8570_v50 = vrot.slane %v7604_v43, %v8537_v22  ;;  %v788_v60 = vcombine.low %v7604_v43, %v7604_v43 }
  0x8d   : > { %v7609_v1 = vld.sshfl [vmem:[#allocation2 + $0x3] sm:$0x1 pattern:$0x73625140] }
  0x8e   : > { %v795_v62 = vrot.slane %v788_v60, %v8537_v22  ;;  %v8596_v3 = vrot.slane %v7609_v1, %v8537_v22  ;;  %v981_v9 = vcombine.low %v7609_v1, %v7609_v1  ;;  %v8271_v10 = vld [vmem:[#allocation2 + $0x2] ss:$0 sps:$4 sm:$0x11]   ;;  %v8238_v43 = vld [vmem:[#allocation2 + $0x3] ss:$0 sps:$4 sm:$0x11]  }
  0x8f   : > { %v435_v35 = vpop.permute.xlu1 %434  ;;  %v457_v36 = vpop.permute.xlu0 %456  ;;  %v7643_v55 = vld.sshfl [vmem:[#allocation2 + $0xa] sm:$0x1 pattern:$0x73625140]  ;;  %v619_v14 = vrot.slane %v8271_v10, %v8537_v22 }
  0x90   : > { %484 = vst.msk [vmem:[#allocation2 + $0x1] sm:$0x1] %vm483_vm1, %v435_v35  ;;  %495 = vst.msk [vmem:[#allocation2 + $0xc] sm:$0x1] %vm483_vm1, %v457_v36  ;;  %v8584_v59 = vrot.slane %v7643_v55, %v8537_v22  ;;  %v2302_v5 = vcombine.low %v7643_v55, %v7643_v55  ;;  %v988_v12 = vrot.slane %v981_v9, %v8537_v22 }
  0x91   : > { %v7648_v7 = vld.sshfl [vmem:[#allocation2 + $0xb] sm:$0x1 pattern:$0x73625140]  ;;  %v626_v18 = vrot.slane %v619_v14, %v8537_v22 }
  0x92   : > { %v2309_v6 = vrot.slane %v2302_v5, %v8537_v22  ;;  %v8607_v8 = vrot.slane %v7648_v7, %v8537_v22  ;;  %v8275_v20 = vld [vmem:[#allocation2 + $0xa] ss:$0 sps:$4 sm:$0x11]   ;;  %v2491_v21 = vcombine.low %v7648_v7, %v7648_v7  ;;  %v8237_v55 = vld [vmem:[#allocation2 + $0xb] ss:$0 sps:$4 sm:$0x11]  }
  0x93   : > { %v451_v37 = vpop.permute.xlu1 %450  ;;  %v443_v38 = vpop.permute.xlu0 %442  ;;  %v7637_v49 = vld.sshfl [vmem:[#allocation2 + $0x8] sm:$0x1 pattern:$0x73625140]  ;;  %628 = vst.msk [vmem:[#allocation7 + $0x8] sm:$0x4] %vm545_vm3, %v626_v18  ;;  %v2137_v24 = vrot.slane %v8275_v20, %v8537_v22  ;;  %v2324_v61 = vrot.slane %v8237_v55, %v8537_v22 }
  0x94   : > { %492 = vst.msk [vmem:[#allocation2 + $0x9] sm:$0x1] %vm483_vm1, %v451_v37  ;;  %488 = vst.msk [vmem:[#allocation2 + $0x5] sm:$0x1] %vm483_vm1, %v443_v38  ;;  %v2033_v53 = vcombine.low %v7637_v49, %v7637_v49  ;;  %v2022_v2 = vld [vmem:[#allocation2 + $0x8] sm:$0x1]  ;;  %v2498_v29 = vrot.slane %v2491_v21, %v8537_v22  ;;  %v831_v49 = vrot.slane %v8238_v43, %v8537_v22 }
  0x95   : > { %2023 = vst.msk [vmem:[#allocation7 + $0x4] sm:$0x1] %vm501_vm4, %v2022_v2  ;;  %v7614_v11 = vld.sshfl [vmem:[#allocation2 + $0x4] sm:$0x1 pattern:$0x73625140]  ;;  %v2144_v27 = vrot.slane %v2137_v24, %v8537_v22  ;;  %v2331_v5 = vrot.slane %v2324_v61, %v8537_v22 }
  0x96   : > { %v2040_v57 = vrot.slane %v2033_v53, %v8537_v22  ;;  %v8618_v16 = vrot.slane %v7614_v11, %v8537_v22  ;;  %v8231_v30 = vld [vmem:[#allocation2 + $0x8] ss:$0 sps:$4 sm:$0x11]   ;;  %v8234_v32 = vld [vmem:[#allocation2 + $0xa] ss:$0 sps:$4 sm:$0x11]   ;;  %v1174_v35 = vcombine.low %v7614_v11, %v7614_v11 }
  0x97   : > { %v7599_v39 = vld.sshfl [vmem:[#allocation2 + $0x1] sm:$0x1 pattern:$0x73625140]  ;;  %v445_v40 = vpop.permute.xlu1 %444  ;;  %v459_v42 = vpop.permute.xlu0 %458  ;;  %2146 = vst.msk [vmem:[#allocation7 + $0xc] sm:$0x4] %vm545_vm3, %v2144_v27  ;;  %v2054_v34 = vrot.slane %v8231_v30, %v8537_v22 }
  0x98   : > { %v583_v41 = vrot.slane %v7599_v39, %v8537_v22  ;;  %489 = vst.msk [vmem:[#allocation2 + $0x6] sm:$0x1] %vm483_vm1, %v445_v40  ;;  %496 = vst.msk [vmem:[#allocation2 + $0xd] sm:$0x1] %vm483_vm1, %v459_v42  ;;  %v597_v47 = vcombine.low %v7599_v39, %v7599_v39  ;;  %v8643_v39 = vrot.slane %v1174_v35, %v8537_v22 }
  0x99   : > { %v8273_v15 = vld [vmem:[#allocation2 + $0x1] ss:$0 sps:$4 sm:$0x11]   ;;  %v8233_v37 = vld [vmem:[#allocation2 + $0x3] ss:$0 sps:$4 sm:$0x11]   ;;  %v2061_v38 = vrot.slane %v2054_v34, %v8537_v22 }
  0x9a   : > { %584 = vrot.lane.b32.xlu0 %v583_v41, %s10175_s26  ;;  %v604_v52 = vrot.slane %v597_v47, %v8537_v22  ;;  %v556_v19 = vrot.slane %v8273_v15, %v8537_v22  ;;  %v8232_v36 = vld [vmem:[#allocation2 + $0x1] ss:$0 sps:$4 sm:$0x11]   ;;  %v8236_v42 = vld [vmem:[#allocation2 + $0x2] ss:$0 sps:$4 sm:$0x11]  }
  0x9b   : > { %v7638_v44 = vld.sshfl [vmem:[#allocation2 + $0x9] sm:$0x1 pattern:$0x73625140]  ;;  %v447_v45 = vpop.permute.xlu1 %446  ;;  %v461_v48 = vpop.permute.xlu0 %460  ;;  %v723_v40 = vrot.slane %v8232_v36, %v8537_v22 }
  0x9c   : > { %v2101_v46 = vrot.slane %v7638_v44, %v8537_v22  ;;  %490 = vst.msk [vmem:[#allocation2 + $0x7] sm:$0x1] %vm483_vm1, %v447_v45  ;;  %497 = vst.msk [vmem:[#allocation2 + $0xe] sm:$0x1] %vm483_vm1, %v461_v48  ;;  %v2218_v63 = vcombine.low %v7638_v44, %v7638_v44  ;;  %v557_v23 = vcombine.low %v556_v19, %v556_v19 }
  0x9d   : > { %v8277_v25 = vld [vmem:[#allocation2 + $0x9] ss:$0 sps:$4 sm:$0x11]   ;;  %v730_v44 = vrot.slane %v723_v40, %v8537_v22  ;;  %v810_v45 = vrot.slane %v8233_v37, %v8537_v22  ;;  %v745_v48 = vrot.slane %v8236_v42, %v8537_v22  ;;  %v8242_v1 = vld [vmem:[#allocation2 + $0xb] ss:$0 sps:$4 sm:$0x11]  }
  0x9e   : > { %687 = vrot.lane.b32.xlu0 %v583_v41, %s10181_s27  ;;  %2102 = vrot.lane.b32.xlu1 %v2101_v46, %s10175_s26  ;;  %v2225_v4 = vrot.slane %v2218_v63, %v8537_v22  ;;  %v564_v26 = vrot.slane %v557_v23, %v8537_v22  ;;  %v2075_v28 = vrot.slane %v8277_v25, %v8537_v22  ;;  %v8235_v47 = vld [vmem:[#allocation2 + $0x9] ss:$0 sps:$4 sm:$0x11]   ;;  %v8244_v10 = vld [vmem:[#allocation2 + $0x3] ss:$0 sps:$4 sm:$0x11]  }
  0x9f   : > { %v465_v51 = vpop.permute.xlu1 %464  ;;  %v463_v54 = vpop.permute.xlu0 %462  ;;  %v2156_v41 = vrot.slane %v8234_v32, %v8537_v22  ;;  %v2239_v53 = vrot.slane %v8235_v47, %v8537_v22  ;;  %v2345_v9 = vrot.slane %v8242_v1, %v8537_v22  ;;  %v8243_v18 = vld [vmem:[#allocation2 + $0xa] ss:$0 sps:$4 sm:$0x11]   ;;  %v938_v19 = vrot.slane %v8244_v10, %v8537_v22  ;;  %v8246_v20 = vld [vmem:[#allocation2 + $0x4] ss:$0 sps:$4 sm:$0x11]  }
  0xa0   : > { %499 = vst.msk [vmem:[#allocation2 + $0x10] sm:$0x1] %vm483_vm1, %v465_v51  ;;  %498 = vst.msk [vmem:[#allocation2 + $0xf] sm:$0x1] %vm483_vm1, %v463_v54  ;;  %v2076_v31 = vcombine.low %v2075_v28, %v2075_v28  ;;  %v817_v51 = vrot.slane %v810_v45, %v8537_v22  ;;  %v746_v54 = vcombine.low %v745_v48, %v745_v48  ;;  %vm1143_vm1 = vcmask 519555  }
  0xa1   : > { %567 = vst.msk [vmem:[#allocation7] sm:$0x8] %vm566_vm5, %v564_v26  ;;  %v2346_v15 = vcombine.low %v2345_v9, %v2345_v9  ;;  %v8245_v21 = vld [vmem:[#allocation2 + $0xc] ss:$0 sps:$4 sm:$0x11]   ;;  %v2428_v25 = vrot.slane %v8243_v18, %v8537_v22  ;;  %v939_v26 = vcombine.low %v938_v19, %v938_v19  ;;  %v1024_v27 = vrot.slane %v8246_v20, %v8537_v22 }
  0xa2   : > { %775 = vrot.lane.b32.xlu0 %v8570_v50, %s10177_s28  ;;  %605 = vrot.lane.b32.xlu1 %v604_v52, %s10173_s25  ;;  %v2083_v33 = vrot.slane %v2076_v31, %v8537_v22  ;;  %v753_v60 = vrot.slane %v746_v54, %v8537_v22  ;;  %v8248_v28 = vld [vmem:[#allocation2 + $0xb] ss:$0 sps:$4 sm:$0x11]   ;;  %v8250_v35 = vld [vmem:[#allocation2 + $0xc] ss:$0 sps:$4 sm:$0x11]  }
  0xa3   : > { %v543_v56 = vpop.permute.xlu1 %542  ;;  %v521_v58 = vpop.permute.xlu0 %520  ;;  %v2353_v24 = vrot.slane %v2346_v15, %v8537_v22  ;;  %v2435_v30 = vrot.slane %v2428_v25, %v8537_v22  ;;  %v946_v31 = vrot.slane %v939_v26, %v8537_v22  ;;  %v1025_v32 = vcombine.low %v1024_v27, %v1024_v27  ;;  %v8249_v37 = vld [vmem:[#allocation2 + $0x5] ss:$0 sps:$4 sm:$0x11]   ;;  %v8252_v43 = vld [vmem:[#allocation2 + $0x4] ss:$0 sps:$4 sm:$0x11]  }
  0xa4   : > { %546 = vst.msk [vmem:[#allocation7] sm:$0x4] %vm545_vm3, %v543_v56  ;;  %v8240_v56 = vld [vmem:[#allocation2 + $0xa] ss:$0 sps:$4 sm:$0x11]   ;;  %v2449_v34 = vrot.slane %v8248_v28, %v8537_v22  ;;  %v2534_v42 = vrot.slane %v8250_v35, %v8537_v22 }
  0xa5   : > { %524 = vst.msk [vmem:[#allocation7] sm:$0x2] %vm523_vm2, %v521_v58  ;;  %v2246_v58 = vrot.slane %v2239_v53, %v8537_v22  ;;  %v2260_v63 = vrot.slane %v8240_v56, %v8537_v22  ;;  %v8251_v45 = vld [vmem:[#allocation2 + $0xb] ss:$0 sps:$4 sm:$0x11]  }
  0xa6   : > { %2205 = vrot.lane.b32.xlu0 %v2101_v46, %s10181_s27  ;;  %2041 = vrot.lane.b32.xlu1 %v2040_v57, %s10175_s26  ;;  %2085 = vst.msk [vmem:[#allocation7 + $0x4] sm:$0x8] %vm566_vm5, %v2083_v33  ;;  %v2157_v46 = vcombine.low %v2156_v41, %v2156_v41  ;;  %v832_v57 = vcombine.low %v831_v49, %v831_v49  ;;  %v8247_v33 = vld [vmem:[#allocation2 + $0x3] ss:$0 sps:$4 sm:$0x11]  }
  0xa7   : > { %v2261_v7 = vcombine.low %v2260_v63, %v2260_v63  ;;  %v1109_v40 = vrot.slane %v8247_v33, %v8537_v22  ;;  %v2450_v41 = vcombine.low %v2449_v34, %v2449_v34  ;;  %v2535_v48 = vcombine.low %v2534_v42, %v2534_v42  ;;  %v7653_v10 = vld.sshfl [vmem:[#allocation2 + $0xc] sm:$0x1 pattern:$0x73625140] }
  0xa8   : > { %v839_v2 = vrot.slane %v832_v57, %v8537_v22  ;;  %v1131_v49 = vrot.slane %v8252_v43, %v8537_v22  ;;  %v2617_v54 = vrot.slane %v8251_v45, %v8537_v22  ;;  %v2680_v18 = vcombine.low %v7653_v10, %v7653_v10  ;;  %v8259_v26 = vld [vmem:[#allocation2 + $0x4] ss:$0 sps:$4 sm:$0x11]  }
  0xa9   : > { %v2268_v14 = vrot.slane %v2261_v7, %v8537_v22  ;;  %v2457_v47 = vrot.slane %v2450_v41, %v8537_v22  ;;  %v2542_v55 = vrot.slane %v2535_v48, %v8537_v22  ;;  %v8262_v48 = vld [vmem:[#allocation2 + $0xc] ss:$0 sps:$4 sm:$0x11]  }
  0xaa   : > { %2289 = vrot.lane.b32.xlu0 %v8584_v59, %s10177_s28  ;;  %709 = vrot.lane.b32.xlu1 %v604_v52, %s10177_s28  ;;  %v2164_v52 = vrot.slane %v2157_v46, %v8537_v22  ;;  %v1116_v46 = vrot.slane %v1109_v40, %v8537_v22  ;;  %v1132_v56 = vcombine.low %v1131_v49, %v1131_v49  ;;  %v8263_v49 = vld [vmem:[#allocation2 + $0xd] ss:$0 sps:$4 sm:$0x11]  }
  0xab   : > { %v2624_v61 = vrot.slane %v2617_v54, %v8537_v22  ;;  %v2827_v54 = vrot.slane %v8263_v49, %v8537_v22 }
  0xae   : > { %880 = vrot.lane.b32.xlu0 %v8570_v50, %s10183_s29  ;;  %796 = vrot.lane.b32.xlu1 %v795_v62, %s10153_s30 }
  0xb2   : > { %968 = vrot.lane.b32.xlu0 %v8596_v3, %s8346_s12  ;;  %2226 = vrot.lane.b32.xlu1 %v2225_v4, %s10177_s28 }
  0xb6   : > { %2394 = vrot.lane.b32.xlu0 %v8584_v59, %s10183_s29  ;;  %2310 = vrot.lane.b32.xlu1 %v2309_v6, %s10153_s30 }
  0xba   : > { %2478 = vrot.lane.b32.xlu0 %v8607_v8, %s8346_s12  ;;  %902 = vrot.lane.b32.xlu1 %v795_v62, %s8346_s12  ;;  %v8239_v62 = vld [vmem:[#allocation2 + $0x2] ss:$0 sps:$4 sm:$0x11]  }
  0xbe   : > { %1073 = vrot.lane.b32.xlu0 %v8596_v3, %s10185_s13  ;;  %989 = vrot.lane.b32.xlu1 %v988_v12, %s10159_s14 }
  0xc2   : > { %1161 = vrot.lane.b32.xlu0 %v8618_v16, %s8349_s15  ;;  %2415 = vrot.lane.b32.xlu1 %v2309_v6, %s8346_s12  ;;  %v916_v6 = vrot.slane %v8239_v62, %v8537_v22  ;;  %v1139_v62 = vrot.slane %v1132_v56, %v8537_v22 }
  0xc6   : > { %2583 = vrot.lane.b32.xlu0 %v8607_v8, %s10185_s13  ;;  %2499 = vrot.lane.b32.xlu1 %v2498_v29, %s10159_s14 }
  0xca   : > { %2123 = vrot.lane.b32.xlu0 %v2225_v4, %s10173_s25  ;;  %1095 = vrot.lane.b32.xlu1 %v988_v12, %s8349_s15  ;;  %v8241_v4 = vld [vmem:[#allocation2 + $0x4] ss:$0 sps:$4 sm:$0x11]   ;;  %v923_v12 = vrot.slane %v916_v6, %v8537_v22 }
  0xcb   : > { %v1003_v11 = vrot.slane %v8241_v4, %v8537_v22  ;;  %v8256_v4 = vld [vmem:[#allocation2 + $0xd] ss:$0 sps:$4 sm:$0x11]  }
  0xcd   : > { %v1010_v23 = vrot.slane %v1003_v11, %v8537_v22  ;;  %v2702_v11 = vrot.slane %v8256_v4, %v8537_v22 }
  0xce   : > { %2062 = vrot.lane.b32.xlu0 %v2061_v38, %s10173_s25  ;;  %1182 = vrot.lane.b32.xlu1 %v8643_v39, %s8350_s16  ;;  %v1032_v38 = vrot.slane %v1025_v32, %v8537_v22 }
  0xcf   : > { %v2709_v19 = vrot.slane %v2702_v11, %v8537_v22 }
  0xd2   : > { %731 = vrot.lane.b32.xlu0 %v730_v44, %s10153_s30  ;;  %2604 = vrot.lane.b32.xlu1 %v2498_v29, %s8349_s15  ;;  %v2513_v29 = vrot.slane %v8245_v21, %v8537_v22  ;;  %v1196_v44 = vrot.slane %v8249_v37, %v8537_v22  ;;  %v8730_v21 = vrot.slane %v2680_v18, %v8537_v22  ;;  %v8261_v37 = vld [vmem:[#allocation2 + $0x6] ss:$0 sps:$4 sm:$0x11]  }
  0xd3   : > { %v1389_v43 = vrot.slane %v8261_v37, %v8537_v22 }
  0xd4   : > { %v2520_v36 = vrot.slane %v2513_v29, %v8537_v22  ;;  %v1203_v53 = vrot.slane %v1196_v44, %v8537_v22  ;;  %v1302_v29 = vrot.slane %v8259_v26, %v8537_v22 }
  0xd6   : > { %818 = vrot.lane.b32.xlu0 %v817_v51, %s10181_s27  ;;  %2165 = vrot.lane.b32.xlu1 %v2164_v52, %s10175_s26  ;;  %v8253_v51 = vld [vmem:[#allocation2 + $0x2] ss:$0 sps:$4 sm:$0x11]   ;;  %v8254_v52 = vld [vmem:[#allocation2 + $0x5] ss:$0 sps:$4 sm:$0x11]   ;;  %v1309_v34 = vrot.slane %v1302_v29, %v8537_v22 }
  0xd7   : > { %v638_v57 = vrot.slane %v8253_v51, %v8537_v22  ;;  %v7625_v29 = vld.sshfl [vmem:[#allocation2 + $0x6] sm:$0x1 pattern:$0x73625140] }
  0xd9   : > { %v639_v63 = vcombine.low %v638_v57, %v638_v57 }
  0xda   : > { %2247 = vrot.lane.b32.xlu0 %v2246_v58, %s10153_s30  ;;  %754 = vrot.lane.b32.xlu1 %v753_v60, %s10181_s27  ;;  %v1217_v58 = vrot.slane %v8254_v52, %v8537_v22  ;;  %v8255_v60 = vld [vmem:[#allocation2 + $0xc] ss:$0 sps:$4 sm:$0x11]  }
  0xdb   : > { %v646_v6 = vrot.slane %v639_v63, %v8537_v22 }
  0xdc   : > { %v1218_v1 = vcombine.low %v1217_v58, %v1217_v58 }
  0xde   : > { %2332 = vrot.lane.b32.xlu0 %v2331_v5, %s10181_s27  ;;  %840 = vrot.lane.b32.xlu1 %v839_v2, %s10177_s28  ;;  %v2638_v2 = vrot.slane %v8255_v60, %v8537_v22  ;;  %v8257_v5 = vld [vmem:[#allocation2 + $0xd] ss:$0 sps:$4 sm:$0x11]   ;;  %v1225_v7 = vrot.slane %v1218_v1, %v8537_v22  ;;  %v2828_v60 = vcombine.low %v2827_v54, %v2827_v54 }
  0xe0   : > { %v2639_v9 = vcombine.low %v2638_v2, %v2638_v2  ;;  %v2835_v2 = vrot.slane %v2828_v60, %v8537_v22  ;;  %v8276_v60 = vld [vmem:[#allocation2 + $0xf] ss:$0 sps:$4 sm:$0x11]  }
  0xe2   : > { %924 = vrot.lane.b32.xlu0 %v923_v12, %s10159_s14  ;;  %2269 = vrot.lane.b32.xlu1 %v2268_v14, %s10181_s27  ;;  %v2723_v12 = vrot.slane %v8257_v5, %v8537_v22  ;;  %v8722_v14 = vrot.slane %v7653_v10, %v8537_v22  ;;  %v2646_v15 = vrot.slane %v2639_v9, %v8537_v22 }
  0xe4   : > { %v2724_v20 = vcombine.low %v2723_v12, %v2723_v12 }
  0xe6   : > { %1011 = vrot.lane.b32.xlu0 %v1010_v23, %s10183_s29  ;;  %2354 = vrot.lane.b32.xlu1 %v2353_v24, %s10177_s28  ;;  %v8258_v23 = vld [vmem:[#allocation2 + $0x5] ss:$0 sps:$4 sm:$0x11]   ;;  %v2731_v24 = vrot.slane %v2724_v20, %v8537_v22 }
  0xe7   : > { %v1324_v25 = vrot.slane %v8258_v23, %v8537_v22  ;;  %v8267_v23 = vld [vmem:[#allocation2 + $0x5] ss:$0 sps:$4 sm:$0x11]  }
  0xe9   : > { %v1325_v28 = vcombine.low %v1324_v25, %v1324_v25 }
  0xea   : > { %2436 = vrot.lane.b32.xlu0 %v2435_v30, %s10159_s14  ;;  %947 = vrot.lane.b32.xlu1 %v946_v31, %s10183_s29  ;;  %v8260_v30 = vld [vmem:[#allocation2 + $0x6] ss:$0 sps:$4 sm:$0x11]  }
  0xeb   : > { %v7620_v31 = vld.sshfl [vmem:[#allocation2 + $0x5] sm:$0x1 pattern:$0x73625140]  ;;  %v1332_v33 = vrot.slane %v1325_v28, %v8537_v22 }
  0xec   : > { %v1367_v35 = vcombine.low %v7620_v31, %v7620_v31  ;;  %v8757_v41 = vrot.slane %v7620_v31, %v8537_v22  ;;  %v8268_v28 = vld [vmem:[#allocation2 + $0x7] ss:$0 sps:$4 sm:$0x11]  }
  0xee   : > { %2521 = vrot.lane.b32.xlu0 %v2520_v36, %s10183_s29  ;;  %1033 = vrot.lane.b32.xlu1 %v1032_v38, %s8346_s12  ;;  %v1410_v36 = vrot.slane %v8260_v30, %v8537_v22  ;;  %v8754_v40 = vrot.slane %v1367_v35, %v8537_v22 }
  0xf0   : > { %v1411_v42 = vcombine.low %v1410_v36, %v1410_v36 }
  0xf2   : > { %1117 = vrot.lane.b32.xlu0 %v1116_v46, %s8350_s16  ;;  %2458 = vrot.lane.b32.xlu1 %v2457_v47, %s10183_s29  ;;  %v1418_v46 = vrot.slane %v1411_v42, %v8537_v22  ;;  %v1396_v47 = vrot.slane %v1389_v43, %v8537_v22 }
  0xf6   : > { %1204 = vrot.lane.b32.xlu0 %v1203_v53, %s10185_s13  ;;  %2543 = vrot.lane.b32.xlu1 %v2542_v55, %s8346_s12  ;;  %v2806_v53 = vrot.slane %v8262_v48, %v8537_v22  ;;  %v7658_v55 = vld.sshfl [vmem:[#allocation2 + $0xd] sm:$0x1 pattern:$0x73625140] }
  0xf7   : > { %v2869_v5 = vcombine.low %v7658_v55, %v7658_v55 }
  0xf8   : > { %v2813_v58 = vrot.slane %v2806_v53, %v8537_v22  ;;  %v7663_v53 = vld.sshfl [vmem:[#allocation2 + $0xe] sm:$0x1 pattern:$0x73625140] }
  0xf9   : > { %v8799_v11 = vrot.slane %v2869_v5, %v8537_v22 }
  0xfa   : > { %2625 = vrot.lane.b32.xlu0 %v2624_v61, %s8350_s16  ;;  %1140 = vrot.lane.b32.xlu1 %v1139_v62, %s10185_s13  ;;  %v8264_v61 = vld [vmem:[#allocation2 + $0xe] ss:$0 sps:$4 sm:$0x11]  }
  0xfb   : > { %v8265_v62 = vld [vmem:[#allocation2 + $0xe] ss:$0 sps:$4 sm:$0x11]   ;;  %v2891_v4 = vrot.slane %v8264_v61, %v8537_v22 }
  0xfd   : > { %v2898_v10 = vrot.slane %v2891_v4, %v8537_v22  ;;  %v3101_v4 = vrot.slane %v8276_v60, %v8537_v22 }
  0xfe   : > { %647 = vrot.lane.b32.xlu0 %v646_v6, %s10175_s26  ;;  %1226 = vrot.lane.b32.xlu1 %v1225_v7, %s8349_s15  ;;  %v2912_v6 = vrot.slane %v8265_v62, %v8537_v22 }
 0x100   : > { %v2913_v12 = vcombine.low %v2912_v6, %v2912_v6 }
 0x102   : > { %2667 = vrot.lane.b32.xlu0 %v8722_v14, %s8349_s15  ;;  %2647 = vrot.lane.b32.xlu1 %v2646_v15, %s10185_s13  ;;  %v8266_v15 = vld [vmem:[#allocation2 + $0x6] ss:$0 sps:$4 sm:$0x11]   ;;  %v2920_v20 = vrot.slane %v2913_v12, %v8537_v22 }
 0x106   : > { %2710 = vrot.lane.b32.xlu0 %v2709_v19, %s10185_s13  ;;  %2688 = vrot.lane.b32.xlu1 %v8730_v21, %s8350_s16 }
 0x10a   : > { %667 = vrot.lane.b32.xlu0 %v8570_v50, %s10173_s25  ;;  %2732 = vrot.lane.b32.xlu1 %v2731_v24, %s8349_s15 }
 0x10c   : > { %v585_v27 = vpop.permute.xlu0 %584 }
 0x10d   : > { %587 = vst.msk [vmem:[#allocation7 + $0x8] sm:$0x1] %vm501_vm4, %v585_v27  ;;  %v1495_v27 = vrot.slane %v8267_v23, %v8537_v22 }
 0x10e   : > { %1288 = vrot.lane.b32.xlu0 %v8643_v39, %s10149_s19  ;;  %1266 = vrot.lane.b32.xlu1 %v8618_v16, %s8352_s20 }
 0x110   : > { %v688_v50 = vpop.permute.xlu0 %687  ;;  %v2103_v32 = vpop.permute.xlu1 %2102 }
 0x111   : > { %691 = vst.msk [vmem:[#allocation7] sm:$0x1] %vm690_vm6, %v688_v50  ;;  %v1502_v50 = vrot.slane %v1495_v27, %v8537_v22  ;;  %v7630_v27 = vld.sshfl [vmem:[#allocation2 + $0x7] sm:$0x1 pattern:$0x73625140] }
 0x112   : > { %2105 = vst.msk [vmem:[#allocation7 + $0xc] sm:$0x1] %vm501_vm4, %v2103_v32  ;;  %1333 = vrot.lane.b32.xlu0 %v1332_v33, %s8352_s20  ;;  %1310 = vrot.lane.b32.xlu1 %v1309_v34, %s8353_s21  ;;  %v1560_v32 = vcombine.low %v7625_v29, %v7625_v29  ;;  %v1603_v33 = vrot.slane %v8268_v28, %v8537_v22  ;;  %v8269_v34 = vld [vmem:[#allocation2 + $0x7] ss:$0 sps:$4 sm:$0x11]  }
 0x114   : > { %v776_v39 = vpop.permute.xlu0 %775  ;;  %v606_v38 = vpop.permute.xlu1 %605  ;;  %v8827_v37 = vrot.slane %v1560_v32, %v8537_v22 }
 0x115   : > { %778 = vst.msk [vmem:[#allocation7 + $0x8] sm:$0x1] %vm690_vm6, %v776_v39  ;;  %v8830_v39 = vrot.slane %v7625_v29, %v8537_v22 }
 0x116   : > { %608 = vst.msk [vmem:[#allocation7 + $0x8] sm:$0x2] %vm523_vm2, %v606_v38  ;;  %1375 = vrot.lane.b32.xlu0 %v8754_v40, %s8353_s21  ;;  %1354 = vrot.lane.b32.xlu1 %v8757_v41, %s10149_s19  ;;  %v1604_v38 = vcombine.low %v1603_v33, %v1603_v33 }
 0x118   : > { %v2206_v44 = vpop.permute.xlu0 %2205  ;;  %v2042_v45 = vpop.permute.xlu1 %2041 }
 0x119   : > { %2208 = vst.msk [vmem:[#allocation7 + $0x4] sm:$0x1] %vm690_vm6, %v2206_v44  ;;  %v1611_v44 = vrot.slane %v1604_v38, %v8537_v22 }
 0x11a   : > { %2044 = vst.msk [vmem:[#allocation7 + $0x4] sm:$0x2] %vm523_vm2, %v2042_v45  ;;  %1419 = vrot.lane.b32.xlu0 %v1418_v46, %s10149_s19  ;;  %1397 = vrot.lane.b32.xlu1 %v1396_v47, %s8352_s20  ;;  %v8270_v46 = vld [vmem:[#allocation2 + $0xd] ss:$0 sps:$4 sm:$0x11]  }
 0x11b   : > { %v8272_v47 = vld [vmem:[#allocation2 + $0xe] ss:$0 sps:$4 sm:$0x11]  }
 0x11c   : > { %v2290_v51 = vpop.permute.xlu0 %2289  ;;  %v710_v52 = vpop.permute.xlu1 %709 }
 0x11d   : > { %2292 = vst.msk [vmem:[#allocation7 + $0xc] sm:$0x1] %vm690_vm6, %v2290_v51  ;;  %v2995_v51 = vrot.slane %v8270_v46, %v8537_v22 }
 0x11e   : > { %713 = vst.msk [vmem:[#allocation7] sm:$0x2] %vm712_vm7, %v710_v52  ;;  %2772 = vrot.lane.b32.xlu0 %v8722_v14, %s8352_s20  ;;  %2185 = vrot.lane.b32.xlu1 %v8584_v59, %s10173_s25  ;;  %v8787_v59 = vrot.slane %v7658_v55, %v8537_v22  ;;  %v3016_v52 = vrot.slane %v8272_v47, %v8537_v22 }
 0x120   : > { %v881_v56 = vpop.permute.xlu0 %880  ;;  %v797_v57 = vpop.permute.xlu1 %796 }
 0x121   : > { %884 = vst.msk [vmem:[#allocation7] sm:$0x1] %vm883_vm8, %v881_v56  ;;  %v3002_v56 = vrot.slane %v2995_v51, %v8537_v22  ;;  %v7668_v51 = vld.sshfl [vmem:[#allocation2 + $0xf] sm:$0x1 pattern:$0x73625140] }
 0x122   : > { %799 = vst.msk [vmem:[#allocation7 + $0x8] sm:$0x2] %vm712_vm7, %v797_v57  ;;  %2814 = vrot.lane.b32.xlu0 %v2813_v58, %s8353_s21  ;;  %2793 = vrot.lane.b32.xlu1 %v8730_v21, %s10149_s19  ;;  %v1517_v21 = vrot.slane %v8266_v15, %v8537_v22  ;;  %v3017_v57 = vcombine.low %v3016_v52, %v3016_v52  ;;  %v8274_v58 = vld [vmem:[#allocation2 + $0xf] ss:$0 sps:$4 sm:$0x11]  }
 0x124   : > { %v969_v63 = vpop.permute.xlu0 %968  ;;  %v2227_v1 = vpop.permute.xlu1 %2226  ;;  %v1518_v26 = vcombine.low %v1517_v21, %v1517_v21 }
 0x125   : > { %971 = vst.msk [vmem:[#allocation7 + $0x8] sm:$0x1] %vm883_vm8, %v969_v63  ;;  %v3024_v63 = vrot.slane %v3017_v57, %v8537_v22  ;;  %v8285_v57 = vld [vmem:[#allocation2 + $0x10] ss:$0 sps:$4 sm:$0x11]  }
 0x126   : > { %2229 = vst.msk [vmem:[#allocation7 + $0x4] sm:$0x2] %vm712_vm7, %v2227_v1  ;;  %2856 = vrot.lane.b32.xlu0 %v8787_v59, %s10149_s19  ;;  %2836 = vrot.lane.b32.xlu1 %v2835_v2, %s8352_s20  ;;  %v1525_v31 = vrot.slane %v1518_v26, %v8537_v22  ;;  %v3080_v1 = vrot.slane %v8274_v58, %v8537_v22  ;;  %v8280_v26 = vld [vmem:[#allocation2 + $0x8] ss:$0 sps:$4 sm:$0x11]  }
 0x127   : > { %v3058_v2 = vcombine.low %v7663_v53, %v7663_v53 }
 0x128   : > { %v2395_v7 = vpop.permute.xlu0 %2394  ;;  %v2311_v9 = vpop.permute.xlu1 %2310 }
 0x129   : > { %2397 = vst.msk [vmem:[#allocation7 + $0x4] sm:$0x1] %vm883_vm8, %v2395_v7  ;;  %v3087_v7 = vrot.slane %v3080_v1, %v8537_v22  ;;  %v3290_v1 = vrot.slane %v8285_v57, %v8537_v22 }
 0x12a   : > { %2899 = vrot.lane.b32.xlu0 %v2898_v10, %s8352_s20  ;;  %2877 = vrot.lane.b32.xlu1 %v8799_v11, %s8353_s21  ;;  %v3102_v10 = vcombine.low %v3101_v4, %v3101_v4 }
 0x12c   : > { %v2479_v18 = vpop.permute.xlu0 %2478  ;;  %v903_v19 = vpop.permute.xlu1 %902 }
 0x12d   : > { %2481 = vst.msk [vmem:[#allocation7 + $0xc] sm:$0x1] %vm883_vm8, %v2479_v18  ;;  %v3109_v18 = vrot.slane %v3102_v10, %v8537_v22 }
 0x12e   : > { %906 = vst.msk [vmem:[#allocation7] sm:$0x2] %vm905_vm9, %v903_v19  ;;  %860 = vrot.lane.b32.xlu0 %v8596_v3, %s10153_s30  ;;  %2921 = vrot.lane.b32.xlu1 %v2920_v20, %s10149_s19  ;;  %s10169_s19 = smov 78   ;;  %v8279_v20 = vld [vmem:[#allocation2 + $0x6] ss:$0 sps:$4 sm:$0x11]  }
 0x130   : > { %v1074_v24 = vpop.permute.xlu0 %1073  ;;  %v990_v25 = vpop.permute.xlu1 %989 }
 0x131   : > { %1077 = vst.msk [vmem:[#allocation7] sm:$0x1] %vm1076_vm10, %v1074_v24 }
 0x132   : > { %992 = vst.msk [vmem:[#allocation7 + $0x8] sm:$0x2] %vm905_vm9, %v990_v25  ;;  %1481 = vrot.lane.b32.xlu0 %v8754_v40, %s10155_s22  ;;  %1459 = vrot.lane.b32.xlu1 %v8757_v41, %s10151_s23  ;;  %v1582_v40 = vrot.slane %v8269_v34, %v8537_v22  ;;  %v1688_v25 = vrot.slane %v8279_v20, %v8537_v22 }
 0x134   : > { %v1162_v3 = vpop.permute.xlu0 %1161  ;;  %v2416_v30 = vpop.permute.xlu1 %2415  ;;  %v1589_v45 = vrot.slane %v1582_v40, %v8537_v22 }
 0x135   : > { %1164 = vst.msk [vmem:[#allocation7 + $0x8] sm:$0x1] %vm1076_vm10, %v1162_v3  ;;  %v1695_v3 = vrot.slane %v1688_v25, %v8537_v22  ;;  %v7635_v25 = vld.sshfl [vmem:[#allocation2 + $0x8] sm:$0x1 pattern:$0x73625140] }
 0x136   : > { %2418 = vst.msk [vmem:[#allocation7 + $0x4] sm:$0x2] %vm905_vm9, %v2416_v30  ;;  %1526 = vrot.lane.b32.xlu0 %v1525_v31, %s10151_s23  ;;  %1503 = vrot.lane.b32.xlu1 %v1502_v50, %s10169_s19  ;;  %v1753_v30 = vcombine.low %v7630_v27, %v7630_v27  ;;  %v1796_v31 = vrot.slane %v8280_v26, %v8537_v22  ;;  %v8281_v50 = vld [vmem:[#allocation2 + $0x8] ss:$0 sps:$4 sm:$0x11]  }
 0x138   : > { %v2584_v35 = vpop.permute.xlu0 %2583  ;;  %v2500_v36 = vpop.permute.xlu1 %2499  ;;  %v8903_v34 = vrot.slane %v1753_v30, %v8537_v22 }
 0x139   : > { %2586 = vst.msk [vmem:[#allocation7 + $0x4] sm:$0x1] %vm1076_vm10, %v2584_v35  ;;  %v8906_v35 = vrot.slane %v7630_v27, %v8537_v22 }
 0x13a   : > { %1568 = vrot.lane.b32.xlu0 %v8827_v37, %s10169_s19  ;;  %1547 = vrot.lane.b32.xlu1 %v8830_v39, %s10155_s22 }
 0x13c   : > { %v2124_v42 = vpop.permute.xlu0 %2123  ;;  %v1096_v43 = vpop.permute.xlu1 %1095 }
 0x13d   : > { %2126 = vst.msk [vmem:[#allocation7 + $0xc] sm:$0x2] %vm523_vm2, %v2124_v42  ;;  %vm1291_vm2 = vcmask 648705  }
 0x13e   : > { %1099 = vst.msk [vmem:[#allocation7] sm:$0x2] %vm1098_vm11, %v1096_v43  ;;  %1612 = vrot.lane.b32.xlu0 %v1611_v44, %s10155_s22  ;;  %1590 = vrot.lane.b32.xlu1 %v1589_v45, %s10151_s23  ;;  %v8282_v44 = vld [vmem:[#allocation2 + $0xe] ss:$0 sps:$4 sm:$0x11]  }
 0x13f   : > { %2313 = vst.msk [vmem:[#allocation7 + $0xc] sm:$0x2] %vm712_vm7, %v2311_v9  ;;  %v8873_v9 = vrot.slane %v3058_v2, %v8537_v22  ;;  %v8283_v45 = vld [vmem:[#allocation2 + $0xf] ss:$0 sps:$4 sm:$0x11]   ;;  %vm1313_vm7 = vcmask 649730  }
 0x140   : > { %2502 = vst.msk [vmem:[#allocation7 + $0xc] sm:$0x2] %vm905_vm9, %v2500_v36  ;;  %v2063_v48 = vpop.permute.xlu0 %2062  ;;  %v1183_v49 = vpop.permute.xlu1 %1182  ;;  %v1797_v36 = vcombine.low %v1796_v31, %v1796_v31  ;;  %vm1462_vm9 = vcmask 778880  }
 0x141   : > { %2065 = vst.msk [vmem:[#allocation7 + $0x4] sm:$0x4] %vm545_vm3, %v2063_v48  ;;  %v3184_v48 = vrot.slane %v8282_v44, %v8537_v22  ;;  %vm1269_vm3 = vcmask 647680  }
 0x142   : > { %1185 = vst.msk [vmem:[#allocation7 + $0x8] sm:$0x2] %vm1098_vm11, %v1183_v49  ;;  %2961 = vrot.lane.b32.xlu0 %v8787_v59, %s10151_s23  ;;  %2374 = vrot.lane.b32.xlu1 %v8607_v8, %s10153_s30  ;;  %v8861_v8 = vrot.slane %v7663_v53, %v8537_v22  ;;  %s10157_s30 = smov 96   ;;  %v1804_v42 = vrot.slane %v1797_v36, %v8537_v22 }
 0x143   : > { %v3205_v49 = vrot.slane %v8283_v45, %v8537_v22 }
 0x144   : > { %v732_v54 = vpop.permute.xlu0 %731  ;;  %v2605_v55 = vpop.permute.xlu1 %2604 }
 0x145   : > { %735 = vst.msk [vmem:[#allocation7] sm:$0x4] %vm734_vm12, %v732_v54  ;;  %v3191_v54 = vrot.slane %v3184_v48, %v8537_v22  ;;  %v8292_v48 = vld [vmem:[#allocation2 + $0x11] ss:$0 sps:$4 sm:$0x11]  }
 0x146   : > { %2607 = vst.msk [vmem:[#allocation7 + $0x4] sm:$0x2] %vm1098_vm11, %v2605_v55  ;;  %3003 = vrot.lane.b32.xlu0 %v3002_v56, %s10169_s19  ;;  %2982 = vrot.lane.b32.xlu1 %v8799_v11, %s10155_s22  ;;  %v8278_v11 = vld [vmem:[#allocation2 + $0x7] ss:$0 sps:$4 sm:$0x11]   ;;  %v3206_v55 = vcombine.low %v3205_v49, %v3205_v49 }
 0x147   : > { %v1710_v19 = vrot.slane %v8278_v11, %v8537_v22  ;;  %v8284_v56 = vld [vmem:[#allocation2 + $0x10] ss:$0 sps:$4 sm:$0x11]   ;;  %v8293_v49 = vld [vmem:[#allocation2 + $0x11] ss:$0 sps:$4 sm:$0x11]  }
 0x148   : > { %v819_v61 = vpop.permute.xlu0 %818  ;;  %v2166_v62 = vpop.permute.xlu1 %2165 }
 0x149   : > { %821 = vst.msk [vmem:[#allocation7 + $0x8] sm:$0x4] %vm734_vm12, %v819_v61  ;;  %v1711_v24 = vcombine.low %v1710_v19, %v1710_v19  ;;  %v3213_v61 = vrot.slane %v3206_v55, %v8537_v22  ;;  %v8287_v19 = vld [vmem:[#allocation2 + $0x7] ss:$0 sps:$4 sm:$0x11]  }
 0x14a   : > { %2168 = vst.msk [vmem:[#allocation7 + $0xc] sm:$0x8] %vm566_vm5, %v2166_v62  ;;  %3045 = vrot.lane.b32.xlu0 %v8861_v8, %s10155_s22  ;;  %3025 = vrot.lane.b32.xlu1 %v3024_v63, %s10151_s23  ;;  %v3269_v62 = vrot.slane %v8284_v56, %v8537_v22  ;;  %v3247_v63 = vcombine.low %v7668_v51, %v7668_v51  ;;  %v7673_v55 = vld.sshfl [vmem:[#allocation2 + $0x10] sm:$0x1 pattern:$0x73625140] }
 0x14b   : > { %v1718_v29 = vrot.slane %v1711_v24, %v8537_v22  ;;  %v8288_v24 = vld [vmem:[#allocation2 + $0x9] ss:$0 sps:$4 sm:$0x11]   ;;  %v3458_v56 = vrot.slane %v8292_v48, %v8537_v22 }
 0x14c   : > { %v2248_v5 = vpop.permute.xlu0 %2247  ;;  %v755_v6 = vpop.permute.xlu1 %754 }
 0x14d   : > { %2250 = vst.msk [vmem:[#allocation7 + $0x4] sm:$0x4] %vm734_vm12, %v2248_v5  ;;  %v3276_v5 = vrot.slane %v3269_v62, %v8537_v22  ;;  %v3436_v62 = vcombine.low %v7673_v55, %v7673_v55 }
 0x14e   : > { %758 = vst.msk [vmem:[#allocation7] sm:$0x8] %vm757_vm13, %v755_v6  ;;  %3088 = vrot.lane.b32.xlu0 %v3087_v7, %s10151_s23  ;;  %3066 = vrot.lane.b32.xlu1 %v8873_v9, %s10169_s19  ;;  %s10161_s23 = smov 95   ;;  %v8947_v6 = vrot.slane %v3247_v63, %v8537_v22  ;;  %v3291_v7 = vcombine.low %v3290_v1, %v3290_v1 }
 0x14f   : > { %v3465_v63 = vrot.slane %v3458_v56, %v8537_v22 }
 0x150   : > { %v2333_v12 = vpop.permute.xlu0 %2332  ;;  %v8880_v15 = vpop.permute.xlu1 %840 }
 0x151   : > { %2335 = vst.msk [vmem:[#allocation7 + $0xc] sm:$0x4] %vm734_vm12, %v2333_v12  ;;  %v3298_v12 = vrot.slane %v3291_v7, %v8537_v22  ;;  %vm1506_vm12 = vcmask 780930  }
 0x152   : > { %1053 = vrot.lane.b32.xlu0 %v8618_v16, %s10159_s14  ;;  %3110 = vrot.lane.b32.xlu1 %v3109_v18, %s10155_s22  ;;  %s10165_s22 = smov 94  }
 0x154   : > { %v925_v21 = vpop.permute.xlu0 %924  ;;  %v2270_v23 = vpop.permute.xlu1 %2269 }
 0x155   : > { %928 = vst.msk [vmem:[#allocation7] sm:$0x4] %vm927_vm14, %v925_v21 }
 0x156   : > { %2272 = vst.msk [vmem:[#allocation7 + $0x4] sm:$0x8] %vm757_vm13, %v2270_v23  ;;  %1674 = vrot.lane.b32.xlu0 %v8827_v37, %s10161_s23  ;;  %1652 = vrot.lane.b32.xlu1 %v8830_v39, %s10157_s30  ;;  %v1775_v37 = vrot.slane %v8281_v50, %v8537_v22  ;;  %v1881_v23 = vrot.slane %v8287_v19, %v8537_v22  ;;  %v7675_v19 = vld.sshfl [vmem:[#allocation2 + $0x11] sm:$0x1 pattern:$0x73625140] }
 0x158   : > { %v1012_v16 = vpop.permute.xlu0 %1011  ;;  %v2355_v28 = vpop.permute.xlu1 %2354  ;;  %v1782_v43 = vrot.slane %v1775_v37, %v8537_v22 }
 0x159   : > { %1014 = vst.msk [vmem:[#allocation7 + $0x8] sm:$0x4] %vm927_vm14, %v1012_v16  ;;  %v1888_v16 = vrot.slane %v1881_v23, %v8537_v22  ;;  %v3518_v23 = vld [vmem:[%s10143_s6 + $0x8] sm:$0xff] }
 0x15a   : > { %2357 = vst.msk [vmem:[#allocation7 + $0xc] sm:$0x8] %vm757_vm13, %v2355_v28  ;;  %1719 = vrot.lane.b32.xlu0 %v1718_v29, %s10157_s30  ;;  %1696 = vrot.lane.b32.xlu1 %v1695_v3, %s10165_s22  ;;  %v1946_v28 = vcombine.low %v7635_v25, %v7635_v25  ;;  %v1989_v29 = vrot.slane %v8288_v24, %v8537_v22  ;;  %v8289_v3 = vld [vmem:[#allocation2 + $0x9] ss:$0 sps:$4 sm:$0x11]  }
 0x15c   : > { %v2437_v32 = vpop.permute.xlu0 %2436  ;;  %v948_v33 = vpop.permute.xlu1 %947  ;;  %v1953_v50 = vrot.slane %v1946_v28, %v8537_v22 }
 0x15d   : > { %2439 = vst.msk [vmem:[#allocation7 + $0x4] sm:$0x4] %vm927_vm14, %v2437_v32  ;;  %v8980_v32 = vrot.slane %v7635_v25, %v8537_v22 }
 0x15e   : > { %951 = vst.msk [vmem:[#allocation7] sm:$0x8] %vm950_vm15, %v948_v33  ;;  %1761 = vrot.lane.b32.xlu0 %v8903_v34, %s10165_s22  ;;  %1740 = vrot.lane.b32.xlu1 %v8906_v35, %s10161_s23  ;;  %v1990_v33 = vcombine.low %v1989_v29, %v1989_v29 }
 0x160   : > { %v2522_v38 = vpop.permute.xlu0 %2521  ;;  %v1034_v40 = vpop.permute.xlu1 %1033 }
 0x161   : > { %2524 = vst.msk [vmem:[#allocation7 + $0xc] sm:$0x4] %vm927_vm14, %v2522_v38  ;;  %v1997_v38 = vrot.slane %v1990_v33, %v8537_v22  ;;  %vm1655_vm14 = vcmask 910080  }
 0x162   : > { %1805 = vrot.lane.b32.xlu0 %v1804_v42, %s10161_s23  ;;  %1783 = vrot.lane.b32.xlu1 %v1782_v43, %s10157_s30  ;;  %v8290_v42 = vld [vmem:[#allocation2 + $0xf] ss:$0 sps:$4 sm:$0x11]   ;;  %v8291_v43 = vld [vmem:[#allocation2 + $0x10] ss:$0 sps:$4 sm:$0x11]  }
 0x164   : > { %v1118_v46 = vpop.permute.xlu0 %1117  ;;  %v2459_v47 = vpop.permute.xlu1 %2458 }
 0x165   : > { %1121 = vst.msk [vmem:[#allocation7] sm:$0x4] %vm1120_vm0, %v1118_v46  ;;  %v3373_v46 = vrot.slane %v8290_v42, %v8537_v22 }
 0x166   : > { %2461 = vst.msk [vmem:[#allocation7 + $0x4] sm:$0x8] %vm950_vm15, %v2459_v47  ;;  %3150 = vrot.lane.b32.xlu0 %v8861_v8, %s10157_s30  ;;  %2563 = vrot.lane.b32.xlu1 %v8722_v14, %s10159_s14  ;;  %v8935_v14 = vrot.slane %v7668_v51, %v8537_v22  ;;  %s10167_s14 = smov 112   ;;  %v3394_v47 = vrot.slane %v8291_v43, %v8537_v22 }
 0x168   : > { %v1205_v52 = vpop.permute.xlu0 %1204  ;;  %v2544_v53 = vpop.permute.xlu1 %2543 }
 0x169   : > { %1207 = vst.msk [vmem:[#allocation7 + $0x8] sm:$0x4] %vm1120_vm0, %v1205_v52 }
 0x16a   : > { %2546 = vst.msk [vmem:[#allocation7 + $0xc] sm:$0x8] %vm950_vm15, %v2544_v53  ;;  %3192 = vrot.lane.b32.xlu0 %v3191_v54, %s10165_s22  ;;  %3171 = vrot.lane.b32.xlu1 %v8873_v9, %s10161_s23  ;;  %v8286_v9 = vld [vmem:[#allocation2 + $0x8] ss:$0 sps:$4 sm:$0x11]   ;;  %v3380_v53 = vrot.slane %v3373_v46, %v8537_v22  ;;  %v3395_v54 = vcombine.low %v3394_v47, %v3394_v47 }
 0x16b   : > { %v1903_v18 = vrot.slane %v8286_v9, %v8537_v22 }
 0x16c   : > { %v2626_v58 = vpop.permute.xlu0 %2625  ;;  %v1141_v60 = vpop.permute.xlu1 %1140 }
 0x16d   : > { %2628 = vst.msk [vmem:[#allocation7 + $0x4] sm:$0x4] %vm1120_vm0, %v2626_v58  ;;  %v1904_v21 = vcombine.low %v1903_v18, %v1903_v18 }
 0x16e   : > { %1144 = vst.msk [vmem:[#allocation7] sm:$0x8] %vm1143_vm1, %v1141_v60  ;;  %3234 = vrot.lane.b32.xlu0 %v8935_v14, %s10161_s23  ;;  %3214 = vrot.lane.b32.xlu1 %v3213_v61, %s10157_s30  ;;  %v3422_v60 = vrot.slane %v7673_v55, %v8537_v22  ;;  %v3402_v61 = vrot.slane %v3395_v54, %v8537_v22 }
 0x16f   : > { %v1911_v27 = vrot.slane %v1904_v21, %v8537_v22 }
 0x170   : > { %v648_v2 = vpop.permute.xlu0 %647  ;;  %v1227_v4 = vpop.permute.xlu1 %1226 }
 0x171   : > { %650 = vst.msk [vmem:[#allocation7 + $0x8] sm:$0x8] %vm566_vm5, %v648_v2  ;;  %vm1336_vm5 = vcmask 650755  }
 0x172   : > { %843 = vst.msk [vmem:[#allocation7 + $0x8] sm:$0x8] %vm757_vm13, %v8880_v15  ;;  %3277 = vrot.lane.b32.xlu0 %v3276_v5, %s10157_s30  ;;  %3255 = vrot.lane.b32.xlu1 %v8947_v6, %s10165_s22  ;;  %s10163_s30 = smov 111   ;;  %v3443_v5 = vrot.slane %v3436_v62, %v8537_v22  ;;  %vm3549_vm13 = vcmask 146432  }
 0x173   : > { %1036 = vst.msk [vmem:[#allocation7 + $0x8] sm:$0x8] %vm950_vm15, %v1034_v40  ;;  %vm1722_vm15 = vcmask 913155  }
 0x174   : > { %1229 = vst.msk [vmem:[#allocation7 + $0x8] sm:$0x8] %vm1143_vm1, %v1227_v4  ;;  %v2668_v10 = vpop.permute.xlu0 %2667  ;;  %v2648_v11 = vpop.permute.xlu1 %2647 }
 0x175   : > { %2670 = vst.msk [vmem:[#allocation7 + $0xc] sm:$0x1] %vm1076_vm10, %v2668_v10 }
 0x176   : > { %2650 = vst.msk [vmem:[#allocation7 + $0x4] sm:$0x8] %vm1143_vm1, %v2648_v11  ;;  %1246 = vrot.lane.b32.xlu0 %v8757_v41, %s8350_s16  ;;  %3299 = vrot.lane.b32.xlu1 %v3298_v12, %s10161_s23  ;;  %s10171_s23 = smov 110  }
 0x177   : > { %3611 = vst.msk [vmem:[#allocation3] sm:$0xff] %vm3549_vm13, %v8337_v0  ;;  %3612 = vst.msk [vmem:[#allocation3 + $0x8] sm:$0xff] %vm3549_vm13, %v8337_v0 }
 0x178   : > { %v2711_v15 = vpop.permute.xlu0 %2710  ;;  %v2689_v20 = vpop.permute.xlu1 %2688  ;;  %3613 = vst.msk [vmem:[#allocation3 + $0x10] sm:$0xff] %vm3549_vm13, %v8337_v0  ;;  %3614 = vst.msk [vmem:[#allocation3 + $0x18] sm:$0xff] %vm3549_vm13, %v8337_v0 }
 0x179   : > { %2713 = vst.msk [vmem:[#allocation7 + $0xc] sm:$0x4] %vm1120_vm0, %v2711_v15  ;;  %vm1699_vm0 = vcmask 912130  }
 0x17a   : > { %2691 = vst.msk [vmem:[#allocation7 + $0xc] sm:$0x2] %vm1098_vm11, %v2689_v20  ;;  %1867 = vrot.lane.b32.xlu0 %v8903_v34, %s10163_s30  ;;  %1845 = vrot.lane.b32.xlu1 %v8906_v35, %s10167_s14  ;;  %v1968_v34 = vrot.slane %v8289_v3, %v8537_v22  ;;  %vm1529_vm11 = vcmask 781955   ;;  %v3507_v20 = vrot.slane %v7675_v19, %v8537_v22 }
 0x17b   : > { %3615 = vst.msk [vmem:[#allocation3 + $0x20] sm:$0xff] %vm3549_vm13, %v8337_v0  ;;  %3616 = vst.msk [vmem:[#allocation3 + $0x28] sm:$0xff] %vm3549_vm13, %v8337_v0 }
 0x17c   : > { %v668_v41 = vpop.permute.xlu0 %667  ;;  %v2733_v26 = vpop.permute.xlu1 %2732  ;;  %v1975_v40 = vrot.slane %v1968_v34, %v8537_v22  ;;  %3617 = vst.msk [vmem:[#allocation3 + $0x30] sm:$0xff] %vm3549_vm13, %v8337_v0  ;;  %3618 = vst.msk [vmem:[#allocation3 + $0x38] sm:$0xff] %vm3549_vm13, %v8337_v0 }
 0x17d   : > { %670 = vst.msk [vmem:[#allocation7 + $0x10] sm:$0x1] %vm501_vm4, %v668_v41 }
 0x17e   : > { %2735 = vst.msk [vmem:[#allocation7 + $0xc] sm:$0x8] %vm1143_vm1, %v2733_v26  ;;  %1912 = vrot.lane.b32.xlu0 %v1911_v27, %s10167_s14  ;;  %1889 = vrot.lane.b32.xlu1 %v1888_v16, %s10171_s23  ;;  %vm1848_vm1 = vcmask 1041280  }
 0x17f   : > { %3619 = vst.msk [vmem:[#allocation3 + $0x40] sm:$0xff] %vm3549_vm13, %v8337_v0  ;;  %3620 = vst.msk [vmem:[#allocation3 + $0x48] sm:$0xff] %vm3549_vm13, %v8337_v0 }
 0x180   : > { %v1289_v30 = vpop.permute.xlu0 %1288  ;;  %v1267_v31 = vpop.permute.xlu1 %1266  ;;  %3621 = vst.msk [vmem:[#allocation3 + $0x50] sm:$0xff] %vm3549_vm13, %v8337_v0  ;;  %3622 = vst.msk [vmem:[#allocation3 + $0x58] sm:$0xff] %vm3549_vm13, %v8337_v0 }
 0x181   : > { %1292 = vst.msk [vmem:[#allocation7] sm:$0x2] %vm1291_vm2, %v1289_v30 }
 0x182   : > { %1270 = vst.msk [vmem:[#allocation7] sm:$0x1] %vm1269_vm3, %v1267_v31  ;;  %1954 = vrot.lane.b32.xlu0 %v1953_v50, %s10171_s23  ;;  %1933 = vrot.lane.b32.xlu1 %v8980_v32, %s10163_s30 }
 0x183   : > { %3623 = vst.msk [vmem:[#allocation3 + $0x60] sm:$0xff] %vm3549_vm13, %v8337_v0  ;;  %3624 = vst.msk [vmem:[#allocation3 + $0x68] sm:$0xff] %vm3549_vm13, %v8337_v0 }
 0x184   : > { %v1334_v36 = vpop.permute.xlu0 %1333  ;;  %v1311_v37 = vpop.permute.xlu1 %1310  ;;  %3625 = vst.msk [vmem:[#allocation3 + $0x70] sm:$0xff] %vm3549_vm13, %v8337_v0  ;;  %3626 = vst.msk [vmem:[#allocation3 + $0x78] sm:$0xff] %vm3549_vm13, %v8337_v0 }
 0x185   : > { %1337 = vst.msk [vmem:[#allocation7] sm:$0x8] %vm1336_vm5, %v1334_v36 }
 0x186   : > { %1314 = vst.msk [vmem:[#allocation7] sm:$0x4] %vm1313_vm7, %v1311_v37  ;;  %1998 = vrot.lane.b32.xlu0 %v1997_v38, %s10163_s30  ;;  %1976 = vrot.lane.b32.xlu1 %v1975_v40, %s10167_s14 }
 0x187   : > { %3627 = vst.msk [vmem:[#allocation3 + $0x80] sm:$0xff] %vm3549_vm13, %v8337_v0 }
 0x188   : > { %v1376_v44 = vpop.permute.xlu0 %1375  ;;  %v1355_v45 = vpop.permute.xlu1 %1354 }
 0x189   : > { %1378 = vst.msk [vmem:[#allocation7 + $0x8] sm:$0x2] %vm1291_vm2, %v1376_v44 }
 0x18a   : > { %1357 = vst.msk [vmem:[#allocation7 + $0x8] sm:$0x1] %vm1269_vm3, %v1355_v45  ;;  %3339 = vrot.lane.b32.xlu0 %v8935_v14, %s10167_s14  ;;  %2752 = vrot.lane.b32.xlu1 %v8787_v59, %s8350_s16  ;;  %v3479_v59 = vrot.slane %v8293_v49, %v8537_v22 }
 0x18c   : > { %v1420_v51 = vpop.permute.xlu0 %1419  ;;  %v1398_v52 = vpop.permute.xlu1 %1397  ;;  %v3480_v1 = vcombine.low %v3479_v59, %v3479_v59 }
 0x18d   : > { %1422 = vst.msk [vmem:[#allocation7 + $0x8] sm:$0x8] %vm1336_vm5, %v1420_v51 }
 0x18e   : > { %1400 = vst.msk [vmem:[#allocation7 + $0x8] sm:$0x4] %vm1313_vm7, %v1398_v52  ;;  %3381 = vrot.lane.b32.xlu0 %v3380_v53, %s10171_s23  ;;  %3360 = vrot.lane.b32.xlu1 %v8947_v6, %s10163_s30  ;;  %v3487_v6 = vrot.slane %v3480_v1, %v8537_v22 }
 0x190   : > { %v2773_v57 = vpop.permute.xlu0 %2772  ;;  %v2186_v58 = vpop.permute.xlu1 %2185 }
 0x191   : > { %2775 = vst.msk [vmem:[#allocation7 + $0x4] sm:$0x1] %vm1269_vm3, %v2773_v57 }
 0x192   : > { %2188 = vst.msk [vmem:[#allocation7 + $0x14] sm:$0x1] %vm501_vm4, %v2186_v58  ;;  %3423 = vrot.lane.b32.xlu0 %v3422_v60, %s10163_s30  ;;  %3403 = vrot.lane.b32.xlu1 %v3402_v61, %s10167_s14  ;;  %vm1484_vm4 = vcmask 779905  }
 0x194   : > { %v2815_v2 = vpop.permute.xlu0 %2814  ;;  %v2794_v4 = vpop.permute.xlu1 %2793 }
 0x195   : > { %2817 = vst.msk [vmem:[#allocation7 + $0x4] sm:$0x4] %vm1313_vm7, %v2815_v2 }
 0x196   : > { %2796 = vst.msk [vmem:[#allocation7 + $0x4] sm:$0x2] %vm1291_vm2, %v2794_v4  ;;  %3466 = vrot.lane.b32.xlu0 %v3465_v63, %s10167_s14  ;;  %3444 = vrot.lane.b32.xlu1 %v3443_v5, %s10171_s23  ;;  %s8366_s14 = smov 49  }
 0x198   : > { %v2857_v7 = vpop.permute.xlu0 %2856  ;;  %v2837_v9 = vpop.permute.xlu1 %2836 }
 0x199   : > { %2859 = vst.msk [vmem:[#allocation7 + $0xc] sm:$0x1] %vm1269_vm3, %v2857_v7 }
 0x19a   : > { %2839 = vst.msk [vmem:[#allocation7 + $0x4] sm:$0x8] %vm1336_vm5, %v2837_v9  ;;  %1439 = vrot.lane.b32.xlu0 %v8830_v39, %s8353_s21  ;;  %3488 = vrot.lane.b32.xlu1 %v3487_v6, %s10163_s30  ;;  %v7636_v39 = vld.sshfl [vmem:[#allocation2 + $0x9] sm:$0x1 pattern:$0x73625140] }
 0x19b   : > { %s8365_s30 = smov 17  }
 0x19c   : > { %v2900_v10 = vpop.permute.xlu0 %2899  ;;  %v2878_v11 = vpop.permute.xlu1 %2877 }
 0x19d   : > { %2902 = vst.msk [vmem:[#allocation7 + $0xc] sm:$0x4] %vm1313_vm7, %v2900_v10  ;;  %vm3635_vm7 = vcmask 138248  }
 0x19e   : > { %2880 = vst.msk [vmem:[#allocation7 + $0xc] sm:$0x2] %vm1291_vm2, %v2878_v11  ;;  %1632 = vrot.lane.b32.xlu0 %v8906_v35, %s10169_s19  ;;  %2941 = vrot.lane.b32.xlu1 %v8861_v8, %s8353_s21  ;;  %v2017_v8 = vrot.slane %v7636_v39, %v8537_v22  ;;  %v3517_v22 = vld [vmem:[%s10143_s6] sm:$0xff]  ;;  %vm1915_vm2 = vcmask 1044355  }
 0x1a0   : > { %v861_v12 = vpop.permute.xlu0 %860  ;;  %v2922_v18 = vpop.permute.xlu1 %2921 }
 0x1a1   : > { %863 = vst.msk [vmem:[#allocation7 + $0x10] sm:$0x1] %vm690_vm6, %v861_v12 }
 0x1a2   : > { %2924 = vst.msk [vmem:[#allocation7 + $0xc] sm:$0x8] %vm1336_vm5, %v2922_v18  ;;  %1825 = vrot.lane.b32.xlu0 %v8980_v32, %s10165_s22  ;;  %3130 = vrot.lane.b32.xlu1 %v8935_v14, %s10169_s19  ;;  %vm1892_vm5 = vcmask 1043330   ;;  %s8363_s19 = smov 81  }
 0x1a4   : > { %v1482_v35 = vpop.permute.xlu0 %1481  ;;  %v1460_v15 = vpop.permute.xlu1 %1459 }
 0x1a5   : > { %1485 = vst.msk [vmem:[#allocation7] sm:$0x2] %vm1484_vm4, %v1482_v35 }
 0x1a6   : > { %1463 = vst.msk [vmem:[#allocation7] sm:$0x1] %vm1462_vm9, %v1460_v15  ;;  %2018 = vrot.lane.b32.xlu0 %v2017_v8, %s10171_s23  ;;  %3319 = vrot.lane.b32.xlu1 %v3422_v60, %s10165_s22  ;;  %s8364_s22 = smov 113  }
 0x1a8   : > { %v1527_v14 = vpop.permute.xlu0 %1526  ;;  %v1504_v21 = vpop.permute.xlu1 %1503 }
 0x1a9   : > { %1530 = vst.msk [vmem:[#allocation7] sm:$0x8] %vm1529_vm11, %v1527_v14 }
 0x1aa   : > { %1507 = vst.msk [vmem:[#allocation7] sm:$0x4] %vm1506_vm12, %v1504_v21  ;;  %3508 = vrot.lane.b32.xlu1 %v3507_v20, %s10171_s23  ;;  %3521 = vperm.xlu0 %8228, %v3517_v22   ;;  %s8367_s23 = smov 97  }
 0x1ac   : > { %v1569_v24 = vpop.permute.xlu0 %1568  ;;  %v1548_v25 = vpop.permute.xlu1 %1547 }
 0x1ad   : > { %1571 = vst.msk [vmem:[#allocation7 + $0x8] sm:$0x2] %vm1484_vm4, %v1569_v24 }
 0x1ae   : > { %1550 = vst.msk [vmem:[#allocation7 + $0x8] sm:$0x1] %vm1462_vm9, %v1548_v25  ;;  %3526 = vperm.xlu1 %8229, %v3518_v23  }
 0x1b0   : > { %v1613_v41 = vpop.permute.xlu0 %1612  ;;  %v1591_v26 = vpop.permute.xlu1 %1590 }
 0x1b1   : > { %1615 = vst.msk [vmem:[#allocation7 + $0x8] sm:$0x8] %vm1529_vm11, %v1613_v41 }
 0x1b2   : > { %1593 = vst.msk [vmem:[#allocation7 + $0x8] sm:$0x4] %vm1506_vm12, %v1591_v26 }
 0x1b4   : > { %v2962_v27 = vpop.permute.xlu0 %2961  ;;  %v2375_v16 = vpop.permute.xlu1 %2374 }
 0x1b5   : > { %2964 = vst.msk [vmem:[#allocation7 + $0x4] sm:$0x1] %vm1462_vm9, %v2962_v27  ;;  %v8298_v27 = vld [vmem:[%s10138_s1] sm:$0xff]  }
 0x1b6   : > { %2377 = vst.msk [vmem:[#allocation7 + $0x14] sm:$0x1] %vm690_vm6, %v2375_v16  ;;  %vm1677_vm6 = vcmask 911105   ;;  %v3717_v16 = vld [vmem:[#allocation3] sm:$0xff] }
 0x1b7   : > { %3719 = vrot.lane.b32.xlu0 %v3717_v16, %s10175_s26  ;;  %s8369_s26 = smov 33  }
 0x1b8   : > { %v3004_v28 = vpop.permute.xlu0 %3003  ;;  %v2983_v29 = vpop.permute.xlu1 %2982 }
 0x1b9   : > { %3006 = vst.msk [vmem:[#allocation7 + $0x4] sm:$0x4] %vm1506_vm12, %v3004_v28 }
 0x1ba   : > { %2985 = vst.msk [vmem:[#allocation7 + $0x4] sm:$0x2] %vm1484_vm4, %v2983_v29 }
 0x1bb   : > { %3725 = vrot.lane.b32.xlu0 %v3717_v16, %s10173_s25  ;;  %s8368_s25 = smov 65  }
 0x1bc   : > { %v3046_v3 = vpop.permute.xlu0 %3045  ;;  %v3026_v30 = vpop.permute.xlu1 %3025 }
 0x1bd   : > { %3048 = vst.msk [vmem:[#allocation7 + $0xc] sm:$0x1] %vm1462_vm9, %v3046_v3 }
 0x1be   : > { %3028 = vst.msk [vmem:[#allocation7 + $0x4] sm:$0x8] %vm1529_vm11, %v3026_v30 }
 0x1c0   : > { %v3089_v31 = vpop.permute.xlu0 %3088  ;;  %v3067_v50 = vpop.permute.xlu1 %3066 }
 0x1c1   : > { %3091 = vst.msk [vmem:[#allocation7 + $0xc] sm:$0x4] %vm1506_vm12, %v3089_v31  ;;  %vm3927_vm12 = vcmask 654848  }
 0x1c2   : > { %3069 = vst.msk [vmem:[#allocation7 + $0xc] sm:$0x2] %vm1484_vm4, %v3067_v50  ;;  %vm3762_vm4 = vcmask 261248  }
 0x1c4   : > { %v1054_v32 = vpop.permute.xlu0 %1053  ;;  %v3111_v33 = vpop.permute.xlu1 %3110 }
 0x1c5   : > { %1056 = vst.msk [vmem:[#allocation7 + $0x10] sm:$0x1] %vm883_vm8, %v1054_v32 }
 0x1c6   : > { %3113 = vst.msk [vmem:[#allocation7 + $0xc] sm:$0x8] %vm1529_vm11, %v3111_v33  ;;  %vm3872_vm11 = vcmask 523648  }
 0x1c8   : > { %v1675_v34 = vpop.permute.xlu0 %1674  ;;  %v1653_v36 = vpop.permute.xlu1 %1652 }
 0x1c9   : > { %1678 = vst.msk [vmem:[#allocation7] sm:$0x2] %vm1677_vm6, %v1675_v34 }
 0x1ca   : > { %1656 = vst.msk [vmem:[#allocation7] sm:$0x1] %vm1655_vm14, %v1653_v36 }
 0x1cc   : > { %v1720_v37 = vpop.permute.xlu0 %1719  ;;  %v1697_v38 = vpop.permute.xlu1 %1696 }
 0x1cd   : > { %1723 = vst.msk [vmem:[#allocation7] sm:$0x8] %vm1722_vm15, %v1720_v37 }
 0x1ce   : > { %1700 = vst.msk [vmem:[#allocation7] sm:$0x4] %vm1699_vm0, %v1697_v38 }
 0x1d0   : > { %v1762_v40 = vpop.permute.xlu0 %1761  ;;  %v1741_v42 = vpop.permute.xlu1 %1740 }
 0x1d1   : > { %1764 = vst.msk [vmem:[#allocation7 + $0x8] sm:$0x2] %vm1677_vm6, %v1762_v40 }
 0x1d2   : > { %1743 = vst.msk [vmem:[#allocation7 + $0x8] sm:$0x1] %vm1655_vm14, %v1741_v42 }
 0x1d4   : > { %v1806_v43 = vpop.permute.xlu0 %1805  ;;  %v1784_v44 = vpop.permute.xlu1 %1783 }
 0x1d5   : > { %1808 = vst.msk [vmem:[#allocation7 + $0x8] sm:$0x8] %vm1722_vm15, %v1806_v43 }
 0x1d6   : > { %1786 = vst.msk [vmem:[#allocation7 + $0x8] sm:$0x4] %vm1699_vm0, %v1784_v44 }
 0x1d8   : > { %v3151_v45 = vpop.permute.xlu0 %3150  ;;  %v2564_v46 = vpop.permute.xlu1 %2563 }
 0x1d9   : > { %3153 = vst.msk [vmem:[#allocation7 + $0x4] sm:$0x1] %vm1655_vm14, %v3151_v45 }
 0x1da   : > { %2566 = vst.msk [vmem:[#allocation7 + $0x14] sm:$0x1] %vm883_vm8, %v2564_v46  ;;  %vm1870_vm8 = vcmask 1042305  }
 0x1dc   : > { %v3193_v47 = vpop.permute.xlu0 %3192  ;;  %v3172_v48 = vpop.permute.xlu1 %3171 }
 0x1dd   : > { %3195 = vst.msk [vmem:[#allocation7 + $0x4] sm:$0x4] %vm1699_vm0, %v3193_v47 }
 0x1de   : > { %3174 = vst.msk [vmem:[#allocation7 + $0x4] sm:$0x2] %vm1677_vm6, %v3172_v48 }
 0x1e0   : > { %v3235_v49 = vpop.permute.xlu0 %3234  ;;  %v3215_v51 = vpop.permute.xlu1 %3214 }
 0x1e1   : > { %3237 = vst.msk [vmem:[#allocation7 + $0xc] sm:$0x1] %vm1655_vm14, %v3235_v49 }
 0x1e2   : > { %3217 = vst.msk [vmem:[#allocation7 + $0x4] sm:$0x8] %vm1722_vm15, %v3215_v51 }
 0x1e4   : > { %v3278_v52 = vpop.permute.xlu0 %3277  ;;  %v3256_v53 = vpop.permute.xlu1 %3255 }
 0x1e5   : > { %3280 = vst.msk [vmem:[#allocation7 + $0xc] sm:$0x4] %vm1699_vm0, %v3278_v52 }
 0x1e6   : > { %3258 = vst.msk [vmem:[#allocation7 + $0xc] sm:$0x2] %vm1677_vm6, %v3256_v53  ;;  %vm4037_vm6 = vcmask 917248  }
 0x1e8   : > { %v1247_v54 = vpop.permute.xlu0 %1246  ;;  %v3300_v55 = vpop.permute.xlu1 %3299 }
 0x1e9   : > { %1249 = vst.msk [vmem:[#allocation7 + $0x10] sm:$0x1] %vm1076_vm10, %v1247_v54 }
 0x1ea   : > { %3302 = vst.msk [vmem:[#allocation7 + $0xc] sm:$0x8] %vm1722_vm15, %v3300_v55 }
 0x1ec   : > { %v1868_v56 = vpop.permute.xlu0 %1867  ;;  %v1846_v59 = vpop.permute.xlu1 %1845 }
 0x1ed   : > { %1871 = vst.msk [vmem:[#allocation7] sm:$0x2] %vm1870_vm8, %v1868_v56 }
 0x1ee   : > { %1849 = vst.msk [vmem:[#allocation7] sm:$0x1] %vm1848_vm1, %v1846_v59 }
 0x1f0   : > { %v1913_v57 = vpop.permute.xlu0 %1912  ;;  %v1890_v58 = vpop.permute.xlu1 %1889 }
 0x1f1   : > { %1916 = vst.msk [vmem:[#allocation7] sm:$0x8] %vm1915_vm2, %v1913_v57 }
 0x1f2   : > { %1893 = vst.msk [vmem:[#allocation7] sm:$0x4] %vm1892_vm5, %v1890_v58 }
 0x1f4   : > { %v1955_v60 = vpop.permute.xlu0 %1954  ;;  %v1934_v61 = vpop.permute.xlu1 %1933 }
 0x1f5   : > { %1957 = vst.msk [vmem:[#allocation7 + $0x8] sm:$0x2] %vm1870_vm8, %v1955_v60 }
 0x1f6   : > { %1936 = vst.msk [vmem:[#allocation7 + $0x8] sm:$0x1] %vm1848_vm1, %v1934_v61 }
 0x1f8   : > { %v1999_v62 = vpop.permute.xlu0 %1998  ;;  %v1977_v63 = vpop.permute.xlu1 %1976 }
 0x1f9   : > { %2001 = vst.msk [vmem:[#allocation7 + $0x8] sm:$0x8] %vm1915_vm2, %v1999_v62 }
 0x1fa   : > { %1979 = vst.msk [vmem:[#allocation7 + $0x8] sm:$0x4] %vm1892_vm5, %v1977_v63 }
 0x1fc   : > { %v3340_v1 = vpop.permute.xlu0 %3339  ;;  %v2753_v2 = vpop.permute.xlu1 %2752 }
 0x1fd   : > { %3342 = vst.msk [vmem:[#allocation7 + $0x4] sm:$0x1] %vm1848_vm1, %v3340_v1 }
 0x1fe   : > { %2755 = vst.msk [vmem:[#allocation7 + $0x14] sm:$0x1] %vm1076_vm10, %v2753_v2  ;;  %vm3553_vm10 = vcmask 1040384  }
 0x200   : > { %v3382_v4 = vpop.permute.xlu0 %3381  ;;  %v3361_v5 = vpop.permute.xlu1 %3360 }
 0x201   : > { %3384 = vst.msk [vmem:[#allocation7 + $0x4] sm:$0x4] %vm1892_vm5, %v3382_v4 }
 0x202   : > { %3363 = vst.msk [vmem:[#allocation7 + $0x4] sm:$0x2] %vm1870_vm8, %v3361_v5 }
 0x204   : > { %v3424_v6 = vpop.permute.xlu0 %3423  ;;  %v3404_v7 = vpop.permute.xlu1 %3403 }
 0x205   : > { %3426 = vst.msk [vmem:[#allocation7 + $0xc] sm:$0x1] %vm1848_vm1, %v3424_v6 }
 0x206   : > { %3406 = vst.msk [vmem:[#allocation7 + $0x4] sm:$0x8] %vm1915_vm2, %v3404_v7 }
 0x208   : > { %v3467_v9 = vpop.permute.xlu0 %3466  ;;  %v3445_v10 = vpop.permute.xlu1 %3444 }
 0x209   : > { %3469 = vst.msk [vmem:[#allocation7 + $0xc] sm:$0x4] %vm1892_vm5, %v3467_v9  ;;  %vm4401_vm5 = vcmask 72712  }
 0x20a   : > { %3447 = vst.msk [vmem:[#allocation7 + $0xc] sm:$0x2] %vm1870_vm8, %v3445_v10 }
 0x20c   : > { %v1440_v11 = vpop.permute.xlu0 %1439  ;;  %v3489_v12 = vpop.permute.xlu1 %3488 }
 0x20d   : > { %1442 = vst.msk [vmem:[#allocation7 + $0x10] sm:$0x1] %vm1269_vm3, %v1440_v11  ;;  %v3514_v15 = vld [vmem:[#allocation7] sm:$0xff] }
 0x20e   : > { %3491 = vst.msk [vmem:[#allocation7 + $0xc] sm:$0x8] %vm1915_vm2, %v3489_v12  ;;  %vm5204_vm2 = vcmask 64512  }
 0x210   : > { %v1633_v18 = vpop.permute.xlu0 %1632  ;;  %v2942_v39 = vpop.permute.xlu1 %2941 }
 0x211   : > { %1635 = vst.msk [vmem:[#allocation7 + $0x10] sm:$0x1] %vm1462_vm9, %v1633_v18 }
 0x212   : > { %2944 = vst.msk [vmem:[#allocation7 + $0x14] sm:$0x1] %vm1269_vm3, %v2942_v39  ;;  %vm3715_vm3 = vcmask 130048  }
 0x213   : > { %3716 = vst.msk [vmem:[#allocation8] sm:$0xff] %vm3715_vm3, %v3717_v16  ;;  %v4155_v16 = vld [vmem:[%s10144_s7] sm:$0xff] }
 0x214   : > { %v1826_v19 = vpop.permute.xlu0 %1825  ;;  %v3131_v35 = vpop.permute.xlu1 %3130 }
 0x215   : > { %v3515_v8 = vld [vmem:[#allocation7 + $0x8] sm:$0xff]  ;;  %1828 = vst.msk [vmem:[#allocation7 + $0x10] sm:$0x1] %vm1655_vm14, %v1826_v19 }
 0x216   : > { %v8294_v20 = vld [vmem:[#allocation7 + $0x4] ss:$8 sps:$4 sm:$0xff]   ;;  %3133 = vst.msk [vmem:[#allocation7 + $0x14] sm:$0x1] %vm1462_vm9, %v3131_v35  ;;  %v7677_v14 = vcombine.low %v3514_v15, %v3515_v8  ;;  %vm3817_vm9 = vcmask 392448  }
 0x217   : > { %3560 = vmatprep.subr.bf16.mxu1 %v8294_v20 }
 0x218   : > { %3561 = vmatpush1.bf16.msra.mxu1 %v7677_v14  ;;  %v2019_v21 = vpop.permute.xlu0 %2018  ;;  %v3320_v22 = vpop.permute.xlu1 %3319 }
 0x219   : > { %2021 = vst.msk [vmem:[#allocation7 + $0x10] sm:$0x1] %vm1848_vm1, %v2019_v21 }
 0x21a   : > { %3322 = vst.msk [vmem:[#allocation7 + $0x14] sm:$0x1] %vm1655_vm14, %v3320_v22  ;;  %vm4092_vm14 = vcmask 1048448  }
 0x21c   : > { %v3509_v23 = vpop.permute.xlu1 %3508 }
 0x21d   : > { %3511 = vst.msk [vmem:[#allocation7 + $0x14] sm:$0x1] %vm1848_vm1, %v3509_v23  ;;  %vm4272_vm1 = vcmask 80896  }
 0x21e   : > { %4273 = vst.msk [vmem:[#allocation4] sm:$0xff] %vm4272_vm1, %v8337_v0  ;;  %4274 = vst.msk [vmem:[#allocation4 + $0x8] sm:$0xff] %vm4272_vm1, %v8337_v0 }
 0x21f   : > { %4275 = vst.msk [vmem:[#allocation4 + $0x10] sm:$0xff] %vm4272_vm1, %v8337_v0  ;;  %4276 = vst.msk [vmem:[#allocation4 + $0x18] sm:$0xff] %vm4272_vm1, %v8337_v0 }
 0x220   : > { %4277 = vst.msk [vmem:[#allocation4 + $0x20] sm:$0xff] %vm4272_vm1, %v8337_v0  ;;  %4278 = vst.msk [vmem:[#allocation4 + $0x28] sm:$0xff] %vm4272_vm1, %v8337_v0 }
 0x221   : > { %4279 = vst.msk [vmem:[#allocation4 + $0x30] sm:$0xff] %vm4272_vm1, %v8337_v0  ;;  %4280 = vst.msk [vmem:[#allocation4 + $0x38] sm:$0xff] %vm4272_vm1, %v8337_v0 }
 0x222   : > { %4281 = vst.msk [vmem:[#allocation4 + $0x40] sm:$0xff] %vm4272_vm1, %v8337_v0  ;;  %4282 = vst.msk [vmem:[#allocation4 + $0x48] sm:$0xff] %vm4272_vm1, %v8337_v0 }
 0x223   : > { %4283 = vst.msk [vmem:[#allocation4 + $0x50] sm:$0xff] %vm4272_vm1, %v8337_v0  ;;  %4284 = vst.msk [vmem:[#allocation4 + $0x58] sm:$0xff] %vm4272_vm1, %v8337_v0 }
 0x224   : > { %v3516_v24 = vld [vmem:[#allocation7 + $0x10] sm:$0x11]  ;;  %4285 = vst.msk [vmem:[#allocation4 + $0x60] sm:$0xff] %vm4272_vm1, %v8337_v0  ;;  %4286 = vst.msk [vmem:[#allocation4 + $0x68] sm:$0xff] %vm4272_vm1, %v8337_v0 }
 0x225   : > { %v7680_v25 = vcombine.high %v3516_v24, %v3516_v24  ;;  %v7679_v41 = vcombine.low %v3516_v24, %v3516_v24  ;;  %4287 = vst.msk [vmem:[#allocation4 + $0x70] sm:$0xff] %vm4272_vm1, %v8337_v0  ;;  %4288 = vst.msk [vmem:[#allocation4 + $0x78] sm:$0xff] %vm4272_vm1, %v8337_v0 }
 0x226   : > { %4289 = vst.msk [vmem:[#allocation4 + $0x80] sm:$0xff] %vm4272_vm1, %v8337_v0  ;;  %4290 = vst.msk [vmem:[#allocation4 + $0x88] sm:$0xff] %vm4272_vm1, %v8337_v0 }
 0x227   : > { %7681 = vmatprep.subr.msk.bf16.mxu1 %vm3553_vm10, %v7680_v25  ;;  %v3555_v26 = vsel %vm3553_vm10, %v7679_v41, 0  ;;  %vm5297_vm10 = vcmask 130112  }
 0x228   : > { %3563 = vmatpush1.bf16.msra.mxu1 %v3555_v26 }
 0x229   : > { %4203 = vmatprep.subr.bf16.mxu1 %v8337_v0  ;;  %v3522_v28 = vpop.permute.xlu0 %3521 }
 0x22b   : > { %7682 = vmatmul.mubr.msk.bf16.vlgmr.msra.gmra.mrb[0].mxu1 %vm3549_vm13, %v8298_v27  ;;  %vm3982_vm13 = vcmask 786048  }
 0x22d   : > { %v3720_v29 = vpop.permute.xlu0 %3719  ;;  %v3527_v3 = vpop.permute.xlu1 %3526 }
 0x22e   : > { %3722 = vst.msk [vmem:[#allocation8 + $0x8] sm:$0xff] %vm3715_vm3, %v3720_v29 }
 0x231   : > { %v3726_v31 = vpop.permute.xlu0 %3725 }
 0x232   : > { %3728 = vst.msk [vmem:[#allocation8 + $0x10] sm:$0xff] %vm3715_vm3, %v3726_v31 }
 0x2fe   : > { %v3594_v30 = vpop.f32.mrb[0].mxu1 }
 0x2ff   : > { %v3595_v50 = vadd.f32 %v3594_v30, %v3522_v28  ;;  %v3596_v32 = vpop.f32.mrb[1].mxu1 }
 0x300   : > { %v3597_v33 = vadd.f32 %v3596_v32, %v3522_v28  ;;  %v3598_v34 = vpop.f32.mrb[2].mxu1 }
 0x301   : > { %v3603_v36 = vmul.f32 0.2, %v3595_v50  ;;  %v3599_v37 = vadd.f32 %v3598_v34, %v3527_v3  ;;  %v3600_v38 = vpop.f32.mrb[3].mxu1  ;;  %v4156_v34 = vld [vmem:[%s10144_s7 + $0x8] sm:$0xff] }
 0x302   : > { %v3604_v40 = vmul.f32 0.2, %v3597_v33  ;;  %v3601_v42 = vadd.f32 %v3600_v38, %v3527_v3  ;;  %v4157_v3 = vld [vmem:[%s10144_s7 + $0x10] sm:$0xff]  ;;  %v4158_v38 = vld [vmem:[%s10144_s7 + $0x18] sm:$0xff] }
 0x303   : > { %v3605_v43 = vmul.f32 0.2, %v3599_v37  ;;  %v3607_v45 = vmax.f32 %v3595_v50, %v3603_v36  ;;  %v8299_v50 = vld [vmem:[%s10139_s2 + $0x4] ss:$8 sps:$4 sm:$0xff]  }
 0x304   : > { %v3606_v44 = vmul.f32 0.2, %v3601_v42  ;;  %v3608_v47 = vmax.f32 %v3597_v33, %v3604_v40  ;;  %7687 = vmatprep.mubr.msk.bf16.mxu1 %vm3715_vm3, %v8299_v50 }
 0x305   : > { %v3609_v46 = vmax.f32 %v3599_v37, %v3605_v43 }
 0x306   : > { %v3610_v48 = vmax.f32 %v3601_v42, %v3606_v44 }
 0x307   : > { %v3629_v49 = vpack.c.bf16 %v3609_v46, %v3607_v45 }
 0x308   : > { %v3672_v51 = vpack.c.bf16 %v3610_v48, %v3608_v47 }
 0x309   : > { %3647 = vrot.lane.b32.xlu0 %v3629_v49, %s8363_s19  ;;  %3637 = vrot.lane.b32.xlu1 %v3629_v49, %s8364_s22 }
 0x30d   : > { %3667 = vrot.lane.b32.xlu0 %v3629_v49, %s8365_s30  ;;  %3657 = vrot.lane.b32.xlu1 %v3629_v49, %s8366_s14 }
 0x311   : > { %3642 = vrot.lane.b32.xlu0 %v3629_v49, %s8367_s23  ;;  %3652 = vrot.lane.b32.xlu1 %v3629_v49, %s8368_s25 }
 0x315   : > { %3662 = vrot.lane.b32.xlu0 %v3629_v49, %s8369_s26  ;;  %3631 = vrot.lane.b32.xlu1 %v3629_v49, %s10179_s24 }
 0x319   : > { %3689 = vrot.lane.b32.xlu0 %v3672_v51, %s8363_s19  ;;  %3679 = vrot.lane.b32.xlu1 %v3672_v51, %s8364_s22  ;;  %s10191_s19 = smov 127   ;;  %s10192_s22 = smov 126  }
 0x31d   : > { %3674 = vrot.lane.b32.xlu0 %v3672_v51, %s10179_s24  ;;  %3699 = vrot.lane.b32.xlu1 %v3672_v51, %s8366_s14  ;;  %s10194_s14 = smov 96   ;;  %s10198_s24 = smov 79  }
 0x321   : > { %3694 = vrot.lane.b32.xlu0 %v3672_v51, %s8368_s25  ;;  %3684 = vrot.lane.b32.xlu1 %v3672_v51, %s8367_s23  ;;  %s10188_s25 = smov 63   ;;  %s10190_s23 = smov 30  }
 0x325   : > { %3709 = vrot.lane.b32.xlu0 %v3672_v51, %s8365_s30  ;;  %3704 = vrot.lane.b32.xlu1 %v3672_v51, %s8369_s26  ;;  %s10189_s26 = smov 14   ;;  %s10193_s30 = smov 80  }
 0x37b   : > { %v3648_v52 = vpop.permute.xlu0 %3647  ;;  %v3638_v53 = vpop.permute.xlu1 %3637 }
 0x37c   : > { %3651 = vst.msk [vmem:[#allocation3 + $0x20] sm:$0xff] %vm3635_vm7, %v3648_v52  ;;  %3641 = vst.msk [vmem:[#allocation3 + $0x10] sm:$0xff] %vm3635_vm7, %v3638_v53 }
 0x37f   : > { %v3668_v54 = vpop.permute.xlu0 %3667  ;;  %v3658_v55 = vpop.permute.xlu1 %3657 }
 0x380   : > { %3671 = vst.msk [vmem:[#allocation3 + $0x40] sm:$0xff] %vm3635_vm7, %v3668_v54  ;;  %3661 = vst.msk [vmem:[#allocation3 + $0x30] sm:$0xff] %vm3635_vm7, %v3658_v55 }
 0x383   : > { %v3643_v56 = vpop.permute.xlu0 %3642  ;;  %v3653_v59 = vpop.permute.xlu1 %3652  ;;  %v9162_v57 = vld [vmem:[#allocation3 + $0x20] sm:$0xff]  ;;  %v3757_v58 = vld [vmem:[#allocation3 + $0x10] sm:$0xff] }
 0x384   : > { %3646 = vst.msk [vmem:[#allocation3 + $0x18] sm:$0xff] %vm3635_vm7, %v3643_v56  ;;  %3656 = vst.msk [vmem:[#allocation3 + $0x28] sm:$0xff] %vm3635_vm7, %v3653_v59  ;;  %3814 = vrot.lane.b32.xlu0 %v9162_v57, %s10183_s29  ;;  %3759 = vrot.lane.b32.xlu1 %v3757_v58, %s10181_s27 }
 0x385   : > { %3744 = vst.msk [vmem:[#allocation8 + $0x30] sm:$0xff] %vm3715_vm3, %v3757_v58 }
 0x387   : > { %v3663_v60 = vpop.permute.xlu0 %3662  ;;  %v3632_v61 = vpop.permute.xlu1 %3631  ;;  %v9170_v62 = vld [vmem:[#allocation3 + $0x30] sm:$0xff]  ;;  %v9177_v2 = vld [vmem:[#allocation3 + $0x40] sm:$0xff] }
 0x388   : > { %3666 = vst.msk [vmem:[#allocation3 + $0x38] sm:$0xff] %vm3635_vm7, %v3663_v60  ;;  %3636 = vst.msk [vmem:[#allocation3 + $0x8] sm:$0xff] %vm3635_vm7, %v3632_v61  ;;  %3766 = vrot.lane.b32.xlu0 %v3757_v58, %s10177_s28  ;;  %3869 = vrot.lane.b32.xlu1 %v9170_v62, %s10185_s13 }
 0x38b   : > { %v3690_v63 = vpop.permute.xlu0 %3689  ;;  %v3680_v1 = vpop.permute.xlu1 %3679  ;;  %v3776_v10 = vld [vmem:[#allocation3 + $0x18] sm:$0xff]  ;;  %v3831_v18 = vld [vmem:[#allocation3 + $0x28] sm:$0xff] }
 0x38c   : > { %3693 = vst.msk [vmem:[#allocation3 + $0x60] sm:$0xff] %vm3635_vm7, %v3690_v63  ;;  %3683 = vst.msk [vmem:[#allocation3 + $0x50] sm:$0xff] %vm3635_vm7, %v3680_v1  ;;  %3821 = vrot.lane.b32.xlu0 %v9162_v57, %s8346_s12  ;;  %3924 = vrot.lane.b32.xlu1 %v9177_v2, %s8352_s20 }
 0x38f   : > { %v3675_v4 = vpop.permute.xlu0 %3674  ;;  %v3700_v5 = vpop.permute.xlu1 %3699  ;;  %v3731_v6 = vld [vmem:[#allocation3 + $0x8] sm:$0xff]  ;;  %v3886_v39 = vld [vmem:[#allocation3 + $0x38] sm:$0xff] }
 0x390   : > { %3678 = vst.msk [vmem:[#allocation3 + $0x48] sm:$0xff] %vm3635_vm7, %v3675_v4  ;;  %3703 = vst.msk [vmem:[#allocation3 + $0x70] sm:$0xff] %vm3635_vm7, %v3700_v5  ;;  %3876 = vrot.lane.b32.xlu0 %v9170_v62, %s8349_s15  ;;  %3931 = vrot.lane.b32.xlu1 %v9177_v2, %s10188_s25 }
 0x391   : > { %3730 = vst.msk [vmem:[#allocation8 + $0x18] sm:$0xff] %vm3715_vm3, %v3731_v6 }
 0x393   : > { %v3695_v7 = vpop.permute.xlu0 %3694  ;;  %v3685_v9 = vpop.permute.xlu1 %3684  ;;  %v3977_v19 = vld [vmem:[#allocation3 + $0x50] sm:$0xff]  ;;  %v9229_v35 = vld [vmem:[#allocation3 + $0x60] sm:$0xff] }
 0x394   : > { %3698 = vst.msk [vmem:[#allocation3 + $0x68] sm:$0xff] %vm3635_vm7, %v3695_v7  ;;  %3688 = vst.msk [vmem:[#allocation3 + $0x58] sm:$0xff] %vm3635_vm7, %v3685_v9  ;;  %3772 = vrot.lane.b32.xlu0 %v3757_v58, %s10189_s26  ;;  %3778 = vrot.lane.b32.xlu1 %v3776_v10, %s10181_s27 }
 0x397   : > { %v3710_v11 = vpop.permute.xlu0 %3709  ;;  %v3705_v12 = vpop.permute.xlu1 %3704  ;;  %v4087_v15 = vld [vmem:[#allocation3 + $0x70] sm:$0xff]  ;;  %v3941_v8 = vld [vmem:[#allocation3 + $0x48] sm:$0xff] }
 0x398   : > { %3713 = vst.msk [vmem:[#allocation3 + $0x80] sm:$0xff] %vm3635_vm7, %v3710_v11  ;;  %3708 = vst.msk [vmem:[#allocation3 + $0x78] sm:$0xff] %vm3635_vm7, %v3705_v12  ;;  %3827 = vrot.lane.b32.xlu0 %v9162_v57, %s10190_s23  ;;  %3833 = vrot.lane.b32.xlu1 %v3831_v18, %s10183_s29  ;;  %vm5406_vm7 = vcmask 195712  }
 0x39b   : > { %v3996_v20 = vld [vmem:[#allocation3 + $0x58] sm:$0xff]  ;;  %v4051_v14 = vld [vmem:[#allocation3 + $0x68] sm:$0xff] }
 0x39c   : > { %3882 = vrot.lane.b32.xlu0 %v9170_v62, %s8350_s16  ;;  %3888 = vrot.lane.b32.xlu1 %v3886_v39, %s10185_s13 }
 0x39f   : > { %v4106_v21 = vld [vmem:[#allocation3 + $0x78] sm:$0xff]  ;;  %v4124_v22 = vld [vmem:[#allocation3 + $0x80] sm:$0xff] }
 0x3a0   : > { %3937 = vrot.lane.b32.xlu0 %v9177_v2, %s8353_s21  ;;  %3733 = vrot.lane.b32.xlu1 %v3731_v6, %s10191_s19 }
 0x3a4   : > { %3796 = vrot.lane.b32.xlu0 %v9162_v57, %s10181_s27  ;;  %3784 = vrot.lane.b32.xlu1 %v3776_v10, %s10177_s28  ;;  %s10199_s27 = smov 110  }
 0x3a8   : > { %3851 = vrot.lane.b32.xlu0 %v9170_v62, %s10183_s29  ;;  %3839 = vrot.lane.b32.xlu1 %v3831_v18, %s8346_s12  ;;  %s10200_s29 = smov 95  }
 0x3ac   : > { %3906 = vrot.lane.b32.xlu0 %v9177_v2, %s10185_s13  ;;  %3894 = vrot.lane.b32.xlu1 %v3886_v39, %s8349_s15  ;;  %s10201_s13 = smov 111  }
 0x3b0   : > { %3747 = vrot.lane.b32.xlu0 %v3757_v58, %s10191_s19  ;;  %3739 = vrot.lane.b32.xlu1 %v3731_v6, %s10192_s22 }
 0x3b4   : > { %3802 = vrot.lane.b32.xlu0 %v9162_v57, %s10177_s28  ;;  %3790 = vrot.lane.b32.xlu1 %v3776_v10, %s10189_s26  ;;  %s10196_s28 = smov 112  }
 0x3b8   : > { %3857 = vrot.lane.b32.xlu0 %v9170_v62, %s8346_s12  ;;  %3845 = vrot.lane.b32.xlu1 %v3831_v18, %s10190_s23  ;;  %s10195_s12 = smov 78  }
 0x3bc   : > { %3912 = vrot.lane.b32.xlu0 %v9177_v2, %s8349_s15  ;;  %3900 = vrot.lane.b32.xlu1 %v3886_v39, %s8350_s16  ;;  %s10197_s15 = smov 94  }
 0x3c0   : > { %3753 = vrot.lane.b32.xlu0 %v3757_v58, %s10192_s22  ;;  %3979 = vrot.lane.b32.xlu1 %v3977_v19, %s10193_s30 }
 0x3c4   : > { %3808 = vrot.lane.b32.xlu0 %v9162_v57, %s10189_s26  ;;  %4034 = vrot.lane.b32.xlu1 %v9229_v35, %s10194_s14 }
 0x3c8   : > { %3992 = vrot.lane.b32.xlu0 %v3977_v19, %s10195_s12  ;;  %4089 = vrot.lane.b32.xlu1 %v4087_v15, %s10196_s28 }
 0x3cc   : > { %4047 = vrot.lane.b32.xlu0 %v9229_v35, %s10197_s15  ;;  %3986 = vrot.lane.b32.xlu1 %v3977_v19, %s10198_s24 }
 0x3d0   : > { %4102 = vrot.lane.b32.xlu0 %v4087_v15, %s10199_s27  ;;  %4041 = vrot.lane.b32.xlu1 %v9229_v35, %s10200_s29 }
 0x3d4   : > { %3943 = vrot.lane.b32.xlu0 %v3941_v8, %s8352_s20  ;;  %4096 = vrot.lane.b32.xlu1 %v4087_v15, %s10201_s13 }
 0x3d8   : > { %3955 = vrot.lane.b32.xlu1 %v3941_v8, %s8353_s21  ;;  %3998 = vrot.lane.b32.xlu0 %v3996_v20, %s10193_s30 }
 0x3dc   : > { %4010 = vrot.lane.b32.xlu1 %v3996_v20, %s10195_s12  ;;  %4053 = vrot.lane.b32.xlu0 %v4051_v14, %s10194_s14 }
 0x3e0   : > { %4065 = vrot.lane.b32.xlu1 %v4051_v14, %s10197_s15  ;;  %4108 = vrot.lane.b32.xlu0 %v4106_v21, %s10196_s28 }
 0x3e4   : > { %4120 = vrot.lane.b32.xlu1 %v4106_v21, %s10199_s27  ;;  %3949 = vrot.lane.b32.xlu0 %v3941_v8, %s10188_s25 }
 0x3e8   : > { %3961 = vrot.lane.b32.xlu1 %v3977_v19, %s8352_s20  ;;  %4004 = vrot.lane.b32.xlu0 %v3996_v20, %s10198_s24 }
 0x3ec   : > { %4016 = vrot.lane.b32.xlu1 %v9229_v35, %s10193_s30  ;;  %4059 = vrot.lane.b32.xlu0 %v4051_v14, %s10200_s29 }
 0x3f0   : > { %4071 = vrot.lane.b32.xlu1 %v4087_v15, %s10194_s14  ;;  %4114 = vrot.lane.b32.xlu0 %v4106_v21, %s10201_s13 }
 0x3f4   : > { %4126 = vrot.lane.b32.xlu1 %v4124_v22, %s10196_s28  ;;  %3863 = vrot.lane.b32.xlu0 %v9170_v62, %s10190_s23 }
 0x3f6   : > { %v3815_v23 = vpop.permute.xlu0 %3814  ;;  %v3760_v24 = vpop.permute.xlu1 %3759 }
 0x3f7   : > { %3763 = vst.msk [vmem:[#allocation8] sm:$0xff] %vm3762_vm4, %v3760_v24 }
 0x3f8   : > { %3967 = vrot.lane.b32.xlu1 %v3977_v19, %s10188_s25  ;;  %3918 = vrot.lane.b32.xlu0 %v9177_v2, %s8350_s16  ;;  %3818 = vst.msk [vmem:[#allocation8] sm:$0xff] %vm3817_vm9, %v3815_v23  ;;  %s8373_s16 = smov 24   ;;  %s8375_s25 = smov 7  }
 0x3fa   : > { %v3767_v25 = vpop.permute.xlu0 %3766  ;;  %v3870_v41 = vpop.permute.xlu1 %3869 }
 0x3fb   : > { %3769 = vst.msk [vmem:[#allocation8 + $0x8] sm:$0xff] %vm3762_vm4, %v3767_v25 }
 0x3fc   : > { %3873 = vst.msk [vmem:[#allocation8] sm:$0xff] %vm3872_vm11, %v3870_v41  ;;  %4022 = vrot.lane.b32.xlu1 %v9229_v35, %s10198_s24  ;;  %3973 = vrot.lane.b32.xlu0 %v3977_v19, %s8353_s21  ;;  %s8376_s24 = smov 22   ;;  %s10210_s21 = smov 15  }
 0x3fe   : > { %v3822_v26 = vpop.permute.xlu0 %3821  ;;  %v3925_v27 = vpop.permute.xlu1 %3924 }
 0x3ff   : > { %3824 = vst.msk [vmem:[#allocation8 + $0x8] sm:$0xff] %vm3817_vm9, %v3822_v26 }
 0x400   : > { %3928 = vst.msk [vmem:[#allocation8] sm:$0xff] %vm3927_vm12, %v3925_v27  ;;  %4077 = vrot.lane.b32.xlu1 %v4087_v15, %s10200_s29  ;;  %4083 = vrot.lane.b32.xlu0 %v4087_v15, %s10197_s15  ;;  %s10207_s15 = smov 32  }
 0x402   : > { %v3877_v28 = vpop.permute.xlu0 %3876  ;;  %v3932_v29 = vpop.permute.xlu1 %3931 }
 0x403   : > { %3879 = vst.msk [vmem:[#allocation8 + $0x8] sm:$0xff] %vm3872_vm11, %v3877_v28 }
 0x404   : > { %3934 = vst.msk [vmem:[#allocation8 + $0x8] sm:$0xff] %vm3927_vm12, %v3932_v29  ;;  %4132 = vrot.lane.b32.xlu1 %v4124_v22, %s10201_s13  ;;  %4161 = vperm.xlu0 %8228, %v4155_v16   ;;  %s10206_s13 = smov 48  }
 0x406   : > { %v3773_v30 = vpop.permute.xlu0 %3772  ;;  %v3779_v31 = vpop.permute.xlu1 %3778 }
 0x407   : > { %3775 = vst.msk [vmem:[#allocation8 + $0x10] sm:$0xff] %vm3762_vm4, %v3773_v30  ;;  %3781 = vst.msk [vmem:[#allocation8 + $0x18] sm:$0xff] %vm3762_vm4, %v3779_v31 }
 0x408   : > { %4028 = vrot.lane.b32.xlu1 %v9229_v35, %s10195_s12  ;;  %4171 = vperm.xlu0 %8228, %v4157_v3   ;;  %s8372_s12 = smov 23  }
 0x40a   : > { %v3828_v32 = vpop.permute.xlu0 %3827  ;;  %v3834_v33 = vpop.permute.xlu1 %3833 }
 0x40b   : > { %3830 = vst.msk [vmem:[#allocation8 + $0x10] sm:$0xff] %vm3817_vm9, %v3828_v32  ;;  %3836 = vst.msk [vmem:[#allocation8 + $0x18] sm:$0xff] %vm3817_vm9, %v3834_v33 }
 0x40c   : > { %4138 = vrot.lane.b32.xlu1 %v4124_v22, %s10199_s27  ;;  %s8374_s27 = smov 6  }
 0x40e   : > { %v3883_v36 = vpop.permute.xlu0 %3882  ;;  %v3889_v37 = vpop.permute.xlu1 %3888 }
 0x40f   : > { %3885 = vst.msk [vmem:[#allocation8 + $0x10] sm:$0xff] %vm3872_vm11, %v3883_v36  ;;  %3891 = vst.msk [vmem:[#allocation8 + $0x18] sm:$0xff] %vm3872_vm11, %v3889_v37 }
 0x410   : > { %4166 = vperm.xlu1 %8229, %v4156_v34  }
 0x412   : > { %v3938_v40 = vpop.permute.xlu0 %3937  ;;  %v3734_v42 = vpop.permute.xlu1 %3733 }
 0x413   : > { %3940 = vst.msk [vmem:[#allocation8 + $0x10] sm:$0xff] %vm3927_vm12, %v3938_v40 }
 0x414   : > { %3736 = vst.msk [vmem:[#allocation8 + $0x20] sm:$0xff] %vm3715_vm3, %v3734_v42  ;;  %4176 = vperm.xlu1 %8229, %v4158_v38   ;;  %v8301_v42 = vld [vmem:[%s10139_s2] ss:$8 sps:$4 sm:$0xff]  }
 0x416   : > { %v3797_v43 = vpop.permute.xlu0 %3796  ;;  %v3785_v44 = vpop.permute.xlu1 %3784 }
 0x417   : > { %3799 = vst.msk [vmem:[#allocation8 + $0x30] sm:$0xff] %vm3762_vm4, %v3797_v43  ;;  %3787 = vst.msk [vmem:[#allocation8 + $0x20] sm:$0xff] %vm3762_vm4, %v3785_v44  ;;  %v8302_v43 = vld [vmem:[%s10139_s2 + $0x14] ss:$8 sps:$4 sm:$0xff]   ;;  %v8304_v44 = vld [vmem:[%s10139_s2 + $0x10] ss:$8 sps:$4 sm:$0xff]  }
 0x41a   : > { %v3852_v45 = vpop.permute.xlu0 %3851  ;;  %v3840_v46 = vpop.permute.xlu1 %3839 }
 0x41b   : > { %3854 = vst.msk [vmem:[#allocation8 + $0x30] sm:$0xff] %vm3817_vm9, %v3852_v45  ;;  %3842 = vst.msk [vmem:[#allocation8 + $0x20] sm:$0xff] %vm3817_vm9, %v3840_v46  ;;  %v4262_v45 = vadd.s32 8, %v8530_v17  ;;  %v4264_v46 = vand.u32 127, %v516_v13 }
 0x41e   : > { %v3907_v47 = vpop.permute.xlu0 %3906  ;;  %v3895_v48 = vpop.permute.xlu1 %3894 }
 0x41f   : > { %3909 = vst.msk [vmem:[#allocation8 + $0x30] sm:$0xff] %vm3872_vm11, %v3907_v47  ;;  %3897 = vst.msk [vmem:[#allocation8 + $0x20] sm:$0xff] %vm3872_vm11, %v3895_v48  ;;  %v4265_v47 = vmul.u32 2, %v4264_v46 }
 0x421   : > { %vm9379_vm15 = vcmp.eq.s32.totalorder %v8530_v17, %v4265_v47  ;;  %vm4267_vm0 = vcmp.eq.s32.totalorder %v4262_v45, %v4265_v47 }
 0x422   : > { %v3748_v49 = vpop.permute.xlu0 %3747  ;;  %v3740_v51 = vpop.permute.xlu1 %3739  ;;  %vm9385_vm8 = vmpackc.low %vm4267_vm0, %vm9379_vm15  ;;  %vm7185_vm0 = vcmask 1041408  }
 0x423   : > { %3750 = vst.msk [vmem:[#allocation8 + $0x38] sm:$0xff] %vm3715_vm3, %v3748_v49  ;;  %3742 = vst.msk [vmem:[#allocation8 + $0x28] sm:$0xff] %vm3715_vm3, %v3740_v51  ;;  %v8370_v51 = vmov 1.0|1.0  }
 0x424   : > { %8140 = vmatprep.subr.msk.bf16.mxu0 %vm9385_vm8, %v8370_v51 }
 0x425   : > { %8142 = vmatpush3.bf16.msk.msra.mxu0 %vm9385_vm8, %v8370_v51 }
 0x426   : > { %v3803_v52 = vpop.permute.xlu0 %3802  ;;  %v3791_v53 = vpop.permute.xlu1 %3790  ;;  %8144 = vmatprep.subr.msk.bf16.mxu0 %vm9385_vm8, %v8370_v51 }
 0x427   : > { %3805 = vst.msk [vmem:[#allocation8 + $0x38] sm:$0xff] %vm3762_vm4, %v3803_v52  ;;  %3793 = vst.msk [vmem:[#allocation8 + $0x28] sm:$0xff] %vm3762_vm4, %v3791_v53 }
 0x42a   : > { %v3858_v54 = vpop.permute.xlu0 %3857  ;;  %v3846_v55 = vpop.permute.xlu1 %3845 }
 0x42b   : > { %3860 = vst.msk [vmem:[#allocation8 + $0x38] sm:$0xff] %vm3817_vm9, %v3858_v54  ;;  %3848 = vst.msk [vmem:[#allocation8 + $0x28] sm:$0xff] %vm3817_vm9, %v3846_v55 }
 0x42e   : > { %v3913_v56 = vpop.permute.xlu0 %3912  ;;  %v3901_v59 = vpop.permute.xlu1 %3900 }
 0x42f   : > { %3915 = vst.msk [vmem:[#allocation8 + $0x38] sm:$0xff] %vm3872_vm11, %v3913_v56  ;;  %3903 = vst.msk [vmem:[#allocation8 + $0x28] sm:$0xff] %vm3872_vm11, %v3901_v59 }
 0x432   : > { %v3754_v57 = vpop.permute.xlu0 %3753  ;;  %v3980_v58 = vpop.permute.xlu1 %3979 }
 0x433   : > { %3756 = vst.msk [vmem:[#allocation8 + $0x40] sm:$0xff] %vm3715_vm3, %v3754_v57 }
 0x434   : > { %3983 = vst.msk [vmem:[#allocation8] sm:$0xff] %vm3982_vm13, %v3980_v58 }
 0x436   : > { %v3809_v60 = vpop.permute.xlu0 %3808  ;;  %v4035_v61 = vpop.permute.xlu1 %4034 }
 0x437   : > { %3811 = vst.msk [vmem:[#allocation8 + $0x40] sm:$0xff] %vm3762_vm4, %v3809_v60  ;;  %vm5515_vm4 = vcmask 261312  }
 0x438   : > { %4038 = vst.msk [vmem:[#allocation8] sm:$0xff] %vm4037_vm6, %v4035_v61 }
 0x43a   : > { %v3993_v62 = vpop.permute.xlu0 %3992  ;;  %v4090_v63 = vpop.permute.xlu1 %4089 }
 0x43b   : > { %3995 = vst.msk [vmem:[#allocation8 + $0x10] sm:$0xff] %vm3982_vm13, %v3993_v62 }
 0x43c   : > { %4093 = vst.msk [vmem:[#allocation8] sm:$0xff] %vm4092_vm14, %v4090_v63 }
 0x43e   : > { %v4048_v1 = vpop.permute.xlu0 %4047  ;;  %v3987_v2 = vpop.permute.xlu1 %3986 }
 0x43f   : > { %4050 = vst.msk [vmem:[#allocation8 + $0x10] sm:$0xff] %vm4037_vm6, %v4048_v1 }
 0x440   : > { %3989 = vst.msk [vmem:[#allocation8 + $0x8] sm:$0xff] %vm3982_vm13, %v3987_v2 }
 0x442   : > { %v4103_v4 = vpop.permute.xlu0 %4102  ;;  %v4042_v5 = vpop.permute.xlu1 %4041 }
 0x443   : > { %v4146_v6 = vld [vmem:[#allocation8] sm:$0xff]  ;;  %4105 = vst.msk [vmem:[#allocation8 + $0x10] sm:$0xff] %vm4092_vm14, %v4103_v4 }
 0x444   : > { %4044 = vst.msk [vmem:[#allocation8 + $0x8] sm:$0xff] %vm4037_vm6, %v4042_v5  ;;  %4204 = vmatpush1.bf16.msra.mxu1 %v4146_v6 }
 0x445   : > { %4205 = vmatprep.subr.bf16.mxu1 %v8337_v0 }
 0x446   : > { %v3944_v7 = vpop.permute.xlu0 %3943  ;;  %v4097_v9 = vpop.permute.xlu1 %4096 }
 0x447   : > { %3946 = vst.msk [vmem:[#allocation8 + $0x18] sm:$0xff] %vm3927_vm12, %v3944_v7 }
 0x448   : > { %4099 = vst.msk [vmem:[#allocation8 + $0x8] sm:$0xff] %vm4092_vm14, %v4097_v9 }
 0x44a   : > { %v3999_v10 = vpop.permute.xlu0 %3998  ;;  %v3956_v11 = vpop.permute.xlu1 %3955  ;;  %v4148_v15 = vld [vmem:[#allocation8 + $0x10] sm:$0xff] }
 0x44b   : > { %4001 = vst.msk [vmem:[#allocation8 + $0x18] sm:$0xff] %vm3982_vm13, %v3999_v10 }
 0x44c   : > { %3958 = vst.msk [vmem:[#allocation8 + $0x28] sm:$0xff] %vm3927_vm12, %v3956_v11 }
 0x44e   : > { %v4054_v12 = vpop.permute.xlu0 %4053  ;;  %v4011_v18 = vpop.permute.xlu1 %4010 }
 0x44f   : > { %v4147_v39 = vld [vmem:[#allocation8 + $0x8] sm:$0xff]  ;;  %4056 = vst.msk [vmem:[#allocation8 + $0x18] sm:$0xff] %vm4037_vm6, %v4054_v12 }
 0x450   : > { %4013 = vst.msk [vmem:[#allocation8 + $0x28] sm:$0xff] %vm3982_vm13, %v4011_v18  ;;  %4206 = vmatpush1.bf16.msra.mxu1 %v4147_v39  ;;  %v5219_v39 = vld [vmem:[#allocation4] sm:$0xff] }
 0x451   : > { %4207 = vmatprep.subr.bf16.mxu1 %v8337_v0  ;;  %5205 = vst.msk [vmem:[#allocation9] sm:$0xff] %vm5204_vm2, %v5219_v39 }
 0x452   : > { %v4109_v19 = vpop.permute.xlu0 %4108  ;;  %v4066_v35 = vpop.permute.xlu1 %4065 }
 0x453   : > { %4111 = vst.msk [vmem:[#allocation8 + $0x18] sm:$0xff] %vm4092_vm14, %v4109_v19 }
 0x454   : > { %4068 = vst.msk [vmem:[#allocation8 + $0x28] sm:$0xff] %vm4037_vm6, %v4066_v35  ;;  %4208 = vmatpush1.bf16.msra.mxu1 %v4148_v15 }
 0x455   : > { %4209 = vmatprep.subr.bf16.mxu1 %v8337_v0 }
 0x456   : > { %v3950_v8 = vpop.permute.xlu0 %3949  ;;  %v4121_v20 = vpop.permute.xlu1 %4120 }
 0x457   : > { %3952 = vst.msk [vmem:[#allocation8 + $0x20] sm:$0xff] %vm3927_vm12, %v3950_v8 }
 0x458   : > { %4123 = vst.msk [vmem:[#allocation8 + $0x28] sm:$0xff] %vm4092_vm14, %v4121_v20 }
 0x45a   : > { %v4005_v14 = vpop.permute.xlu0 %4004  ;;  %v3962_v21 = vpop.permute.xlu1 %3961  ;;  %v4149_v22 = vld [vmem:[#allocation8 + $0x18] sm:$0xff] }
 0x45b   : > { %4007 = vst.msk [vmem:[#allocation8 + $0x20] sm:$0xff] %vm3982_vm13, %v4005_v14  ;;  %4210 = vmatpush1.bf16.msra.mxu1 %v4149_v22 }
 0x45c   : > { %3964 = vst.msk [vmem:[#allocation8 + $0x30] sm:$0xff] %vm3927_vm12, %v3962_v21  ;;  %4211 = vmatprep.subr.bf16.mxu1 %v8337_v0 }
 0x45e   : > { %v4060_v23 = vpop.permute.xlu0 %4059  ;;  %v4017_v24 = vpop.permute.xlu1 %4016 }
 0x45f   : > { %4062 = vst.msk [vmem:[#allocation8 + $0x20] sm:$0xff] %vm4037_vm6, %v4060_v23  ;;  %v4151_v31 = vld [vmem:[#allocation8 + $0x28] sm:$0xff] }
 0x460   : > { %4019 = vst.msk [vmem:[#allocation8 + $0x30] sm:$0xff] %vm3982_vm13, %v4017_v24 }
 0x462   : > { %v4115_v25 = vpop.permute.xlu0 %4114  ;;  %v4072_v41 = vpop.permute.xlu1 %4071 }
 0x463   : > { %4117 = vst.msk [vmem:[#allocation8 + $0x20] sm:$0xff] %vm4092_vm14, %v4115_v25 }
 0x464   : > { %4074 = vst.msk [vmem:[#allocation8 + $0x30] sm:$0xff] %vm4037_vm6, %v4072_v41 }
 0x466   : > { %v3864_v26 = vpop.permute.xlu0 %3863  ;;  %v4127_v27 = vpop.permute.xlu1 %4126 }
 0x467   : > { %3866 = vst.msk [vmem:[#allocation8 + $0x40] sm:$0xff] %vm3817_vm9, %v3864_v26  ;;  %vm5807_vm9 = vcmask 48128  }
 0x468   : > { %4129 = vst.msk [vmem:[#allocation8 + $0x30] sm:$0xff] %vm4092_vm14, %v4127_v27 }
 0x469   : > { %5810 = vst.msk [vmem:[#allocation5 + $0x10] sm:$0xff] %vm5807_vm9, %v8337_v0  ;;  %5808 = vst.msk [vmem:[#allocation5] sm:$0xff] %vm5807_vm9, %v8337_v0 }
 0x46a   : > { %v3919_v16 = vpop.permute.xlu0 %3918  ;;  %v3968_v28 = vpop.permute.xlu1 %3967  ;;  %v4150_v29 = vld [vmem:[#allocation8 + $0x20] sm:$0xff]  ;;  %5809 = vst.msk [vmem:[#allocation5 + $0x8] sm:$0xff] %vm5807_vm9, %v8337_v0  ;;  %5811 = vst.msk [vmem:[#allocation5 + $0x18] sm:$0xff] %vm5807_vm9, %v8337_v0 }
 0x46b   : > { %3921 = vst.msk [vmem:[#allocation8 + $0x40] sm:$0xff] %vm3872_vm11, %v3919_v16  ;;  %4212 = vmatpush1.bf16.msra.mxu1 %v4150_v29  ;;  %vm6275_vm11 = vcmask 31744  }
 0x46c   : > { %3970 = vst.msk [vmem:[#allocation8 + $0x38] sm:$0xff] %vm3927_vm12, %v3968_v28  ;;  %4213 = vmatprep.subr.bf16.mxu1 %v8337_v0 }
 0x46d   : > { %5812 = vst.msk [vmem:[#allocation5 + $0x20] sm:$0xff] %vm5807_vm9, %v8337_v0  ;;  %5813 = vst.msk [vmem:[#allocation5 + $0x28] sm:$0xff] %vm5807_vm9, %v8337_v0 }
 0x46e   : > { %v3974_v3 = vpop.permute.xlu0 %3973  ;;  %v4023_v30 = vpop.permute.xlu1 %4022  ;;  %5814 = vst.msk [vmem:[#allocation5 + $0x30] sm:$0xff] %vm5807_vm9, %v8337_v0  ;;  %5815 = vst.msk [vmem:[#allocation5 + $0x38] sm:$0xff] %vm5807_vm9, %v8337_v0 }
 0x46f   : > { %3976 = vst.msk [vmem:[#allocation8 + $0x40] sm:$0xff] %vm3927_vm12, %v3974_v3  ;;  %4214 = vmatpush1.bf16.msra.mxu1 %v4151_v31  ;;  %v4152_v32 = vld [vmem:[#allocation8 + $0x30] sm:$0xff]  ;;  %vm5928_vm12 = vcmask 39944  }
 0x470   : > { %4025 = vst.msk [vmem:[#allocation8 + $0x38] sm:$0xff] %vm3982_vm13, %v4023_v30  ;;  %4215 = vmatprep.subr.bf16.mxu1 %v8337_v0 }
 0x471   : > { %5816 = vst.msk [vmem:[#allocation5 + $0x40] sm:$0xff] %vm5807_vm9, %v8337_v0  ;;  %5817 = vst.msk [vmem:[#allocation5 + $0x48] sm:$0xff] %vm5807_vm9, %v8337_v0 }
 0x472   : > { %v4078_v50 = vpop.permute.xlu1 %4077  ;;  %v4084_v36 = vpop.permute.xlu0 %4083  ;;  %6659 = vst.msk [vmem:[#allocation6] sm:$0xff] %vm6275_vm11, %v8337_v0  ;;  %6660 = vst.msk [vmem:[#allocation6 + $0x8] sm:$0xff] %vm6275_vm11, %v8337_v0 }
 0x473   : > { %4080 = vst.msk [vmem:[#allocation8 + $0x38] sm:$0xff] %vm4037_vm6, %v4078_v50  ;;  %4216 = vmatpush1.bf16.msra.mxu1 %v4152_v32 }
 0x474   : > { %4217 = vmatprep.subr.bf16.mxu1 %v8337_v0  ;;  %6661 = vst.msk [vmem:[#allocation6 + $0x10] sm:$0xff] %vm6275_vm11, %v8337_v0  ;;  %6662 = vst.msk [vmem:[#allocation6 + $0x18] sm:$0xff] %vm6275_vm11, %v8337_v0 }
 0x475   : > { %6663 = vst.msk [vmem:[#allocation6 + $0x20] sm:$0xff] %vm6275_vm11, %v8337_v0  ;;  %6664 = vst.msk [vmem:[#allocation6 + $0x28] sm:$0xff] %vm6275_vm11, %v8337_v0 }
 0x476   : > { %v4133_v33 = vpop.permute.xlu1 %4132 }
 0x477   : > { %4135 = vst.msk [vmem:[#allocation8 + $0x38] sm:$0xff] %vm4092_vm14, %v4133_v33 }
 0x47a   : > { %v4029_v34 = vpop.permute.xlu1 %4028 }
 0x47b   : > { %4031 = vst.msk [vmem:[#allocation8 + $0x40] sm:$0xff] %vm3982_vm13, %v4029_v34  ;;  %vm6368_vm13 = vcmask 64544  }
 0x47c   : > { %4086 = vst.msk [vmem:[#allocation8 + $0x40] sm:$0xff] %vm4037_vm6, %v4084_v36  ;;  %vm6679_vm6 = vcmask 1043456  }
 0x47e   : > { %v4139_v37 = vpop.permute.xlu1 %4138  ;;  %v4153_v38 = vld [vmem:[#allocation8 + $0x38] sm:$0xff] }
 0x47f   : > { %4141 = vst.msk [vmem:[#allocation8 + $0x40] sm:$0xff] %vm4092_vm14, %v4139_v37  ;;  %4218 = vmatpush1.bf16.msra.mxu1 %v4153_v38  ;;  %vm6898_vm14 = vcmask 15360  }
 0x480   : > { %4219 = vmatprep.subr.bf16.mxu1 %v8337_v0 }
 0x483   : > { %v4162_v13 = vpop.permute.xlu0 %4161 }
 0x486   : > { %v4154_v40 = vld [vmem:[#allocation8 + $0x40] sm:$0xff] }
 0x487   : > { %4220 = vmatpush1.bf16.msra.mxu1 %v4154_v40  ;;  %v4172_v63 = vpop.permute.xlu0 %4171 }
 0x488   : > { %8160 = vmatprep.subr.msk.bf16.mxu1 %vm9385_vm8, %v8370_v51 }
 0x48a   : > { %4236 = vmatmul.mubr.bf16.vlgmr.msra.gmra.mrb[4].mxu1 %v8301_v42 }
 0x48b   : > { %7688 = vmatprep.mubr.msk.bf16.mxu1 %vm3715_vm3, %v8302_v43  ;;  %8162 = vmatpush3.bf16.msk.msra.mxu1 %vm9385_vm8, %v8370_v51 }
 0x48c   : > { %8168 = vmatprep.subr.msk.bf16.mxu1 %vm9385_vm8, %v8370_v51 }
 0x48f   : > { %v4167_v55 = vpop.permute.xlu1 %4166 }
 0x492   : > { %4244 = vmatmul.mubr.bf16.gmra.mrb[8].mxu1 %v8304_v44 }
 0x493   : > { %v4177_v5 = vpop.permute.xlu1 %4176 }
 0x55d   : > { %v4237_v52 = vpop.f32.mrb[4].mxu1 }
 0x55e   : > { %v4238_v53 = vadd.f32 %v4237_v52, %v4162_v13  ;;  %v4239_v54 = vpop.f32.mrb[5].mxu1 }
 0x55f   : > { %v4240_v56 = vpop.f32.mrb[6].mxu1 }
 0x560   : > { %v4252_v59 = vmul.f32 0.2, %v4238_v53  ;;  %v4241_v57 = vadd.f32 %v4240_v56, %v4167_v55  ;;  %v4242_v58 = vpop.f32.mrb[7].mxu1 }
 0x562   : > { %v4256_v60 = vmax.f32 %v4238_v53, %v4252_v59  ;;  %v4253_v61 = vmul.f32 0.2, %v4241_v57 }
 0x564   : > { %v4257_v62 = vmax.f32 %v4241_v57, %v4253_v61  ;;  %4404 = vrot.lane.b32.xlu0 %v4256_v60, %s10196_s28  ;;  %7983 = vmatprep.mubr.msk.f32.mxu0 %vm3715_vm3, %v4256_v60 }
 0x565   : > { %v4245_v1 = vpop.f32.mrb[8].mxu1 }
 0x566   : > { %v4246_v2 = vadd.f32 %v4245_v1, %v4172_v63  ;;  %v4247_v4 = vpop.f32.mrb[9].mxu1  ;;  %4406 = vrot.lane.b32.xlu1 %v4257_v62, %s10196_s28  ;;  %7984 = vmatmul.mubr.msk.f32.vlgmr.msra.gmra.mrb[0].mxu0 %vm3715_vm3, %v4257_v62 }
 0x567   : > { %v4248_v6 = vpop.f32.mrb[10].mxu1  ;;  %8146 = vmatpush3.bf16.msk.msra.mxu0 %vm9385_vm8, %v8370_v51 }
 0x568   : > { %v4254_v7 = vmul.f32 0.2, %v4246_v2  ;;  %v4249_v9 = vadd.f32 %v4248_v6, %v4177_v5  ;;  %v4250_v10 = vpop.f32.mrb[11].mxu1  ;;  %4518 = vrot.lane.b32.xlu0 %v4256_v60, %s10194_s14  ;;  %8148 = vmatprep.subr.msk.bf16.mxu0 %vm9385_vm8, %v8370_v51 }
 0x56a   : > { %v4258_v11 = vmax.f32 %v4246_v2, %v4254_v7  ;;  %v4255_v12 = vmul.f32 0.2, %v4249_v9  ;;  %4520 = vrot.lane.b32.xlu1 %v4257_v62, %s10194_s14 }
 0x56c   : > { %v4259_v18 = vmax.f32 %v4249_v9, %v4255_v12  ;;  %4408 = vrot.lane.b32.xlu0 %v4258_v11, %s10196_s28  ;;  %7986 = vmatprep.mubr.msk.f32.mxu0 %vm3715_vm3, %v4258_v11 }
 0x56e   : > { %4410 = vrot.lane.b32.xlu1 %v4259_v18, %s10196_s28  ;;  %7987 = vmatmul.mubr.msk.f32.gmra.mrb[2].mxu0 %vm3715_vm3, %v4259_v18 }
 0x570   : > { %4632 = vrot.lane.b32.xlu0 %v4256_v60, %s10193_s30 }
 0x572   : > { %4634 = vrot.lane.b32.xlu1 %v4257_v62, %s10193_s30 }
 0x574   : > { %4522 = vrot.lane.b32.xlu0 %v4258_v11, %s10194_s14 }
 0x576   : > { %4524 = vrot.lane.b32.xlu1 %v4259_v18, %s10194_s14  ;;  %s8371_s14 = smov 8  }
 0x578   : > { %4636 = vrot.lane.b32.xlu0 %v4258_v11, %s10193_s30 }
 0x57a   : > { %4748 = vrot.lane.b32.xlu1 %v4257_v62, %s8352_s20 }
 0x57c   : > { %4746 = vrot.lane.b32.xlu0 %v4256_v60, %s8352_s20 }
 0x57e   : > { %4638 = vrot.lane.b32.xlu1 %v4259_v18, %s10193_s30  ;;  %s10208_s30 = smov 16  }
 0x580   : > { %4750 = vrot.lane.b32.xlu0 %v4258_v11, %s8352_s20 }
 0x582   : > { %4860 = vrot.lane.b32.xlu1 %v4256_v60, %s10206_s13 }
 0x584   : > { %4974 = vrot.lane.b32.xlu0 %v4256_v60, %s10207_s15 }
 0x586   : > { %4752 = vrot.lane.b32.xlu1 %v4259_v18, %s8352_s20  ;;  %s10209_s20 = smov 1  }
 0x588   : > { %4976 = vrot.lane.b32.xlu0 %v4257_v62, %s10207_s15 }
 0x58a   : > { %4862 = vrot.lane.b32.xlu1 %v4257_v62, %s10206_s13 }
 0x58c   : > { %4978 = vrot.lane.b32.xlu0 %v4258_v11, %s10207_s15 }
 0x58e   : > { %4864 = vrot.lane.b32.xlu1 %v4258_v11, %s10206_s13 }
 0x590   : > { %4980 = vrot.lane.b32.xlu0 %v4259_v18, %s10207_s15 }
 0x592   : > { %4866 = vrot.lane.b32.xlu1 %v4259_v18, %s10206_s13 }
 0x594   : > { %5088 = vrot.lane.b32.xlu0 %v4256_v60, %s10208_s30 }
 0x596   : > { %5090 = vrot.lane.b32.xlu1 %v4257_v62, %s10208_s30 }
 0x598   : > { %5092 = vrot.lane.b32.xlu0 %v4258_v11, %s10208_s30 }
 0x59a   : > { %5094 = vrot.lane.b32.xlu1 %v4259_v18, %s10208_s30 }
 0x59c   : > { %5223 = vrot.lane.b32.xlu0 %v5219_v39, %s10192_s22 }
 0x59e   : > { %5211 = vrot.lane.b32.xlu1 %v5219_v39, %s10191_s19 }
 0x5d6   : > { %v4405_v19 = vpop.permute.xlu0 %4404 }
 0x5d7   : > { %7993 = vmatprep.mubr.msk.f32.mxu0 %vm3715_vm3, %v4405_v19 }
 0x5d8   : > { %v4407_v35 = vpop.permute.xlu1 %4406 }
 0x5d9   : > { %7994 = vmatmul.mubr.msk.f32.vlgmr.msra.gmra.mrb[4].mxu0 %vm3715_vm3, %v4407_v35 }
 0x5da   : > { %v4519_v15 = vpop.permute.xlu0 %4518  ;;  %8150 = vmatpush3.bf16.msk.msra.mxu0 %vm9385_vm8, %v8370_v51 }
 0x5db   : > { %8152 = vmatprep.subr.msk.bf16.mxu0 %vm9385_vm8, %v8370_v51 }
 0x5dc   : > { %v4521_v8 = vpop.permute.xlu1 %4520 }
 0x5de   : > { %v4409_v20 = vpop.permute.xlu0 %4408 }
 0x5df   : > { %7996 = vmatprep.mubr.msk.f32.mxu0 %vm3715_vm3, %v4409_v20 }
 0x5e0   : > { %v4411_v14 = vpop.permute.xlu1 %4410 }
 0x5e1   : > { %7997 = vmatmul.mubr.msk.f32.gmra.mrb[6].mxu0 %vm3715_vm3, %v4411_v14 }
 0x5e2   : > { %v4633_v21 = vpop.permute.xlu0 %4632  ;;  %8003 = vmatprep.mubr.msk.f32.mxu0 %vm3715_vm3, %v4519_v15 }
 0x5e4   : > { %v4635_v22 = vpop.permute.xlu1 %4634 }
 0x5e5   : > { %8004 = vmatmul.mubr.msk.f32.vlgmr.msra.gmra.mrb[8].mxu0 %vm3715_vm3, %v4521_v8 }
 0x5e6   : > { %v4523_v23 = vpop.permute.xlu0 %4522  ;;  %8154 = vmatpush3.bf16.msk.msra.mxu0 %vm9385_vm8, %v8370_v51 }
 0x5e7   : > { %8006 = vmatprep.mubr.msk.f32.mxu0 %vm3715_vm3, %v4523_v23  ;;  %8156 = vmatprep.subr.msk.bf16.mxu0 %vm9385_vm8, %v8370_v51 }
 0x5e8   : > { %v4525_v24 = vpop.permute.xlu1 %4524 }
 0x5e9   : > { %8007 = vmatmul.mubr.msk.f32.gmra.mrb[10].mxu0 %vm3715_vm3, %v4525_v24 }
 0x5ea   : > { %v4637_v25 = vpop.permute.xlu0 %4636  ;;  %8013 = vmatprep.mubr.msk.f32.mxu0 %vm3715_vm3, %v4633_v21 }
 0x5ec   : > { %v4749_v41 = vpop.permute.xlu1 %4748 }
 0x5ed   : > { %8014 = vmatmul.mubr.msk.f32.vlgmr.msra.gmra.mrb[12].mxu0 %vm3715_vm3, %v4635_v22 }
 0x5ee   : > { %v4747_v26 = vpop.permute.xlu0 %4746  ;;  %8016 = vmatprep.mubr.msk.f32.mxu0 %vm3715_vm3, %v4637_v25  ;;  %8158 = vmatpush3.bf16.msk.msra.mxu0 %vm9385_vm8, %v8370_v51 }
 0x5ef   : > { %8164 = vmatprep.subr.msk.bf16.mxu0 %vm9385_vm8, %v8370_v51 }
 0x5f0   : > { %v4639_v27 = vpop.permute.xlu1 %4638 }
 0x5f1   : > { %8017 = vmatmul.mubr.msk.f32.gmra.mrb[14].mxu0 %vm3715_vm3, %v4639_v27 }
 0x5f2   : > { %v4751_v16 = vpop.permute.xlu0 %4750  ;;  %8023 = vmatprep.mubr.msk.f32.mxu0 %vm3715_vm3, %v4747_v26 }
 0x5f4   : > { %v4861_v28 = vpop.permute.xlu1 %4860 }
 0x5f5   : > { %8024 = vmatmul.mubr.msk.f32.vlgmr.msra.gmra.mrb[16].mxu0 %vm3715_vm3, %v4749_v41  ;;  %8033 = vmatprep.mubr.msk.f32.mxu1 %vm3715_vm3, %v4861_v28 }
 0x5f6   : > { %v4975_v29 = vpop.permute.xlu0 %4974  ;;  %8026 = vmatprep.mubr.msk.f32.mxu0 %vm3715_vm3, %v4751_v16  ;;  %8166 = vmatpush3.bf16.msk.msra.mxu0 %vm9385_vm8, %v8370_v51 }
 0x5f8   : > { %v4753_v3 = vpop.permute.xlu1 %4752 }
 0x5f9   : > { %8027 = vmatmul.mubr.msk.f32.gmra.mrb[18].mxu0 %vm3715_vm3, %v4753_v3 }
 0x5fa   : > { %v4977_v30 = vpop.permute.xlu0 %4976  ;;  %8043 = vmatprep.mubr.msk.f32.mxu0 %vm3715_vm3, %v4975_v29 }
 0x5fc   : > { %v4863_v31 = vpop.permute.xlu1 %4862 }
 0x5fd   : > { %8034 = vmatmul.mubr.msk.f32.vlgmr.msra.gmra.mrb[12].mxu1 %vm3715_vm3, %v4863_v31  ;;  %8044 = vmatmul.mubr.msk.f32.vlgmr.msra.gmra.mrb[20].mxu0 %vm3715_vm3, %v4977_v30 }
 0x5fe   : > { %v4979_v50 = vpop.permute.xlu0 %4978  ;;  %8170 = vmatpush3.bf16.msk.msra.mxu1 %vm9385_vm8, %v8370_v51  ;;  %v5208_v51 = vld [vmem:[#allocation4 + $0x8] sm:$0xff]  ;;  %vm7505_vm8 = vcmask 0  }
 0x5ff   : > { %8046 = vmatprep.mubr.msk.f32.mxu0 %vm3715_vm3, %v4979_v50  ;;  %5213 = vrot.lane.b32.xlu1 %v5208_v51, %s10191_s19  ;;  %5206 = vst.msk [vmem:[#allocation9 + $0x8] sm:$0xff] %vm5204_vm2, %v5208_v51 }
 0x600   : > { %v4865_v32 = vpop.permute.xlu1 %4864 }
 0x601   : > { %8036 = vmatprep.mubr.msk.f32.mxu1 %vm3715_vm3, %v4865_v32 }
 0x602   : > { %v4981_v33 = vpop.permute.xlu0 %4980 }
 0x603   : > { %8047 = vmatmul.mubr.msk.f32.gmra.mrb[22].mxu0 %vm3715_vm3, %v4981_v33  ;;  %5225 = vrot.lane.b32.xlu1 %v5208_v51, %s10192_s22 }
 0x604   : > { %v4867_v34 = vpop.permute.xlu1 %4866 }
 0x605   : > { %8037 = vmatmul.mubr.msk.f32.gmra.mrb[14].mxu1 %vm3715_vm3, %v4867_v34 }
 0x606   : > { %v5089_v36 = vpop.permute.xlu0 %5088 }
 0x607   : > { %8053 = vmatprep.mubr.msk.f32.mxu1 %vm3715_vm3, %v5089_v36 }
 0x608   : > { %v5091_v37 = vpop.permute.xlu1 %5090 }
 0x609   : > { %8054 = vmatmul.mubr.msk.f32.vlgmr.msra.gmra.mrb[16].mxu1 %vm3715_vm3, %v5091_v37 }
 0x60a   : > { %v5093_v38 = vpop.permute.xlu0 %5092 }
 0x60b   : > { %8056 = vmatprep.mubr.msk.f32.mxu1 %vm3715_vm3, %v5093_v38 }
 0x60c   : > { %v5095_v40 = vpop.permute.xlu1 %5094 }
 0x60d   : > { %8057 = vmatmul.mubr.msk.f32.gmra.mrb[18].mxu1 %vm3715_vm3, %v5095_v40  ;;  %vm5694_vm3 = vcmask 261120  }
 0x60e   : > { %v5224_v42 = vpop.permute.xlu0 %5223 }
 0x60f   : > { %5229 = vst.msk [vmem:[#allocation9 + $0x20] sm:$0xff] %vm5204_vm2, %v5224_v42 }
 0x610   : > { %v5212_v13 = vpop.permute.xlu1 %5211 }
 0x611   : > { %5217 = vst.msk [vmem:[#allocation9 + $0x10] sm:$0xff] %vm5204_vm2, %v5212_v13 }
 0x639   : > { %v7985_v43 = vpop.f32.mrb[0].mxu0 }
 0x63a   : > { %v4371_v44 = vpop.f32.mrb[1].mxu0 }
 0x63b   : > { %v4390_v45 = vpack.c.bf16 %v7985_v43, %v4371_v44 }
 0x63d   : > { %4394 = vrot.lane.b32.xlu0 %v4390_v45, %s10209_s20 }
 0x641   : > { %v7988_v46 = vpop.f32.mrb[2].mxu0 }
 0x642   : > { %v4381_v47 = vpop.f32.mrb[3].mxu0 }
 0x643   : > { %v4391_v49 = vpack.c.bf16 %v7988_v46, %v4381_v47 }
 0x645   : > { %4396 = vrot.lane.b32.xlu0 %v4391_v49, %s10209_s20 }
 0x671   : > { %v5214_v4 = vpop.permute.xlu1 %5213 }
 0x672   : > { %5218 = vst.msk [vmem:[#allocation9 + $0x18] sm:$0xff] %vm5204_vm2, %v5214_v4 }
 0x675   : > { %v5226_v10 = vpop.permute.xlu1 %5225 }
 0x676   : > { %5230 = vst.msk [vmem:[#allocation9 + $0x28] sm:$0xff] %vm5204_vm2, %v5226_v10 }
 0x6ac   : > { %v7995_v52 = vpop.f32.mrb[4].mxu0 }
 0x6ad   : > { %v4486_v53 = vpop.f32.mrb[5].mxu0 }
 0x6ae   : > { %v4505_v54 = vpack.c.bf16 %v7995_v52, %v4486_v53 }
 0x6af   : > { %v4395_v55 = vpop.permute.xlu0 %4394 }
 0x6b0   : > { %4402 = vst.msk [vmem:[#allocation4 + $0x10] sm:$0xff] %vm4401_vm5, %v4395_v55  ;;  %4509 = vrot.lane.b32.xlu0 %v4505_v54, %s10209_s20 }
 0x6b4   : > { %v7998_v56 = vpop.f32.mrb[6].mxu0 }
 0x6b5   : > { %v4496_v59 = vpop.f32.mrb[7].mxu0 }
 0x6b6   : > { %v4506_v57 = vpack.c.bf16 %v7998_v56, %v4496_v59 }
 0x6b7   : > { %v4397_v58 = vpop.permute.xlu0 %4396  ;;  %v5235_v60 = vld [vmem:[#allocation4 + $0x10] sm:$0xff] }
 0x6b8   : > { %4403 = vst.msk [vmem:[#allocation4 + $0x18] sm:$0xff] %vm4401_vm5, %v4397_v58  ;;  %5239 = vrot.lane.b32.xlu0 %v5235_v60, %s10191_s19  ;;  %v8005_v61 = vpop.f32.mrb[8].mxu0 }
 0x6b9   : > { %5233 = vst.msk [vmem:[#allocation9 + $0x30] sm:$0xff] %vm5204_vm2, %v5235_v60  ;;  %v4600_v62 = vpop.f32.mrb[9].mxu0 }
 0x6ba   : > { %v4619_v63 = vpack.c.bf16 %v8005_v61, %v4600_v62 }
 0x6bc   : > { %v8008_v1 = vpop.f32.mrb[10].mxu0 }
 0x6bd   : > { %v4610_v2 = vpop.f32.mrb[11].mxu0 }
 0x6be   : > { %v4620_v5 = vpack.c.bf16 %v8008_v1, %v4610_v2 }
 0x6bf   : > { %v5236_v6 = vld [vmem:[#allocation4 + $0x18] sm:$0xff] }
 0x6c0   : > { %v8015_v7 = vpop.f32.mrb[12].mxu0  ;;  %5234 = vst.msk [vmem:[#allocation9 + $0x38] sm:$0xff] %vm5204_vm2, %v5236_v6 }
 0x6c1   : > { %v4714_v9 = vpop.f32.mrb[13].mxu0 }
 0x6c2   : > { %v4733_v11 = vpack.c.bf16 %v8015_v7, %v4714_v9 }
 0x6c4   : > { %v8018_v12 = vpop.f32.mrb[14].mxu0 }
 0x6c5   : > { %v4724_v18 = vpop.f32.mrb[15].mxu0 }
 0x6c6   : > { %v4734_v39 = vpack.c.bf16 %v8018_v12, %v4724_v18  ;;  %v5641_v12 = vld [vmem:[%s10145_s8 + $0x8] sm:$0xff] }
 0x6c7   : > { %v8311_v18 = vld [vmem:[%s10140_s3 + $0x8] ss:$12 sps:$4 sm:$0xff]  }
 0x6c8   : > { %v8025_v19 = vpop.f32.mrb[16].mxu0  ;;  %8063 = vmatprep.mubr.msk.bf16.mxu1 %vm5694_vm3, %v8311_v18 }
 0x6c9   : > { %v4828_v35 = vpop.f32.mrb[17].mxu0 }
 0x6ca   : > { %v4847_v15 = vpack.c.bf16 %v8025_v19, %v4828_v35  ;;  %v5643_v19 = vld [vmem:[%s10145_s8 + $0x18] sm:$0xff] }
 0x6cc   : > { %v8028_v8 = vpop.f32.mrb[18].mxu0 }
 0x6cd   : > { %v4838_v20 = vpop.f32.mrb[19].mxu0 }
 0x6ce   : > { %v4848_v14 = vpack.c.bf16 %v8028_v8, %v4838_v20  ;;  %v5642_v8 = vld [vmem:[%s10145_s8 + $0x10] sm:$0xff] }
 0x6d0   : > { %v8035_v21 = vpop.f32.mrb[12].mxu1  ;;  %v8045_v22 = vpop.f32.mrb[20].mxu0 }
 0x6d1   : > { %v4942_v23 = vpop.f32.mrb[13].mxu1  ;;  %v5056_v24 = vpop.f32.mrb[21].mxu0 }
 0x6d2   : > { %v4961_v25 = vpack.c.bf16 %v8035_v21, %v4942_v23  ;;  %v5075_v41 = vpack.c.bf16 %v8045_v22, %v5056_v24 }
 0x6d4   : > { %4965 = vrot.lane.b32.xlu1 %v4961_v25, %s10209_s20 }
 0x6d6   : > { %v8048_v26 = vpop.f32.mrb[22].mxu0 }
 0x6d7   : > { %v5066_v27 = vpop.f32.mrb[23].mxu0 }
 0x6d8   : > { %v5076_v16 = vpack.c.bf16 %v8048_v26, %v5066_v27  ;;  %4511 = vrot.lane.b32.xlu1 %v4506_v57, %s10209_s20  ;;  %v8038_v28 = vpop.f32.mrb[14].mxu1 }
 0x6d9   : > { %v4952_v29 = vpop.f32.mrb[15].mxu1 }
 0x6da   : > { %v4962_v3 = vpack.c.bf16 %v8038_v28, %v4952_v29 }
 0x6dc   : > { %4967 = vrot.lane.b32.xlu1 %v4962_v3, %s10209_s20  ;;  %v8055_v30 = vpop.f32.mrb[16].mxu1 }
 0x6dd   : > { %v5170_v31 = vpop.f32.mrb[17].mxu1 }
 0x6de   : > { %v5189_v50 = vpack.c.bf16 %v8055_v30, %v5170_v31 }
 0x6e0   : > { %5251 = vrot.lane.b32.xlu1 %v5235_v60, %s10192_s22  ;;  %5193 = vrot.lane.b32.xlu0 %v5189_v50, %s10209_s20  ;;  %v8058_v32 = vpop.f32.mrb[18].mxu1 }
 0x6e1   : > { %v5180_v33 = vpop.f32.mrb[19].mxu1 }
 0x6e2   : > { %v5190_v34 = vpack.c.bf16 %v8058_v32, %v5180_v33 }
 0x6e4   : > { %4623 = vrot.lane.b32.xlu1 %v4619_v63, %s10209_s20  ;;  %4625 = vrot.lane.b32.xlu0 %v4620_v5, %s10209_s20 }
 0x6e8   : > { %5241 = vrot.lane.b32.xlu0 %v5236_v6, %s10191_s19  ;;  %5195 = vrot.lane.b32.xlu1 %v5190_v34, %s10209_s20 }
 0x6ec   : > { %4737 = vrot.lane.b32.xlu0 %v4733_v11, %s10209_s20  ;;  %5253 = vrot.lane.b32.xlu1 %v5236_v6, %s10192_s22  ;;  %v8307_v11 = vld [vmem:[%s10140_s3 + $0x4] ss:$12 sps:$4 sm:$0xff]  }
 0x6ed   : > { %5733 = vmatprep.mubr.bf16.mxu0 %v8307_v11 }
 0x6f0   : > { %4853 = vrot.lane.b32.xlu0 %v4848_v14, %s10209_s20  ;;  %4739 = vrot.lane.b32.xlu1 %v4734_v39, %s10209_s20  ;;  %v5640_v39 = vld [vmem:[%s10145_s8] sm:$0xff] }
 0x6f4   : > { %5081 = vrot.lane.b32.xlu0 %v5076_v16, %s10209_s20  ;;  %4851 = vrot.lane.b32.xlu1 %v4847_v15, %s10209_s20 }
 0x6f8   : > { %5079 = vrot.lane.b32.xlu1 %v5075_v41, %s10209_s20 }
 0x722   : > { %v4510_v36 = vpop.permute.xlu0 %4509 }
 0x723   : > { %4516 = vst.msk [vmem:[#allocation4 + $0x20] sm:$0xff] %vm4401_vm5, %v4510_v36 }
 0x72a   : > { %v5240_v37 = vpop.permute.xlu0 %5239  ;;  %v9568_v38 = vld [vmem:[#allocation4 + $0x20] sm:$0xff] }
 0x72b   : > { %5245 = vst.msk [vmem:[#allocation9 + $0x40] sm:$0xff] %vm5204_vm2, %v5240_v37  ;;  %5291 = vrot.lane.b32.xlu0 %v9568_v38, %s8371_s14  ;;  %5261 = vst.msk [vmem:[#allocation9 + $0x60] sm:$0xff] %vm5204_vm2, %v9568_v38 }
 0x746   : > { %v4966_v40 = vpop.permute.xlu1 %4965 }
 0x747   : > { %4972 = vst.msk [vmem:[#allocation4 + $0x60] sm:$0xff] %vm4401_vm5, %v4966_v40 }
 0x74a   : > { %v4512_v42 = vpop.permute.xlu1 %4511 }
 0x74b   : > { %4517 = vst.msk [vmem:[#allocation4 + $0x28] sm:$0xff] %vm4401_vm5, %v4512_v42 }
 0x74e   : > { %v4968_v43 = vpop.permute.xlu1 %4967  ;;  %v9577_v44 = vld [vmem:[#allocation4 + $0x60] sm:$0xff] }
 0x74f   : > { %4973 = vst.msk [vmem:[#allocation4 + $0x68] sm:$0xff] %vm4401_vm5, %v4968_v43  ;;  %5522 = vrot.lane.b32.xlu0 %v9577_v44, %s8372_s12  ;;  %5509 = vrot.lane.b32.xlu1 %v9577_v44, %s8373_s16 }
 0x752   : > { %v5194_v45 = vpop.permute.xlu0 %5193  ;;  %v5252_v46 = vpop.permute.xlu1 %5251  ;;  %v9584_v47 = vld [vmem:[#allocation4 + $0x28] sm:$0xff] }
 0x753   : > { %5200 = vst.msk [vmem:[#allocation4 + $0x80] sm:$0xff] %vm4401_vm5, %v5194_v45  ;;  %5316 = vrot.lane.b32.xlu0 %v9568_v38, %s8374_s27  ;;  %5304 = vrot.lane.b32.xlu1 %v9568_v38, %s8375_s25 }
 0x754   : > { %5257 = vst.msk [vmem:[#allocation9 + $0x50] sm:$0xff] %vm5204_vm2, %v5252_v46  ;;  %5262 = vst.msk [vmem:[#allocation9 + $0x68] sm:$0xff] %vm5204_vm2, %v9584_v47 }
 0x756   : > { %v4626_v49 = vpop.permute.xlu0 %4625  ;;  %v4624_v51 = vpop.permute.xlu1 %4623  ;;  %v9600_v53 = vld [vmem:[#allocation4 + $0x68] sm:$0xff] }
 0x757   : > { %4631 = vst.msk [vmem:[#allocation4 + $0x38] sm:$0xff] %vm4401_vm5, %v4626_v49  ;;  %4630 = vst.msk [vmem:[#allocation4 + $0x30] sm:$0xff] %vm4401_vm5, %v4624_v51  ;;  %5534 = vrot.lane.b32.xlu0 %v9577_v44, %s8376_s24  ;;  %5473 = vrot.lane.b32.xlu1 %v9577_v44, %s10208_s30 }
 0x75a   : > { %v5242_v13 = vpop.permute.xlu0 %5241  ;;  %v5196_v52 = vpop.permute.xlu1 %5195  ;;  %v5578_v63 = vld [vmem:[#allocation4 + $0x80] sm:$0xff] }
 0x75b   : > { %5246 = vst.msk [vmem:[#allocation9 + $0x48] sm:$0xff] %vm5204_vm2, %v5242_v13  ;;  %5267 = vrot.lane.b32.xlu1 %v9568_v38, %s10191_s19  ;;  %5511 = vrot.lane.b32.xlu0 %v9600_v53, %s8373_s16 }
 0x75c   : > { %5201 = vst.msk [vmem:[#allocation4 + $0x88] sm:$0xff] %vm4401_vm5, %v5196_v52 }
 0x75e   : > { %v4738_v54 = vpop.permute.xlu0 %4737  ;;  %v5254_v55 = vpop.permute.xlu1 %5253  ;;  %v5348_v60 = vld [vmem:[#allocation4 + $0x30] sm:$0xff]  ;;  %v5337_v62 = vld [vmem:[#allocation4 + $0x38] sm:$0xff] }
 0x75f   : > { %4744 = vst.msk [vmem:[#allocation4 + $0x40] sm:$0xff] %vm4401_vm5, %v4738_v54  ;;  %5485 = vrot.lane.b32.xlu1 %v9577_v44, %s10210_s21  ;;  %5475 = vrot.lane.b32.xlu0 %v9600_v53, %s10208_s30 }
 0x760   : > { %5258 = vst.msk [vmem:[#allocation9 + $0x58] sm:$0xff] %vm5204_vm2, %v5254_v55 }
 0x762   : > { %v4854_v56 = vpop.permute.xlu0 %4853  ;;  %v4740_v59 = vpop.permute.xlu1 %4739 }
 0x763   : > { %4859 = vst.msk [vmem:[#allocation4 + $0x58] sm:$0xff] %vm4401_vm5, %v4854_v56  ;;  %4745 = vst.msk [vmem:[#allocation4 + $0x48] sm:$0xff] %vm4401_vm5, %v4740_v59  ;;  %5293 = vrot.lane.b32.xlu1 %v9584_v47, %s8371_s14  ;;  %5536 = vrot.lane.b32.xlu0 %v9600_v53, %s8376_s24  ;;  %v5579_v1 = vld [vmem:[#allocation4 + $0x88] sm:$0xff] }
 0x766   : > { %v5082_v57 = vpop.permute.xlu0 %5081  ;;  %v4852_v58 = vpop.permute.xlu1 %4851  ;;  %v5409_v2 = vld [vmem:[#allocation4 + $0x40] sm:$0xff] }
 0x767   : > { %5087 = vst.msk [vmem:[#allocation4 + $0x78] sm:$0xff] %vm4401_vm5, %v5082_v57  ;;  %4858 = vst.msk [vmem:[#allocation4 + $0x50] sm:$0xff] %vm4401_vm5, %v4852_v58  ;;  %5306 = vrot.lane.b32.xlu1 %v9584_v47, %s8375_s25  ;;  %5352 = vrot.lane.b32.xlu0 %v5348_v60, %s8374_s27 }
 0x76a   : > { %v5080_v61 = vpop.permute.xlu1 %5079  ;;  %v5361_v4 = vld [vmem:[#allocation4 + $0x48] sm:$0xff]  ;;  %v5446_v6 = vld [vmem:[#allocation4 + $0x58] sm:$0xff] }
 0x76b   : > { %5086 = vst.msk [vmem:[#allocation4 + $0x70] sm:$0xff] %vm4401_vm5, %v5080_v61  ;;  %5524 = vrot.lane.b32.xlu1 %v9600_v53, %s8372_s12  ;;  %5328 = vrot.lane.b32.xlu0 %v5348_v60, %s8371_s14 }
 0x76e   : > { %v5457_v5 = vld [vmem:[#allocation4 + $0x50] sm:$0xff]  ;;  %v5555_v10 = vld [vmem:[#allocation4 + $0x78] sm:$0xff] }
 0x76f   : > { %5318 = vrot.lane.b32.xlu1 %v9584_v47, %s8374_s27  ;;  %5342 = vrot.lane.b32.xlu0 %v5337_v62, %s8375_s25 }
 0x772   : > { %v5554_v7 = vld [vmem:[#allocation4 + $0x70] sm:$0xff] }
 0x773   : > { %5340 = vrot.lane.b32.xlu1 %v5348_v60, %s8375_s25  ;;  %5354 = vrot.lane.b32.xlu0 %v5337_v62, %s8374_s27 }
 0x777   : > { %5582 = vrot.lane.b32.xlu1 %v5578_v63, %s8373_s16  ;;  %5584 = vrot.lane.b32.xlu0 %v5579_v1, %s8373_s16 }
 0x77b   : > { %5413 = vrot.lane.b32.xlu1 %v5409_v2, %s10210_s21  ;;  %5400 = vrot.lane.b32.xlu0 %v5409_v2, %s10208_s30 }
 0x77f   : > { %5364 = vrot.lane.b32.xlu1 %v5409_v2, %s8371_s14  ;;  %5425 = vrot.lane.b32.xlu0 %v5409_v2, %s10189_s26 }
 0x783   : > { %5376 = vrot.lane.b32.xlu1 %v5409_v2, %s8375_s25  ;;  %5366 = vrot.lane.b32.xlu0 %v5361_v4, %s8371_s14 }
 0x787   : > { %5402 = vrot.lane.b32.xlu1 %v5361_v4, %s10208_s30  ;;  %5461 = vrot.lane.b32.xlu0 %v5457_v5, %s10189_s26 }
 0x78b   : > { %5415 = vrot.lane.b32.xlu1 %v5361_v4, %s10210_s21  ;;  %5437 = vrot.lane.b32.xlu0 %v5457_v5, %s10208_s30 }
 0x78f   : > { %5427 = vrot.lane.b32.xlu1 %v5361_v4, %s10189_s26  ;;  %5451 = vrot.lane.b32.xlu0 %v5446_v6, %s10210_s21 }
 0x793   : > { %5449 = vrot.lane.b32.xlu1 %v5457_v5, %s10210_s21  ;;  %5463 = vrot.lane.b32.xlu0 %v5446_v6, %s10189_s26 }
 0x797   : > { %5269 = vrot.lane.b32.xlu0 %v9584_v47, %s10191_s19  ;;  %5558 = vrot.lane.b32.xlu1 %v5554_v7, %s8372_s12 }
 0x79b   : > { %5570 = vrot.lane.b32.xlu0 %v5554_v7, %s8376_s24  ;;  %5594 = vrot.lane.b32.xlu1 %v5578_v63, %s8372_s12 }
 0x79d   : > { %v5292_v9 = vpop.permute.xlu0 %5291 }
 0x79e   : > { %5298 = vst.msk [vmem:[#allocation9] sm:$0xff] %vm5297_vm10, %v5292_v9 }
 0x79f   : > { %5560 = vrot.lane.b32.xlu0 %v5555_v10, %s8372_s12  ;;  %5546 = vrot.lane.b32.xlu1 %v5554_v7, %s8373_s16 }
 0x7a3   : > { %5378 = vrot.lane.b32.xlu0 %v5361_v4, %s8375_s25  ;;  %5330 = vrot.lane.b32.xlu1 %v5337_v62, %s8371_s14  ;;  %s8381_s25 = smov 2  }
 0x7a7   : > { %5572 = vrot.lane.b32.xlu0 %v5555_v10, %s8376_s24  ;;  %5439 = vrot.lane.b32.xlu1 %v5446_v6, %s10208_s30  ;;  %s8384_s30 = smov 124  }
 0x7ab   : > { %5487 = vrot.lane.b32.xlu0 %v9600_v53, %s10210_s21  ;;  %5279 = vrot.lane.b32.xlu1 %v9568_v38, %s10192_s22 }
 0x7af   : > { %5596 = vrot.lane.b32.xlu0 %v5579_v1, %s8372_s12  ;;  %5388 = vrot.lane.b32.xlu1 %v5409_v2, %s8374_s27 }
 0x7b3   : > { %5497 = vrot.lane.b32.xlu0 %v9577_v44, %s10189_s26  ;;  %5606 = vrot.lane.b32.xlu1 %v5578_v63, %s8376_s24 }
 0x7b7   : > { %5548 = vrot.lane.b32.xlu0 %v5555_v10, %s8373_s16  ;;  %5390 = vrot.lane.b32.xlu1 %v5361_v4, %s8374_s27  ;;  %s8378_s16 = smov 120   ;;  %s8379_s27 = smov 104  }
 0x7bb   : > { %5281 = vrot.lane.b32.xlu0 %v9584_v47, %s10192_s22  ;;  %5608 = vrot.lane.b32.xlu1 %v5579_v1, %s8376_s24  ;;  %s8382_s24 = smov 3  }
 0x7bf   : > { %5499 = vrot.lane.b32.xlu0 %v9600_v53, %s10189_s26  ;;  %5651 = vperm.xlu1 %8229, %v5641_v12  }
 0x7c1   : > { %v5523_v35 = vpop.permute.xlu0 %5522  ;;  %v5510_v15 = vpop.permute.xlu1 %5509 }
 0x7c3   : > { %5646 = vperm.xlu0 %8228, %v5640_v39   ;;  %5661 = vperm.xlu1 %8229, %v5643_v19  }
 0x7c5   : > { %v5317_v20 = vpop.permute.xlu0 %5316  ;;  %v5305_v14 = vpop.permute.xlu1 %5304 }
 0x7c6   : > { %5322 = vst.msk [vmem:[#allocation9 + $0x20] sm:$0xff] %vm5297_vm10, %v5317_v20  ;;  %5310 = vst.msk [vmem:[#allocation9 + $0x10] sm:$0xff] %vm5297_vm10, %v5305_v14 }
 0x7c7   : > { %5656 = vperm.xlu0 %8228, %v5642_v8  }
 0x7c9   : > { %v5535_v21 = vpop.permute.xlu0 %5534  ;;  %v5474_v22 = vpop.permute.xlu1 %5473 }
 0x7cd   : > { %v5512_v23 = vpop.permute.xlu0 %5511  ;;  %v5268_v24 = vpop.permute.xlu1 %5267 }
 0x7ce   : > { %5273 = vst.msk [vmem:[#allocation9 + $0x70] sm:$0xff] %vm5204_vm2, %v5268_v24 }
 0x7d1   : > { %v5476_v25 = vpop.permute.xlu0 %5475  ;;  %v5486_v41 = vpop.permute.xlu1 %5485 }
 0x7d5   : > { %v5537_v26 = vpop.permute.xlu0 %5536  ;;  %v5294_v27 = vpop.permute.xlu1 %5293 }
 0x7d6   : > { %5299 = vst.msk [vmem:[#allocation9 + $0x8] sm:$0xff] %vm5297_vm10, %v5294_v27 }
 0x7d9   : > { %v5353_v16 = vpop.permute.xlu0 %5352  ;;  %v5307_v28 = vpop.permute.xlu1 %5306 }
 0x7da   : > { %5358 = vst.msk [vmem:[#allocation9 + $0x50] sm:$0xff] %vm5297_vm10, %v5353_v16  ;;  %5311 = vst.msk [vmem:[#allocation9 + $0x18] sm:$0xff] %vm5297_vm10, %v5307_v28  ;;  %v8305_v28 = vld [vmem:[%s10140_s3] ss:$12 sps:$4 sm:$0xff]  }
 0x7dd   : > { %v5329_v29 = vpop.permute.xlu0 %5328  ;;  %v5525_v3 = vpop.permute.xlu1 %5524 }
 0x7de   : > { %5334 = vst.msk [vmem:[#allocation9 + $0x30] sm:$0xff] %vm5297_vm10, %v5329_v29  ;;  %v8308_v29 = vld [vmem:[%s10140_s3 + $0x1c] ss:$12 sps:$4 sm:$0xff]  }
 0x7e1   : > { %v5343_v30 = vpop.permute.xlu0 %5342  ;;  %v5319_v31 = vpop.permute.xlu1 %5318 }
 0x7e2   : > { %5347 = vst.msk [vmem:[#allocation9 + $0x48] sm:$0xff] %vm5297_vm10, %v5343_v30  ;;  %5323 = vst.msk [vmem:[#allocation9 + $0x28] sm:$0xff] %vm5297_vm10, %v5319_v31  ;;  %v8310_v30 = vld [vmem:[%s10140_s3 + $0x18] ss:$12 sps:$4 sm:$0xff]   ;;  %v8312_v31 = vld [vmem:[%s10140_s3 + $0x20] ss:$12 sps:$4 sm:$0xff]  }
 0x7e5   : > { %v5355_v50 = vpop.permute.xlu0 %5354  ;;  %v5341_v32 = vpop.permute.xlu1 %5340 }
 0x7e6   : > { %5359 = vst.msk [vmem:[#allocation9 + $0x58] sm:$0xff] %vm5297_vm10, %v5355_v50  ;;  %5346 = vst.msk [vmem:[#allocation9 + $0x40] sm:$0xff] %vm5297_vm10, %v5341_v32  ;;  %v8377_v50 = vmov 1.0  }
 0x7e9   : > { %v5585_v33 = vpop.permute.xlu0 %5584  ;;  %v5583_v34 = vpop.permute.xlu1 %5582 }
 0x7ed   : > { %v5401_v36 = vpop.permute.xlu0 %5400  ;;  %v5414_v37 = vpop.permute.xlu1 %5413 }
 0x7ee   : > { %5407 = vst.msk [vmem:[#allocation9] sm:$0xff] %vm5406_vm7, %v5401_v36  ;;  %5419 = vst.msk [vmem:[#allocation9 + $0x10] sm:$0xff] %vm5406_vm7, %v5414_v37 }
 0x7ef   : > { %5516 = vst.msk [vmem:[#allocation9] sm:$0xff] %vm5515_vm4, %v5510_v15  ;;  %5528 = vst.msk [vmem:[#allocation9 + $0x10] sm:$0xff] %vm5515_vm4, %v5523_v35 }
 0x7f1   : > { %v5426_v38 = vpop.permute.xlu0 %5425  ;;  %v5365_v40 = vpop.permute.xlu1 %5364 }
 0x7f2   : > { %5431 = vst.msk [vmem:[#allocation9 + $0x20] sm:$0xff] %vm5406_vm7, %v5426_v38 }
 0x7f3   : > { %5370 = vst.msk [vmem:[#allocation9 + $0x60] sm:$0xff] %vm5297_vm10, %v5365_v40 }
 0x7f4   : > { %5540 = vst.msk [vmem:[#allocation9 + $0x20] sm:$0xff] %vm5515_vm4, %v5535_v21 }
 0x7f5   : > { %5479 = vst.msk [vmem:[#allocation9 + $0x60] sm:$0xff] %vm5406_vm7, %v5474_v22  ;;  %v5367_v42 = vpop.permute.xlu0 %5366  ;;  %v5377_v43 = vpop.permute.xlu1 %5376 }
 0x7f6   : > { %5588 = vst.msk [vmem:[#allocation9 + $0x60] sm:$0xff] %vm5515_vm4, %v5583_v34  ;;  %v5622_v60 = vld [vmem:[#allocation9] sm:$0xff]  ;;  %v5624_v9 = vld [vmem:[#allocation9 + $0x10] sm:$0xff] }
 0x7f7   : > { %5371 = vst.msk [vmem:[#allocation9 + $0x68] sm:$0xff] %vm5297_vm10, %v5367_v42  ;;  %5382 = vst.msk [vmem:[#allocation9 + $0x70] sm:$0xff] %vm5297_vm10, %v5377_v43 }
 0x7f8   : > { %5480 = vst.msk [vmem:[#allocation9 + $0x68] sm:$0xff] %vm5406_vm7, %v5476_v25  ;;  %5491 = vst.msk [vmem:[#allocation9 + $0x70] sm:$0xff] %vm5406_vm7, %v5486_v41 }
 0x7f9   : > { %5589 = vst.msk [vmem:[#allocation9 + $0x68] sm:$0xff] %vm5515_vm4, %v5585_v33  ;;  %v5462_v44 = vpop.permute.xlu0 %5461  ;;  %v5403_v45 = vpop.permute.xlu1 %5402 }
 0x7fa   : > { %5467 = vst.msk [vmem:[#allocation9 + $0x50] sm:$0xff] %vm5406_vm7, %v5462_v44  ;;  %5408 = vst.msk [vmem:[#allocation9 + $0x8] sm:$0xff] %vm5406_vm7, %v5403_v45 }
 0x7fb   : > { %5517 = vst.msk [vmem:[#allocation9 + $0x8] sm:$0xff] %vm5515_vm4, %v5512_v23  ;;  %v5626_v15 = vld [vmem:[#allocation9 + $0x20] sm:$0xff] }
 0x7fd   : > { %v5438_v46 = vpop.permute.xlu0 %5437  ;;  %v5416_v47 = vpop.permute.xlu1 %5415  ;;  %v5634_v39 = vld [vmem:[#allocation9 + $0x60] sm:$0xff] }
 0x7fe   : > { %5443 = vst.msk [vmem:[#allocation9 + $0x30] sm:$0xff] %vm5406_vm7, %v5438_v46  ;;  %5420 = vst.msk [vmem:[#allocation9 + $0x18] sm:$0xff] %vm5406_vm7, %v5416_v47 }
 0x7ff   : > { %5529 = vst.msk [vmem:[#allocation9 + $0x18] sm:$0xff] %vm5515_vm4, %v5525_v3 }
 0x800   : > { %v5635_v8 = vld [vmem:[#allocation9 + $0x68] sm:$0xff] }
 0x801   : > { %v5452_v49 = vpop.permute.xlu0 %5451  ;;  %v5428_v51 = vpop.permute.xlu1 %5427 }
 0x802   : > { %5456 = vst.msk [vmem:[#allocation9 + $0x48] sm:$0xff] %vm5406_vm7, %v5452_v49  ;;  %5432 = vst.msk [vmem:[#allocation9 + $0x28] sm:$0xff] %vm5406_vm7, %v5428_v51  ;;  %v5623_v4 = vld [vmem:[#allocation9 + $0x8] sm:$0xff] }
 0x803   : > { %5541 = vst.msk [vmem:[#allocation9 + $0x28] sm:$0xff] %vm5515_vm4, %v5537_v26 }
 0x805   : > { %v5464_v13 = vpop.permute.xlu0 %5463  ;;  %v5450_v52 = vpop.permute.xlu1 %5449 }
 0x806   : > { %5468 = vst.msk [vmem:[#allocation9 + $0x58] sm:$0xff] %vm5406_vm7, %v5464_v13  ;;  %5455 = vst.msk [vmem:[#allocation9 + $0x40] sm:$0xff] %vm5406_vm7, %v5450_v52  ;;  %v5625_v18 = vld [vmem:[#allocation9 + $0x18] sm:$0xff] }
 0x809   : > { %v5270_v53 = vpop.permute.xlu0 %5269  ;;  %v5559_v54 = vpop.permute.xlu1 %5558 }
 0x80a   : > { %5274 = vst.msk [vmem:[#allocation9 + $0x78] sm:$0xff] %vm5204_vm2, %v5270_v53  ;;  %v5627_v14 = vld [vmem:[#allocation9 + $0x28] sm:$0xff] }
 0x80b   : > { %5564 = vst.msk [vmem:[#allocation9 + $0x40] sm:$0xff] %vm5515_vm4, %v5559_v54 }
 0x80d   : > { %v5571_v55 = vpop.permute.xlu0 %5570  ;;  %v5595_v56 = vpop.permute.xlu1 %5594 }
 0x80e   : > { %5576 = vst.msk [vmem:[#allocation9 + $0x50] sm:$0xff] %vm5515_vm4, %v5571_v55  ;;  %5600 = vst.msk [vmem:[#allocation9 + $0x70] sm:$0xff] %vm5515_vm4, %v5595_v56 }
 0x811   : > { %v5561_v59 = vpop.permute.xlu0 %5560  ;;  %v5547_v57 = vpop.permute.xlu1 %5546 }
 0x812   : > { %v5630_v58 = vld [vmem:[#allocation9 + $0x40] sm:$0xff]  ;;  %5565 = vst.msk [vmem:[#allocation9 + $0x48] sm:$0xff] %vm5515_vm4, %v5561_v59  ;;  %5552 = vst.msk [vmem:[#allocation9 + $0x30] sm:$0xff] %vm5515_vm4, %v5547_v57 }
 0x813   : > { %7848 = vmatprep.subr.bf16.mxu0 %v5630_v58 }
 0x814   : > { %7849 = vmatpush3.bf16.msra.mxu0 %v5622_v60 }
 0x815   : > { %v5379_v61 = vpop.permute.xlu0 %5378  ;;  %v5331_v62 = vpop.permute.xlu1 %5330  ;;  %v5632_v5 = vld [vmem:[#allocation9 + $0x50] sm:$0xff] }
 0x816   : > { %5383 = vst.msk [vmem:[#allocation9 + $0x78] sm:$0xff] %vm5297_vm10, %v5379_v61  ;;  %5335 = vst.msk [vmem:[#allocation9 + $0x38] sm:$0xff] %vm5297_vm10, %v5331_v62  ;;  %v5636_v21 = vld [vmem:[#allocation9 + $0x70] sm:$0xff] }
 0x819   : > { %v5573_v63 = vpop.permute.xlu0 %5572  ;;  %v5440_v1 = vpop.permute.xlu1 %5439  ;;  %v5631_v2 = vld [vmem:[#allocation9 + $0x48] sm:$0xff]  ;;  %v5628_v24 = vld [vmem:[#allocation9 + $0x30] sm:$0xff] }
 0x81a   : > { %5577 = vst.msk [vmem:[#allocation9 + $0x58] sm:$0xff] %vm5515_vm4, %v5573_v63  ;;  %7850 = vmatprep.subr.bf16.mxu0 %v5631_v2 }
 0x81b   : > { %5444 = vst.msk [vmem:[#allocation9 + $0x38] sm:$0xff] %vm5406_vm7, %v5440_v1  ;;  %7851 = vmatpush3.bf16.msra.mxu0 %v5623_v4 }
 0x81c   : > { %7852 = vmatprep.subr.bf16.mxu0 %v5632_v5 }
 0x81d   : > { %v5488_v6 = vpop.permute.xlu0 %5487  ;;  %v5280_v7 = vpop.permute.xlu1 %5279 }
 0x81e   : > { %5492 = vst.msk [vmem:[#allocation9 + $0x78] sm:$0xff] %vm5406_vm7, %v5488_v6 }
 0x81f   : > { %5285 = vst.msk [vmem:[#allocation9 + $0x80] sm:$0xff] %vm5204_vm2, %v5280_v7  ;;  %7853 = vmatpush3.bf16.msra.mxu0 %v5624_v9 }
 0x821   : > { %v5597_v10 = vpop.permute.xlu0 %5596  ;;  %v5389_v11 = vpop.permute.xlu1 %5388  ;;  %v5633_v12 = vld [vmem:[#allocation9 + $0x58] sm:$0xff] }
 0x822   : > { %5601 = vst.msk [vmem:[#allocation9 + $0x78] sm:$0xff] %vm5515_vm4, %v5597_v10  ;;  %7854 = vmatprep.subr.bf16.mxu0 %v5633_v12 }
 0x823   : > { %5394 = vst.msk [vmem:[#allocation9 + $0x80] sm:$0xff] %vm5297_vm10, %v5389_v11  ;;  %7855 = vmatpush3.bf16.msra.mxu0 %v5625_v18 }
 0x824   : > { %7856 = vmatprep.subr.bf16.mxu0 %v5634_v39 }
 0x825   : > { %v5498_v19 = vpop.permute.xlu0 %5497  ;;  %v5607_v35 = vpop.permute.xlu1 %5606 }
 0x826   : > { %5503 = vst.msk [vmem:[#allocation9 + $0x80] sm:$0xff] %vm5406_vm7, %v5498_v19 }
 0x827   : > { %5612 = vst.msk [vmem:[#allocation9 + $0x80] sm:$0xff] %vm5515_vm4, %v5607_v35  ;;  %7857 = vmatpush3.bf16.msra.mxu0 %v5626_v15 }
 0x828   : > { %7858 = vmatprep.subr.bf16.mxu0 %v5635_v8 }
 0x829   : > { %v5549_v20 = vpop.permute.xlu0 %5548  ;;  %v5391_v22 = vpop.permute.xlu1 %5390  ;;  %v5637_v41 = vld [vmem:[#allocation9 + $0x78] sm:$0xff] }
 0x82a   : > { %5553 = vst.msk [vmem:[#allocation9 + $0x38] sm:$0xff] %vm5515_vm4, %v5549_v20 }
 0x82b   : > { %7859 = vmatpush3.bf16.msra.mxu0 %v5627_v14 }
 0x82c   : > { %7860 = vmatprep.subr.bf16.mxu0 %v5636_v21 }
 0x82d   : > { %v5282_v23 = vpop.permute.xlu0 %5281  ;;  %v5609_v16 = vpop.permute.xlu1 %5608 }
 0x82e   : > { %5286 = vst.msk [vmem:[#allocation9 + $0x88] sm:$0xff] %vm5204_vm2, %v5282_v23  ;;  %v5638_v25 = vld [vmem:[#allocation9 + $0x80] sm:$0xff] }
 0x82f   : > { %5395 = vst.msk [vmem:[#allocation9 + $0x88] sm:$0xff] %vm5297_vm10, %v5391_v22  ;;  %7861 = vmatpush3.bf16.msra.mxu0 %v5628_v24  ;;  %8059 = vmatprep.subr.bf16.mxu1 %v5638_v25 }
 0x830   : > { %7862 = vmatprep.subr.bf16.mxu0 %v5637_v41  ;;  %8060 = vmatpush3.bf16.msra.mxu1 %v5638_v25 }
 0x831   : > { %v5500_v26 = vpop.permute.xlu0 %5499  ;;  %v5629_v27 = vld [vmem:[#allocation9 + $0x38] sm:$0xff] }
 0x832   : > { %5504 = vst.msk [vmem:[#allocation9 + $0x88] sm:$0xff] %vm5406_vm7, %v5500_v26 }
 0x833   : > { %5613 = vst.msk [vmem:[#allocation9 + $0x88] sm:$0xff] %vm5515_vm4, %v5609_v16  ;;  %7863 = vmatpush3.bf16.msra.mxu0 %v5629_v27 }
 0x836   : > { %5734 = vmatmul.mubr.bf16.vlgmr.msra.gmra.mrb[24].mxu0 %v8305_v28 }
 0x837   : > { %5741 = vmatprep.mubr.bf16.mxu0 %v8308_v29 }
 0x83a   : > { %v5639_v3 = vld [vmem:[#allocation9 + $0x88] sm:$0xff] }
 0x83b   : > { %8061 = vmatprep.subr.bf16.mxu1 %v5639_v3 }
 0x83c   : > { %8062 = vmatpush3.bf16.msra.mxu1 %v5639_v3 }
 0x83d   : > { %8067 = vmatprep.subr.msk.mxu1 %vm9379_vm15, %v8377_v50 }
 0x83e   : > { %5742 = vmatmul.mubr.bf16.gmra.mrb[28].mxu0 %v8310_v30  ;;  %v5652_v42 = vpop.permute.xlu1 %5651 }
 0x83f   : > { %8064 = vmatmul.mubr.msk.bf16.vlgmr.msra.gmra.mrb[20].mxu1 %vm5694_vm3, %v8312_v31 }
 0x840   : > { %8068 = vmatpush3.msk.msra.mxu1 %vm9379_vm15, %v8377_v50 }
 0x841   : > { %8075 = vmatprep.subr.msk.mxu1 %vm9379_vm15, %v8377_v50 }
 0x842   : > { %v5647_v34 = vpop.permute.xlu0 %5646  ;;  %v5662_v58 = vpop.permute.xlu1 %5661 }
 0x846   : > { %v5657_v43 = vpop.permute.xlu0 %5656 }
 0x909   : > { %v7864_v32 = vpop.f32.mrb[24].mxu0 }
 0x90a   : > { %v7865_v33 = vpop.f32.mrb[25].mxu0 }
 0x90b   : > { %v7866_v36 = vadd.f32 %v7865_v33, %v7864_v32  ;;  %v7867_v37 = vpop.f32.mrb[26].mxu0 }
 0x90c   : > { %v7868_v38 = vpop.f32.mrb[27].mxu0 }
 0x90d   : > { %v7869_v40 = vadd.f32 %v7868_v38, %v7867_v37  ;;  %v5736_v47 = vadd.f32 %v7866_v36, %v5647_v34 }
 0x90f   : > { %v5739_v55 = vadd.f32 %v7869_v40, %v5652_v42  ;;  %v6278_v40 = vld [vmem:[#allocation5] sm:$0xff] }
 0x910   : > { %6276 = vst.msk [vmem:[#allocation10] sm:$0xff] %vm6275_vm11, %v6278_v40 }
 0x911   : > { %v7870_v44 = vpop.f32.mrb[28].mxu0 }
 0x912   : > { %v7871_v45 = vpop.f32.mrb[29].mxu0  ;;  %v8065_v46 = vpop.f32.mrb[20].mxu1 }
 0x913   : > { %v7872_v49 = vadd.f32 %v7871_v45, %v7870_v44  ;;  %v7873_v51 = vpop.f32.mrb[30].mxu0  ;;  %v5784_v13 = vpop.f32.mrb[21].mxu1  ;;  %v6279_v45 = vld [vmem:[#allocation5 + $0x8] sm:$0xff] }
 0x914   : > { %v5785_v52 = vadd.f32 %v5784_v13, %v5736_v47  ;;  %v7874_v53 = vpop.f32.mrb[31].mxu0  ;;  %v8066_v54 = vpop.f32.mrb[22].mxu1  ;;  %6277 = vst.msk [vmem:[#allocation10 + $0x8] sm:$0xff] %vm6275_vm11, %v6279_v45 }
 0x915   : > { %v5744_v56 = vadd.f32 %v7872_v49, %v5657_v43  ;;  %v7875_v59 = vadd.f32 %v7874_v53, %v7873_v51  ;;  %v5787_v57 = vpop.f32.mrb[23].mxu1 }
 0x916   : > { %v5799_v60 = vmul.f32 0.2, %v5785_v52  ;;  %v5788_v61 = vadd.f32 %v5787_v57, %v5739_v55 }
 0x917   : > { %v5793_v62 = vadd.f32 %v8065_v46, %v5744_v56  ;;  %v5747_v63 = vadd.f32 %v7875_v59, %v5662_v58 }
 0x918   : > { %v5803_v1 = vmax.f32 %v5785_v52, %v5799_v60  ;;  %v5800_v2 = vmul.f32 0.2, %v5788_v61 }
 0x919   : > { %v5801_v4 = vmul.f32 0.2, %v5793_v62  ;;  %v5796_v5 = vadd.f32 %v8066_v54, %v5747_v63 }
 0x91a   : > { %v5804_v6 = vmax.f32 %v5788_v61, %v5800_v2  ;;  %5931 = vrot.lane.b32.xlu0 %v5803_v1, %s8378_s16  ;;  %8069 = vmatprep.mubr.msk.f32.mxu1 %vm5204_vm2, %v5803_v1 }
 0x91b   : > { %v5805_v7 = vmax.f32 %v5793_v62, %v5801_v4  ;;  %v5802_v9 = vmul.f32 0.2, %v5796_v5  ;;  %v8315_v4 = vld [vmem:[%s10141_s4 + $0x4] ss:$12 sps:$4 sm:$0xff]  }
 0x91c   : > { %5933 = vrot.lane.b32.xlu1 %v5804_v6, %s8378_s16  ;;  %8070 = vmatmul.mubr.msk.f32.vlgmr.msra.gmra.mrb[24].mxu1 %vm5204_vm2, %v5804_v6 }
 0x91d   : > { %v5806_v10 = vmax.f32 %v5796_v5, %v5802_v9  ;;  %8072 = vmatprep.mubr.msk.f32.mxu1 %vm5204_vm2, %v5805_v7  ;;  %8076 = vmatpush3.msk.msra.mxu1 %vm9379_vm15, %v8377_v50  ;;  %v6493_v5 = vld [vmem:[%s10146_s9] sm:$0xff]  ;;  %v6494_v9 = vld [vmem:[%s10146_s9 + $0x8] sm:$0xff] }
 0x91e   : > { %5935 = vrot.lane.b32.xlu0 %v5805_v7, %s8378_s16  ;;  %8083 = vmatprep.subr.msk.mxu1 %vm9379_vm15, %v8377_v50 }
 0x91f   : > { %6585 = vmatprep.mubr.bf16.mxu0 %v8315_v4 }
 0x920   : > { %5937 = vrot.lane.b32.xlu1 %v5806_v10, %s8378_s16  ;;  %8073 = vmatmul.mubr.msk.f32.gmra.mrb[26].mxu1 %vm5204_vm2, %v5806_v10  ;;  %s7597_s16 = sshll.u32 %s10212_s18, 5 }
 0x922   : > { %6045 = vrot.lane.b32.xlu0 %v5803_v1, %s10196_s28 }
 0x924   : > { %6047 = vrot.lane.b32.xlu1 %v5804_v6, %s10196_s28 }
 0x926   : > { %6049 = vrot.lane.b32.xlu0 %v5805_v7, %s10196_s28 }
 0x928   : > { %6051 = vrot.lane.b32.xlu1 %v5806_v10, %s10196_s28  ;;  %s8380_s28 = smov 4  }
 0x92a   : > { %6159 = vrot.lane.b32.xlu0 %v5803_v1, %s8379_s27 }
 0x92c   : > { %6161 = vrot.lane.b32.xlu1 %v5804_v6, %s8379_s27  ;;  %v8318_v6 = vld [vmem:[%s10141_s4 + $0x8] ss:$12 sps:$4 sm:$0xff]  }
 0x92e   : > { %6163 = vrot.lane.b32.xlu0 %v5805_v7, %s8379_s27  ;;  %v6495_v7 = vld [vmem:[%s10146_s9 + $0x10] sm:$0xff] }
 0x930   : > { %6165 = vrot.lane.b32.xlu1 %v5806_v10, %s8379_s27  ;;  %v6496_v10 = vld [vmem:[%s10146_s9 + $0x18] sm:$0xff] }
 0x98c   : > { %v5932_v11 = vpop.permute.xlu0 %5931 }
 0x98d   : > { %8077 = vmatprep.mubr.msk.f32.mxu1 %vm5204_vm2, %v5932_v11 }
 0x98e   : > { %v5934_v12 = vpop.permute.xlu1 %5933 }
 0x98f   : > { %8078 = vmatmul.mubr.msk.f32.vlgmr.msra.gmra.mrb[28].mxu1 %vm5204_vm2, %v5934_v12 }
 0x990   : > { %v5936_v18 = vpop.permute.xlu0 %5935  ;;  %8084 = vmatpush3.msk.msra.mxu1 %vm9379_vm15, %v8377_v50 }
 0x991   : > { %8080 = vmatprep.mubr.msk.f32.mxu1 %vm5204_vm2, %v5936_v18  ;;  %8091 = vmatprep.subr.msk.mxu1 %vm9379_vm15, %v8377_v50 }
 0x992   : > { %v5938_v39 = vpop.permute.xlu1 %5937 }
 0x993   : > { %8081 = vmatmul.mubr.msk.f32.gmra.mrb[30].mxu1 %vm5204_vm2, %v5938_v39 }
 0x994   : > { %v6046_v19 = vpop.permute.xlu0 %6045 }
 0x995   : > { %8085 = vmatprep.mubr.msk.f32.mxu1 %vm5204_vm2, %v6046_v19 }
 0x996   : > { %v6048_v35 = vpop.permute.xlu1 %6047 }
 0x997   : > { %8086 = vmatmul.mubr.msk.f32.vlgmr.msra.gmra.mrb[32].mxu1 %vm5204_vm2, %v6048_v35 }
 0x998   : > { %v6050_v15 = vpop.permute.xlu0 %6049  ;;  %8092 = vmatpush3.msk.msra.mxu1 %vm9379_vm15, %v8377_v50 }
 0x999   : > { %8088 = vmatprep.mubr.msk.f32.mxu1 %vm5204_vm2, %v6050_v15 }
 0x99a   : > { %v6052_v8 = vpop.permute.xlu1 %6051 }
 0x99b   : > { %8089 = vmatmul.mubr.msk.f32.gmra.mrb[34].mxu1 %vm5204_vm2, %v6052_v8 }
 0x99c   : > { %v6160_v20 = vpop.permute.xlu0 %6159 }
 0x99d   : > { %8093 = vmatprep.mubr.msk.f32.mxu1 %vm5204_vm2, %v6160_v20 }
 0x99e   : > { %v6162_v14 = vpop.permute.xlu1 %6161 }
 0x99f   : > { %8094 = vmatmul.mubr.msk.f32.vlgmr.msra.gmra.mrb[36].mxu1 %vm5204_vm2, %v6162_v14 }
 0x9a0   : > { %v6164_v21 = vpop.permute.xlu0 %6163 }
 0x9a1   : > { %8096 = vmatprep.mubr.msk.f32.mxu1 %vm5204_vm2, %v6164_v21 }
 0x9a2   : > { %v6166_v22 = vpop.permute.xlu1 %6165 }
 0x9a3   : > { %8097 = vmatmul.mubr.msk.f32.gmra.mrb[38].mxu1 %vm5204_vm2, %v6166_v22 }
 0x9a4   : > { %8103 = vmatprep.mubr.msk.bf16.mxu1 %vm5694_vm3, %v8318_v6 }
 0x9ef   : > { %v8071_v23 = vpop.f32.mrb[24].mxu1 }
 0x9f0   : > { %v5898_v24 = vpop.f32.mrb[25].mxu1 }
 0x9f1   : > { %v5917_v25 = vpack.c.bf16 %v8071_v23, %v5898_v24 }
 0x9f3   : > { %5921 = vrot.lane.b32.xlu0 %v5917_v25, %s10209_s20  ;;  %v8074_v41 = vpop.f32.mrb[26].mxu1 }
 0x9f4   : > { %v5908_v26 = vpop.f32.mrb[27].mxu1 }
 0x9f5   : > { %v5918_v27 = vpack.c.bf16 %v8074_v41, %v5908_v26 }
 0xa62   : > { %v8079_v16 = vpop.f32.mrb[28].mxu1 }
 0xa63   : > { %v6013_v28 = vpop.f32.mrb[29].mxu1 }
 0xa64   : > { %v6032_v29 = vpack.c.bf16 %v8079_v16, %v6013_v28 }
 0xa65   : > { %v5922_v3 = vpop.permute.xlu0 %5921 }
 0xa66   : > { %5929 = vst.msk [vmem:[#allocation5 + $0x10] sm:$0xff] %vm5928_vm12, %v5922_v3  ;;  %6036 = vrot.lane.b32.xlu0 %v6032_v29, %s10209_s20  ;;  %v8082_v30 = vpop.f32.mrb[30].mxu1 }
 0xa67   : > { %v6023_v31 = vpop.f32.mrb[31].mxu1 }
 0xa68   : > { %v6033_v50 = vpack.c.bf16 %v8082_v30, %v6023_v31 }
 0xa6a   : > { %v8087_v32 = vpop.f32.mrb[32].mxu1 }
 0xa6b   : > { %v6127_v33 = vpop.f32.mrb[33].mxu1 }
 0xa6c   : > { %v6146_v34 = vpack.c.bf16 %v8087_v32, %v6127_v33 }
 0xa6d   : > { %v6306_v36 = vld [vmem:[#allocation5 + $0x10] sm:$0xff] }
 0xa6e   : > { %6150 = vrot.lane.b32.xlu1 %v6146_v34, %s10209_s20  ;;  %v8090_v37 = vpop.f32.mrb[34].mxu1  ;;  %6304 = vst.msk [vmem:[#allocation10 + $0x30] sm:$0xff] %vm6275_vm11, %v6306_v36 }
 0xa6f   : > { %v6137_v0 = vpop.f32.mrb[35].mxu1 }
 0xa70   : > { %v6147_v38 = vpack.c.bf16 %v8090_v37, %v6137_v0 }
 0xa72   : > { %5923 = vrot.lane.b32.xlu1 %v5918_v27, %s10209_s20  ;;  %6152 = vrot.lane.b32.xlu0 %v6147_v38, %s10209_s20  ;;  %v8095_v42 = vpop.f32.mrb[36].mxu1 }
 0xa73   : > { %v6241_v43 = vpop.f32.mrb[37].mxu1 }
 0xa74   : > { %v6260_v44 = vpack.c.bf16 %v8095_v42, %v6241_v43 }
 0xa76   : > { %6038 = vrot.lane.b32.xlu1 %v6033_v50, %s10209_s20  ;;  %6264 = vrot.lane.b32.xlu0 %v6260_v44, %s10209_s20  ;;  %v8098_v46 = vpop.f32.mrb[38].mxu1 }
 0xa77   : > { %v6251_v47 = vpop.f32.mrb[39].mxu1 }
 0xa78   : > { %v6261_v49 = vpack.c.bf16 %v8098_v46, %v6251_v47 }
 0xa7a   : > { %6310 = vrot.lane.b32.xlu0 %v6306_v36, %s10191_s19  ;;  %6266 = vrot.lane.b32.xlu1 %v6261_v49, %s10209_s20 }
 0xa7e   : > { %6322 = vrot.lane.b32.xlu0 %v6306_v36, %s10192_s22 }
 0xad8   : > { %v6037_v51 = vpop.permute.xlu0 %6036 }
 0xad9   : > { %6043 = vst.msk [vmem:[#allocation5 + $0x20] sm:$0xff] %vm5928_vm12, %v6037_v51 }
 0xae0   : > { %v6151_v13 = vpop.permute.xlu1 %6150  ;;  %v6358_v52 = vld [vmem:[#allocation5 + $0x20] sm:$0xff] }
 0xae1   : > { %6157 = vst.msk [vmem:[#allocation5 + $0x30] sm:$0xff] %vm5928_vm12, %v6151_v13 }
 0xae2   : > { %6332 = vst.msk [vmem:[#allocation10 + $0x60] sm:$0xff] %vm6275_vm11, %v6358_v52 }
 0xae4   : > { %v6153_v53 = vpop.permute.xlu0 %6152  ;;  %v5924_v54 = vpop.permute.xlu1 %5923 }
 0xae5   : > { %6158 = vst.msk [vmem:[#allocation5 + $0x38] sm:$0xff] %vm5928_vm12, %v6153_v53  ;;  %5930 = vst.msk [vmem:[#allocation5 + $0x18] sm:$0xff] %vm5928_vm12, %v5924_v54  ;;  %v8313_v54 = vld [vmem:[%s10141_s4] ss:$12 sps:$4 sm:$0xff]  }
 0xae8   : > { %v6265_v55 = vpop.permute.xlu0 %6264  ;;  %v6039_v56 = vpop.permute.xlu1 %6038  ;;  %v6419_v62 = vld [vmem:[#allocation5 + $0x30] sm:$0xff] }
 0xae9   : > { %6271 = vst.msk [vmem:[#allocation5 + $0x40] sm:$0xff] %vm5928_vm12, %v6265_v55  ;;  %6044 = vst.msk [vmem:[#allocation5 + $0x28] sm:$0xff] %vm5928_vm12, %v6039_v56  ;;  %v8316_v55 = vld [vmem:[%s10141_s4 + $0x1c] ss:$12 sps:$4 sm:$0xff]  }
 0xaec   : > { %v6311_v59 = vpop.permute.xlu0 %6310  ;;  %v6267_v57 = vpop.permute.xlu1 %6266  ;;  %v6319_v58 = vld [vmem:[#allocation5 + $0x18] sm:$0xff] }
 0xaed   : > { %6316 = vst.msk [vmem:[#allocation10 + $0x40] sm:$0xff] %vm6275_vm11, %v6311_v59  ;;  %6324 = vrot.lane.b32.xlu0 %v6319_v58, %s10192_s22  ;;  %6312 = vrot.lane.b32.xlu1 %v6319_v58, %s10191_s19  ;;  %6305 = vst.msk [vmem:[#allocation10 + $0x38] sm:$0xff] %vm6275_vm11, %v6319_v58  ;;  %v6408_v63 = vld [vmem:[#allocation5 + $0x38] sm:$0xff] }
 0xaee   : > { %6272 = vst.msk [vmem:[#allocation5 + $0x48] sm:$0xff] %vm5928_vm12, %v6267_v57  ;;  %v8319_v57 = vld [vmem:[%s10141_s4 + $0x18] ss:$12 sps:$4 sm:$0xff]   ;;  %v8320_v58 = vld [vmem:[%s10141_s4 + $0x20] ss:$12 sps:$4 sm:$0xff]  }
 0xaf0   : > { %v6323_v60 = vpop.permute.xlu0 %6322  ;;  %v6359_v61 = vld [vmem:[#allocation5 + $0x28] sm:$0xff]  ;;  %v6431_v2 = vld [vmem:[#allocation5 + $0x40] sm:$0xff] }
 0xaf1   : > { %6328 = vst.msk [vmem:[#allocation10 + $0x50] sm:$0xff] %vm6275_vm11, %v6323_v60  ;;  %6362 = vrot.lane.b32.xlu0 %v6358_v52, %s8380_s28  ;;  %6282 = vrot.lane.b32.xlu1 %v6278_v40, %s10191_s19  ;;  %6333 = vst.msk [vmem:[#allocation10 + $0x68] sm:$0xff] %vm6275_vm11, %v6359_v61  ;;  %v8383_v60 = vmov 0.0  }
 0xaf5   : > { %6294 = vrot.lane.b32.xlu0 %v6278_v40, %s10192_s22  ;;  %6284 = vrot.lane.b32.xlu1 %v6279_v45, %s10191_s19  ;;  %v6432_v1 = vld [vmem:[#allocation5 + $0x48] sm:$0xff] }
 0xaf9   : > { %6423 = vrot.lane.b32.xlu0 %v6419_v62, %s8381_s25  ;;  %6375 = vrot.lane.b32.xlu1 %v6358_v52, %s8382_s24 }
 0xafd   : > { %6413 = vrot.lane.b32.xlu0 %v6408_v63, %s8382_s24  ;;  %6364 = vrot.lane.b32.xlu1 %v6359_v61, %s8380_s28 }
 0xb01   : > { %6387 = vrot.lane.b32.xlu0 %v6358_v52, %s8381_s25  ;;  %6411 = vrot.lane.b32.xlu1 %v6419_v62, %s8382_s24 }
 0xb05   : > { %6425 = vrot.lane.b32.xlu0 %v6408_v63, %s8381_s25  ;;  %6377 = vrot.lane.b32.xlu1 %v6359_v61, %s8382_s24 }
 0xb09   : > { %6338 = vrot.lane.b32.xlu0 %v6358_v52, %s10191_s19  ;;  %6296 = vrot.lane.b32.xlu1 %v6279_v45, %s10192_s22 }
 0xb0d   : > { %6389 = vrot.lane.b32.xlu1 %v6359_v61, %s8381_s25  ;;  %6437 = vrot.lane.b32.xlu0 %v6432_v1, %s8380_s28 }
 0xb11   : > { %6435 = vrot.lane.b32.xlu1 %v6431_v2, %s8380_s28  ;;  %6399 = vrot.lane.b32.xlu0 %v6419_v62, %s8380_s28 }
 0xb15   : > { %6447 = vrot.lane.b32.xlu1 %v6431_v2, %s8382_s24  ;;  %6449 = vrot.lane.b32.xlu0 %v6432_v1, %s8382_s24 }
 0xb19   : > { %6340 = vrot.lane.b32.xlu1 %v6359_v61, %s10191_s19  ;;  %6350 = vrot.lane.b32.xlu0 %v6358_v52, %s10192_s22 }
 0xb1d   : > { %6401 = vrot.lane.b32.xlu1 %v6408_v63, %s8380_s28  ;;  %6352 = vrot.lane.b32.xlu0 %v6359_v61, %s10192_s22  ;;  %v9943_v61 = vsel %vm9379_vm15, 1.0, %v8383_v60  ;;  %vm6779_vm15 = vcmask 23560  }
 0xb21   : > { %6459 = vrot.lane.b32.xlu1 %v6431_v2, %s8381_s25  ;;  %6499 = vperm.xlu0 %8228, %v6493_v5  }
 0xb25   : > { %6461 = vrot.lane.b32.xlu1 %v6432_v1, %s8381_s25  ;;  %6509 = vperm.xlu0 %8228, %v6495_v7  }
 0xb29   : > { %6504 = vperm.xlu1 %8229, %v6494_v9  }
 0xb2d   : > { %6514 = vperm.xlu1 %8229, %v6496_v10  }
 0xb5f   : > { %v6325_v11 = vpop.permute.xlu0 %6324  ;;  %v6313_v12 = vpop.permute.xlu1 %6312 }
 0xb60   : > { %6329 = vst.msk [vmem:[#allocation10 + $0x58] sm:$0xff] %vm6275_vm11, %v6325_v11  ;;  %6317 = vst.msk [vmem:[#allocation10 + $0x48] sm:$0xff] %vm6275_vm11, %v6313_v12 }
 0xb63   : > { %v6363_v18 = vpop.permute.xlu0 %6362  ;;  %v6283_v39 = vpop.permute.xlu1 %6282 }
 0xb64   : > { %6369 = vst.msk [vmem:[#allocation10] sm:$0xff] %vm6368_vm13, %v6363_v18 }
 0xb65   : > { %6288 = vst.msk [vmem:[#allocation10 + $0x10] sm:$0xff] %vm6275_vm11, %v6283_v39 }
 0xb67   : > { %v6295_v19 = vpop.permute.xlu0 %6294  ;;  %v6285_v35 = vpop.permute.xlu1 %6284 }
 0xb68   : > { %6300 = vst.msk [vmem:[#allocation10 + $0x20] sm:$0xff] %vm6275_vm11, %v6295_v19  ;;  %6289 = vst.msk [vmem:[#allocation10 + $0x18] sm:$0xff] %vm6275_vm11, %v6285_v35 }
 0xb6b   : > { %v6424_v15 = vpop.permute.xlu0 %6423  ;;  %v6376_v8 = vpop.permute.xlu1 %6375  ;;  %v6475_v27 = vld [vmem:[#allocation10] sm:$0xff] }
 0xb6c   : > { %6429 = vst.msk [vmem:[#allocation10 + $0x50] sm:$0xff] %vm6368_vm13, %v6424_v15  ;;  %6381 = vst.msk [vmem:[#allocation10 + $0x10] sm:$0xff] %vm6368_vm13, %v6376_v8 }
 0xb6f   : > { %v6414_v20 = vpop.permute.xlu0 %6413  ;;  %v6365_v14 = vpop.permute.xlu1 %6364 }
 0xb70   : > { %6418 = vst.msk [vmem:[#allocation10 + $0x48] sm:$0xff] %vm6368_vm13, %v6414_v20  ;;  %6370 = vst.msk [vmem:[#allocation10 + $0x8] sm:$0xff] %vm6368_vm13, %v6365_v14 }
 0xb73   : > { %v6388_v21 = vpop.permute.xlu0 %6387  ;;  %v6412_v22 = vpop.permute.xlu1 %6411  ;;  %v6485_v30 = vld [vmem:[#allocation10 + $0x50] sm:$0xff] }
 0xb74   : > { %6393 = vst.msk [vmem:[#allocation10 + $0x20] sm:$0xff] %vm6368_vm13, %v6388_v21  ;;  %6417 = vst.msk [vmem:[#allocation10 + $0x40] sm:$0xff] %vm6368_vm13, %v6412_v22  ;;  %v6477_v32 = vld [vmem:[#allocation10 + $0x10] sm:$0xff] }
 0xb77   : > { %v6426_v23 = vpop.permute.xlu0 %6425  ;;  %v6378_v24 = vpop.permute.xlu1 %6377  ;;  %v6484_v16 = vld [vmem:[#allocation10 + $0x48] sm:$0xff] }
 0xb78   : > { %6430 = vst.msk [vmem:[#allocation10 + $0x58] sm:$0xff] %vm6368_vm13, %v6426_v23  ;;  %6382 = vst.msk [vmem:[#allocation10 + $0x18] sm:$0xff] %vm6368_vm13, %v6378_v24  ;;  %v6476_v3 = vld [vmem:[#allocation10 + $0x8] sm:$0xff] }
 0xb7b   : > { %v6339_v25 = vpop.permute.xlu0 %6338  ;;  %v6297_v41 = vpop.permute.xlu1 %6296  ;;  %v6483_v26 = vld [vmem:[#allocation10 + $0x40] sm:$0xff] }
 0xb7c   : > { %6344 = vst.msk [vmem:[#allocation10 + $0x70] sm:$0xff] %vm6275_vm11, %v6339_v25  ;;  %6301 = vst.msk [vmem:[#allocation10 + $0x28] sm:$0xff] %vm6275_vm11, %v6297_v41  ;;  %7900 = vmatprep.subr.bf16.mxu0 %v6483_v26  ;;  %v6479_v42 = vld [vmem:[#allocation10 + $0x20] sm:$0xff] }
 0xb7d   : > { %7901 = vmatpush3.bf16.msra.mxu0 %v6475_v27 }
 0xb7e   : > { %7902 = vmatprep.subr.bf16.mxu0 %v6484_v16 }
 0xb7f   : > { %v6438_v28 = vpop.permute.xlu0 %6437  ;;  %v6390_v29 = vpop.permute.xlu1 %6389  ;;  %v6486_v33 = vld [vmem:[#allocation10 + $0x58] sm:$0xff] }
 0xb80   : > { %6442 = vst.msk [vmem:[#allocation10 + $0x68] sm:$0xff] %vm6368_vm13, %v6438_v28  ;;  %6394 = vst.msk [vmem:[#allocation10 + $0x28] sm:$0xff] %vm6368_vm13, %v6390_v29  ;;  %v6478_v37 = vld [vmem:[#allocation10 + $0x18] sm:$0xff] }
 0xb81   : > { %7903 = vmatpush3.bf16.msra.mxu0 %v6476_v3 }
 0xb82   : > { %7904 = vmatprep.subr.bf16.mxu0 %v6485_v30 }
 0xb83   : > { %v6400_v31 = vpop.permute.xlu0 %6399  ;;  %v6436_v50 = vpop.permute.xlu1 %6435 }
 0xb84   : > { %6405 = vst.msk [vmem:[#allocation10 + $0x30] sm:$0xff] %vm6368_vm13, %v6400_v31  ;;  %6441 = vst.msk [vmem:[#allocation10 + $0x60] sm:$0xff] %vm6368_vm13, %v6436_v50 }
 0xb85   : > { %7905 = vmatpush3.bf16.msra.mxu0 %v6477_v32 }
 0xb86   : > { %7906 = vmatprep.subr.bf16.mxu0 %v6486_v33 }
 0xb87   : > { %v6450_v34 = vpop.permute.xlu0 %6449  ;;  %v6448_v36 = vpop.permute.xlu1 %6447  ;;  %v6488_v43 = vld [vmem:[#allocation10 + $0x68] sm:$0xff] }
 0xb88   : > { %6453 = vst.msk [vmem:[#allocation10 + $0x70] sm:$0xff] %vm6368_vm13, %v6448_v36  ;;  %v6480_v46 = vld [vmem:[#allocation10 + $0x28] sm:$0xff] }
 0xb89   : > { %7907 = vmatpush3.bf16.msra.mxu0 %v6478_v37 }
 0xb8b   : > { %v6351_v0 = vpop.permute.xlu0 %6350  ;;  %v6341_v38 = vpop.permute.xlu1 %6340  ;;  %v6487_v40 = vld [vmem:[#allocation10 + $0x60] sm:$0xff]  ;;  %v6481_v51 = vld [vmem:[#allocation10 + $0x30] sm:$0xff] }
 0xb8c   : > { %6356 = vst.msk [vmem:[#allocation10 + $0x80] sm:$0xff] %vm6275_vm11, %v6351_v0  ;;  %6345 = vst.msk [vmem:[#allocation10 + $0x78] sm:$0xff] %vm6275_vm11, %v6341_v38  ;;  %7908 = vmatprep.subr.bf16.mxu0 %v6487_v40 }
 0xb8d   : > { %6454 = vst.msk [vmem:[#allocation10 + $0x78] sm:$0xff] %vm6368_vm13, %v6450_v34  ;;  %7909 = vmatpush3.bf16.msra.mxu0 %v6479_v42 }
 0xb8e   : > { %7910 = vmatprep.subr.bf16.mxu0 %v6488_v43 }
 0xb8f   : > { %v6353_v44 = vpop.permute.xlu0 %6352  ;;  %v6402_v45 = vpop.permute.xlu1 %6401  ;;  %v6489_v47 = vld [vmem:[#allocation10 + $0x70] sm:$0xff] }
 0xb90   : > { %6357 = vst.msk [vmem:[#allocation10 + $0x88] sm:$0xff] %vm6275_vm11, %v6353_v44  ;;  %v6901_v44 = vld [vmem:[#allocation6] sm:$0xff] }
 0xb91   : > { %6406 = vst.msk [vmem:[#allocation10 + $0x38] sm:$0xff] %vm6368_vm13, %v6402_v45  ;;  %7911 = vmatpush3.bf16.msra.mxu0 %v6480_v46  ;;  %v6902_v45 = vld [vmem:[#allocation6 + $0x8] sm:$0xff] }
 0xb92   : > { %7912 = vmatprep.subr.bf16.mxu0 %v6489_v47  ;;  %6899 = vst.msk [vmem:[#allocation11] sm:$0xff] %vm6898_vm14, %v6901_v44  ;;  %6900 = vst.msk [vmem:[#allocation11 + $0x8] sm:$0xff] %vm6898_vm14, %v6902_v45 }
 0xb93   : > { %v6460_v49 = vpop.permute.xlu1 %6459 }
 0xb94   : > { %6465 = vst.msk [vmem:[#allocation10 + $0x80] sm:$0xff] %vm6368_vm13, %v6460_v49  ;;  %v6490_v13 = vld [vmem:[#allocation10 + $0x78] sm:$0xff] }
 0xb95   : > { %7913 = vmatpush3.bf16.msra.mxu0 %v6481_v51 }
 0xb96   : > { %7914 = vmatprep.subr.bf16.mxu0 %v6490_v13 }
 0xb97   : > { %v6462_v52 = vpop.permute.xlu1 %6461 }
 0xb98   : > { %v6482_v53 = vld [vmem:[#allocation10 + $0x38] sm:$0xff]  ;;  %6466 = vst.msk [vmem:[#allocation10 + $0x88] sm:$0xff] %vm6368_vm13, %v6462_v52 }
 0xb99   : > { %7915 = vmatpush3.bf16.msra.mxu0 %v6482_v53 }
 0xb9b   : > { %v6491_v56 = vld [vmem:[#allocation10 + $0x80] sm:$0xff] }
 0xb9c   : > { %6586 = vmatmul.mubr.bf16.vlgmr.msra.gmra.mrb[32].mxu0 %v8313_v54  ;;  %8099 = vmatprep.subr.bf16.mxu1 %v6491_v56 }
 0xb9d   : > { %8100 = vmatpush3.bf16.msra.mxu1 %v6491_v56  ;;  %6593 = vmatprep.mubr.bf16.mxu0 %v8316_v55 }
 0xb9f   : > { %v6492_v59 = vld [vmem:[#allocation10 + $0x88] sm:$0xff] }
 0xba0   : > { %8101 = vmatprep.subr.bf16.mxu1 %v6492_v59  ;;  %v6500_v63 = vpop.permute.xlu0 %6499 }
 0xba1   : > { %8102 = vmatpush3.bf16.msra.mxu1 %v6492_v59 }
 0xba2   : > { %8107 = vmatprep.subr.msk.mxu1 %vm6679_vm6, %v9943_v61 }
 0xba4   : > { %6594 = vmatmul.mubr.bf16.gmra.mrb[36].mxu0 %v8319_v57  ;;  %8104 = vmatmul.mubr.msk.bf16.vlgmr.msra.gmra.mrb[40].mxu1 %vm5694_vm3, %v8320_v58  ;;  %v6510_v7 = vpop.permute.xlu0 %6509 }
 0xba5   : > { %8108 = vmatpush3.msk.msra.mxu1 %vm6679_vm6, %v9943_v61 }
 0xba6   : > { %8115 = vmatprep.subr.msk.mxu1 %vm6679_vm6, %v9943_v61 }
 0xba8   : > { %v6505_v48 = vpop.permute.xlu1 %6504 }
 0xbac   : > { %v6515_v25 = vpop.permute.xlu1 %6514 }
 0xc6f   : > { %v7916_v62 = vpop.f32.mrb[32].mxu0 }
 0xc70   : > { %v7917_v1 = vpop.f32.mrb[33].mxu0 }
 0xc71   : > { %v7918_v2 = vadd.f32 %v7917_v1, %v7916_v62  ;;  %v7919_v4 = vpop.f32.mrb[34].mxu0  ;;  %v8323_v62 = vld [vmem:[%s10142_s5 + $0x4] ss:$12 sps:$4 sm:$0xff]  }
 0xc72   : > { %v7920_v5 = vpop.f32.mrb[35].mxu0  ;;  %7099 = vmatprep.mubr.bf16.mxu0 %v8323_v62 }
 0xc73   : > { %v7921_v6 = vadd.f32 %v7920_v5, %v7919_v4  ;;  %v6588_v11 = vadd.f32 %v7918_v2, %v6500_v63  ;;  %v7007_v4 = vld [vmem:[%s10147_s10] sm:$0xff]  ;;  %v8324_v5 = vld [vmem:[%s10142_s5 + $0x8] ss:$12 sps:$4 sm:$0xff]  }
 0xc75   : > { %v6591_v8 = vadd.f32 %v7921_v6, %v6505_v48  ;;  %v6989_v6 = vld [vmem:[#allocation11] sm:$0xff] }
 0xc77   : > { %v7922_v9 = vpop.f32.mrb[36].mxu0  ;;  %v8105_v10 = vpop.f32.mrb[40].mxu1 }
 0xc78   : > { %v7923_v12 = vpop.f32.mrb[37].mxu0  ;;  %v6636_v18 = vpop.f32.mrb[41].mxu1 }
 0xc79   : > { %v7924_v39 = vadd.f32 %v7923_v12, %v7922_v9  ;;  %v6637_v19 = vadd.f32 %v6636_v18, %v6588_v11  ;;  %v7925_v35 = vpop.f32.mrb[38].mxu0  ;;  %v8106_v15 = vpop.f32.mrb[42].mxu1  ;;  %v7008_v11 = vld [vmem:[%s10147_s10 + $0x8] sm:$0xff] }
 0xc7a   : > { %v7926_v20 = vpop.f32.mrb[39].mxu0  ;;  %v6639_v14 = vpop.f32.mrb[43].mxu1  ;;  %v6990_v12 = vld [vmem:[#allocation11 + $0x8] sm:$0xff] }
 0xc7b   : > { %v6596_v21 = vadd.f32 %v7924_v39, %v6510_v7  ;;  %v6651_v22 = vmul.f32 0.2, %v6637_v19  ;;  %v7927_v23 = vadd.f32 %v7926_v20, %v7925_v35  ;;  %v6640_v24 = vadd.f32 %v6639_v14, %v6591_v8 }
 0xc7d   : > { %v6645_v41 = vadd.f32 %v8105_v10, %v6596_v21  ;;  %v6655_v26 = vmax.f32 %v6637_v19, %v6651_v22  ;;  %v6599_v27 = vadd.f32 %v7927_v23, %v6515_v25  ;;  %v6652_v16 = vmul.f32 0.2, %v6640_v24  ;;  %v7009_v10 = vld [vmem:[%s10147_s10 + $0x10] sm:$0xff] }
 0xc7f   : > { %v6653_v28 = vmul.f32 0.2, %v6645_v41  ;;  %v6648_v29 = vadd.f32 %v8106_v15, %v6599_v27  ;;  %v6656_v3 = vmax.f32 %v6640_v24, %v6652_v16  ;;  %6782 = vrot.lane.b32.xlu0 %v6655_v26, %s8384_s30  ;;  %8109 = vmatprep.mubr.msk.f32.mxu1 %vm6275_vm11, %v6655_v26  ;;  %v7010_v15 = vld [vmem:[%s10147_s10 + $0x18] sm:$0xff] }
 0xc81   : > { %v6657_v30 = vmax.f32 %v6645_v41, %v6653_v28  ;;  %v6654_v31 = vmul.f32 0.2, %v6648_v29  ;;  %6784 = vrot.lane.b32.xlu1 %v6656_v3, %s8384_s30  ;;  %8110 = vmatmul.mubr.msk.f32.vlgmr.msra.gmra.mrb[44].mxu1 %vm6275_vm11, %v6656_v3 }
 0xc82   : > { %8116 = vmatpush3.msk.msra.mxu1 %vm6679_vm6, %v9943_v61 }
 0xc83   : > { %v6658_v50 = vmax.f32 %v6648_v29, %v6654_v31  ;;  %6786 = vrot.lane.b32.xlu0 %v6657_v30, %s8384_s30  ;;  %8112 = vmatprep.mubr.msk.f32.mxu1 %vm6275_vm11, %v6657_v30 }
 0xc85   : > { %6788 = vrot.lane.b32.xlu1 %v6658_v50, %s8384_s30  ;;  %8113 = vmatmul.mubr.msk.f32.gmra.mrb[46].mxu1 %vm6275_vm11, %v6658_v50  ;;  %v8321_v50 = vld [vmem:[%s10142_s5] ss:$12 sps:$4 sm:$0xff]  }
 0xcf1   : > { %v6783_v32 = vpop.permute.xlu0 %6782 }
 0xcf2   : > { %8117 = vmatprep.mubr.msk.f32.mxu1 %vm6275_vm11, %v6783_v32  ;;  %v8326_v32 = vld [vmem:[%s10142_s5 + $0x1c] ss:$12 sps:$4 sm:$0xff]  }
 0xcf3   : > { %v6785_v33 = vpop.permute.xlu1 %6784 }
 0xcf4   : > { %8118 = vmatmul.mubr.msk.f32.vlgmr.msra.gmra.mrb[48].mxu1 %vm6275_vm11, %v6785_v33 }
 0xcf5   : > { %v6787_v34 = vpop.permute.xlu0 %6786 }
 0xcf6   : > { %8120 = vmatprep.mubr.msk.f32.mxu1 %vm6275_vm11, %v6787_v34  ;;  %v8325_v34 = vld [vmem:[%s10142_s5 + $0x20] ss:$12 sps:$4 sm:$0xff]  }
 0xcf7   : > { %v6789_v36 = vpop.permute.xlu1 %6788 }
 0xcf8   : > { %8121 = vmatmul.mubr.msk.f32.gmra.mrb[50].mxu1 %vm6275_vm11, %v6789_v36  ;;  %v8328_v36 = vld [vmem:[%s10142_s5 + $0x18] ss:$12 sps:$4 sm:$0xff]  }
 0xcf9   : > { %8127 = vmatprep.mubr.msk.bf16.mxu1 %vm5694_vm3, %v8324_v5 }
 0xd54   : > { %v8111_v37 = vpop.f32.mrb[44].mxu1 }
 0xd55   : > { %v6749_v0 = vpop.f32.mrb[45].mxu1 }
 0xd56   : > { %v6768_v38 = vpack.c.bf16 %v8111_v37, %v6749_v0 }
 0xd58   : > { %6772 = vrot.lane.b32.xlu0 %v6768_v38, %s10209_s20  ;;  %v8114_v40 = vpop.f32.mrb[46].mxu1 }
 0xd59   : > { %v6759_v42 = vpop.f32.mrb[47].mxu1 }
 0xd5a   : > { %v6769_v43 = vpack.c.bf16 %v8114_v40, %v6759_v42 }
 0xd5c   : > { %6774 = vrot.lane.b32.xlu1 %v6769_v43, %s10209_s20 }
 0xdc7   : > { %v8119_v46 = vpop.f32.mrb[48].mxu1 }
 0xdc8   : > { %v6864_v47 = vpop.f32.mrb[49].mxu1 }
 0xdc9   : > { %v6883_v49 = vpack.c.bf16 %v8119_v46, %v6864_v47 }
 0xdca   : > { %v6773_v51 = vpop.permute.xlu0 %6772 }
 0xdcb   : > { %6780 = vst.msk [vmem:[#allocation6 + $0x10] sm:$0xff] %vm6779_vm15, %v6773_v51  ;;  %6887 = vrot.lane.b32.xlu0 %v6883_v49, %s10209_s20  ;;  %v8122_v13 = vpop.f32.mrb[50].mxu1 }
 0xdcc   : > { %v6874_v52 = vpop.f32.mrb[51].mxu1 }
 0xdcd   : > { %v6884_v53 = vpack.c.bf16 %v8122_v13, %v6874_v52 }
 0xdce   : > { %v6775_v54 = vpop.permute.xlu1 %6774 }
 0xdcf   : > { %6781 = vst.msk [vmem:[#allocation6 + $0x18] sm:$0xff] %vm6779_vm15, %v6775_v54  ;;  %6889 = vrot.lane.b32.xlu1 %v6884_v53, %s10209_s20 }
 0xdd2   : > { %v6925_v55 = vld [vmem:[#allocation6 + $0x10] sm:$0xff] }
 0xdd3   : > { %6927 = vst.msk [vmem:[#allocation11 + $0x30] sm:$0xff] %vm6898_vm14, %v6925_v55  ;;  %6933 = vrot.lane.b32.xlu0 %v6925_v55, %s10191_s19 }
 0xdd6   : > { %v6926_v56 = vld [vmem:[#allocation6 + $0x18] sm:$0xff] }
 0xdd7   : > { %6928 = vst.msk [vmem:[#allocation11 + $0x38] sm:$0xff] %vm6898_vm14, %v6926_v56  ;;  %6945 = vrot.lane.b32.xlu0 %v6925_v55, %s10192_s22  ;;  %6935 = vrot.lane.b32.xlu1 %v6926_v56, %s10191_s19 }
 0xdda   : > { %v6995_v29 = vld [vmem:[#allocation11 + $0x30] sm:$0xff] }
 0xddb   : > { %6947 = vrot.lane.b32.xlu0 %v6926_v56, %s10192_s22  ;;  %6905 = vrot.lane.b32.xlu1 %v6901_v44, %s10191_s19 }
 0xdde   : > { %v6996_v31 = vld [vmem:[#allocation11 + $0x38] sm:$0xff] }
 0xddf   : > { %6907 = vrot.lane.b32.xlu1 %v6902_v45, %s10191_s19  ;;  %6917 = vrot.lane.b32.xlu0 %v6901_v44, %s10192_s22 }
 0xde3   : > { %6919 = vrot.lane.b32.xlu1 %v6902_v45, %s10192_s22 }
 0xe3d   : > { %v6888_v59 = vpop.permute.xlu0 %6887 }
 0xe3e   : > { %6894 = vst.msk [vmem:[#allocation6 + $0x20] sm:$0xff] %vm6779_vm15, %v6888_v59 }
 0xe41   : > { %v6890_v57 = vpop.permute.xlu1 %6889 }
 0xe42   : > { %6895 = vst.msk [vmem:[#allocation6 + $0x28] sm:$0xff] %vm6779_vm15, %v6890_v57 }
 0xe45   : > { %v6953_v58 = vld [vmem:[#allocation6 + $0x20] sm:$0xff]  ;;  %v6934_v60 = vpop.permute.xlu0 %6933 }
 0xe46   : > { %6955 = vst.msk [vmem:[#allocation11 + $0x60] sm:$0xff] %vm6898_vm14, %v6953_v58  ;;  %6939 = vst.msk [vmem:[#allocation11 + $0x40] sm:$0xff] %vm6898_vm14, %v6934_v60  ;;  %6961 = vrot.lane.b32.xlu0 %v6953_v58, %s10191_s19 }
 0xe49   : > { %v6954_v63 = vld [vmem:[#allocation6 + $0x28] sm:$0xff]  ;;  %v6946_v1 = vpop.permute.xlu0 %6945  ;;  %v6936_v2 = vpop.permute.xlu1 %6935 }
 0xe4a   : > { %6956 = vst.msk [vmem:[#allocation11 + $0x68] sm:$0xff] %vm6898_vm14, %v6954_v63  ;;  %6951 = vst.msk [vmem:[#allocation11 + $0x50] sm:$0xff] %vm6898_vm14, %v6946_v1  ;;  %6973 = vrot.lane.b32.xlu0 %v6953_v58, %s10192_s22  ;;  %6963 = vrot.lane.b32.xlu1 %v6954_v63, %s10191_s19  ;;  %s10045_s19 = scalar_lea.vmem %s10148_s11, %s7597_s16 }
 0xe4b   : > { %6940 = vst.msk [vmem:[#allocation11 + $0x48] sm:$0xff] %vm6898_vm14, %v6936_v2 }
 0xe4d   : > { %v6948_v7 = vpop.permute.xlu0 %6947  ;;  %v6997_v48 = vld [vmem:[#allocation11 + $0x40] sm:$0xff]  ;;  %v6906_v9 = vpop.permute.xlu1 %6905 }
 0xe4e   : > { %6952 = vst.msk [vmem:[#allocation11 + $0x58] sm:$0xff] %vm6898_vm14, %v6948_v7  ;;  %7942 = vmatprep.subr.bf16.mxu0 %v6997_v48  ;;  %7013 = vperm.xlu0 %8228, %v7007_v4   ;;  %6911 = vst.msk [vmem:[#allocation11 + $0x10] sm:$0xff] %vm6898_vm14, %v6906_v9  ;;  %v7001_v22 = vld [vmem:[#allocation11 + $0x60] sm:$0xff] }
 0xe4f   : > { %6975 = vrot.lane.b32.xlu1 %v6954_v63, %s10192_s22  ;;  %7943 = vmatpush3.bf16.msra.mxu0 %v6989_v6 }
 0xe51   : > { %v6908_v39 = vpop.permute.xlu1 %6907  ;;  %v6918_v19 = vpop.permute.xlu0 %6917  ;;  %v6999_v35 = vld [vmem:[#allocation11 + $0x50] sm:$0xff]  ;;  %v7002_v24 = vld [vmem:[#allocation11 + $0x68] sm:$0xff] }
 0xe52   : > { %v6998_v18 = vld [vmem:[#allocation11 + $0x48] sm:$0xff]  ;;  %7023 = vperm.xlu0 %8228, %v7009_v10   ;;  %6912 = vst.msk [vmem:[#allocation11 + $0x18] sm:$0xff] %vm6898_vm14, %v6908_v39  ;;  %6923 = vst.msk [vmem:[#allocation11 + $0x20] sm:$0xff] %vm6898_vm14, %v6918_v19 }
 0xe53   : > { %7944 = vmatprep.subr.bf16.mxu0 %v6998_v18  ;;  %7018 = vperm.xlu1 %8229, %v7008_v11   ;;  %v8385_v18 = vmov 1966171168  }
 0xe54   : > { %7945 = vmatpush3.bf16.msra.mxu0 %v6990_v12  ;;  %v7279_v39 = vunpack.c.l.s4 %v8385_v18 }
 0xe55   : > { %7946 = vmatprep.subr.bf16.mxu0 %v6999_v35  ;;  %v6991_v8 = vld [vmem:[#allocation11 + $0x10] sm:$0xff]  ;;  %v6920_v20 = vpop.permute.xlu1 %6919  ;;  %v7000_v14 = vld [vmem:[#allocation11 + $0x58] sm:$0xff] }
 0xe56   : > { %6924 = vst.msk [vmem:[#allocation11 + $0x28] sm:$0xff] %vm6898_vm14, %v6920_v20  ;;  %v7280_v19 = vunpack.c.0.s8 %v7279_v39 }
 0xe57   : > { %7028 = vperm.xlu1 %8229, %v7010_v15  }
 0xe58   : > { %7947 = vmatpush3.bf16.msra.mxu0 %v6991_v8  ;;  %v10038_v35 = vsub.s32 %v7280_v19, %v8530_v17 }
 0xe59   : > { %7948 = vmatprep.subr.bf16.mxu0 %v7000_v14  ;;  %v6992_v21 = vld [vmem:[#allocation11 + $0x18] sm:$0xff]  ;;  %v6993_v23 = vld [vmem:[#allocation11 + $0x20] sm:$0xff] }
 0xe5c   : > { %7949 = vmatpush3.bf16.msra.mxu0 %v6992_v21 }
 0xe5d   : > { %7950 = vmatprep.subr.bf16.mxu0 %v7001_v22  ;;  %v6994_v25 = vld [vmem:[#allocation11 + $0x28] sm:$0xff] }
 0xe60   : > { %7951 = vmatpush3.bf16.msra.mxu0 %v6993_v23 }
 0xe61   : > { %7952 = vmatprep.subr.bf16.mxu0 %v7002_v24 }
 0xe64   : > { %7953 = vmatpush3.bf16.msra.mxu0 %v6994_v25 }
 0xeb8   : > { %v6962_v41 = vpop.permute.xlu0 %6961 }
 0xeb9   : > { %6967 = vst.msk [vmem:[#allocation11 + $0x70] sm:$0xff] %vm6898_vm14, %v6962_v41 }
 0xebc   : > { %v6974_v26 = vpop.permute.xlu0 %6973  ;;  %v6964_v27 = vpop.permute.xlu1 %6963 }
 0xebd   : > { %6979 = vst.msk [vmem:[#allocation11 + $0x80] sm:$0xff] %vm6898_vm14, %v6974_v26  ;;  %6968 = vst.msk [vmem:[#allocation11 + $0x78] sm:$0xff] %vm6898_vm14, %v6964_v27 }
 0xec0   : > { %v7003_v16 = vld [vmem:[#allocation11 + $0x70] sm:$0xff] }
 0xec1   : > { %v6976_v28 = vpop.permute.xlu1 %6975  ;;  %7954 = vmatprep.subr.bf16.mxu0 %v7003_v16 }
 0xec2   : > { %6980 = vst.msk [vmem:[#allocation11 + $0x88] sm:$0xff] %vm6898_vm14, %v6976_v28  ;;  %7955 = vmatpush3.bf16.msra.mxu0 %v6995_v29 }
 0xec4   : > { %v7004_v3 = vld [vmem:[#allocation11 + $0x78] sm:$0xff]  ;;  %v7005_v30 = vld [vmem:[#allocation11 + $0x80] sm:$0xff] }
 0xec5   : > { %7956 = vmatprep.subr.bf16.mxu0 %v7004_v3  ;;  %8123 = vmatprep.subr.bf16.mxu1 %v7005_v30 }
 0xec6   : > { %7957 = vmatpush3.bf16.msra.mxu0 %v6996_v31  ;;  %8124 = vmatpush3.bf16.msra.mxu1 %v7005_v30 }
 0xec9   : > { %7100 = vmatmul.mubr.bf16.vlgmr.msra.gmra.mrb[40].mxu0 %v8321_v50  ;;  %v7006_v33 = vld [vmem:[#allocation11 + $0x88] sm:$0xff] }
 0xeca   : > { %8125 = vmatprep.subr.bf16.mxu1 %v7006_v33  ;;  %7107 = vmatprep.mubr.bf16.mxu0 %v8326_v32 }
 0xecb   : > { %8126 = vmatpush3.bf16.msra.mxu1 %v7006_v33 }
 0xecc   : > { %8131 = vmatprep.subr.msk.mxu1 %vm7185_vm0, %v9943_v61 }
 0xecd   : > { %v7014_v42 = vpop.permute.xlu0 %7013 }
 0xece   : > { %8128 = vmatmul.mubr.msk.bf16.vlgmr.msra.gmra.mrb[52].mxu1 %vm5694_vm3, %v8325_v34 }
 0xecf   : > { %8132 = vmatpush3.msk.msra.mxu1 %vm7185_vm0, %v9943_v61 }
 0xed1   : > { %7108 = vmatmul.mubr.bf16.gmra.mrb[44].mxu0 %v8328_v36  ;;  %v7024_v58 = vpop.permute.xlu0 %7023 }
 0xed2   : > { %v7019_v46 = vpop.permute.xlu1 %7018 }
 0xed6   : > { %v7029_v4 = vpop.permute.xlu1 %7028 }
 0xf9c   : > { %v7958_v37 = vpop.f32.mrb[40].mxu0 }
 0xf9d   : > { %v7959_v0 = vpop.f32.mrb[41].mxu0 }
 0xf9e   : > { %v7960_v38 = vadd.f32 %v7959_v0, %v7958_v37  ;;  %v7961_v40 = vpop.f32.mrb[42].mxu0 }
 0xf9f   : > { %v7962_v43 = vpop.f32.mrb[43].mxu0 }
 0xfa0   : > { %v7963_v44 = vadd.f32 %v7962_v43, %v7961_v40  ;;  %v7102_v45 = vadd.f32 %v7960_v38, %v7014_v42 }
 0xfa1   : > { %v8129_v47 = vpop.f32.mrb[52].mxu1 }
 0xfa2   : > { %v7150_v49 = vpop.f32.mrb[53].mxu1  ;;  %v7105_v51 = vadd.f32 %v7963_v44, %v7019_v46 }
 0xfa3   : > { %v7151_v13 = vadd.f32 %v7150_v49, %v7102_v45  ;;  %v8130_v52 = vpop.f32.mrb[54].mxu1 }
 0xfa4   : > { %v7153_v53 = vpop.f32.mrb[55].mxu1  ;;  %v7964_v54 = vpop.f32.mrb[44].mxu0 }
 0xfa5   : > { %v7165_v55 = vmul.f32 0.2, %v7151_v13  ;;  %v7154_v56 = vadd.f32 %v7153_v53, %v7105_v51  ;;  %v7965_v59 = vpop.f32.mrb[45].mxu0 }
 0xfa6   : > { %v7966_v61 = vadd.f32 %v7965_v59, %v7964_v54  ;;  %v7967_v57 = vpop.f32.mrb[46].mxu0 }
 0xfa7   : > { %v7169_v60 = vmax.f32 %v7151_v13, %v7165_v55  ;;  %v7166_v62 = vmul.f32 0.2, %v7154_v56  ;;  %v7968_v63 = vpop.f32.mrb[47].mxu0 }
 0xfa8   : > { %v7110_v1 = vadd.f32 %v7966_v61, %v7024_v58  ;;  %v7969_v2 = vadd.f32 %v7968_v63, %v7967_v57 }
 0xfa9   : > { %v7170_v5 = vmax.f32 %v7154_v56, %v7166_v62  ;;  %8133 = vmatprep.mubr.msk.f32.mxu1 %vm6898_vm14, %v7169_v60 }
 0xfaa   : > { %v7159_v6 = vadd.f32 %v8129_v47, %v7110_v1  ;;  %v7113_v7 = vadd.f32 %v7969_v2, %v7029_v4 }
 0xfab   : > { %8134 = vmatmul.mubr.msk.f32.vlgmr.msra.gmra.mrb[56].mxu1 %vm6898_vm14, %v7170_v5 }
 0xfac   : > { %v7167_v48 = vmul.f32 0.2, %v7159_v6  ;;  %v7162_v9 = vadd.f32 %v8130_v52, %v7113_v7 }
 0xfae   : > { %v7171_v10 = vmax.f32 %v7159_v6, %v7167_v48  ;;  %v7168_v11 = vmul.f32 0.2, %v7162_v9 }
 0xfb0   : > { %v7172_v12 = vmax.f32 %v7162_v9, %v7168_v11  ;;  %8136 = vmatprep.mubr.msk.f32.mxu1 %vm6898_vm14, %v7171_v10 }
 0xfb2   : > { %8137 = vmatmul.mubr.msk.f32.gmra.mrb[58].mxu1 %vm6898_vm14, %v7172_v12 }
0x107e   : > { %v8135_v15 = vpop.f32.mrb[56].mxu1 }
0x107f   : > { %v7326_v8 = vcombine.high %v8135_v15, %v8135_v15  ;;  %v7333_v20 = vrot.slane %v8135_v15, %v10038_v35  ;;  %v7254_v14 = vpop.f32.mrb[57].mxu1 }
0x1080   : > { %v7277_v21 = vcombine.high %v7254_v14, %v7254_v14  ;;  %v7284_v22 = vrot.slane %v7254_v14, %v10038_v35 }
0x1081   : > { %v7340_v17 = vrot.slane %v7326_v8, %v10038_v35  ;;  %v7341_v23 = vcombine.high %v7333_v20, %v7333_v20  ;;  %v7349_v24 = vrot.slane %v7333_v20, %v10038_v35 }
0x1082   : > { %v7291_v25 = vrot.slane %v7277_v21, %v10038_v35  ;;  %v7292_v41 = vcombine.high %v7284_v22, %v7284_v22  ;;  %v7300_v26 = vrot.slane %v7284_v22, %v10038_v35 }
0x1083   : > { %v7342_v27 = vcombine.high %v7340_v17, %v7340_v17  ;;  %v7356_v16 = vrot.slane %v7340_v17, %v10038_v35  ;;  %v7363_v28 = vrot.slane %v7341_v23, %v10038_v35  ;;  %v7371_v29 = vcombine.high %v7349_v24, %v7349_v24  ;;  %7514 = vst.msk [vmem:[%s10045_s19 + $0x8] sm:$0x1] %vm7505_vm8, %v7349_v24 }
0x1084   : > { %v7293_v3 = vcombine.high %v7291_v25, %v7291_v25  ;;  %v7307_v30 = vrot.slane %v7291_v25, %v10038_v35  ;;  %v7314_v31 = vrot.slane %v7292_v41, %v10038_v35  ;;  %v7322_v50 = vcombine.high %v7300_v26, %v7300_v26  ;;  %7506 = vst.msk [vmem:[%s10045_s19] sm:$0x1] %vm7505_vm8, %v7300_v26 }
0x1085   : > { %v7370_v32 = vrot.slane %v7342_v27, %v10038_v35  ;;  %v7372_v33 = vcombine.high %v7356_v16, %v7356_v16  ;;  %v7373_v34 = vcombine.high %v7363_v28, %v7363_v28  ;;  %7515 = vst.msk [vmem:[%s10045_s19 + $0x9] sm:$0x1] %vm7505_vm8, %v7363_v28  ;;  %7516 = vst.msk [vmem:[%s10045_s19 + $0xa] sm:$0x1] %vm7505_vm8, %v7371_v29  ;;  %v8138_v36 = vpop.f32.mrb[58].mxu1 }
0x1086   : > { %7518 = vst.msk [vmem:[%s10045_s19 + $0xc] sm:$0x1] %vm7505_vm8, %v7356_v16  ;;  %v7321_v37 = vrot.slane %v7293_v3, %v10038_v35  ;;  %v7323_v0 = vcombine.high %v7307_v30, %v7307_v30  ;;  %v7324_v38 = vcombine.high %v7314_v31, %v7314_v31  ;;  %7507 = vst.msk [vmem:[%s10045_s19 + $0x1] sm:$0x1] %vm7505_vm8, %v7314_v31  ;;  %v7264_v42 = vpop.f32.mrb[59].mxu1 }
0x1087   : > { %7508 = vst.msk [vmem:[%s10045_s19 + $0x2] sm:$0x1] %vm7505_vm8, %v7322_v50  ;;  %7510 = vst.msk [vmem:[%s10045_s19 + $0x4] sm:$0x1] %vm7505_vm8, %v7307_v30  ;;  %v7424_v40 = vcombine.high %v8138_v36, %v8138_v36  ;;  %v7374_v43 = vcombine.high %v7370_v32, %v7370_v32  ;;  %v7431_v44 = vrot.slane %v8138_v36, %v10038_v35 }
0x1088   : > { %7517 = vst.msk [vmem:[%s10045_s19 + $0xb] sm:$0x1] %vm7505_vm8, %v7373_v34  ;;  %7519 = vst.msk [vmem:[%s10045_s19 + $0xd] sm:$0x1] %vm7505_vm8, %v7370_v32  ;;  %v7375_v45 = vcombine.high %v7264_v42, %v7264_v42  ;;  %v7382_v46 = vrot.slane %v7264_v42, %v10038_v35  ;;  %v7325_v47 = vcombine.high %v7321_v37, %v7321_v37 }
0x1089   : > { %7520 = vst.msk [vmem:[%s10045_s19 + $0xe] sm:$0x1] %vm7505_vm8, %v7372_v33  ;;  %7509 = vst.msk [vmem:[%s10045_s19 + $0x3] sm:$0x1] %vm7505_vm8, %v7324_v38  ;;  %v7438_v49 = vrot.slane %v7424_v40, %v10038_v35  ;;  %v7439_v51 = vcombine.high %v7431_v44, %v7431_v44  ;;  %v7447_v13 = vrot.slane %v7431_v44, %v10038_v35 }
0x108a   : > { %7511 = vst.msk [vmem:[%s10045_s19 + $0x5] sm:$0x1] %vm7505_vm8, %v7321_v37  ;;  %7512 = vst.msk [vmem:[%s10045_s19 + $0x6] sm:$0x1] %vm7505_vm8, %v7323_v0  ;;  %v7389_v52 = vrot.slane %v7375_v45, %v10038_v35  ;;  %v7390_v53 = vcombine.high %v7382_v46, %v7382_v46  ;;  %v7398_v56 = vrot.slane %v7382_v46, %v10038_v35 }
0x108b   : > { %7521 = vst.msk [vmem:[%s10045_s19 + $0xf] sm:$0x1] %vm7505_vm8, %v7374_v43  ;;  %7513 = vst.msk [vmem:[%s10045_s19 + $0x7] sm:$0x1] %vm7505_vm8, %v7325_v47  ;;  %v7440_v54 = vcombine.high %v7438_v49, %v7438_v49  ;;  %v7454_v55 = vrot.slane %v7438_v49, %v10038_v35  ;;  %v7461_v59 = vrot.slane %v7439_v51, %v10038_v35 }
0x108c   : > { %v7469_v61 = vcombine.high %v7447_v13, %v7447_v13  ;;  %7530 = vst.msk [vmem:[%s10045_s19 + $0x18] sm:$0x1] %vm7505_vm8, %v7447_v13  ;;  %v7391_v57 = vcombine.high %v7389_v52, %v7389_v52  ;;  %v7405_v58 = vrot.slane %v7389_v52, %v10038_v35  ;;  %v7412_v63 = vrot.slane %v7390_v53, %v10038_v35 }
0x108d   : > { %v7468_v60 = vrot.slane %v7440_v54, %v10038_v35  ;;  %v7470_v62 = vcombine.high %v7454_v55, %v7454_v55  ;;  %7534 = vst.msk [vmem:[%s10045_s19 + $0x1c] sm:$0x1] %vm7505_vm8, %v7454_v55  ;;  %v7420_v1 = vcombine.high %v7398_v56, %v7398_v56  ;;  %7522 = vst.msk [vmem:[%s10045_s19 + $0x10] sm:$0x1] %vm7505_vm8, %v7398_v56 }
0x108e   : > { %v7471_v2 = vcombine.high %v7461_v59, %v7461_v59  ;;  %7531 = vst.msk [vmem:[%s10045_s19 + $0x19] sm:$0x1] %vm7505_vm8, %v7461_v59  ;;  %7532 = vst.msk [vmem:[%s10045_s19 + $0x1a] sm:$0x1] %vm7505_vm8, %v7469_v61  ;;  %v7419_v4 = vrot.slane %v7391_v57, %v10038_v35  ;;  %v7421_v5 = vcombine.high %v7405_v58, %v7405_v58 }
0x108f   : > { %7526 = vst.msk [vmem:[%s10045_s19 + $0x14] sm:$0x1] %vm7505_vm8, %v7405_v58  ;;  %v7472_v6 = vcombine.high %v7468_v60, %v7468_v60  ;;  %7535 = vst.msk [vmem:[%s10045_s19 + $0x1d] sm:$0x1] %vm7505_vm8, %v7468_v60  ;;  %v7422_v7 = vcombine.high %v7412_v63, %v7412_v63 }
0x1090   : > { %7536 = vst.msk [vmem:[%s10045_s19 + $0x1e] sm:$0x1] %vm7505_vm8, %v7470_v62  ;;  %7523 = vst.msk [vmem:[%s10045_s19 + $0x11] sm:$0x1] %vm7505_vm8, %v7412_v63  ;;  %v7423_v48 = vcombine.high %v7419_v4, %v7419_v4 }
0x1091   : > { %7524 = vst.msk [vmem:[%s10045_s19 + $0x12] sm:$0x1] %vm7505_vm8, %v7420_v1  ;;  %7533 = vst.msk [vmem:[%s10045_s19 + $0x1b] sm:$0x1] %vm7505_vm8, %v7471_v2 }
0x1092   : > { %7527 = vst.msk [vmem:[%s10045_s19 + $0x15] sm:$0x1] %vm7505_vm8, %v7419_v4  ;;  %7528 = vst.msk [vmem:[%s10045_s19 + $0x16] sm:$0x1] %vm7505_vm8, %v7421_v5 }
0x1093   : > { %7537 = vst.msk [vmem:[%s10045_s19 + $0x1f] sm:$0x1] %vm7505_vm8, %v7472_v6  ;;  %7525 = vst.msk [vmem:[%s10045_s19 + $0x13] sm:$0x1] %vm7505_vm8, %v7422_v7 }
0x1094   : > { %7529 = vst.msk [vmem:[%s10045_s19 + $0x17] sm:$0x1] %vm7505_vm8, %v7423_v48 }
0x1095 PF: > { %s21_s17 = sadd.s32 1, %s8335_s17  }
0x1096   : > { %p18_p4 = scmp.ge.s32.totalorder %s21_s17, 4  }
0x1098   :  { %20 = sbr.rel (!%p18_p4) target bundleno = 1 (0x1), region = 141 }

</bundles_post_ra>
